<compile_context>
chip_gen: v5e
topology: v5e:2x2
jax: 0.10.0
libtpu: 0.0.40
codegen_flags: <defaults>
</compile_context>

<pallas_src>
import functools

import numpy as np
import jax
import jax.numpy as jnp
from jax.experimental import pallas as pl
from jax.experimental.pallas import tpu as pltpu

_LANES = 128


def _round_up(x, m):
    return (x + m - 1) // m * m


def _vmem_capacity_bytes():
    try:
        return int(pltpu.get_tpu_info().vmem_capacity_bytes)
    except Exception:
        return 64 * 1024 * 1024          # v7x worst case


def _plan(N, H, W, Wp, cin_p, cmid_p, cout_p, cout, out_itemsize):
    """Pick the row-tile th (divisor of H), grid rows, and a vmem limit."""
    cap = _vmem_capacity_bytes()
    budget = int(cap * 0.6)

    def need(th):
        f_t = (th + 5) * Wp
        b = 2 * f_t * cin_p * 2                       # input block, double-buffered bf16
        b += 2 * 9 * cin_p * cmid_p * 2               # w1, double-buffered bf16
        b += 2 * 9 * cmid_p * cout_p * 2              # w2, double-buffered bf16
        b += 4 * (cmid_p + cout_p) * 4                # biases
        b += 2 * th * W * cout * out_itemsize         # output block, double-buffered
        b += (th + 3) * Wp * cmid_p * 2               # mid scratch (bf16)
        b += (th + 2) * Wp * cmid_p * 4               # acc1 f32 temporary
        b += th * Wp * cout_p * 4                     # acc2 f32 temporary
        b += (th + 2) * Wp * max(cin_p, cmid_p) * 2   # slice/relayout headroom
        return int(b * 1.15)

    def fits(th):
        return need(th) <= budget

    if fits(H):
        th, num_r = H, 1
    else:
        th = next((d for d in range(H - 1, 0, -1) if H % d == 0 and fits(d)), 1)
        num_r = H // th
    # Guarantee >= 2 parallel grid steps (keeps v7x's 2nd TensorCore busy).
    if N * num_r < 2 and H % 2 == 0 and fits(H // 2):
        th, num_r = H // 2, 2

    vmem_limit = int(min(cap - 8 * 1024 * 1024,
                         max(2 * need(th), 32 * 1024 * 1024)))
    return th, num_r, vmem_limit


def _double_conv_kernel(x_ref, w1_ref, b1_ref, w2_ref, b2_ref, o_ref, mid_ref,
                        *, th, Wp, W, H, cout):
    """Fused conv3x3+ReLU -> conv3x3+ReLU for one (batch, row-tile) grid step.

    x_ref  : ((th+5)*Wp, Cin_p)  bf16  row-flattened, spatially pre-padded
                                       (2 zero rows top, 3 bottom, 2 zero cols
                                       left, >=1 right; image col m at col m+2)
    w1_ref : (9, Cin_p, Cmid_p)  bf16  tap t = dh*3+dw
    b1_ref : (1, Cmid_p)         f32
    w2_ref : (9, Cmid_p, Cout_p) bf16
    b2_ref : (1, Cout_p)         f32
    o_ref  : (th, W, Cout)       caller dtype
    mid_ref: ((th+3)*Wp, Cmid_p) bf16  VMEM scratch (intermediate, MID[h, p]:
                                       p=1..W holds conv1 col p-1, rest zero)
    """
    r = pl.program_id(1)
    cmid_p = w1_ref.shape[-1]
    cout_p = w2_ref.shape[-1]
    L1 = (th + 2) * Wp                  # intermediate rows (th + 2 halo rows)
    L2 = th * Wp

    # ---- conv1: every tap is a contiguous window of the flattened input ----
    acc1 = None
    for dh in range(3):
        for dw in range(3):
            off = dh * Wp + dw
            d = jnp.dot(x_ref[off:off + L1, :], w1_ref[dh * 3 + dw],
                        preferred_element_type=jnp.float32)
            acc1 = d if acc1 is None else acc1 + d

    # bias + ReLU (f32 epilogue), then zero the positions that must act as
    # conv2's zero padding (out-of-image intermediate rows, junk columns).
    mid3 = jnp.maximum(acc1 + b1_ref[...], 0.0).reshape(th + 2, Wp, cmid_p)
    hh = jax.lax.broadcasted_iota(jnp.int32, (th + 2, Wp, 1), 0)
    pp = jax.lax.broadcasted_iota(jnp.int32, (th + 2, Wp, 1), 1)
    abs_row = r * th + hh - 1                       # absolute intermediate row
    valid = jnp.logical_and(
        jnp.logical_and(abs_row >= 0, abs_row < H),
        jnp.logical_and(pp >= 1, pp <= W))
    mid3 = jnp.where(valid, mid3, 0.0)
    mid_ref[0:L1, :] = mid3.reshape(L1, cmid_p).astype(mid_ref.dtype)

    # ---- conv2 on the VMEM-resident intermediate (same contiguous taps) ----
    acc2 = None
    for dh in range(3):
        for dw in range(3):
            off = dh * Wp + dw
            d = jnp.dot(mid_ref[off:off + L2, :], w2_ref[dh * 3 + dw],
                        preferred_element_type=jnp.float32)
            acc2 = d if acc2 is None else acc2 + d
    out = jnp.maximum(acc2 + b2_ref[...], 0.0)
    out = out.reshape(th, Wp, cout_p)[:, :W, :cout]   # drop junk cols / pad chans
    o_ref[...] = out.astype(o_ref.dtype)


def double_conv_forward(x_nchw, params):
    """Matches double_conv.forward: (conv3x3 pad=1 + ReLU) x 2. NCHW in/out."""
    w1, b1, w2, b2 = params                           # weights in HWIO layout
    N, Cin, H, W = x_nchw.shape
    Cmid = w1.shape[-1]
    Cout = w2.shape[-1]

    cin_p = _round_up(Cin, _LANES)
    cmid_p = _round_up(Cmid, _LANES)
    cout_p = _round_up(Cout, _LANES)
    Wp = _round_up(W + 3, 8)          # 2 zero cols left, >=1 right, 8-aligned

    out_dtype = x_nchw.dtype
    th, num_r, vmem_limit = _plan(N, H, W, Wp, cin_p, cmid_p, cout_p, Cout,
                                  jnp.dtype(out_dtype).itemsize)

    # bf16 cast BEFORE relayout; NCHW -> NHWC; halo / lane padding; row-flatten.
    x = jnp.transpose(x_nchw.astype(jnp.bfloat16), (0, 2, 3, 1))
    x = jnp.pad(x, ((0, 0), (2, 3), (2, Wp - W - 2), (0, cin_p - Cin)))
    if num_r == 1:
        xw = x.reshape(N, (H + 5) * Wp, cin_p)        # no gather, no duplication
    else:
        # TODO(synk): replace this overlapping-window gather (one extra HBM
        # pass, only taken when a whole image's rows exceed the VMEM budget)
        # with in-kernel halo delivery (element-offset spec / manual DMA).
        rows = np.arange(num_r)[:, None] * th + np.arange(th + 5)[None, :]
        xw = jnp.take(x, jnp.asarray(rows.reshape(-1), jnp.int32), axis=1)
        xw = xw.reshape(N * num_r, (th + 5) * Wp, cin_p)

    w1p = jnp.pad(w1.astype(jnp.bfloat16).reshape(9, Cin, Cmid),
                  ((0, 0), (0, cin_p - Cin), (0, cmid_p - Cmid)))
    w2p = jnp.pad(w2.astype(jnp.bfloat16).reshape(9, Cmid, Cout),
                  ((0, 0), (0, cmid_p - Cmid), (0, cout_p - Cout)))
    b1p = jnp.pad(b1.astype(jnp.float32), (0, cmid_p - Cmid)).reshape(1, cmid_p)
    b2p = jnp.pad(b2.astype(jnp.float32), (0, cout_p - Cout)).reshape(1, cout_p)

    f_t = (th + 5) * Wp
    kernel = functools.partial(_double_conv_kernel,
                               th=th, Wp=Wp, W=W, H=H, cout=Cout)

    out_nhwc = pl.pallas_call(
        kernel,
        out_shape=jax.ShapeDtypeStruct((N, H, W, Cout), out_dtype),
        grid_spec=pltpu.PrefetchScalarGridSpec(
            num_scalar_prefetch=0,
            grid=(N, num_r),
            in_specs=[
                pl.BlockSpec((None, f_t, cin_p),
                             lambda n, r: (n * num_r + r, 0, 0)),
                pl.BlockSpec((9, cin_p, cmid_p), lambda n, r: (0, 0, 0)),
                pl.BlockSpec((1, cmid_p), lambda n, r: (0, 0)),
                pl.BlockSpec((9, cmid_p, cout_p), lambda n, r: (0, 0, 0)),
                pl.BlockSpec((1, cout_p), lambda n, r: (0, 0)),
            ],
            out_specs=pl.BlockSpec((None, th, W, Cout),
                                   lambda n, r: (n, r, 0, 0)),
            scratch_shapes=[pltpu.VMEM(((th + 3) * Wp, cmid_p), jnp.bfloat16)],
        ),
        compiler_params=pltpu.CompilerParams(
            dimension_semantics=("parallel", "parallel"),
            vmem_limit_bytes=vmem_limit),
    )(xw, w1p, b1p, w2p, b2p)

    return jnp.transpose(out_nhwc, (0, 3, 1, 2))      # NHWC -> NCHW (small, exact)


def init_params(key, in_channels, out_channels, dtype=jnp.float32):
    """Deterministic init mimicking nn.Conv2d defaults (uniform +/- 1/sqrt(fan_in))."""
    k1, k2, k3, k4 = jax.random.split(key, 4)
    bnd1 = 1.0 / jnp.sqrt(in_channels * 9)
    bnd2 = 1.0 / jnp.sqrt(out_channels * 9)
    # weights stored as (kh, kw, Cin, Cout) for the NHWC kernel
    w1 = jax.random.uniform(k1, (3, 3, in_channels, out_channels), dtype,
                            minval=-bnd1, maxval=bnd1)
    b1 = jax.random.uniform(k2, (out_channels,), dtype, minval=-bnd1, maxval=bnd1)
    w2 = jax.random.uniform(k3, (3, 3, out_channels, out_channels), dtype,
                            minval=-bnd2, maxval=bnd2)
    b2 = jax.random.uniform(k4, (out_channels,), dtype, minval=-bnd2, maxval=bnd2)
    return w1, b1, w2, b2


def _reference(x_nchw, params, quantize_operands=True):
    """Pure-JAX lax.conv reference; quantize_operands rounds x / weights / the
    intermediate to bf16 exactly like the kernel so only accumulation-order
    noise remains."""
    w1, b1, w2, b2 = params

    def q(a):
        return a.astype(jnp.bfloat16).astype(jnp.float32) if quantize_operands else a

    def conv(x, w, b):
        y = jax.lax.conv_general_dilated(
            q(x), q(w), window_strides=(1, 1), padding=((1, 1), (1, 1)),
            dimension_numbers=("NCHW", "HWIO", "NCHW"),
            preferred_element_type=jnp.float32)
        return jax.nn.relu(y + b[None, :, None, None])

    return conv(conv(x_nchw, w1, b1), w2, b2)


if __name__ == "__main__":
    key = jax.random.PRNGKey(0)
    kx, kp = jax.random.split(key)

    N, Cin, Cout, H, W = 2, 4, 8, 16, 16
    x = jax.random.normal(kx, (N, Cin, H, W), jnp.float32)
    params = init_params(kp, Cin, Cout)

    fwd = jax.jit(double_conv_forward)
    out = jax.block_until_ready(fwd(x, params))

    ref = _reference(x, params, quantize_operands=True)
    assert out.shape == (N, Cout, H, W), out.shape
    max_err = float(jnp.max(jnp.abs(out - ref)))
    # bf16 operands -> tolerance loosened vs a pure-f32 implementation.
    assert jnp.allclose(out, ref, atol=2e-2, rtol=2e-2), max_err

    print("KERNEL_OK")
</pallas_src>

<mosaic_0001>
module attributes {stable_mosaic.version = 11 : i64} {
  func.func @_double_conv_kernel(%arg0: i32, %arg1: i32, %arg2: memref<1x504x128xbf16, #tpu.memory_space<vmem>>, %arg3: memref<9x128x128xbf16, #tpu.memory_space<vmem>>, %arg4: memref<1x128xf32, #tpu.memory_space<vmem>>, %arg5: memref<9x128x128xbf16, #tpu.memory_space<vmem>>, %arg6: memref<1x128xf32, #tpu.memory_space<vmem>>, %arg7: memref<1x16x16x8xf32, #tpu.memory_space<vmem>>, %arg8: memref<456x128xbf16, #tpu.memory_space<vmem>>) attributes {dimension_semantics = [#tpu.dimension_semantics<parallel>, #tpu.dimension_semantics<parallel>], iteration_bounds = array<i64: 2, 1>, scalar_prefetch = 0 : i64, scratch_operands = 1 : i64, tpu.core_type = #tpu.core_type<tc>, window_params = [{transform_indices = @transform_0, window_bounds = array<i64: 1, 504, 128>}, {pipeline_mode = #tpu.pipeline_mode<synchronous>, transform_indices = @transform_1, window_bounds = array<i64: 9, 128, 128>}, {pipeline_mode = #tpu.pipeline_mode<synchronous>, transform_indices = @transform_2, window_bounds = array<i64: 1, 128>}, {pipeline_mode = #tpu.pipeline_mode<synchronous>, transform_indices = @transform_3, window_bounds = array<i64: 9, 128, 128>}, {pipeline_mode = #tpu.pipeline_mode<synchronous>, transform_indices = @transform_4, window_bounds = array<i64: 1, 128>}, {transform_indices = @transform_5, window_bounds = array<i64: 1, 16, 16, 8>}]} {
    %c0 = arith.constant 0 : index
    %c0_0 = arith.constant 0 : index
    %c0_1 = arith.constant 0 : index
    %0 = vector.load %arg2[%c0, %c0_0, %c0_1] : memref<1x504x128xbf16, #tpu.memory_space<vmem>>, vector<1x432x128xbf16>
    %1 = vector.shape_cast %0 : vector<1x432x128xbf16> to vector<432x128xbf16>
    %c0_2 = arith.constant 0 : index
    %c0_3 = arith.constant 0 : index
    %c0_4 = arith.constant 0 : index
    %2 = vector.load %arg3[%c0_2, %c0_3, %c0_4] : memref<9x128x128xbf16, #tpu.memory_space<vmem>>, vector<1x128x128xbf16>
    %3 = vector.shape_cast %2 : vector<1x128x128xbf16> to vector<128x128xbf16>
    %cst = arith.constant dense<0.000000e+00> : vector<432x128xf32>
    %4 = tpu.matmul %1, %3, %cst {dimension_numbers = #tpu.dot_dimension_numbers<[1], [0], [0], [1], [0, 0, 1, 1], [], []>} : vector<432x128xbf16>, vector<128x128xbf16>, vector<432x128xf32> -> vector<432x128xf32>
    %c0_5 = arith.constant 0 : index
    %c1 = arith.constant 1 : index
    %c0_6 = arith.constant 0 : index
    %5 = vector.load %arg2[%c0_5, %c1, %c0_6] : memref<1x504x128xbf16, #tpu.memory_space<vmem>>, vector<1x432x128xbf16>
    %6 = vector.shape_cast %5 : vector<1x432x128xbf16> to vector<432x128xbf16>
    %c1_7 = arith.constant 1 : index
    %c0_8 = arith.constant 0 : index
    %c0_9 = arith.constant 0 : index
    %7 = vector.load %arg3[%c1_7, %c0_8, %c0_9] : memref<9x128x128xbf16, #tpu.memory_space<vmem>>, vector<1x128x128xbf16>
    %8 = vector.shape_cast %7 : vector<1x128x128xbf16> to vector<128x128xbf16>
    %cst_10 = arith.constant dense<0.000000e+00> : vector<432x128xf32>
    %9 = tpu.matmul %6, %8, %cst_10 {dimension_numbers = #tpu.dot_dimension_numbers<[1], [0], [0], [1], [0, 0, 1, 1], [], []>} : vector<432x128xbf16>, vector<128x128xbf16>, vector<432x128xf32> -> vector<432x128xf32>
    %10 = arith.addf %4, %9 : vector<432x128xf32>
    %c0_11 = arith.constant 0 : index
    %c2 = arith.constant 2 : index
    %c0_12 = arith.constant 0 : index
    %11 = vector.load %arg2[%c0_11, %c2, %c0_12] : memref<1x504x128xbf16, #tpu.memory_space<vmem>>, vector<1x432x128xbf16>
    %12 = vector.shape_cast %11 : vector<1x432x128xbf16> to vector<432x128xbf16>
    %c2_13 = arith.constant 2 : index
    %c0_14 = arith.constant 0 : index
    %c0_15 = arith.constant 0 : index
    %13 = vector.load %arg3[%c2_13, %c0_14, %c0_15] : memref<9x128x128xbf16, #tpu.memory_space<vmem>>, vector<1x128x128xbf16>
    %14 = vector.shape_cast %13 : vector<1x128x128xbf16> to vector<128x128xbf16>
    %cst_16 = arith.constant dense<0.000000e+00> : vector<432x128xf32>
    %15 = tpu.matmul %12, %14, %cst_16 {dimension_numbers = #tpu.dot_dimension_numbers<[1], [0], [0], [1], [0, 0, 1, 1], [], []>} : vector<432x128xbf16>, vector<128x128xbf16>, vector<432x128xf32> -> vector<432x128xf32>
    %16 = arith.addf %10, %15 : vector<432x128xf32>
    %c0_17 = arith.constant 0 : index
    %c24 = arith.constant 24 : index
    %c0_18 = arith.constant 0 : index
    %17 = vector.load %arg2[%c0_17, %c24, %c0_18] : memref<1x504x128xbf16, #tpu.memory_space<vmem>>, vector<1x432x128xbf16>
    %18 = vector.shape_cast %17 : vector<1x432x128xbf16> to vector<432x128xbf16>
    %c3 = arith.constant 3 : index
    %c0_19 = arith.constant 0 : index
    %c0_20 = arith.constant 0 : index
    %19 = vector.load %arg3[%c3, %c0_19, %c0_20] : memref<9x128x128xbf16, #tpu.memory_space<vmem>>, vector<1x128x128xbf16>
    %20 = vector.shape_cast %19 : vector<1x128x128xbf16> to vector<128x128xbf16>
    %cst_21 = arith.constant dense<0.000000e+00> : vector<432x128xf32>
    %21 = tpu.matmul %18, %20, %cst_21 {dimension_numbers = #tpu.dot_dimension_numbers<[1], [0], [0], [1], [0, 0, 1, 1], [], []>} : vector<432x128xbf16>, vector<128x128xbf16>, vector<432x128xf32> -> vector<432x128xf32>
    %22 = arith.addf %16, %21 : vector<432x128xf32>
    %c0_22 = arith.constant 0 : index
    %c25 = arith.constant 25 : index
    %c0_23 = arith.constant 0 : index
    %23 = vector.load %arg2[%c0_22, %c25, %c0_23] : memref<1x504x128xbf16, #tpu.memory_space<vmem>>, vector<1x432x128xbf16>
    %24 = vector.shape_cast %23 : vector<1x432x128xbf16> to vector<432x128xbf16>
    %c4 = arith.constant 4 : index
    %c0_24 = arith.constant 0 : index
    %c0_25 = arith.constant 0 : index
    %25 = vector.load %arg3[%c4, %c0_24, %c0_25] : memref<9x128x128xbf16, #tpu.memory_space<vmem>>, vector<1x128x128xbf16>
    %26 = vector.shape_cast %25 : vector<1x128x128xbf16> to vector<128x128xbf16>
    %cst_26 = arith.constant dense<0.000000e+00> : vector<432x128xf32>
    %27 = tpu.matmul %24, %26, %cst_26 {dimension_numbers = #tpu.dot_dimension_numbers<[1], [0], [0], [1], [0, 0, 1, 1], [], []>} : vector<432x128xbf16>, vector<128x128xbf16>, vector<432x128xf32> -> vector<432x128xf32>
    %28 = arith.addf %22, %27 : vector<432x128xf32>
    %c0_27 = arith.constant 0 : index
    %c26 = arith.constant 26 : index
    %c0_28 = arith.constant 0 : index
    %29 = vector.load %arg2[%c0_27, %c26, %c0_28] : memref<1x504x128xbf16, #tpu.memory_space<vmem>>, vector<1x432x128xbf16>
    %30 = vector.shape_cast %29 : vector<1x432x128xbf16> to vector<432x128xbf16>
    %c5 = arith.constant 5 : index
    %c0_29 = arith.constant 0 : index
    %c0_30 = arith.constant 0 : index
    %31 = vector.load %arg3[%c5, %c0_29, %c0_30] : memref<9x128x128xbf16, #tpu.memory_space<vmem>>, vector<1x128x128xbf16>
    %32 = vector.shape_cast %31 : vector<1x128x128xbf16> to vector<128x128xbf16>
    %cst_31 = arith.constant dense<0.000000e+00> : vector<432x128xf32>
    %33 = tpu.matmul %30, %32, %cst_31 {dimension_numbers = #tpu.dot_dimension_numbers<[1], [0], [0], [1], [0, 0, 1, 1], [], []>} : vector<432x128xbf16>, vector<128x128xbf16>, vector<432x128xf32> -> vector<432x128xf32>
    %34 = arith.addf %28, %33 : vector<432x128xf32>
    %c0_32 = arith.constant 0 : index
    %c48 = arith.constant 48 : index
    %c0_33 = arith.constant 0 : index
    %35 = vector.load %arg2[%c0_32, %c48, %c0_33] : memref<1x504x128xbf16, #tpu.memory_space<vmem>>, vector<1x432x128xbf16>
    %36 = vector.shape_cast %35 : vector<1x432x128xbf16> to vector<432x128xbf16>
    %c6 = arith.constant 6 : index
    %c0_34 = arith.constant 0 : index
    %c0_35 = arith.constant 0 : index
    %37 = vector.load %arg3[%c6, %c0_34, %c0_35] : memref<9x128x128xbf16, #tpu.memory_space<vmem>>, vector<1x128x128xbf16>
    %38 = vector.shape_cast %37 : vector<1x128x128xbf16> to vector<128x128xbf16>
    %cst_36 = arith.constant dense<0.000000e+00> : vector<432x128xf32>
    %39 = tpu.matmul %36, %38, %cst_36 {dimension_numbers = #tpu.dot_dimension_numbers<[1], [0], [0], [1], [0, 0, 1, 1], [], []>} : vector<432x128xbf16>, vector<128x128xbf16>, vector<432x128xf32> -> vector<432x128xf32>
    %40 = arith.addf %34, %39 : vector<432x128xf32>
    %c0_37 = arith.constant 0 : index
    %c49 = arith.constant 49 : index
    %c0_38 = arith.constant 0 : index
    %41 = vector.load %arg2[%c0_37, %c49, %c0_38] : memref<1x504x128xbf16, #tpu.memory_space<vmem>>, vector<1x432x128xbf16>
    %42 = vector.shape_cast %41 : vector<1x432x128xbf16> to vector<432x128xbf16>
    %c7 = arith.constant 7 : index
    %c0_39 = arith.constant 0 : index
    %c0_40 = arith.constant 0 : index
    %43 = vector.load %arg3[%c7, %c0_39, %c0_40] : memref<9x128x128xbf16, #tpu.memory_space<vmem>>, vector<1x128x128xbf16>
    %44 = vector.shape_cast %43 : vector<1x128x128xbf16> to vector<128x128xbf16>
    %cst_41 = arith.constant dense<0.000000e+00> : vector<432x128xf32>
    %45 = tpu.matmul %42, %44, %cst_41 {dimension_numbers = #tpu.dot_dimension_numbers<[1], [0], [0], [1], [0, 0, 1, 1], [], []>} : vector<432x128xbf16>, vector<128x128xbf16>, vector<432x128xf32> -> vector<432x128xf32>
    %46 = arith.addf %40, %45 : vector<432x128xf32>
    %c0_42 = arith.constant 0 : index
    %c50 = arith.constant 50 : index
    %c0_43 = arith.constant 0 : index
    %47 = vector.load %arg2[%c0_42, %c50, %c0_43] : memref<1x504x128xbf16, #tpu.memory_space<vmem>>, vector<1x432x128xbf16>
    %48 = vector.shape_cast %47 : vector<1x432x128xbf16> to vector<432x128xbf16>
    %c8 = arith.constant 8 : index
    %c0_44 = arith.constant 0 : index
    %c0_45 = arith.constant 0 : index
    %49 = vector.load %arg3[%c8, %c0_44, %c0_45] : memref<9x128x128xbf16, #tpu.memory_space<vmem>>, vector<1x128x128xbf16>
    %50 = vector.shape_cast %49 : vector<1x128x128xbf16> to vector<128x128xbf16>
    %cst_46 = arith.constant dense<0.000000e+00> : vector<432x128xf32>
    %51 = tpu.matmul %48, %50, %cst_46 {dimension_numbers = #tpu.dot_dimension_numbers<[1], [0], [0], [1], [0, 0, 1, 1], [], []>} : vector<432x128xbf16>, vector<128x128xbf16>, vector<432x128xf32> -> vector<432x128xf32>
    %52 = arith.addf %46, %51 : vector<432x128xf32>
    %c0_47 = arith.constant 0 : index
    %c0_48 = arith.constant 0 : index
    %53 = vector.load %arg4[%c0_47, %c0_48] : memref<1x128xf32, #tpu.memory_space<vmem>>, vector<1x128xf32>
    %54 = vector.broadcast %53 : vector<1x128xf32> to vector<432x128xf32>
    %55 = arith.addf %52, %54 : vector<432x128xf32>
    %cst_49 = arith.constant 0.000000e+00 : f32
    %56 = vector.broadcast %cst_49 : f32 to vector<432x128xf32>
    %57 = arith.maximumf %55, %56 : vector<432x128xf32>
    %58 = vector.shape_cast %57 : vector<432x128xf32> to vector<18x24x128xf32>
    %59 = tpu.iota {dimensions = array<i32: 0>} : vector<18x24x1xi32>
    %60 = tpu.iota {dimensions = array<i32: 1>} : vector<18x24x1xi32>
    %c16_i32 = arith.constant 16 : i32
    %61 = arith.muli %arg1, %c16_i32 : i32
    %62 = vector.broadcast %61 : i32 to vector<18x24x1xi32>
    %63 = arith.addi %62, %59 : vector<18x24x1xi32>
    %c1_i32 = arith.constant 1 : i32
    %64 = vector.broadcast %c1_i32 : i32 to vector<18x24x1xi32>
    %65 = arith.subi %63, %64 : vector<18x24x1xi32>
    %c0_i32 = arith.constant 0 : i32
    %66 = vector.broadcast %c0_i32 : i32 to vector<18x24x1xi32>
    %67 = arith.cmpi sge, %65, %66 : vector<18x24x1xi32>
    %c16_i32_50 = arith.constant 16 : i32
    %68 = vector.broadcast %c16_i32_50 : i32 to vector<18x24x1xi32>
    %69 = arith.cmpi slt, %65, %68 : vector<18x24x1xi32>
    %70 = arith.andi %67, %69 : vector<18x24x1xi1>
    %c1_i32_51 = arith.constant 1 : i32
    %71 = vector.broadcast %c1_i32_51 : i32 to vector<18x24x1xi32>
    %72 = arith.cmpi sge, %60, %71 : vector<18x24x1xi32>
    %c16_i32_52 = arith.constant 16 : i32
    %73 = vector.broadcast %c16_i32_52 : i32 to vector<18x24x1xi32>
    %74 = arith.cmpi sle, %60, %73 : vector<18x24x1xi32>
    %75 = arith.andi %72, %74 : vector<18x24x1xi1>
    %76 = arith.andi %70, %75 : vector<18x24x1xi1>
    %cst_53 = arith.constant 0.000000e+00 : f32
    %77 = vector.shape_cast %76 : vector<18x24x1xi1> to vector<18x24x1xi1>
    %78 = vector.broadcast %77 : vector<18x24x1xi1> to vector<18x24x128xi1>
    %79 = vector.broadcast %cst_53 : f32 to vector<18x24x128xf32>
    %80 = arith.select %78, %58, %79 : vector<18x24x128xi1>, vector<18x24x128xf32>
    %81 = vector.shape_cast %80 : vector<18x24x128xf32> to vector<432x128xf32>
    %82 = arith.truncf %81 : vector<432x128xf32> to vector<432x128xbf16>
    %c0_54 = arith.constant 0 : index
    %c0_55 = arith.constant 0 : index
    %83 = vector.load %arg8[%c0_54, %c0_55] : memref<456x128xbf16, #tpu.memory_space<vmem>>, vector<432x128xbf16>
    tpu.vector_store %arg8[%c0_54, %c0_55], %82 {strides = array<i32>} : memref<456x128xbf16, #tpu.memory_space<vmem>>, vector<432x128xbf16>,
    %c0_56 = arith.constant 0 : index
    %c0_57 = arith.constant 0 : index
    %84 = vector.load %arg8[%c0_56, %c0_57] : memref<456x128xbf16, #tpu.memory_space<vmem>>, vector<384x128xbf16>
    %c0_58 = arith.constant 0 : index
    %c0_59 = arith.constant 0 : index
    %c0_60 = arith.constant 0 : index
    %85 = vector.load %arg5[%c0_58, %c0_59, %c0_60] : memref<9x128x128xbf16, #tpu.memory_space<vmem>>, vector<1x128x128xbf16>
    %86 = vector.shape_cast %85 : vector<1x128x128xbf16> to vector<128x128xbf16>
    %cst_61 = arith.constant dense<0.000000e+00> : vector<384x128xf32>
    %87 = tpu.matmul %84, %86, %cst_61 {dimension_numbers = #tpu.dot_dimension_numbers<[1], [0], [0], [1], [0, 0, 1, 1], [], []>} : vector<384x128xbf16>, vector<128x128xbf16>, vector<384x128xf32> -> vector<384x128xf32>
    %c1_62 = arith.constant 1 : index
    %c0_63 = arith.constant 0 : index
    %88 = vector.load %arg8[%c1_62, %c0_63] : memref<456x128xbf16, #tpu.memory_space<vmem>>, vector<384x128xbf16>
    %c1_64 = arith.constant 1 : index
    %c0_65 = arith.constant 0 : index
    %c0_66 = arith.constant 0 : index
    %89 = vector.load %arg5[%c1_64, %c0_65, %c0_66] : memref<9x128x128xbf16, #tpu.memory_space<vmem>>, vector<1x128x128xbf16>
    %90 = vector.shape_cast %89 : vector<1x128x128xbf16> to vector<128x128xbf16>
    %cst_67 = arith.constant dense<0.000000e+00> : vector<384x128xf32>
    %91 = tpu.matmul %88, %90, %cst_67 {dimension_numbers = #tpu.dot_dimension_numbers<[1], [0], [0], [1], [0, 0, 1, 1], [], []>} : vector<384x128xbf16>, vector<128x128xbf16>, vector<384x128xf32> -> vector<384x128xf32>
    %92 = arith.addf %87, %91 : vector<384x128xf32>
    %c2_68 = arith.constant 2 : index
    %c0_69 = arith.constant 0 : index
    %93 = vector.load %arg8[%c2_68, %c0_69] : memref<456x128xbf16, #tpu.memory_space<vmem>>, vector<384x128xbf16>
    %c2_70 = arith.constant 2 : index
    %c0_71 = arith.constant 0 : index
    %c0_72 = arith.constant 0 : index
    %94 = vector.load %arg5[%c2_70, %c0_71, %c0_72] : memref<9x128x128xbf16, #tpu.memory_space<vmem>>, vector<1x128x128xbf16>
    %95 = vector.shape_cast %94 : vector<1x128x128xbf16> to vector<128x128xbf16>
    %cst_73 = arith.constant dense<0.000000e+00> : vector<384x128xf32>
    %96 = tpu.matmul %93, %95, %cst_73 {dimension_numbers = #tpu.dot_dimension_numbers<[1], [0], [0], [1], [0, 0, 1, 1], [], []>} : vector<384x128xbf16>, vector<128x128xbf16>, vector<384x128xf32> -> vector<384x128xf32>
    %97 = arith.addf %92, %96 : vector<384x128xf32>
    %c24_74 = arith.constant 24 : index
    %c0_75 = arith.constant 0 : index
    %98 = vector.load %arg8[%c24_74, %c0_75] : memref<456x128xbf16, #tpu.memory_space<vmem>>, vector<384x128xbf16>
    %c3_76 = arith.constant 3 : index
    %c0_77 = arith.constant 0 : index
    %c0_78 = arith.constant 0 : index
    %99 = vector.load %arg5[%c3_76, %c0_77, %c0_78] : memref<9x128x128xbf16, #tpu.memory_space<vmem>>, vector<1x128x128xbf16>
    %100 = vector.shape_cast %99 : vector<1x128x128xbf16> to vector<128x128xbf16>
    %cst_79 = arith.constant dense<0.000000e+00> : vector<384x128xf32>
    %101 = tpu.matmul %98, %100, %cst_79 {dimension_numbers = #tpu.dot_dimension_numbers<[1], [0], [0], [1], [0, 0, 1, 1], [], []>} : vector<384x128xbf16>, vector<128x128xbf16>, vector<384x128xf32> -> vector<384x128xf32>
    %102 = arith.addf %97, %101 : vector<384x128xf32>
    %c25_80 = arith.constant 25 : index
    %c0_81 = arith.constant 0 : index
    %103 = vector.load %arg8[%c25_80, %c0_81] : memref<456x128xbf16, #tpu.memory_space<vmem>>, vector<384x128xbf16>
    %c4_82 = arith.constant 4 : index
    %c0_83 = arith.constant 0 : index
    %c0_84 = arith.constant 0 : index
    %104 = vector.load %arg5[%c4_82, %c0_83, %c0_84] : memref<9x128x128xbf16, #tpu.memory_space<vmem>>, vector<1x128x128xbf16>
    %105 = vector.shape_cast %104 : vector<1x128x128xbf16> to vector<128x128xbf16>
    %cst_85 = arith.constant dense<0.000000e+00> : vector<384x128xf32>
    %106 = tpu.matmul %103, %105, %cst_85 {dimension_numbers = #tpu.dot_dimension_numbers<[1], [0], [0], [1], [0, 0, 1, 1], [], []>} : vector<384x128xbf16>, vector<128x128xbf16>, vector<384x128xf32> -> vector<384x128xf32>
    %107 = arith.addf %102, %106 : vector<384x128xf32>
    %c26_86 = arith.constant 26 : index
    %c0_87 = arith.constant 0 : index
    %108 = vector.load %arg8[%c26_86, %c0_87] : memref<456x128xbf16, #tpu.memory_space<vmem>>, vector<384x128xbf16>
    %c5_88 = arith.constant 5 : index
    %c0_89 = arith.constant 0 : index
    %c0_90 = arith.constant 0 : index
    %109 = vector.load %arg5[%c5_88, %c0_89, %c0_90] : memref<9x128x128xbf16, #tpu.memory_space<vmem>>, vector<1x128x128xbf16>
    %110 = vector.shape_cast %109 : vector<1x128x128xbf16> to vector<128x128xbf16>
    %cst_91 = arith.constant dense<0.000000e+00> : vector<384x128xf32>
    %111 = tpu.matmul %108, %110, %cst_91 {dimension_numbers = #tpu.dot_dimension_numbers<[1], [0], [0], [1], [0, 0, 1, 1], [], []>} : vector<384x128xbf16>, vector<128x128xbf16>, vector<384x128xf32> -> vector<384x128xf32>
    %112 = arith.addf %107, %111 : vector<384x128xf32>
    %c48_92 = arith.constant 48 : index
    %c0_93 = arith.constant 0 : index
    %113 = vector.load %arg8[%c48_92, %c0_93] : memref<456x128xbf16, #tpu.memory_space<vmem>>, vector<384x128xbf16>
    %c6_94 = arith.constant 6 : index
    %c0_95 = arith.constant 0 : index
    %c0_96 = arith.constant 0 : index
    %114 = vector.load %arg5[%c6_94, %c0_95, %c0_96] : memref<9x128x128xbf16, #tpu.memory_space<vmem>>, vector<1x128x128xbf16>
    %115 = vector.shape_cast %114 : vector<1x128x128xbf16> to vector<128x128xbf16>
    %cst_97 = arith.constant dense<0.000000e+00> : vector<384x128xf32>
    %116 = tpu.matmul %113, %115, %cst_97 {dimension_numbers = #tpu.dot_dimension_numbers<[1], [0], [0], [1], [0, 0, 1, 1], [], []>} : vector<384x128xbf16>, vector<128x128xbf16>, vector<384x128xf32> -> vector<384x128xf32>
    %117 = arith.addf %112, %116 : vector<384x128xf32>
    %c49_98 = arith.constant 49 : index
    %c0_99 = arith.constant 0 : index
    %118 = vector.load %arg8[%c49_98, %c0_99] : memref<456x128xbf16, #tpu.memory_space<vmem>>, vector<384x128xbf16>
    %c7_100 = arith.constant 7 : index
    %c0_101 = arith.constant 0 : index
    %c0_102 = arith.constant 0 : index
    %119 = vector.load %arg5[%c7_100, %c0_101, %c0_102] : memref<9x128x128xbf16, #tpu.memory_space<vmem>>, vector<1x128x128xbf16>
    %120 = vector.shape_cast %119 : vector<1x128x128xbf16> to vector<128x128xbf16>
    %cst_103 = arith.constant dense<0.000000e+00> : vector<384x128xf32>
    %121 = tpu.matmul %118, %120, %cst_103 {dimension_numbers = #tpu.dot_dimension_numbers<[1], [0], [0], [1], [0, 0, 1, 1], [], []>} : vector<384x128xbf16>, vector<128x128xbf16>, vector<384x128xf32> -> vector<384x128xf32>
    %122 = arith.addf %117, %121 : vector<384x128xf32>
    %c50_104 = arith.constant 50 : index
    %c0_105 = arith.constant 0 : index
    %123 = vector.load %arg8[%c50_104, %c0_105] : memref<456x128xbf16, #tpu.memory_space<vmem>>, vector<384x128xbf16>
    %c8_106 = arith.constant 8 : index
    %c0_107 = arith.constant 0 : index
    %c0_108 = arith.constant 0 : index
    %124 = vector.load %arg5[%c8_106, %c0_107, %c0_108] : memref<9x128x128xbf16, #tpu.memory_space<vmem>>, vector<1x128x128xbf16>
    %125 = vector.shape_cast %124 : vector<1x128x128xbf16> to vector<128x128xbf16>
    %cst_109 = arith.constant dense<0.000000e+00> : vector<384x128xf32>
    %126 = tpu.matmul %123, %125, %cst_109 {dimension_numbers = #tpu.dot_dimension_numbers<[1], [0], [0], [1], [0, 0, 1, 1], [], []>} : vector<384x128xbf16>, vector<128x128xbf16>, vector<384x128xf32> -> vector<384x128xf32>
    %127 = arith.addf %122, %126 : vector<384x128xf32>
    %c0_110 = arith.constant 0 : index
    %c0_111 = arith.constant 0 : index
    %128 = vector.load %arg6[%c0_110, %c0_111] : memref<1x128xf32, #tpu.memory_space<vmem>>, vector<1x128xf32>
    %129 = vector.broadcast %128 : vector<1x128xf32> to vector<384x128xf32>
    %130 = arith.addf %127, %129 : vector<384x128xf32>
    %cst_112 = arith.constant 0.000000e+00 : f32
    %131 = vector.broadcast %cst_112 : f32 to vector<384x128xf32>
    %132 = arith.maximumf %130, %131 : vector<384x128xf32>
    %133 = vector.shape_cast %132 : vector<384x128xf32> to vector<16x24x128xf32>
    %134 = vector.extract_strided_slice %133 {offsets = [0, 0, 0], sizes = [16, 16, 8], strides = [1, 1, 1]} : vector<16x24x128xf32> to vector<16x16x8xf32>
    %c0_113 = arith.constant 0 : index
    %c0_114 = arith.constant 0 : index
    %c0_115 = arith.constant 0 : index
    %c0_116 = arith.constant 0 : index
    %135 = vector.load %arg7[%c0_113, %c0_114, %c0_115, %c0_116] : memref<1x16x16x8xf32, #tpu.memory_space<vmem>>, vector<1x16x16x8xf32>
    %136 = vector.shape_cast %135 : vector<1x16x16x8xf32> to vector<16x16x8xf32>
    %137 = vector.shape_cast %134 : vector<16x16x8xf32> to vector<1x16x16x8xf32>
    tpu.vector_store %arg7[%c0_113, %c0_114, %c0_115, %c0_116], %137 {strides = array<i32>} : memref<1x16x16x8xf32, #tpu.memory_space<vmem>>, vector<1x16x16x8xf32>,
    return
  }
  func.func @transform_0(%arg0: i32, %arg1: i32) -> (i32, i32, i32) {
    %c1_i32 = arith.constant 1 : i32
    %0 = arith.muli %arg0, %c1_i32 : i32
    %1 = arith.addi %0, %arg1 : i32
    %c0_i32 = arith.constant 0 : i32
    %c0_i32_0 = arith.constant 0 : i32
    %c0_i32_1 = arith.constant 0 : i32
    return %1, %c0_i32, %c0_i32_0 : i32, i32, i32
  }
  func.func @transform_1(%arg0: i32, %arg1: i32) -> (i32, i32, i32) {
    %c0_i32 = arith.constant 0 : i32
    %c0_i32_0 = arith.constant 0 : i32
    %c0_i32_1 = arith.constant 0 : i32
    %c0_i32_2 = arith.constant 0 : i32
    return %c0_i32, %c0_i32_0, %c0_i32_1 : i32, i32, i32
  }
  func.func @transform_2(%arg0: i32, %arg1: i32) -> (i32, i32) {
    %c0_i32 = arith.constant 0 : i32
    %c0_i32_0 = arith.constant 0 : i32
    %c0_i32_1 = arith.constant 0 : i32
    return %c0_i32, %c0_i32_0 : i32, i32
  }
  func.func @transform_3(%arg0: i32, %arg1: i32) -> (i32, i32, i32) {
    %c0_i32 = arith.constant 0 : i32
    %c0_i32_0 = arith.constant 0 : i32
    %c0_i32_1 = arith.constant 0 : i32
    %c0_i32_2 = arith.constant 0 : i32
    return %c0_i32, %c0_i32_0, %c0_i32_1 : i32, i32, i32
  }
  func.func @transform_4(%arg0: i32, %arg1: i32) -> (i32, i32) {
    %c0_i32 = arith.constant 0 : i32
    %c0_i32_0 = arith.constant 0 : i32
    %c0_i32_1 = arith.constant 0 : i32
    return %c0_i32, %c0_i32_0 : i32, i32
  }
  func.func @transform_5(%arg0: i32, %arg1: i32) -> (i32, i32, i32, i32) {
    %c0_i32 = arith.constant 0 : i32
    %c0_i32_0 = arith.constant 0 : i32
    %c0_i32_1 = arith.constant 0 : i32
    return %arg0, %arg1, %c0_i32, %c0_i32_0 : i32, i32, i32, i32
  }
}

</mosaic_0001>

<bundles_post_ra>
// kernel: double_conv_forward.1
= control target key start
LH: loop header
LB: loop body
LE: loop exit
PB: predicated region body
PF: predicated region fallthrough
CT: control target
= control target key end

     0   :  { %s11491_s18 = smov 0   ;;  %s11493_s19 = smov 0   ;;  %s14306_s0 = inlined_call_operand.vmem [shape: bf16[2,504,128], index: 0, kind: input, shape index: {}]   ;;  %s14307_s1 = inlined_call_operand.vmem [shape: bf16[9,128,128], index: 1, kind: input, shape index: {}]   ;;  %s14308_s2 = inlined_call_operand.vmem [shape: f32[1,128], index: 2, kind: input, shape index: {}]   ;;  %s14309_s3 = inlined_call_operand.vmem [shape: bf16[9,128,128], index: 3, kind: input, shape index: {}]   ;;  %s14310_s4 = inlined_call_operand.vmem [shape: f32[1,128], index: 4, kind: input, shape index: {}]   ;;  %s14311_s5 = inlined_call_operand.vmem [shape: f32[2,16,16,8], index: 5, kind: output, shape index: {}]  }
   0x1   :  { %s11495_s20 = smov 0  }
   0x2 LB: > { %s27_s21 = sadd.s32 1, %s11454_s19  ;;  %p8924_p0 = scmp.ge.s32.totalorder %s11458_s20, 1  ;;  %s11458_s20 = sphi %s11495_s20, %s15_s20   ;;  %s11454_s19 = sphi %s11493_s19, %s14568_s19   ;;  %s11450_s18 = sphi %s11491_s18, %s14567_s18  }
   0x3   : > { %p29_p1 = scmp.ge.s32.totalorder %s27_s21, 2  ;;  %p205_p2 = scmp.lt.s32.totalorder %s11458_s20, 3 }
   0x5   : > { %s14570_s21 = smov (%p29_p1, %s27_s21), 0  ;;  %p206_p3 = pnand %p8924_p0, %p205_p2 }
   0x7   : > { %209 = sbr.rel (%p206_p3) target bundleno = 2530 (0x9e2), region = 40 }
   0xc   : > { %v10800_v0 = vld [vmem:[%s14307_s1 + $0x78] sm:$0xff]  ;;  %p240_p4 = scmp.lt.s32.totalorder %s11450_s18, 1  ;;  %v10799_v2 = vld [vmem:[%s14307_s1 + $0x70] sm:$0xff]  ;;  %v10798_v5 = vld [vmem:[%s14307_s1 + $0x68] sm:$0xff]  ;;  %vm483_vm0 = vsmask.f32 7424 }
   0xd   : > { %v10792_v1 = vld [vmem:[%s14307_s1 + $0x38] sm:$0xff]  ;;  %779 = vmatpush.bf16.msra.mxu0 %v10800_v0  ;;  %v10791_v3 = vld [vmem:[%s14307_s1 + $0x30] sm:$0xff]  ;;  %v10790_v6 = vld [vmem:[%s14307_s1 + $0x28] sm:$0xff]  ;;  %vm1163_vm1 = vcmask 1046528   ;;  %vm8800_vm4 = vcmask 64512  }
   0xe   : > { %998 = vmatpush.bf16.msra.mxu1 %v10792_v1  ;;  %11343 = vmatpush.bf16.msra.mxu3 %v10792_v1  ;;  %s14572_s18 = smov (!%p240_p4, %s11450_s18), 1  ;;  %v10808_v4 = vld [vmem:[%s14307_s1 + $0xb8] sm:$0xff]  ;;  %v10797_v7 = vld [vmem:[%s14307_s1 + $0x60] sm:$0xff]  ;;  %v10795_v12 = vld [vmem:[%s14307_s1 + $0x50] sm:$0xff] }
   0xf   : > { %11351 = vmatpush.bf16.msra.mxu2 %v10808_v4  ;;  %s11367_s11 = smul.u32 252, %s14572_s18  ;;  %v10789_v8 = vld [vmem:[%s14307_s1 + $0x20] sm:$0xff]  ;;  %v10796_v9 = vld [vmem:[%s14307_s1 + $0x58] sm:$0xff]  ;;  %v10787_v13 = vld [vmem:[%s14307_s1 + $0x10] sm:$0xff] }
  0x10   : > { %v10788_v10 = vld [vmem:[%s14307_s1 + $0x18] sm:$0xff]  ;;  %v10794_v16 = vld [vmem:[%s14307_s1 + $0x48] sm:$0xff]  ;;  %v10793_v21 = vld [vmem:[%s14307_s1 + $0x40] sm:$0xff] }
  0x11   : > { %780 = vmatpush.bf16.msra.mxu0 %v10799_v2  ;;  %s11542_s22 = scalar_lea.vmem %s14306_s0, %s11367_s11  ;;  %v10786_v17 = vld [vmem:[%s14307_s1 + $0x8] sm:$0xff]  ;;  %v10785_v22 = vld [vmem:[%s14307_s1] sm:$0xff]  ;;  %v10807_v35 = vld [vmem:[%s14307_s1 + $0xb0] sm:$0xff]  ;;  %s10758_s11 = sshll.u32 %s14572_s18, 8 }
  0x12   : > { %999 = vmatpush.bf16.msra.mxu1 %v10791_v3  ;;  %11344 = vmatpush.bf16.msra.mxu3 %v10791_v3  ;;  %v11153_v11 = vld [vmem:[%s11542_s22] sm:$0xff]   ;;  %v10759_v14 = vld [vmem:[%s11542_s22 + $0x8] sm:$0xff]  ;;  %v11576_v27 = vld [vmem:[%s11542_s22 + $0x10] sm:$0xff]  ;;  %s14085_s13 = scalar_lea.vmem %s14311_s5, %s10758_s11 }
  0x13   : > { %v487_v15 = vshll.u32 %v11153_v11, 16  ;;  %v485_v18 = vshrl.u32 %v11153_v11, 16  ;;  %v492_v20 = vshll.u32 %v10759_v14, 16  ;;  %v11572_v26 = vld [vmem:[%s11542_s22 + $0x80] sm:$0xff]  ;;  %v496_v28 = vshrl.u32 %v10759_v14, 16  ;;  %v11581_v33 = vld [vmem:[%s11542_s22 + $0x88] sm:$0xff]  ;;  %11352 = vmatpush.bf16.msra.mxu2 %v10807_v35 }
  0x14   : > { %v500_v29 = vshll.u32 %v11576_v27, 16  ;;  %v11585_v34 = vld [vmem:[%s11542_s22 + $0x18] sm:$0xff]  ;;  %v504_v36 = vshrl.u32 %v11576_v27, 16  ;;  %v11594_v41 = vld [vmem:[%s11542_s22 + $0x90] sm:$0xff]  ;;  %v10762_v42 = vld [vmem:[%s11542_s22 + $0x20] sm:$0xff] }
  0x15   : > { %781 = vmatpush.bf16.msra.mxu0 %v10798_v5  ;;  %v489_v19 = vrot.slane %v487_v15, 1  ;;  %v494_v24 = vrot.slane %v492_v20, 1  ;;  %v508_v37 = vshll.u32 %v11585_v34, 16  ;;  %v512_v43 = vshrl.u32 %v11585_v34, 16  ;;  %v11602_v48 = vld [vmem:[%s11542_s22 + $0x98] sm:$0xff]  ;;  %v10763_v49 = vld [vmem:[%s11542_s22 + $0x28] sm:$0xff] }
  0x16   : > { %1000 = vmatpush.bf16.msra.mxu1 %v10790_v6  ;;  %11345 = vmatpush.bf16.msra.mxu3 %v10790_v6  ;;  %v502_v31 = vrot.slane %v500_v29, 1  ;;  %v516_v44 = vshll.u32 %v10762_v42, 16  ;;  %v520_v50 = vshrl.u32 %v10762_v42, 16  ;;  %v524_v51 = vshll.u32 %v10763_v49, 16  ;;  %v11609_v55 = vld [vmem:[%s11542_s22 + $0xa0] sm:$0xff]  ;;  %v10764_v56 = vld [vmem:[%s11542_s22 + $0x30] sm:$0xff] }
  0x17   : > { %v490_v23 = vor.u32 %v489_v19, %v485_v18  ;;  %v498_v30 = vor.u32 %v496_v28, %v494_v24  ;;  %v510_v39 = vrot.slane %v508_v37, 1  ;;  %v10806_v57 = vld [vmem:[%s14307_s1 + $0xa8] sm:$0xff]  ;;  %v528_v58 = vshrl.u32 %v10763_v49, 16  ;;  %v10765_v0 = vld [vmem:[%s11542_s22 + $0x38] sm:$0xff]  ;;  %v11624_v6 = vld [vmem:[%s11542_s22 + $0xb0] sm:$0xff] }
  0x18   : > { %v506_v38 = vor.u32 %v504_v36, %v502_v31  ;;  %v518_v46 = vrot.slane %v516_v44, 1  ;;  %v526_v53 = vrot.slane %v524_v51, 1  ;;  %11353 = vmatpush.bf16.msra.mxu2 %v10806_v57  ;;  %v532_v59 = vshll.u32 %v10764_v56, 16  ;;  %v11618_v63 = vld [vmem:[%s11542_s22 + $0xa8] sm:$0xff]  ;;  %v10805_v19 = vld [vmem:[%s14307_s1 + $0xa0] sm:$0xff] }
  0x19   : > { %782 = vmatpush.bf16.msra.mxu0 %v10797_v7  ;;  %v495_v25 = vsel %vm483_vm0, %v490_v23, %v494_v24  ;;  %v503_v32 = vsel %vm483_vm0, %v498_v30, %v502_v31  ;;  %v514_v45 = vor.u32 %v512_v43, %v510_v39  ;;  %v536_v1 = vshrl.u32 %v10764_v56, 16  ;;  %v10766_v7 = vld [vmem:[%s11542_s22 + $0x40] sm:$0xff]  ;;  %v10767_v15 = vld [vmem:[%s11542_s22 + $0x48] sm:$0xff]  ;;  %v10804_v23 = vld [vmem:[%s14307_s1 + $0x98] sm:$0xff] }
  0x1a   : > { %1001 = vmatpush.bf16.msra.mxu1 %v10789_v8  ;;  %11346 = vmatpush.bf16.msra.mxu3 %v10789_v8  ;;  %v511_v40 = vsel %vm483_vm0, %v506_v38, %v510_v39  ;;  %v522_v52 = vor.u32 %v520_v50, %v518_v46  ;;  %v530_v60 = vor.u32 %v528_v58, %v526_v53  ;;  %v534_v61 = vrot.slane %v532_v59, 1  ;;  %v10841_v20 = vld [vmem:[%s14307_s1 + $0xe8] sm:$0xff]  ;;  %v10840_v24 = vld [vmem:[%s14307_s1 + $0xe0] sm:$0xff]  ;;  %v10803_v31 = vld [vmem:[%s14307_s1 + $0x90] sm:$0xff] }
  0x1b   : > { %v519_v47 = vsel %vm483_vm0, %v514_v45, %v518_v46  ;;  %v540_v2 = vshll.u32 %v10765_v0, 16  ;;  %v544_v8 = vshrl.u32 %v10765_v0, 16  ;;  %v556_v18 = vshll.u32 %v10767_v15, 16  ;;  %v11654_v30 = vld [vmem:[%s11542_s22 + $0xc0] sm:$0xff]  ;;  %v10802_v37 = vld [vmem:[%s14307_s1 + $0x88] sm:$0xff]  ;;  %v10838_v38 = vld [vmem:[%s14307_s1 + $0xd0] sm:$0xff] }
  0x1c   : > { %v527_v54 = vsel %vm483_vm0, %v522_v52, %v526_v53  ;;  %v535_v62 = vsel %vm483_vm0, %v530_v60, %v534_v61  ;;  %v538_v3 = vor.u32 %v536_v1, %v534_v61  ;;  %11354 = vmatpush.bf16.msra.mxu2 %v10805_v19  ;;  %v10801_v44 = vld [vmem:[%s14307_s1 + $0x80] sm:$0xff]  ;;  %v10837_v45 = vld [vmem:[%s14307_s1 + $0xc8] sm:$0xff]  ;;  %v11679_v46 = vld [vmem:[%s11542_s22 + $0x58] sm:$0xff] }
  0x1d   : > { %783 = vmatpush.bf16.msra.mxu0 %v10796_v9  ;;  %v548_v9 = vshll.u32 %v10766_v7, 16  ;;  %v14312_v51 = vrot.slane %v11679_v46, 1  ;;  %v11696_v60 = vld [vmem:[%s11542_s22 + $0xc8] sm:$0xff] }
  0x1e   : > { %1002 = vmatpush.bf16.msra.mxu1 %v10788_v10  ;;  %11347 = vmatpush.bf16.msra.mxu3 %v10788_v10 }
  0x20   : > { %11355 = vmatpush.bf16.msra.mxu2 %v10804_v23 }
  0x21   : > { %784 = vmatpush.bf16.msra.mxu0 %v10795_v12 }
  0x22   : > { %1003 = vmatpush.bf16.msra.mxu1 %v10787_v13  ;;  %11348 = vmatpush.bf16.msra.mxu3 %v10787_v13  ;;  %v11630_v13 = vld [vmem:[%s11542_s22 + $0xb8] sm:$0xff] }
  0x24   : > { %11356 = vmatpush.bf16.msra.mxu2 %v10803_v31 }
  0x25   : > { %785 = vmatpush.bf16.msra.mxu0 %v10794_v16  ;;  %v10842_v16 = vld [vmem:[%s14307_s1 + $0xf0] sm:$0xff] }
  0x26   : > { %1004 = vmatpush.bf16.msra.mxu1 %v10786_v17  ;;  %11349 = vmatpush.bf16.msra.mxu3 %v10786_v17  ;;  %v552_v17 = vshrl.u32 %v10766_v7, 16 }
  0x28   : > { %11357 = vmatpush.bf16.msra.mxu2 %v10802_v37 }
  0x29   : > { %786 = vmatpush.bf16.msra.mxu0 %v10793_v21 }
  0x2a   : > { %1005 = vmatpush.bf16.msra.mxu1 %v10785_v22  ;;  %11350 = vmatpush.bf16.msra.mxu3 %v10785_v22  ;;  %v558_v22 = vrot.slane %v556_v18, 1 }
  0x2c   : > { %787 = vmatmul.bf16.vlgmr.msra.gmra.mxu0 %v495_v25  ;;  %11358 = vmatpush.bf16.msra.mxu2 %v10801_v44 }
  0x2d   : > { %1294 = vmatpush.bf16.msrb.mxu0 %v10808_v4  ;;  %1006 = vmatmul.bf16.vlgmr.msra.gmra.mxu1 %v11153_v11  ;;  %v542_v4 = vrot.slane %v540_v2, 1  ;;  %v550_v11 = vrot.slane %v548_v9, 1  ;;  %v572_v2 = vshll.u32 %v11679_v46, 16 }
  0x2e   : > { %1086 = vmatmul.bf16.vlgmr.msra.gmra.mxu3 %v11572_v26 }
  0x2f   : > { %v543_v5 = vsel %vm483_vm0, %v538_v3, %v542_v4  ;;  %v546_v10 = vor.u32 %v544_v8, %v542_v4  ;;  %v554_v21 = vor.u32 %v552_v17, %v550_v11  ;;  %v11705_v4 = vld [vmem:[%s11542_s22 + $0x68] sm:$0xff] }
  0x30   : > { %v1189_v8 = vrot.slane %v11705_v4, 1 }
  0x31   : > { %1295 = vmatpush.bf16.msrb.mxu0 %v10807_v35  ;;  %v551_v12 = vsel %vm483_vm0, %v546_v10, %v550_v11  ;;  %v559_v29 = vsel %vm483_vm0, %v554_v21, %v558_v22  ;;  %v10768_v35 = vld [vmem:[%s11542_s22 + $0x50] sm:$0xff] }
  0x32   : > { %v564_v43 = vshll.u32 %v10768_v35, 16  ;;  %v568_v1 = vshrl.u32 %v10768_v35, 16 }
  0x34   : > { %v566_v50 = vrot.slane %v564_v43, 1 }
  0x35   : > { %1296 = vmatpush.bf16.msrb.mxu0 %v10806_v57 }
  0x39   : > { %1297 = vmatpush.bf16.msrb.mxu0 %v10805_v19 }
  0x3c   : > { %792 = vmatmul.bf16.gmra.mxu0 %v503_v32  ;;  %v10839_v32 = vld [vmem:[%s14307_s1 + $0xd8] sm:$0xff] }
  0x3d   : > { %1011 = vmatmul.bf16.gmra.mxu1 %v10759_v14  ;;  %v10843_v14 = vld [vmem:[%s14307_s1 + $0xf8] sm:$0xff]  ;;  %1298 = vmatpush.bf16.msrb.mxu0 %v10804_v23  ;;  %v11725_v23 = vld [vmem:[%s11542_s22 + $0x70] sm:$0xff] }
  0x3e   : > { %1091 = vmatmul.bf16.gmra.mxu3 %v11581_v33 }
  0x3f   : > { %1773 = vmatpush.bf16.msrb.mxu3 %v10843_v14 }
  0x41   : > { %1299 = vmatpush.bf16.msrb.mxu0 %v10803_v31 }
  0x43   : > { %1774 = vmatpush.bf16.msrb.mxu3 %v10842_v16 }
  0x45   : > { %1300 = vmatpush.bf16.msrb.mxu0 %v10802_v37 }
  0x47   : > { %1775 = vmatpush.bf16.msrb.mxu3 %v10841_v20  ;;  %v576_v20 = vshrl.u32 %v11679_v46, 16 }
  0x49   : > { %1301 = vmatpush.bf16.msrb.mxu0 %v10801_v44 }
  0x4b   : > { %1776 = vmatpush.bf16.msrb.mxu3 %v10840_v24 }
  0x4c   : > { %797 = vmatmul.bf16.gmra.mxu0 %v511_v40 }
  0x4d   : > { %1016 = vmatmul.bf16.gmra.mxu1 %v11576_v27 }
  0x4e   : > { %1096 = vmatmul.bf16.gmra.mxu3 %v11594_v41 }
  0x4f   : > { %1777 = vmatpush.bf16.msrb.mxu3 %v10839_v32 }
  0x53   : > { %1778 = vmatpush.bf16.msrb.mxu3 %v10838_v38  ;;  %v10809_v38 = vld [vmem:[%s11542_s22 + $0xc] sm:$0xff] }
  0x57   : > { %1779 = vmatpush.bf16.msrb.mxu3 %v10837_v45  ;;  %v588_v45 = vshll.u32 %v11705_v4, 16 }
  0x5c   : > { %802 = vmatmul.bf16.gmra.mxu0 %v519_v47  ;;  %v11682_v47 = vld [vmem:[%s11542_s22 + $0x60] sm:$0xff] }
  0x5d   : > { %1021 = vmatmul.bf16.gmra.mxu1 %v11585_v34  ;;  %v1187_v52 = vrot.slane %v11682_v47, 1  ;;  %v580_v21 = vshll.u32 %v11682_v47, 16  ;;  %v584_v44 = vshrl.u32 %v11682_v47, 16 }
  0x5e   : > { %1101 = vmatmul.bf16.gmra.mxu3 %v11602_v48 }
  0x5f   : > { %v1190_v10 = vsel %vm1163_vm1, %v1187_v52, %v1189_v8 }
  0x6c   : > { %807 = vmatmul.bf16.gmra.mxu0 %v527_v54  ;;  %v1188_v54 = vsel %vm1163_vm1, %v14312_v51, %v1187_v52 }
  0x6d   : > { %1026 = vmatmul.bf16.gmra.mxu1 %v10762_v42  ;;  %v560_v42 = vshrl.u32 %v10767_v15, 16  ;;  %1357 = vmatmul.bf16.vlgmr.msra.gmra.mxu2 %v1188_v54  ;;  %v590_v54 = vrot.slane %v588_v45, 1 }
  0x6e   : > { %1106 = vmatmul.bf16.gmra.mxu3 %v11609_v55 }
  0x7c   : > { %812 = vmatmul.bf16.gmra.mxu0 %v535_v62 }
  0x7d   : > { %1031 = vmatmul.bf16.gmra.mxu1 %v10763_v49  ;;  %v562_v49 = vor.u32 %v560_v42, %v558_v22  ;;  %1362 = vmatmul.bf16.gmra.mxu2 %v1190_v10  ;;  %v592_v10 = vshrl.u32 %v11705_v4, 16 }
  0x7e   : > { %1111 = vmatmul.bf16.gmra.mxu3 %v11618_v63 }
  0x7f   : > { %v567_v59 = vsel %vm483_vm0, %v562_v49, %v566_v50 }
  0x8c   : > { %817 = vmatmul.bf16.gmra.mxu0 %v543_v5  ;;  %v570_v5 = vor.u32 %v568_v1, %v566_v50  ;;  %v11743_v50 = vld [vmem:[%s11542_s22 + $0x78] sm:$0xff] }
  0x8d   : > { %1036 = vmatmul.bf16.gmra.mxu1 %v10764_v56  ;;  %v10836_v56 = vld [vmem:[%s14307_s1 + $0xc0] sm:$0xff]  ;;  %v10810_v1 = vld [vmem:[%s11542_s22 + $0x14] sm:$0xff] }
  0x8e   : > { %1116 = vmatmul.bf16.gmra.mxu3 %v11624_v6 }
  0x8f   : > { %1780 = vmatpush.bf16.msrb.mxu3 %v10836_v56  ;;  %v1193_v56 = vrot.slane %v11743_v50, 1 }
  0x9c   : > { %822 = vmatmul.bf16.gmra.mxu0 %v551_v12 }
  0x9d   : > { %1041 = vmatmul.bf16.gmra.mxu1 %v10765_v0 }
  0x9e   : > { %1121 = vmatmul.bf16.gmra.mxu3 %v11630_v13 }
  0xa9   : > { %v788_v25 = vpop.f32.mrf.mxu0 }
  0xaa   : > { %v1007_v28 = vpop.f32.mrf.mxu1  ;;  %v582_v25 = vrot.slane %v580_v21, 1 }
  0xab   : > { %v1191_v28 = vrot.slane %v11725_v23, 1 }
  0xac   : > { %827 = vmatmul.bf16.gmra.mxu0 %v559_v29  ;;  %v586_v52 = vor.u32 %v584_v44, %v582_v25  ;;  %v1197_v44 = vrot.slane %v11581_v33, 1 }
  0xad   : > { %1046 = vmatmul.bf16.gmra.mxu1 %v10766_v7  ;;  %v574_v7 = vrot.slane %v572_v2, 1  ;;  %v1192_v31 = vsel %vm1163_vm1, %v1189_v8, %v1191_v28 }
  0xae   : > { %1126 = vmatmul.bf16.gmra.mxu3 %v11654_v30  ;;  %1367 = vmatmul.bf16.gmra.mxu2 %v1192_v31 }
  0xaf   : > { %v575_v14 = vsel %vm483_vm0, %v570_v5, %v574_v7  ;;  %v578_v24 = vor.u32 %v576_v20, %v574_v7 }
  0xb1   : > { %v11664_v36 = vpop.f32.mrf.mxu3  ;;  %v790_v39 = vpop.f32.mrf.mxu0  ;;  %v583_v37 = vsel %vm483_vm0, %v578_v24, %v582_v25  ;;  %v10811_v25 = vld [vmem:[%s11542_s22 + $0x1c] sm:$0xff] }
  0xb2   : > { %v1009_v40 = vpop.f32.mrf.mxu1 }
  0xb9   : > { %v11686_v53 = vpop.f32.mrf.mxu3  ;;  %v793_v57 = vpop.f32.mrf.mxu0 }
  0xba   : > { %v1012_v58 = vpop.f32.mrf.mxu1 }
  0xbb   : > { %v1194_v58 = vsel %vm1163_vm1, %v1191_v28, %v1193_v56 }
  0xbc   : > { %832 = vmatmul.bf16.gmra.mxu0 %v567_v59 }
  0xbd   : > { %1051 = vmatmul.bf16.gmra.mxu1 %v10767_v15  ;;  %v11713_v15 = vld [vmem:[%s11542_s22 + $0xd0] sm:$0xff] }
  0xbe   : > { %1131 = vmatmul.bf16.gmra.mxu3 %v11696_v60  ;;  %1372 = vmatmul.bf16.gmra.mxu2 %v1194_v58  ;;  %v10812_v58 = vld [vmem:[%s11542_s22 + $0x24] sm:$0xff] }
  0xc1   : > { %v11699_v61 = vpop.f32.mrf.mxu3  ;;  %v795_v62 = vpop.f32.mrf.mxu0 }
  0xc2   : > { %v1014_v0 = vpop.f32.mrf.mxu1 }
  0xc3   : > { %v11702_v3 = vadd.f32 %v1014_v0, %v795_v62  ;;  %v591_v0 = vsel %vm483_vm0, %v586_v52, %v590_v54 }
  0xc9   : > { %v11708_v9 = vpop.f32.mrf.mxu3  ;;  %v798_v11 = vpop.f32.mrf.mxu0 }
  0xca   : > { %v1017_v12 = vpop.f32.mrf.mxu1 }
  0xcb   : > { %v11715_v16 = vadd.f32 %v1017_v12, %v798_v11  ;;  %v596_v11 = vshll.u32 %v11725_v23, 16  ;;  %v594_v12 = vor.u32 %v592_v10, %v590_v54  ;;  %v608_v10 = vshrl.u32 %v11743_v50, 16 }
  0xcc   : > { %837 = vmatmul.bf16.gmra.mxu0 %v575_v14 }
  0xcd   : > { %1056 = vmatmul.bf16.gmra.mxu1 %v10768_v35  ;;  %v598_v14 = vrot.slane %v596_v11, 1  ;;  %v612_v11 = vshll.u32 %v11572_v26, 16 }
  0xce   : > { %1136 = vmatmul.bf16.gmra.mxu3 %v11713_v15 }
  0xcf   : > { %v599_v24 = vsel %vm483_vm0, %v594_v12, %v598_v14 }
  0xd1   : > { %v11718_v17 = vpop.f32.mrf.mxu3  ;;  %v800_v18 = vpop.f32.mrf.mxu0 }
  0xd2   : > { %v1019_v19 = vpop.f32.mrf.mxu1 }
  0xd3   : > { %v11722_v22 = vadd.f32 %v1019_v19, %v800_v18  ;;  %v1195_v18 = vrot.slane %v11572_v26, 1 }
  0xd5   : > { %v1196_v20 = vsel %vm1163_vm1, %v1193_v56, %v1195_v18  ;;  %v1198_v52 = vsel %vm1163_vm1, %v1195_v18, %v1197_v44  ;;  %v1199_v18 = vrot.slane %v11594_v41, 1 }
  0xd6   : > { %1377 = vmatmul.bf16.gmra.mxu2 %v1196_v20 }
  0xd9   : > { %v11728_v29 = vpop.f32.mrf.mxu3  ;;  %v803_v32 = vpop.f32.mrf.mxu0 }
  0xda   : > { %v1022_v35 = vpop.f32.mrf.mxu1 }
  0xdb   : > { %v11733_v39 = vadd.f32 %v1022_v35, %v803_v32 }
  0xdc   : > { %842 = vmatmul.bf16.gmra.mxu0 %v583_v37  ;;  %v600_v37 = vshrl.u32 %v11725_v23, 16 }
  0xdd   : > { %1061 = vmatmul.bf16.gmra.mxu1 %v11679_v46 }
  0xde   : > { %1781 = vmatmul.bf16.vlgmr.msrb.gmra.mxu3 %v10809_v38  ;;  %v604_v38 = vshll.u32 %v11743_v50, 16 }
  0xe1   : > { %v11736_v40 = vpop.f32.mrf.mxu3  ;;  %v805_v42 = vpop.f32.mrf.mxu0 }
  0xe2   : > { %v1024_v43 = vpop.f32.mrf.mxu1 }
  0xe3   : > { %v11740_v49 = vadd.f32 %v1024_v43, %v805_v42  ;;  %v602_v42 = vor.u32 %v600_v37, %v598_v14  ;;  %v606_v43 = vrot.slane %v604_v38, 1  ;;  %v614_v14 = vrot.slane %v612_v11, 1 }
  0xe5   : > { %v607_v56 = vsel %vm483_vm0, %v602_v42, %v606_v43  ;;  %v610_v12 = vor.u32 %v608_v10, %v606_v43 }
  0xe6   : > { %1382 = vmatmul.bf16.gmra.mxu2 %v1198_v52  ;;  %v620_v52 = vshll.u32 %v11581_v33, 16 }
  0xe9   : > { %v11746_v57 = vpop.f32.mrf.mxu3  ;;  %v808_v59 = vpop.f32.mrf.mxu0 }
  0xea   : > { %v1027_v62 = vpop.f32.mrf.mxu1 }
  0xeb   : > { %v11751_v2 = vadd.f32 %v1027_v62, %v808_v59 }
  0xec   : > { %847 = vmatmul.bf16.gmra.mxu0 %v591_v0 }
  0xed   : > { %1066 = vmatmul.bf16.gmra.mxu1 %v11682_v47 }
  0xee   : > { %1786 = vmatmul.bf16.gmra.mxu3 %v10810_v1 }
  0xf1   : > { %v11754_v5 = vpop.f32.mrf.mxu3  ;;  %v11756_v7 = vpop.f32.mrf.mxu0 }
  0xf2   : > { %v11758_v8 = vpop.f32.mrf.mxu1 }
  0xf9   : > { %v11763_v19 = vpop.f32.mrf.mxu3  ;;  %v813_v47 = vpop.f32.mrf.mxu0 }
  0xfa   : > { %v1032_v21 = vpop.f32.mrf.mxu1 }
  0xfb   : > { %v11768_v28 = vadd.f32 %v1032_v21, %v813_v47  ;;  %v1200_v47 = vsel %vm1163_vm1, %v1197_v44, %v1199_v18  ;;  %v616_v44 = vshrl.u32 %v11572_v26, 16 }
  0xfc   : > { %852 = vmatmul.bf16.gmra.mxu0 %v599_v24  ;;  %v615_v24 = vsel %vm483_vm0, %v610_v12, %v614_v14  ;;  %1387 = vmatmul.bf16.gmra.mxu2 %v1200_v47  ;;  %v10814_v47 = vld [vmem:[%s11542_s22 + $0x34] sm:$0xff] }
  0xfd   : > { %14316 = vst [vmem:[#allocation3_spill] sm:$0xff] %v11768_v28  ;;  %1071 = vmatmul.bf16.gmra.mxu1 %v11705_v4 }
  0xfe   : > { %1791 = vmatmul.bf16.gmra.mxu3 %v10811_v25  ;;  %v10813_v25 = vld [vmem:[%s11542_s22 + $0x2c] sm:$0xff] }
 0x101   : > { %v11771_v31 = vpop.f32.mrf.mxu3  ;;  %v11773_v32 = vpop.f32.mrf.mxu0 }
 0x102   : > { %14317 = vst [vmem:[#allocation4_spill] sm:$0xff] %v11773_v32  ;;  %v11775_v35 = vpop.f32.mrf.mxu1  ;;  %v11304_v32 = vld [vmem:[%s11542_s22] sm:$0xe] }
 0x103   : > { %14318 = vst [vmem:[#allocation5_spill] sm:$0xff] %v11775_v35  ;;  %v11303_v35 = vld [vmem:[%s11542_s22] sm:$0xf0] }
 0x109   : > { %v11780_v45 = vpop.f32.mrf.mxu3  ;;  %v818_v4 = vpop.f32.mrf.mxu0 }
 0x10a   : > { %14319 = vst [vmem:[#allocation6_spill] sm:$0xff] %v11780_v45  ;;  %v1037_v54 = vpop.f32.mrf.mxu1 }
 0x10b   : > { %v11785_v59 = vadd.f32 %v1037_v54, %v818_v4  ;;  %v618_v4 = vor.u32 %v616_v44, %v614_v14  ;;  %v622_v54 = vrot.slane %v620_v52, 1  ;;  %v1203_v52 = vrot.slane %v11609_v55, 1 }
 0x10c   : > { %857 = vmatmul.bf16.gmra.mxu0 %v607_v56  ;;  %v1201_v56 = vrot.slane %v11602_v48, 1 }
 0x10d   : > { %14320 = vst [vmem:[#allocation7_spill] sm:$0xff] %v11785_v59  ;;  %1076 = vmatmul.bf16.gmra.mxu1 %v11725_v23  ;;  %v623_v12 = vsel %vm483_vm0, %v618_v4, %v622_v54  ;;  %v327_v59 = vld [vmem:[%s11542_s22 + $0xd8] sm:$0x1] }
 0x10e   : > { %1796 = vmatmul.bf16.gmra.mxu3 %v10812_v58  ;;  %v1202_v10 = vsel %vm1163_vm1, %v1199_v18, %v1201_v56  ;;  %v628_v18 = vshll.u32 %v11594_v41, 16 }
 0x10f   : > { %1392 = vmatmul.bf16.gmra.mxu2 %v1202_v10  ;;  %v1204_v10 = vsel %vm1163_vm1, %v1201_v56, %v1203_v52  ;;  %v632_v56 = vshrl.u32 %v11594_v41, 16 }
 0x110   : > { %v630_v44 = vrot.slane %v628_v18, 1 }
 0x111   : > { %v11788_v62 = vpop.f32.mrf.mxu3  ;;  %v11790_v0 = vpop.f32.mrf.mxu0 }
 0x112   : > { %14321 = vst [vmem:[#allocation8_spill] sm:$0xff] %v11790_v0  ;;  %v11792_v1 = vpop.f32.mrf.mxu1 }
 0x113   : > { %14322 = vst [vmem:[#allocation9_spill] sm:$0xff] %v11792_v1 }
 0x119   : > { %v11797_v20 = vpop.f32.mrf.mxu3  ;;  %v823_v23 = vpop.f32.mrf.mxu0 }
 0x11a   : > { %14323 = vst [vmem:[#allocation10_spill] sm:$0xff] %v11797_v20  ;;  %v1042_v21 = vpop.f32.mrf.mxu1 }
 0x11b   : > { %v11802_v37 = vadd.f32 %v1042_v21, %v823_v23 }
 0x11c   : > { %862 = vmatmul.bf16.gmra.mxu0 %v615_v24  ;;  %v624_v24 = vshrl.u32 %v11581_v33, 16  ;;  %v1358_v33 = vpop.f32.mrf.mxu2 }
 0x11d   : > { %14324 = vst [vmem:[#allocation11_spill] sm:$0xff] %v11802_v37  ;;  %1081 = vmatmul.bf16.gmra.mxu1 %v11743_v50 }
 0x11e   : > { %1801 = vmatmul.bf16.gmra.mxu3 %v10813_v25  ;;  %v626_v25 = vor.u32 %v624_v24, %v622_v54 }
 0x11f   : > { %1397 = vmatmul.bf16.gmra.mxu2 %v1204_v10  ;;  %v1205_v10 = vrot.slane %v11618_v63, 1 }
 0x121   : > { %v11805_v38 = vpop.f32.mrf.mxu3  ;;  %v11807_v42 = vpop.f32.mrf.mxu0 }
 0x122   : > { %14325 = vst [vmem:[#allocation12_spill] sm:$0xff] %v11807_v42  ;;  %v11809_v43 = vpop.f32.mrf.mxu1 }
 0x123   : > { %14326 = vst [vmem:[#allocation13_spill] sm:$0xff] %v11809_v43 }
 0x129   : > { %v11814_v58 = vpop.f32.mrf.mxu3  ;;  %v828_v50 = vpop.f32.mrf.mxu0 }
 0x12a   : > { %14327 = vst [vmem:[#allocation14_spill] sm:$0xff] %v11814_v58  ;;  %v1047_v11 = vpop.f32.mrf.mxu1 }
 0x12b   : > { %v11819_v23 = vadd.f32 %v1047_v11, %v828_v50 }
 0x12c   : > { %867 = vmatmul.bf16.gmra.mxu0 %v623_v12  ;;  %v631_v12 = vsel %vm483_vm0, %v626_v25, %v630_v44  ;;  %v634_v25 = vor.u32 %v632_v56, %v630_v44  ;;  %v640_v56 = vshrl.u32 %v11602_v48, 16 }
 0x12d   : > { %14328 = vst [vmem:[#allocation15_spill] sm:$0xff] %v11819_v23  ;;  %v10816_v23 = vld [vmem:[%s11542_s22 + $0x44] sm:$0xff] }
 0x12e   : > { %1806 = vmatmul.bf16.gmra.mxu3 %v10814_v47  ;;  %v10815_v47 = vld [vmem:[%s11542_s22 + $0x3c] sm:$0xff] }
 0x131   : > { %v11821_v26 = vpop.f32.mrf.mxu3  ;;  %v11823_v14 = vpop.f32.mrf.mxu0 }
 0x132   : > { %14329 = vst [vmem:[#allocation16_spill] sm:$0xff] %v11823_v14  ;;  %v11825_v21 = vpop.f32.mrf.mxu1 }
 0x133   : > { %14330 = vst [vmem:[#allocation17_spill] sm:$0xff] %v11825_v21  ;;  %v1360_v21 = vpop.f32.mrf.mxu2 }
 0x139   : > { %v11830_v4 = vpop.f32.mrf.mxu3  ;;  %v833_v50 = vpop.f32.mrf.mxu0 }
 0x13a   : > { %14331 = vst [vmem:[#allocation18_spill] sm:$0xff] %v11830_v4  ;;  %v1052_v11 = vpop.f32.mrf.mxu1  ;;  %v636_v4 = vshll.u32 %v11602_v48, 16 }
 0x13b   : > { %v11835_v51 = vadd.f32 %v1052_v11, %v833_v50  ;;  %v1206_v11 = vsel %vm1163_vm1, %v1203_v52, %v1205_v10  ;;  %v1363_v41 = vpop.f32.mrf.mxu2  ;;  %v644_v52 = vshll.u32 %v11609_v55, 16 }
 0x13c   : > { %872 = vmatmul.bf16.gmra.mxu0 %v631_v12  ;;  %v638_v14 = vrot.slane %v636_v4, 1  ;;  %1402 = vmatmul.bf16.gmra.mxu2 %v1206_v11  ;;  %v1207_v11 = vrot.slane %v11624_v6, 1 }
 0x13d   : > { %14332 = vst [vmem:[#allocation19_spill] sm:$0xff] %v11835_v51 }
 0x13e   : > { %1811 = vmatmul.bf16.gmra.mxu3 %v10815_v47  ;;  %v639_v51 = vsel %vm483_vm0, %v634_v25, %v638_v14  ;;  %v642_v58 = vor.u32 %v640_v56, %v638_v14  ;;  %v646_v25 = vrot.slane %v644_v52, 1  ;;  %v648_v52 = vshrl.u32 %v11609_v55, 16 }
 0x140   : > { %v650_v37 = vor.u32 %v648_v52, %v646_v25  ;;  %v656_v52 = vshrl.u32 %v11618_v63, 16 }
 0x141   : > { %v11837_v54 = vpop.f32.mrf.mxu3  ;;  %v11839_v24 = vpop.f32.mrf.mxu0 }
 0x142   : > { %14333 = vst [vmem:[#allocation20_spill] sm:$0xff] %v11839_v24  ;;  %v11841_v18 = vpop.f32.mrf.mxu1 }
 0x143   : > { %14334 = vst [vmem:[#allocation21_spill] sm:$0xff] %v11841_v18 }
 0x149   : > { %v1134_v50 = vpop.f32.mrf.mxu3  ;;  %v838_v12 = vpop.f32.mrf.mxu0 }
 0x14a   : > { %v1057_v47 = vpop.f32.mrf.mxu1  ;;  %v1365_v50 = vpop.f32.mrf.mxu2 }
 0x14b   : > { %v11849_v24 = vadd.f32 %v1057_v47, %v838_v12 }
 0x14c   : > { %877 = vmatmul.bf16.gmra.mxu0 %v639_v51  ;;  %v1208_v51 = vsel %vm1163_vm1, %v1205_v10, %v1207_v11  ;;  %v652_v10 = vshll.u32 %v11618_v63, 16  ;;  %v10819_v63 = vld [vmem:[%s11542_s22 + $0x5c] sm:$0xff] }
 0x14d   : > { %14335 = vst [vmem:[#allocation22_spill] sm:$0xff] %v11849_v24  ;;  %1407 = vmatmul.bf16.gmra.mxu2 %v1208_v51 }
 0x14e   : > { %1816 = vmatmul.bf16.gmra.mxu3 %v10816_v23  ;;  %v647_v23 = vsel %vm483_vm0, %v642_v58, %v646_v25  ;;  %v654_v51 = vrot.slane %v652_v10, 1 }
 0x151   : > { %v1137_v18 = vpop.f32.mrf.mxu3  ;;  %v11851_v44 = vpop.f32.mrf.mxu0 }
 0x152   : > { %14336 = vst [vmem:[#allocation23_spill] sm:$0xff] %v11851_v44  ;;  %v11853_v4 = vpop.f32.mrf.mxu1  ;;  %v10817_v18 = vld [vmem:[%s11542_s22 + $0x4c] sm:$0xff]  ;;  %v1368_v48 = vpop.f32.mrf.mxu2 }
 0x153   : > { %14337 = vst [vmem:[#allocation24_spill] sm:$0xff] %v11853_v4 }
 0x159   : > { %v1139_v12 = vpop.f32.mrf.mxu3  ;;  %v843_v47 = vpop.f32.mrf.mxu0 }
 0x15a   : > { %v1062_v24 = vpop.f32.mrf.mxu1  ;;  %v1370_v58 = vpop.f32.mrf.mxu2 }
 0x15b   : > { %v1063_v44 = vadd.f32 %v1062_v24, %v843_v47 }
 0x15c   : > { %882 = vmatmul.bf16.gmra.mxu0 %v647_v23  ;;  %v655_v23 = vsel %vm483_vm0, %v650_v37, %v654_v51 }
 0x15d   : > { %v11861_v4 = vadd.f32 %v1358_v33, %v1063_v44  ;;  %v1209_v33 = vrot.slane %v11630_v13, 1 }
 0x15e   : > { %1821 = vmatmul.bf16.gmra.mxu3 %v10817_v18  ;;  %v10818_v18 = vld [vmem:[%s11542_s22 + $0x54] sm:$0xff] }
 0x15f   : > { %v1210_v44 = vsel %vm1163_vm1, %v1207_v11, %v1209_v33  ;;  %v660_v11 = vshll.u32 %v11624_v6, 16 }
 0x160   : > { %1412 = vmatmul.bf16.gmra.mxu2 %v1210_v44 }
 0x161   : > { %v1782_v43 = vpop.f32.mrf.mxu3  ;;  %v845_v14 = vpop.f32.mrf.mxu0  ;;  %v662_v44 = vrot.slane %v660_v11, 1  ;;  %v664_v11 = vshrl.u32 %v11624_v6, 16  ;;  %v10820_v6 = vld [vmem:[%s11542_s22 + $0x64] sm:$0xff] }
 0x162   : > { %v1064_v56 = vpop.f32.mrf.mxu1 }
 0x163   : > { %v1065_v12 = vadd.f32 %v1064_v56, %v845_v14 }
 0x165   : > { %v11865_v42 = vadd.f32 %v1360_v21, %v1065_v12  ;;  %v1373_v21 = vpop.f32.mrf.mxu2 }
 0x169   : > { %v1784_v24 = vpop.f32.mrf.mxu3  ;;  %v848_v47 = vpop.f32.mrf.mxu0 }
 0x16a   : > { %v1067_v43 = vpop.f32.mrf.mxu1  ;;  %v658_v24 = vor.u32 %v656_v52, %v654_v51 }
 0x16b   : > { %v1068_v55 = vadd.f32 %v1067_v43, %v848_v47 }
 0x16c   : > { %887 = vmatmul.bf16.gmra.mxu0 %v655_v23 }
 0x16d   : > { %v11871_v20 = vadd.f32 %v1363_v41, %v1068_v55  ;;  %v11877_v37 = vpop.f32.mrf.mxu2  ;;  %v1211_v41 = vrot.slane %v11654_v30, 1  ;;  %v663_v55 = vsel %vm483_vm0, %v658_v24, %v662_v44 }
 0x16e   : > { %1826 = vmatmul.bf16.gmra.mxu3 %v10818_v18 }
 0x16f   : > { %v1212_v43 = vsel %vm1163_vm1, %v1209_v33, %v1211_v41  ;;  %v668_v33 = vshll.u32 %v11630_v13, 16 }
 0x170   : > { %1417 = vmatmul.bf16.gmra.mxu2 %v1212_v43  ;;  %v666_v43 = vor.u32 %v664_v11, %v662_v44 }
 0x171   : > { %v1787_v14 = vpop.f32.mrf.mxu3  ;;  %v850_v25 = vpop.f32.mrf.mxu0 }
 0x172   : > { %v1069_v56 = vpop.f32.mrf.mxu1 }
 0x173   : > { %v1070_v10 = vadd.f32 %v1069_v56, %v850_v25 }
 0x175   : > { %v11875_v12 = vadd.f32 %v1365_v50, %v1070_v10  ;;  %v1378_v50 = vpop.f32.mrf.mxu2 }
 0x179   : > { %v11880_v47 = vpop.f32.mrf.mxu3  ;;  %v853_v23 = vpop.f32.mrf.mxu0 }
 0x17a   : > { %14338 = vst [vmem:[#allocation25_spill] sm:$0xff] %v11880_v47  ;;  %v1072_v18 = vpop.f32.mrf.mxu1 }
 0x17b   : > { %v1073_v14 = vadd.f32 %v1072_v18, %v853_v23  ;;  %v1213_v23 = vrot.slane %v11696_v60, 1 }
 0x17c   : > { %892 = vmatmul.bf16.gmra.mxu0 %v663_v55 }
 0x17d   : > { %v11885_v25 = vadd.f32 %v1368_v48, %v1073_v14  ;;  %v11893_v24 = vpop.f32.mrf.mxu2  ;;  %v670_v48 = vrot.slane %v668_v33, 1  ;;  %v1214_v55 = vsel %vm1163_vm1, %v1211_v41, %v1213_v23  ;;  %v672_v41 = vshrl.u32 %v11630_v13, 16 }
 0x17e   : > { %1831 = vmatmul.bf16.gmra.mxu3 %v10819_v63  ;;  %v676_v33 = vshll.u32 %v11654_v30, 16 }
 0x180   : > { %1422 = vmatmul.bf16.gmra.mxu2 %v1214_v55  ;;  %v678_v55 = vrot.slane %v676_v33, 1 }
 0x181   : > { %v11887_v51 = vpop.f32.mrf.mxu3  ;;  %v855_v56 = vpop.f32.mrf.mxu0 }
 0x182   : > { %14339 = vst [vmem:[#allocation26_spill] sm:$0xff] %v11887_v51  ;;  %v1074_v52 = vpop.f32.mrf.mxu1  ;;  %v671_v51 = vsel %vm483_vm0, %v666_v43, %v670_v48  ;;  %v674_v43 = vor.u32 %v672_v41, %v670_v48 }
 0x183   : > { %v1075_v10 = vadd.f32 %v1074_v52, %v855_v56 }
 0x185   : > { %v11891_v47 = vadd.f32 %v1370_v58, %v1075_v10  ;;  %v1383_v58 = vpop.f32.mrf.mxu2 }
 0x189   : > { %v11896_v18 = vpop.f32.mrf.mxu3  ;;  %v858_v63 = vpop.f32.mrf.mxu0 }
 0x18a   : > { %14340 = vst [vmem:[#allocation27_spill] sm:$0xff] %v11896_v18  ;;  %v1077_v14 = vpop.f32.mrf.mxu1 }
 0x18b   : > { %v1078_v1 = vadd.f32 %v1077_v14, %v858_v63 }
 0x18c   : > { %897 = vmatmul.bf16.gmra.mxu0 %v671_v51 }
 0x18d   : > { %v11901_v56 = vadd.f32 %v1373_v21, %v1078_v1  ;;  %v11911_v10 = vpop.f32.mrf.mxu2  ;;  %v14313_v1 = vrot.slane %v11713_v15, 1 }
 0x18e   : > { %1836 = vmatmul.bf16.gmra.mxu3 %v10820_v6  ;;  %v679_v6 = vsel %vm483_vm0, %v674_v43, %v678_v55 }
 0x18f   : > { %v1216_v51 = vsel %vm1163_vm1, %v1213_v23, %v14313_v1  ;;  %v684_v23 = vshll.u32 %v11696_v60, 16 }
 0x190   : > { %1427 = vmatmul.bf16.gmra.mxu2 %v1216_v51 }
 0x191   : > { %v11903_v44 = vpop.f32.mrf.mxu3  ;;  %v11905_v52 = vpop.f32.mrf.mxu0  ;;  %v686_v0 = vrot.slane %v684_v23, 1 }
 0x192   : > { %14341 = vst [vmem:[#allocation28_spill] sm:$0xff] %v11903_v44  ;;  %v11907_v11 = vpop.f32.mrf.mxu1  ;;  %v10821_v44 = vld [vmem:[%s11542_s22 + $0x6c] sm:$0xff] }
 0x195   : > { %v1388_v48 = vpop.f32.mrf.mxu2 }
 0x199   : > { %v11914_v21 = vpop.f32.mrf.mxu3  ;;  %v863_v63 = vpop.f32.mrf.mxu0 }
 0x19a   : > { %14342 = vst [vmem:[#allocation29_spill] sm:$0xff] %v11914_v21  ;;  %v1082_v14 = vpop.f32.mrf.mxu1  ;;  %v680_v21 = vshrl.u32 %v11654_v30, 16 }
 0x19b   : > { %v1083_v13 = vadd.f32 %v1082_v14, %v863_v63  ;;  %v10822_v14 = vld [vmem:[%s11542_s22 + $0x74] sm:$0xff] }
 0x19c   : > { %902 = vmatmul.bf16.gmra.mxu0 %v679_v6  ;;  %v682_v43 = vor.u32 %v680_v21, %v678_v55  ;;  %v688_v55 = vshrl.u32 %v11696_v60, 16  ;;  %v692_v21 = vshll.u32 %v11713_v15, 16 }
 0x19d   : > { %v11921_v18 = vadd.f32 %v1378_v50, %v1083_v13  ;;  %v11929_v1 = vpop.f32.mrf.mxu2 }
 0x19e   : > { %1841 = vmatmul.bf16.gmra.mxu3 %v10821_v44  ;;  %v687_v63 = vsel %vm483_vm0, %v682_v43, %v686_v0  ;;  %v690_v43 = vor.u32 %v688_v55, %v686_v0  ;;  %v10877_v0 = vld [vmem:[%s14307_s1 + $0x138] sm:$0xff] }
 0x19f   : > { %2476 = vmatpush.bf16.msra.mxu0 %v10877_v0 }
 0x1a1   : > { %v11923_v41 = vpop.f32.mrf.mxu3  ;;  %v11925_v33 = vpop.f32.mrf.mxu0 }
 0x1a2   : > { %14343 = vst [vmem:[#allocation30_spill] sm:$0xff] %v11923_v41 }
 0x1a5   : > { %v1393_v30 = vpop.f32.mrf.mxu2 }
 0x1a9   : > { %v11931_v51 = vpop.f32.mrf.mxu3  ;;  %v868_v50 = vpop.f32.mrf.mxu0 }
 0x1aa   : > { %14344 = vst [vmem:[#allocation31_spill] sm:$0xff] %v11931_v51  ;;  %v1088_v44 = vadd.f32 %v11664_v36, %v868_v50  ;;  %v694_v51 = vrot.slane %v692_v21, 1 }
 0x1ac   : > { %v11936_v6 = vadd.f32 %v1383_v58, %v1088_v44  ;;  %907 = vmatmul.bf16.gmra.mxu0 %v687_v63  ;;  %v695_v50 = vsel %vm483_vm0, %v690_v43, %v694_v51  ;;  %v10823_v63 = vld [vmem:[%s11542_s22 + $0x7c] sm:$0xff] }
 0x1ad   : > { %v11944_v23 = vpop.f32.mrf.mxu2 }
 0x1ae   : > { %1846 = vmatmul.bf16.gmra.mxu3 %v10822_v14  ;;  %v454_v14 = vunpack.c.l.b16 %v327_v59 }
 0x1b0   : > { %v11954_v45 = vpack.c.b16 %v454_v14, %v454_v14 }
 0x1b1   : > { %v11938_v13 = vpop.f32.mrf.mxu3  ;;  %v11940_v41 = vpop.f32.mrf.mxu0 }
 0x1b2   : > { %14345 = vst [vmem:[#allocation32_spill] sm:$0xff] %v11938_v13  ;;  %v700_v59 = vshll.u32 %v11954_v45, 16 }
 0x1b5   : > { %v1398_v60 = vpop.f32.mrf.mxu2 }
 0x1b9   : > { %v11947_v36 = vpop.f32.mrf.mxu3  ;;  %v873_v58 = vpop.f32.mrf.mxu0 }
 0x1ba   : > { %14346 = vst [vmem:[#allocation33_spill] sm:$0xff] %v11947_v36  ;;  %v1093_v44 = vadd.f32 %v11699_v61, %v873_v58  ;;  %v696_v61 = vshrl.u32 %v11713_v15, 16  ;;  %v702_v58 = vrot.slane %v700_v59, 1  ;;  %v10876_v59 = vld [vmem:[%s14307_s1 + $0x130] sm:$0xff] }
 0x1bb   : > { %2477 = vmatpush.bf16.msra.mxu0 %v10876_v59 }
 0x1bc   : > { %v11952_v13 = vadd.f32 %v1388_v48, %v1093_v44  ;;  %912 = vmatmul.bf16.gmra.mxu0 %v695_v50  ;;  %v698_v43 = vor.u32 %v696_v61, %v694_v51  ;;  %v10824_v44 = vld [vmem:[%s11542_s22 + $0x84] sm:$0xff]  ;;  %v11305_v61 = vor.u32 %v11304_v32, %v11303_v35 }
 0x1bd   : > { %v11965_v48 = vpop.f32.mrf.mxu2 }
 0x1be   : > { %1851 = vmatmul.bf16.gmra.mxu3 %v10823_v63  ;;  %v703_v14 = vsel %vm483_vm0, %v698_v43, %v702_v58 }
 0x1c1   : > { %v11959_v55 = vpop.f32.mrf.mxu3  ;;  %v11961_v21 = vpop.f32.mrf.mxu0 }
 0x1c2   : > { %14347 = vst [vmem:[#allocation34_spill] sm:$0xff] %v11959_v55 }
 0x1c5   : > { %v1403_v36 = vpop.f32.mrf.mxu2 }
 0x1c9   : > { %v11967_v50 = vpop.f32.mrf.mxu3  ;;  %v878_v63 = vpop.f32.mrf.mxu0 }
 0x1ca   : > { %14348 = vst [vmem:[#allocation35_spill] sm:$0xff] %v11967_v50  ;;  %v1098_v0 = vadd.f32 %v11718_v17, %v878_v63  ;;  %v1164_v17 = vrot.slane %v11305_v61, 1 }
 0x1cc   : > { %v11972_v55 = vadd.f32 %v1393_v30, %v1098_v0  ;;  %917 = vmatmul.bf16.gmra.mxu0 %v703_v14  ;;  %v11395_v30 = vld [vmem:[%s11542_s22 + $0x8] sm:$0xff] }
 0x1cd   : > { %v11983_v43 = vpop.f32.mrf.mxu2  ;;  %v1165_v58 = vrot.slane %v11395_v30, 1  ;;  %v10825_v0 = vld [vmem:[%s11542_s22 + $0x8c] sm:$0xff]  ;;  %v1167_v30 = vrot.slane %v11576_v27, 1 }
 0x1ce   : > { %1856 = vmatmul.bf16.gmra.mxu3 %v10824_v44  ;;  %14350 = vst [vmem:[#allocation37_spill] sm:$0xff] %v11983_v43 }
 0x1cf   : > { %v1166_v44 = vsel %vm1163_vm1, %v1164_v17, %v1165_v58  ;;  %v10875_v17 = vld [vmem:[%s14307_s1 + $0x128] sm:$0xff] }
 0x1d0   : > { %2478 = vmatpush.bf16.msra.mxu0 %v10875_v17  ;;  %v10827_v17 = vld [vmem:[%s11542_s22 + $0x9c] sm:$0xff] }
 0x1d1   : > { %v11976_v28 = vpop.f32.mrf.mxu3  ;;  %v11978_v51 = vpop.f32.mrf.mxu0 }
 0x1d2   : > { %14349 = vst [vmem:[#allocation36_spill] sm:$0xff] %v11976_v28 }
 0x1d5   : > { %v1408_v35 = vpop.f32.mrf.mxu2 }
 0x1d9   : > { %v11986_v63 = vpop.f32.mrf.mxu3  ;;  %v883_v14 = vpop.f32.mrf.mxu0 }
 0x1da   : > { %14351 = vst [vmem:[#allocation38_spill] sm:$0xff] %v11986_v63  ;;  %v1103_v28 = vadd.f32 %v11736_v40, %v883_v14 }
 0x1dc   : > { %v11991_v32 = vadd.f32 %v1398_v60, %v1103_v28  ;;  %1302 = vmatmul.bf16.vlgmr.msrb.gmra.mxu0 %v1166_v44  ;;  %v1168_v28 = vsel %vm1163_vm1, %v1165_v58, %v1167_v30  ;;  %v10826_v60 = vld [vmem:[%s11542_s22 + $0x94] sm:$0xff] }
 0x1dd   : > { %v11997_v61 = vpop.f32.mrf.mxu2 }
 0x1de   : > { %1861 = vmatmul.bf16.gmra.mxu3 %v10825_v0  ;;  %14353 = vst [vmem:[#allocation40_spill] sm:$0xff] %v11997_v61  ;;  %v1169_v61 = vrot.slane %v11585_v34, 1 }
 0x1e1   : > { %v11993_v59 = vpop.f32.mrf.mxu3  ;;  %v11995_v50 = vpop.f32.mrf.mxu0 }
 0x1e2   : > { %14352 = vst [vmem:[#allocation39_spill] sm:$0xff] %v11993_v59 }
 0x1e5   : > { %v1413_v0 = vpop.f32.mrf.mxu2 }
 0x1e9   : > { %v12000_v63 = vpop.f32.mrf.mxu3  ;;  %v888_v40 = vpop.f32.mrf.mxu0 }
 0x1ea   : > { %14354 = vst [vmem:[#allocation41_spill] sm:$0xff] %v12000_v63  ;;  %v1108_v14 = vadd.f32 %v11754_v5, %v888_v40  ;;  %v1170_v5 = vsel %vm1163_vm1, %v1167_v30, %v1169_v61  ;;  %v11396_v30 = vld [vmem:[%s11542_s22 + $0x20] sm:$0xff] }
 0x1ec   : > { %v12008_v44 = vadd.f32 %v1403_v36, %v1108_v14  ;;  %1307 = vmatmul.bf16.gmra.mxu0 %v1168_v28 }
 0x1ed   : > { %v12014_v59 = vpop.f32.mrf.mxu2 }
 0x1ee   : > { %1866 = vmatmul.bf16.gmra.mxu3 %v10826_v60  ;;  %14356 = vst [vmem:[#allocation43_spill] sm:$0xff] %v12014_v59  ;;  %v10874_v60 = vld [vmem:[%s14307_s1 + $0x120] sm:$0xff] }
 0x1ef   : > { %2479 = vmatpush.bf16.msra.mxu0 %v10874_v60 }
 0x1f1   : > { %v12010_v27 = vpop.f32.mrf.mxu3  ;;  %v12012_v63 = vpop.f32.mrf.mxu0 }
 0x1f2   : > { %14355 = vst [vmem:[#allocation42_spill] sm:$0xff] %v12010_v27  ;;  %v1171_v27 = vrot.slane %v11396_v30, 1 }
 0x1f5   : > { %v1418_v28 = vpop.f32.mrf.mxu2 }
 0x1f9   : > { %v12017_v43 = vpop.f32.mrf.mxu3  ;;  %v893_v58 = vpop.f32.mrf.mxu0 }
 0x1fa   : > { %14357 = vst [vmem:[#allocation44_spill] sm:$0xff] %v12017_v43  ;;  %v1113_v36 = vadd.f32 %v11771_v31, %v893_v58  ;;  %v1172_v58 = vsel %vm1163_vm1, %v1169_v61, %v1171_v27  ;;  %v10873_v61 = vld [vmem:[%s14307_s1 + $0x118] sm:$0xff] }
 0x1fb   : > { %2480 = vmatpush.bf16.msra.mxu0 %v10873_v61  ;;  %v10885_v61 = vld [vmem:[%s14307_s1 + $0x178] sm:$0xff] }
 0x1fc   : > { %v12022_v40 = vadd.f32 %v1408_v35, %v1113_v36  ;;  %1312 = vmatmul.bf16.gmra.mxu0 %v1170_v5  ;;  %v10828_v5 = vld [vmem:[%s11542_s22 + $0xa4] sm:$0xff]  ;;  %2825 = vmatpush.bf16.msrb.mxu1 %v10885_v61 }
 0x1fd   : > { %v12031_v43 = vpop.f32.mrf.mxu2 }
 0x1fe   : > { %1871 = vmatmul.bf16.gmra.mxu3 %v10827_v17  ;;  %14359 = vst [vmem:[#allocation46_spill] sm:$0xff] %v12031_v43 }
 0x201   : > { %v12027_v34 = vpop.f32.mrf.mxu3  ;;  %v12029_v14 = vpop.f32.mrf.mxu0 }
 0x202   : > { %14358 = vst [vmem:[#allocation45_spill] sm:$0xff] %v12027_v34 }
 0x205   : > { %v1423_v60 = vpop.f32.mrf.mxu2 }
 0x209   : > { %v12034_v31 = vpop.f32.mrf.mxu3  ;;  %v898_v35 = vpop.f32.mrf.mxu0 }
 0x20a   : > { %14360 = vst [vmem:[#allocation47_spill] sm:$0xff] %v12034_v31  ;;  %v1118_v17 = vadd.f32 %v11788_v62, %v898_v35  ;;  %v10920_v62 = vld [vmem:[%s14307_s1 + $0x1b8] sm:$0xff] }
 0x20b   : > { %3304 = vmatpush.bf16.msrb.mxu2 %v10920_v62 }
 0x20c   : > { %v12039_v36 = vadd.f32 %v1413_v0, %v1118_v17  ;;  %1317 = vmatmul.bf16.gmra.mxu0 %v1172_v58  ;;  %v11397_v0 = vld [vmem:[%s11542_s22 + $0x28] sm:$0xff] }
 0x20d   : > { %v12046_v59 = vpop.f32.mrf.mxu2  ;;  %v1173_v35 = vrot.slane %v11397_v0, 1  ;;  %v10829_v17 = vld [vmem:[%s11542_s22 + $0xac] sm:$0xff] }
 0x20e   : > { %1876 = vmatmul.bf16.gmra.mxu3 %v10828_v5  ;;  %14362 = vst [vmem:[#allocation49_spill] sm:$0xff] %v12046_v59 }
 0x20f   : > { %v1174_v5 = vsel %vm1163_vm1, %v1171_v27, %v1173_v35 }
 0x211   : > { %v1837_v34 = vpop.f32.mrf.mxu3  ;;  %v12044_v30 = vpop.f32.mrf.mxu0 }
 0x212   : > { %v12042_v43 = vadd.f32 %v1837_v34, %v11861_v4 }
 0x214   : > { %14361 = vst [vmem:[#allocation48_spill] sm:$0xff] %v12042_v43 }
 0x215   : > { %v1428_v59 = vpop.f32.mrf.mxu2 }
 0x219   : > { %v1839_v58 = vpop.f32.mrf.mxu3  ;;  %v903_v34 = vpop.f32.mrf.mxu0 }
 0x21a   : > { %v12056_v4 = vadd.f32 %v1839_v58, %v11865_v42  ;;  %v1123_v43 = vadd.f32 %v11805_v38, %v903_v34  ;;  %v11398_v58 = vld [vmem:[%s11542_s22 + $0x30] sm:$0xff] }
 0x21b   : > { %v1175_v38 = vrot.slane %v11398_v58, 1  ;;  %v11399_v58 = vld [vmem:[%s11542_s22 + $0x38] sm:$0xff] }
 0x21c   : > { %14363 = vst [vmem:[#allocation50_spill] sm:$0xff] %v12056_v4  ;;  %v12061_v31 = vadd.f32 %v1418_v28, %v1123_v43  ;;  %1322 = vmatmul.bf16.gmra.mxu0 %v1174_v5  ;;  %v10830_v4 = vld [vmem:[%s11542_s22 + $0xb4] sm:$0xff] }
 0x21d   : > { %v1430_v27 = vpop.f32.mrf.mxu2  ;;  %v1176_v5 = vsel %vm1163_vm1, %v1173_v35, %v1175_v38  ;;  %v10919_v35 = vld [vmem:[%s14307_s1 + $0x1b0] sm:$0xff] }
 0x21e   : > { %1881 = vmatmul.bf16.gmra.mxu3 %v10829_v17  ;;  %v10872_v17 = vld [vmem:[%s14307_s1 + $0x110] sm:$0xff]  ;;  %3305 = vmatpush.bf16.msrb.mxu2 %v10919_v35 }
 0x21f   : > { %2481 = vmatpush.bf16.msra.mxu0 %v10872_v17 }
 0x221   : > { %v1842_v62 = vpop.f32.mrf.mxu3  ;;  %v12069_v0 = vpop.f32.mrf.mxu0 }
 0x222   : > { %v12067_v42 = vadd.f32 %v1842_v62, %v11871_v20 }
 0x229   : > { %v1844_v43 = vpop.f32.mrf.mxu3  ;;  %v908_v34 = vpop.f32.mrf.mxu0 }
 0x22a   : > { %v12073_v28 = vadd.f32 %v1844_v43, %v11875_v12  ;;  %v1128_v20 = vadd.f32 %v11821_v26, %v908_v34  ;;  %v1177_v43 = vrot.slane %v11399_v58, 1  ;;  %v1080_v58 = vadd.f32 %v11907_v11, %v11905_v52  ;;  %v1084_v52 = vpop.f32.mrf.mxu1 }
 0x22c   : > { %v12081_v61 = vadd.f32 %v1423_v60, %v1128_v20  ;;  %1327 = vmatmul.bf16.gmra.mxu0 %v1176_v5  ;;  %v10831_v5 = vld [vmem:[%s11542_s22 + $0xbc] sm:$0xff] }
 0x22e   : > { %1886 = vmatmul.bf16.gmra.mxu3 %v10830_v4  ;;  %v1178_v4 = vsel %vm1163_vm1, %v1175_v38, %v1177_v43  ;;  %v10871_v38 = vld [vmem:[%s14307_s1 + $0x108] sm:$0xff] }
 0x22f   : > { %2482 = vmatpush.bf16.msra.mxu0 %v10871_v38  ;;  %v10952_v38 = vld [vmem:[%s14307_s1 + $0x1e8] sm:$0xff] }
 0x231   : > { %v1847_v62 = vpop.f32.mrf.mxu3  ;;  %v12086_v27 = vpop.f32.mrf.mxu0 }
 0x232   : > { %v12084_v12 = vadd.f32 %v1847_v62, %v11885_v25  ;;  %v10884_v25 = vld [vmem:[%s14307_s1 + $0x170] sm:$0xff] }
 0x233   : > { %2826 = vmatpush.bf16.msrb.mxu1 %v10884_v25  ;;  %v10832_v25 = vld [vmem:[%s11542_s22 + $0xc4] sm:$0xff] }
 0x239   : > { %v1849_v26 = vpop.f32.mrf.mxu3  ;;  %v913_v60 = vpop.f32.mrf.mxu0 }
 0x23a   : > { %v12093_v34 = vadd.f32 %v1849_v26, %v11891_v47  ;;  %v1133_v17 = vadd.f32 %v11837_v54, %v913_v60  ;;  %v11400_v54 = vld [vmem:[%s11542_s22 + $0x40] sm:$0xff] }
 0x23b   : > { %v1179_v26 = vrot.slane %v11400_v54, 1  ;;  %v1085_v54 = vadd.f32 %v1084_v52, %v11925_v33  ;;  %v10951_v33 = vld [vmem:[%s14307_s1 + $0x1e0] sm:$0xff] }
 0x23c   : > { %v12101_v20 = vadd.f32 %v1428_v59, %v1133_v17  ;;  %1332 = vmatmul.bf16.gmra.mxu0 %v1178_v4  ;;  %v1467_v59 = vadd.f32 %v11877_v37, %v1080_v58  ;;  %v10954_v17 = vld [vmem:[%s14307_s1 + $0x1f8] sm:$0xff]  ;;  %v10953_v37 = vld [vmem:[%s14307_s1 + $0x1f0] sm:$0xff]  ;;  %v10870_v58 = vld [vmem:[%s14307_s1 + $0x100] sm:$0xff] }
 0x23d   : > { %4007 = vmatpush.bf16.msra.mxu3 %v10954_v17  ;;  %2483 = vmatpush.bf16.msra.mxu0 %v10870_v58  ;;  %v1217_v17 = vrot.slane %v11954_v45, 1  ;;  %v10916_v58 = vld [vmem:[%s14307_s1 + $0x198] sm:$0xff] }
 0x23e   : > { %1891 = vmatmul.bf16.gmra.mxu3 %v10831_v5  ;;  %v10950_v45 = vld [vmem:[%s14307_s1 + $0x1d8] sm:$0xff] }
 0x241   : > { %v1852_v62 = vpop.f32.mrf.mxu3  ;;  %v915_v35 = vpop.f32.mrf.mxu0  ;;  %4008 = vmatpush.bf16.msra.mxu3 %v10953_v37 }
 0x242   : > { %v12104_v47 = vadd.f32 %v1852_v62, %v11901_v56  ;;  %v1180_v56 = vsel %vm1163_vm1, %v1177_v43, %v1179_v26  ;;  %v10918_v43 = vld [vmem:[%s14307_s1 + $0x1a8] sm:$0xff] }
 0x243   : > { %3306 = vmatpush.bf16.msrb.mxu2 %v10918_v43  ;;  %v14364_v43 = vrot.slane %v11713_v15, 1  ;;  %v10881_v15 = vld [vmem:[%s14307_s1 + $0x158] sm:$0xff] }
 0x245   : > { %4009 = vmatpush.bf16.msra.mxu3 %v10952_v38  ;;  %v10882_v38 = vld [vmem:[%s14307_s1 + $0x160] sm:$0xff] }
 0x249   : > { %v1854_v60 = vpop.f32.mrf.mxu3  ;;  %v918_v5 = vpop.f32.mrf.mxu0  ;;  %4010 = vmatpush.bf16.msra.mxu3 %v10951_v33  ;;  %v10948_v33 = vld [vmem:[%s14307_s1 + $0x1c8] sm:$0xff] }
 0x24a   : > { %v12113_v4 = vadd.f32 %v1854_v60, %v1467_v59  ;;  %v10883_v60 = vld [vmem:[%s14307_s1 + $0x168] sm:$0xff]  ;;  %v10917_v5 = vld [vmem:[%s14307_s1 + $0x1a0] sm:$0xff] }
 0x24b   : > { %2827 = vmatpush.bf16.msrb.mxu1 %v10883_v60  ;;  %3307 = vmatpush.bf16.msrb.mxu2 %v10917_v5 }
 0x24c   : > { %1337 = vmatmul.bf16.gmra.mxu0 %v1180_v56  ;;  %v1469_v56 = vadd.f32 %v11893_v24, %v1085_v54  ;;  %v1218_v24 = vsel %vm1163_vm1, %v14364_v43, %v1217_v17  ;;  %v11402_v17 = vld [vmem:[%s11542_s22 + $0x50] sm:$0xff] }
 0x24d   : > { %1432 = vmatmul.bf16.gmra.mxu2 %v1218_v24  ;;  %4011 = vmatpush.bf16.msra.mxu3 %v10950_v45  ;;  %v12195_v43 = vld [vmem:[%s11542_s22 + $0xc] sm:$0xff]  }
 0x24e   : > { %1896 = vmatmul.bf16.gmra.mxu3 %v10832_v25  ;;  %v11445_v24 = vld [vmem:[%s11542_s22 + $0xc] sm:$0xf0] }
 0x24f   : > { %2828 = vmatpush.bf16.msrb.mxu1 %v10882_v38  ;;  %3308 = vmatpush.bf16.msrb.mxu2 %v10916_v58  ;;  %v10947_v58 = vld [vmem:[%s14307_s1 + $0x1c0] sm:$0xff] }
 0x251   : > { %v1857_v11 = vpop.f32.mrf.mxu3  ;;  %v920_v35 = vpop.f32.mrf.mxu0 }
 0x252   : > { %v12124_v62 = vadd.f32 %v1857_v11, %v11921_v18  ;;  %v11401_v18 = vld [vmem:[%s11542_s22 + $0x48] sm:$0xff] }
 0x253   : > { %v1181_v59 = vrot.slane %v11401_v18, 1  ;;  %v10833_v35 = vld [vmem:[%s11542_s22 + $0xcc] sm:$0xff]  ;;  %2829 = vmatpush.bf16.msrb.mxu1 %v10881_v15 }
 0x254   : > { %v10949_v18 = vld [vmem:[%s14307_s1 + $0x1d0] sm:$0xff] }
 0x255   : > { %v1182_v37 = vsel %vm1163_vm1, %v1179_v26, %v1181_v59  ;;  %v10915_v26 = vld [vmem:[%s14307_s1 + $0x190] sm:$0xff]  ;;  %4012 = vmatpush.bf16.msra.mxu3 %v10949_v18  ;;  %v10886_v18 = vld [vmem:[%s11542_s22 + $0x18] sm:$0xff] }
 0x256   : > { %3309 = vmatpush.bf16.msrb.mxu2 %v10915_v26 }
 0x259   : > { %v1859_v25 = vpop.f32.mrf.mxu3  ;;  %v1303_v11 = vpop.f32.mrf.mxu0  ;;  %4013 = vmatpush.bf16.msra.mxu3 %v10948_v33 }
 0x25a   : > { %v12148_v52 = vadd.f32 %v1859_v25, %v1469_v56  ;;  %v10880_v56 = vld [vmem:[%s14307_s1 + $0x150] sm:$0xff]  ;;  %v10914_v25 = vld [vmem:[%s14307_s1 + $0x188] sm:$0xff]  ;;  %v1183_v11 = vrot.slane %v11402_v17, 1 }
 0x25b   : > { %2830 = vmatpush.bf16.msrb.mxu1 %v10880_v56  ;;  %3310 = vmatpush.bf16.msrb.mxu2 %v10914_v25 }
 0x25c   : > { %1342 = vmatmul.bf16.gmra.mxu0 %v1182_v37  ;;  %v10879_v37 = vld [vmem:[%s14307_s1 + $0x148] sm:$0xff]  ;;  %v1184_v26 = vsel %vm1163_vm1, %v1181_v59, %v1183_v11  ;;  %v10962_v59 = vld [vmem:[%s14307_s1 + $0x238] sm:$0xff] }
 0x25d   : > { %4014 = vmatpush.bf16.msra.mxu3 %v10947_v58  ;;  %4356 = vmatpush.bf16.msrb.mxu0 %v10962_v59 }
 0x25e   : > { %1901 = vmatmul.bf16.gmra.mxu3 %v10833_v35  ;;  %v10913_v35 = vld [vmem:[%s14307_s1 + $0x180] sm:$0xff] }
 0x25f   : > { %2831 = vmatpush.bf16.msrb.mxu1 %v10879_v37  ;;  %3311 = vmatpush.bf16.msrb.mxu2 %v10913_v35 }
 0x261   : > { %v1862_v54 = vpop.f32.mrf.mxu3  ;;  %v1305_v5 = vpop.f32.mrf.mxu0 }
 0x262   : > { %v12174_v60 = vadd.f32 %v1862_v54, %v11936_v6  ;;  %v1090_v6 = vadd.f32 %v11686_v53, %v11940_v41  ;;  %v11446_v41 = vld [vmem:[%s11542_s22 + $0xc] sm:$0xe]  ;;  %v10834_v54 = vld [vmem:[%s11542_s22 + $0xd4] sm:$0xff]  ;;  %3312 = vmatmul.bf16.vlgmr.msrb.gmra.mxu2 %v10886_v18  ;;  %v10887_v18 = vld [vmem:[%s11542_s22 + $0x20] sm:$0xff] }
 0x263   : > { %v12212_v5 = vld [vmem:[%s11542_s22 + $0x14] sm:$0xff]  ;;  %v11447_v56 = vor.u32 %v11446_v41, %v11445_v24 }
 0x264   : > { %v1471_v53 = vadd.f32 %v11911_v10, %v1090_v6  ;;  %v10878_v10 = vld [vmem:[%s14307_s1 + $0x140] sm:$0xff]  ;;  %v2696_v25 = vrot.slane %v12212_v5, 1 }
 0x265   : > { %2832 = vmatpush.bf16.msrb.mxu1 %v10878_v10  ;;  %v2695_v33 = vrot.slane %v11447_v56, 1  ;;  %v11306_v56 = vld [vmem:[%s11542_s22 + $0x18] sm:$0xff]  }
 0x266   : > { %v3715_v59 = vshll.u32 %v11306_v56, 16 }
 0x267   : > { %v2697_v6 = vsel %vm1163_vm1, %v2695_v33, %v2696_v25 }
 0x268   : > { %2833 = vmatmul.bf16.vlgmr.msrb.gmra.mxu1 %v2697_v6  ;;  %v2182_v6 = vshrl.u32 %v12195_v43, 16 }
 0x269   : > { %v1864_v38 = vpop.f32.mrf.mxu3  ;;  %v1308_v15 = vpop.f32.mrf.mxu0 }
 0x26a   : > { %v12203_v45 = vadd.f32 %v1864_v38, %v1471_v53  ;;  %v1095_v53 = vadd.f32 %v11708_v9, %v11961_v21  ;;  %v10921_v21 = vld [vmem:[%s11542_s22 + $0x20] sm:$0xff] }
 0x26c   : > { %1347 = vmatmul.bf16.gmra.mxu0 %v1184_v26  ;;  %v1473_v41 = vadd.f32 %v11929_v1, %v1095_v53  ;;  %v14365_v26 = vrot.slane %v11679_v46, 1  ;;  %v2184_v1 = vshll.u32 %v12195_v43, 16 }
 0x26e   : > { %1906 = vmatmul.bf16.gmra.mxu3 %v10834_v54  ;;  %v1186_v54 = vsel %vm1163_vm1, %v1183_v11, %v14365_v26 }
 0x271   : > { %v1867_v17 = vpop.f32.mrf.mxu3  ;;  %v1310_v35 = vpop.f32.mrf.mxu0 }
 0x272   : > { %v12220_v37 = vadd.f32 %v1867_v17, %v11952_v13  ;;  %v12223_v24 = vadd.f32 %v1310_v35, %v11702_v3  ;;  %v10835_v13 = vld [vmem:[%s11542_s22 + $0xdc] sm:$0xff]  ;;  %3317 = vmatmul.bf16.gmra.mxu2 %v10887_v18  ;;  %v2186_v17 = vrot.slane %v2184_v1, 1  ;;  %v2189_v35 = vshll.u32 %v12212_v5, 16 }
 0x273   : > { %v12239_v3 = vld [vmem:[%s11542_s22 + $0x1c] sm:$0xff] }
 0x274   : > { %v2698_v9 = vrot.slane %v12239_v3, 1  ;;  %v2187_v26 = vor.u32 %v2186_v17, %v2182_v6 }
 0x276   : > { %v2699_v46 = vsel %vm1163_vm1, %v2696_v25, %v2698_v9  ;;  %v1100_v25 = vadd.f32 %v11728_v29, %v11978_v51  ;;  %v12266_v29 = vld [vmem:[%s11542_s22 + $0x24] sm:$0xff] }
 0x277   : > { %v2700_v51 = vrot.slane %v12266_v29, 1 }
 0x278   : > { %2838 = vmatmul.bf16.gmra.mxu1 %v2699_v46  ;;  %v1475_v43 = vadd.f32 %v11944_v23, %v1100_v25  ;;  %v10922_v23 = vld [vmem:[%s11542_s22 + $0x28] sm:$0xff] }
 0x279   : > { %v1869_v38 = vpop.f32.mrf.mxu3  ;;  %v1313_v15 = vpop.f32.mrf.mxu0  ;;  %v3728_v25 = vshll.u32 %v10922_v23, 16 }
 0x27a   : > { %v12228_v58 = vadd.f32 %v1869_v38, %v1473_v41  ;;  %v12236_v10 = vadd.f32 %v1313_v15, %v11715_v16  ;;  %v3713_v41 = vshrl.u32 %v11306_v56, 16  ;;  %v3717_v38 = vrot.slane %v3715_v59, 1  ;;  %v10888_v56 = vld [vmem:[%s11542_s22 + $0x28] sm:$0xff] }
 0x27b   : > { %v3720_v15 = vshll.u32 %v10921_v21, 16 }
 0x27c   : > { %1352 = vmatmul.bf16.gmra.mxu0 %v1186_v54  ;;  %v3718_v54 = vor.u32 %v3717_v38, %v3713_v41  ;;  %v2197_v41 = vshll.u32 %v12239_v3, 16 }
 0x27e   : > { %1911 = vmatmul.bf16.gmra.mxu3 %v10835_v13  ;;  %v3722_v13 = vrot.slane %v3720_v15, 1  ;;  %v3724_v15 = vshrl.u32 %v10921_v21, 16 }
 0x281   : > { %v1872_v11 = vpop.f32.mrf.mxu3  ;;  %v1315_v16 = vpop.f32.mrf.mxu0 }
 0x282   : > { %v12247_v33 = vadd.f32 %v1872_v11, %v11972_v55  ;;  %v12252_v53 = vadd.f32 %v1315_v16, %v11722_v22  ;;  %v2191_v55 = vrot.slane %v2189_v35, 1  ;;  %v3723_v11 = vsel %vm483_vm0, %v3718_v54, %v3722_v13  ;;  %3322 = vmatmul.bf16.gmra.mxu2 %v10888_v56  ;;  %v10889_v56 = vld [vmem:[%s11542_s22 + $0x30] sm:$0xff] }
 0x283   : > { %v2701_v16 = vsel %vm1163_vm1, %v2698_v9, %v2700_v51  ;;  %v1105_v9 = vadd.f32 %v11746_v57, %v11995_v50  ;;  %v2199_v54 = vrot.slane %v2197_v41, 1  ;;  %v12291_v57 = vld [vmem:[%s11542_s22 + $0x2c] sm:$0xff] }
 0x284   : > { %v2192_v22 = vsel %vm483_vm0, %v2187_v26, %v2191_v55  ;;  %v2702_v50 = vrot.slane %v12291_v57, 1 }
 0x288   : > { %2843 = vmatmul.bf16.gmra.mxu1 %v2701_v16 }
 0x289   : > { %v1874_v18 = vpop.f32.mrf.mxu3  ;;  %v1318_v46 = vpop.f32.mrf.mxu0 }
 0x28a   : > { %v12257_v1 = vadd.f32 %v1874_v18, %v1475_v43  ;;  %v12262_v59 = vadd.f32 %v1318_v46, %v11733_v39  ;;  %v2193_v39 = vshrl.u32 %v12212_v5, 16  ;;  %v3730_v43 = vrot.slane %v3728_v25, 1 }
 0x28b   : > { %v1477_v18 = vadd.f32 %v11965_v48, %v1105_v9  ;;  %v10923_v48 = vld [vmem:[%s11542_s22 + $0x30] sm:$0xff] }
 0x28c   : > { %14366 = vst [vmem:[#allocation51_spill] sm:$0xff] %v12257_v1  ;;  %2484 = vmatmul.bf16.vlgmr.msra.gmra.mxu0 %v2192_v22  ;;  %v2195_v26 = vor.u32 %v2193_v39, %v2191_v55  ;;  %v2703_v55 = vsel %vm1163_vm1, %v2700_v51, %v2702_v50  ;;  %v2205_v39 = vshll.u32 %v12266_v29, 16  ;;  %v3736_v25 = vshll.u32 %v10923_v48, 16 }
 0x28e   : > { %4015 = vmatmul.bf16.vlgmr.msra.gmra.mxu3 %v3723_v11  ;;  %v2207_v51 = vrot.slane %v2205_v39, 1  ;;  %v3738_v9 = vrot.slane %v3736_v25, 1  ;;  %v2209_v25 = vshrl.u32 %v12266_v29, 16 }
 0x291   : > { %v1877_v6 = vpop.f32.mrf.mxu3  ;;  %v1320_v35 = vpop.f32.mrf.mxu0 }
 0x292   : > { %v12272_v17 = vadd.f32 %v1877_v6, %v11991_v32  ;;  %v12277_v38 = vadd.f32 %v1320_v35, %v11740_v49  ;;  %v3726_v32 = vor.u32 %v3724_v15, %v3722_v13  ;;  %v2200_v49 = vsel %vm483_vm0, %v2195_v26, %v2199_v54  ;;  %3327 = vmatmul.bf16.gmra.mxu2 %v10889_v56  ;;  %v14370_v26 = vld [vmem:[#allocation37_spill] sm:$0xff]  ;;  %v14372_v56 = vld [vmem:[#allocation3_spill] sm:$0xff] }
 0x293   : > { %v1030_v13 = vadd.f32 %v11758_v8, %v11756_v7  ;;  %v2201_v35 = vshrl.u32 %v12239_v3, 16  ;;  %v3732_v15 = vshrl.u32 %v10922_v23, 16  ;;  %v10961_v7 = vld [vmem:[%s14307_s1 + $0x230] sm:$0xff]  ;;  %v1110_v8 = vadd.f32 %v11763_v19, %v12012_v63 }
 0x294   : > { %14367 = vst [vmem:[#allocation52_spill] sm:$0xff] %v12272_v17  ;;  %v3731_v11 = vsel %vm483_vm0, %v3726_v32, %v3730_v43  ;;  %4357 = vmatpush.bf16.msrb.mxu0 %v10961_v7  ;;  %v12320_v63 = vld [vmem:[%s11542_s22 + $0x34] sm:$0xff]  ;;  %v2213_v7 = vshll.u32 %v12291_v57, 16 }
 0x295   : > { %v3734_v3 = vor.u32 %v3732_v15, %v3730_v43  ;;  %v1479_v32 = vadd.f32 %v14370_v26, %v1110_v8  ;;  %v10924_v43 = vld [vmem:[%s11542_s22 + $0x38] sm:$0xff] }
 0x297   : > { %v3739_v19 = vsel %vm483_vm0, %v3734_v3, %v3738_v9  ;;  %v3744_v3 = vshll.u32 %v10924_v43, 16 }
 0x298   : > { %2848 = vmatmul.bf16.gmra.mxu1 %v2703_v55 }
 0x299   : > { %v1879_v46 = vpop.f32.mrf.mxu3  ;;  %v1323_v22 = vpop.f32.mrf.mxu0 }
 0x29a   : > { %v12282_v5 = vadd.f32 %v1879_v46, %v1477_v18  ;;  %v12287_v21 = vadd.f32 %v1323_v22, %v11751_v2 }
 0x29c   : > { %14368 = vst [vmem:[#allocation53_spill] sm:$0xff] %v12282_v5  ;;  %2489 = vmatmul.bf16.gmra.mxu0 %v2200_v49  ;;  %v10890_v49 = vld [vmem:[%s11542_s22 + $0x38] sm:$0xff] }
 0x29e   : > { %4020 = vmatmul.bf16.gmra.mxu3 %v3731_v11 }
 0x2a1   : > { %v1882_v16 = vpop.f32.mrf.mxu3  ;;  %v1325_v6 = vpop.f32.mrf.mxu0 }
 0x2a2   : > { %v12299_v2 = vadd.f32 %v1882_v16, %v12008_v44  ;;  %v12303_v41 = vadd.f32 %v1325_v6, %v1030_v13  ;;  %v2203_v44 = vor.u32 %v2201_v35, %v2199_v54  ;;  %3332 = vmatmul.bf16.gmra.mxu2 %v10890_v49  ;;  %v2704_v54 = vrot.slane %v12320_v63, 1  ;;  %v14373_v13 = vld [vmem:[#allocation4_spill] sm:$0xff]  ;;  %v14374_v16 = vld [vmem:[#allocation5_spill] sm:$0xff] }
 0x2a3   : > { %v1035_v6 = vadd.f32 %v14374_v16, %v14373_v13  ;;  %v10891_v13 = vld [vmem:[%s11542_s22 + $0x40] sm:$0xff] }
 0x2a4   : > { %14369 = vst [vmem:[#allocation54_spill] sm:$0xff] %v12299_v2  ;;  %v2208_v22 = vsel %vm483_vm0, %v2203_v44, %v2207_v51  ;;  %v2705_v55 = vsel %vm1163_vm1, %v2702_v50, %v2704_v54  ;;  %v3740_v44 = vshrl.u32 %v10923_v48, 16  ;;  %v14376_v50 = vld [vmem:[#allocation6_spill] sm:$0xff]  ;;  %v14379_v16 = vld [vmem:[#allocation7_spill] sm:$0xff] }
 0x2a5   : > { %v1115_v26 = vadd.f32 %v14376_v50, %v12029_v14  ;;  %v12346_v14 = vld [vmem:[%s11542_s22 + $0x3c] sm:$0xff] }
 0x2a8   : > { %2853 = vmatmul.bf16.gmra.mxu1 %v2705_v55 }
 0x2a9   : > { %v1884_v18 = vpop.f32.mrf.mxu3  ;;  %v1328_v23 = vpop.f32.mrf.mxu0 }
 0x2aa   : > { %v12311_v46 = vadd.f32 %v1884_v18, %v1479_v32  ;;  %v12316_v11 = vadd.f32 %v1328_v23, %v14372_v56  ;;  %v2211_v32 = vor.u32 %v2209_v25, %v2207_v51  ;;  %v2215_v18 = vrot.slane %v2213_v7, 1  ;;  %v14381_v25 = vld [vmem:[#allocation9_spill] sm:$0xff] }
 0x2ab   : > { %v3742_v23 = vor.u32 %v3740_v44, %v3738_v9  ;;  %v2706_v51 = vrot.slane %v12346_v14, 1  ;;  %v10925_v9 = vld [vmem:[%s11542_s22 + $0x40] sm:$0xff] }
 0x2ac   : > { %14371 = vst [vmem:[#allocation37_spill] sm:$0xff] %v12311_v46  ;;  %2494 = vmatmul.bf16.gmra.mxu0 %v2208_v22  ;;  %v14377_v22 = vld [vmem:[#allocation40_spill] sm:$0xff]  ;;  %v2216_v55 = vsel %vm483_vm0, %v2211_v32, %v2215_v18  ;;  %v2221_v32 = vshll.u32 %v12320_v63, 16 }
 0x2ad   : > { %v1481_v49 = vadd.f32 %v14377_v22, %v1115_v26  ;;  %v2217_v26 = vshrl.u32 %v12291_v57, 16  ;;  %v3748_v22 = vshrl.u32 %v10924_v43, 16 }
 0x2ae   : > { %4025 = vmatmul.bf16.gmra.mxu3 %v3739_v19 }
 0x2b1   : > { %v1887_v35 = vpop.f32.mrf.mxu3  ;;  %v1330_v15 = vpop.f32.mrf.mxu0 }
 0x2b2   : > { %v12328_v39 = vadd.f32 %v1887_v35, %v12022_v40  ;;  %v12332_v8 = vadd.f32 %v1330_v15, %v1035_v6  ;;  %v3746_v40 = vrot.slane %v3744_v3, 1  ;;  %3337 = vmatmul.bf16.gmra.mxu2 %v10891_v13  ;;  %v2707_v35 = vsel %vm1163_vm1, %v2704_v54, %v2706_v51  ;;  %v14380_v15 = vld [vmem:[#allocation8_spill] sm:$0xff]  ;;  %v14383_v54 = vld [vmem:[#allocation10_spill] sm:$0xff] }
 0x2b3   : > { %v1040_v7 = vadd.f32 %v14381_v25, %v14380_v15 }
 0x2b4   : > { %14375 = vst [vmem:[#allocation3_spill] sm:$0xff] %v12328_v39  ;;  %v3747_v6 = vsel %vm483_vm0, %v3742_v23, %v3746_v40  ;;  %v3750_v13 = vor.u32 %v3748_v22, %v3746_v40  ;;  %v10926_v40 = vld [vmem:[%s11542_s22 + $0x48] sm:$0xff]  ;;  %v14388_v22 = vld [vmem:[#allocation13_spill] sm:$0xff] }
 0x2b8   : > { %2858 = vmatmul.bf16.gmra.mxu1 %v2707_v35 }
 0x2b9   : > { %v1889_v56 = vpop.f32.mrf.mxu3  ;;  %v1333_v29 = vpop.f32.mrf.mxu0 }
 0x2ba   : > { %v12337_v19 = vadd.f32 %v1889_v56, %v1481_v49  ;;  %v12342_v48 = vadd.f32 %v1333_v29, %v14379_v16  ;;  %v3752_v49 = vshll.u32 %v10925_v9, 16  ;;  %v1120_v56 = vadd.f32 %v14383_v54, %v12044_v30  ;;  %v14384_v16 = vld [vmem:[#allocation43_spill] sm:$0xff] }
 0x2bb   : > { %v2219_v29 = vor.u32 %v2217_v26, %v2215_v18  ;;  %v12372_v30 = vld [vmem:[%s11542_s22 + $0x44] sm:$0xff] }
 0x2bc   : > { %14378 = vst [vmem:[#allocation4_spill] sm:$0xff] %v12337_v19  ;;  %2499 = vmatmul.bf16.gmra.mxu0 %v2216_v55  ;;  %v2223_v55 = vrot.slane %v2221_v32, 1  ;;  %v2708_v18 = vrot.slane %v12372_v30, 1  ;;  %v14387_v32 = vld [vmem:[#allocation12_spill] sm:$0xff] }
 0x2be   : > { %4030 = vmatmul.bf16.gmra.mxu3 %v3747_v6  ;;  %v1483_v6 = vadd.f32 %v14384_v16, %v1120_v56  ;;  %v2224_v25 = vsel %vm483_vm0, %v2219_v29, %v2223_v55  ;;  %v2709_v26 = vsel %vm1163_vm1, %v2706_v51, %v2708_v18  ;;  %v2229_v16 = vshll.u32 %v12346_v14, 16  ;;  %v14390_v51 = vld [vmem:[#allocation14_spill] sm:$0xff] }
 0x2c1   : > { %v1892_v44 = vpop.f32.mrf.mxu3  ;;  %v1335_v50 = vpop.f32.mrf.mxu0 }
 0x2c2   : > { %v12354_v3 = vadd.f32 %v1892_v44, %v12039_v36  ;;  %v12358_v23 = vadd.f32 %v1335_v50, %v1040_v7  ;;  %v3754_v36 = vrot.slane %v3752_v49, 1  ;;  %v10892_v7 = vld [vmem:[%s11542_s22 + $0x48] sm:$0xff]  ;;  %v1045_v49 = vadd.f32 %v14388_v22, %v14387_v32 }
 0x2c3   : > { %v14386_v44 = vld [vmem:[#allocation11_spill] sm:$0xff]  ;;  %3342 = vmatmul.bf16.gmra.mxu2 %v10892_v7 }
 0x2c4   : > { %14382 = vst [vmem:[#allocation5_spill] sm:$0xff] %v12354_v3  ;;  %v3755_v50 = vsel %vm483_vm0, %v3750_v13, %v3754_v36  ;;  %v2225_v13 = vshrl.u32 %v12320_v63, 16  ;;  %v10960_v63 = vld [vmem:[%s14307_s1 + $0x228] sm:$0xff] }
 0x2c5   : > { %4358 = vmatpush.bf16.msrb.mxu0 %v10960_v63  ;;  %v12463_v3 = vld [vmem:[%s11542_s22 + $0x64] sm:$0xff] }
 0x2c6   : > { %v2227_v7 = vor.u32 %v2225_v13, %v2223_v55  ;;  %v2269_v19 = vshll.u32 %v12463_v3, 16 }
 0x2c8   : > { %2863 = vmatmul.bf16.gmra.mxu1 %v2709_v26 }
 0x2c9   : > { %v1894_v35 = vpop.f32.mrf.mxu3  ;;  %v1338_v57 = vpop.f32.mrf.mxu0 }
 0x2ca   : > { %v12363_v15 = vadd.f32 %v1894_v35, %v1483_v6  ;;  %v12368_v43 = vadd.f32 %v1338_v57, %v14386_v44  ;;  %v3756_v35 = vshrl.u32 %v10925_v9, 16  ;;  %v3760_v57 = vshll.u32 %v10926_v40, 16 }
 0x2cb   : > { %v2231_v44 = vrot.slane %v2229_v16, 1  ;;  %v10927_v16 = vld [vmem:[%s11542_s22 + $0x50] sm:$0xff] }
 0x2cc   : > { %14385 = vst [vmem:[#allocation6_spill] sm:$0xff] %v12363_v15  ;;  %2504 = vmatmul.bf16.gmra.mxu0 %v2224_v25  ;;  %v1125_v25 = vadd.f32 %v14390_v51, %v12069_v0  ;;  %v3762_v26 = vrot.slane %v3760_v57, 1  ;;  %v14394_v51 = vld [vmem:[#allocation16_spill] sm:$0xff] }
 0x2ce   : > { %4035 = vmatmul.bf16.gmra.mxu3 %v3755_v50  ;;  %v3758_v50 = vor.u32 %v3756_v35, %v3754_v36  ;;  %v12401_v36 = vld [vmem:[%s11542_s22 + $0x4c] sm:$0xff] }
 0x2cf   : > { %v2710_v13 = vrot.slane %v12401_v36, 1 }
 0x2d0   : > { %v3763_v55 = vsel %vm483_vm0, %v3758_v50, %v3762_v26  ;;  %v1433_v35 = vpop.f32.mrf.mxu2 }
 0x2d1   : > { %v1897_v54 = vpop.f32.mrf.mxu3  ;;  %v1340_v29 = vpop.f32.mrf.mxu0  ;;  %v2711_v57 = vsel %vm1163_vm1, %v2708_v18, %v2710_v13  ;;  %v14397_v18 = vld [vmem:[#allocation18_spill] sm:$0xff] }
 0x2d2   : > { %v12380_v56 = vadd.f32 %v1897_v54, %v12061_v31  ;;  %v12384_v6 = vadd.f32 %v1340_v29, %v1045_v49  ;;  %v14391_v31 = vld [vmem:[#allocation46_spill] sm:$0xff]  ;;  %v2232_v54 = vsel %vm483_vm0, %v2227_v7, %v2231_v44  ;;  %v10893_v29 = vld [vmem:[%s11542_s22 + $0x50] sm:$0xff] }
 0x2d3   : > { %v1485_v32 = vadd.f32 %v14391_v31, %v1125_v25  ;;  %3347 = vmatmul.bf16.gmra.mxu2 %v10893_v29  ;;  %v14395_v25 = vld [vmem:[#allocation17_spill] sm:$0xff]  ;;  %v1130_v29 = vadd.f32 %v14397_v18, %v12086_v27  ;;  %v14401_v18 = vld [vmem:[#allocation20_spill] sm:$0xff] }
 0x2d4   : > { %14389 = vst [vmem:[#allocation40_spill] sm:$0xff] %v12380_v56  ;;  %v14393_v56 = vld [vmem:[#allocation15_spill] sm:$0xff]  ;;  %v1050_v7 = vadd.f32 %v14395_v25, %v14394_v51  ;;  %v14398_v25 = vld [vmem:[#allocation49_spill] sm:$0xff] }
 0x2d8   : > { %2868 = vmatmul.bf16.gmra.mxu1 %v2711_v57 }
 0x2d9   : > { %v1899_v22 = vpop.f32.mrf.mxu3  ;;  %v1343_v9 = vpop.f32.mrf.mxu0 }
 0x2da   : > { %v12392_v49 = vadd.f32 %v1899_v22, %v1485_v32  ;;  %v12397_v0 = vadd.f32 %v1343_v9, %v14393_v56  ;;  %v2233_v32 = vshrl.u32 %v12346_v14, 16  ;;  %v2237_v22 = vshll.u32 %v12372_v30, 16 }
 0x2db   : > { %v3764_v9 = vshrl.u32 %v10926_v40, 16  ;;  %v10894_v40 = vld [vmem:[%s11542_s22 + $0x58] sm:$0xff] }
 0x2dc   : > { %14392 = vst [vmem:[#allocation7_spill] sm:$0xff] %v12392_v49  ;;  %2509 = vmatmul.bf16.gmra.mxu0 %v2232_v54  ;;  %v3768_v54 = vshll.u32 %v10927_v16, 16  ;;  %v2239_v35 = vrot.slane %v2237_v22, 1  ;;  %v10928_v22 = vld [vmem:[%s11542_s22 + $0x58] sm:$0xff] }
 0x2dd   : > { %v3766_v57 = vor.u32 %v3764_v9, %v3762_v26 }
 0x2de   : > { %4040 = vmatmul.bf16.gmra.mxu3 %v3763_v55  ;;  %v2235_v55 = vor.u32 %v2233_v32, %v2231_v44  ;;  %v3770_v51 = vrot.slane %v3768_v54, 1  ;;  %v12427_v44 = vld [vmem:[%s11542_s22 + $0x54] sm:$0xff] }
 0x2df   : > { %v2712_v26 = vrot.slane %v12427_v44, 1 }
 0x2e0   : > { %v3771_v27 = vsel %vm483_vm0, %v3766_v57, %v3770_v51 }
 0x2e1   : > { %v1902_v31 = vpop.f32.mrf.mxu3  ;;  %v1345_v50 = vpop.f32.mrf.mxu0  ;;  %v2713_v9 = vsel %vm1163_vm1, %v2710_v13, %v2712_v26  ;;  %v3776_v13 = vshll.u32 %v10928_v22, 16 }
 0x2e2   : > { %v12409_v56 = vadd.f32 %v1902_v31, %v12081_v61  ;;  %v12413_v63 = vadd.f32 %v1345_v50, %v1050_v7  ;;  %v1435_v61 = vpop.f32.mrf.mxu2  ;;  %v1487_v31 = vadd.f32 %v14398_v25, %v1130_v29  ;;  %v2240_v7 = vsel %vm483_vm0, %v2235_v55, %v2239_v35  ;;  %v14400_v50 = vld [vmem:[#allocation19_spill] sm:$0xff]  ;;  %v14402_v29 = vld [vmem:[#allocation21_spill] sm:$0xff] }
 0x2e3   : > { %3352 = vmatmul.bf16.gmra.mxu2 %v10894_v40  ;;  %v1055_v55 = vadd.f32 %v14402_v29, %v14401_v18  ;;  %v2241_v25 = vshrl.u32 %v12372_v30, 16  ;;  %v14404_v30 = vld [vmem:[#allocation22_spill] sm:$0xff] }
 0x2e4   : > { %14396 = vst [vmem:[#allocation8_spill] sm:$0xff] %v12409_v56 }
 0x2e5   : > { %v2834_v32 = vpop.f32.mrf.mxu1  ;;  %v2243_v40 = vor.u32 %v2241_v25, %v2239_v35 }
 0x2e8   : > { %2873 = vmatmul.bf16.gmra.mxu1 %v2713_v9  ;;  %v3778_v9 = vrot.slane %v3776_v13, 1  ;;  %v14406_v13 = vld [vmem:[#allocation24_spill] sm:$0xff] }
 0x2e9   : > { %v1904_v14 = vpop.f32.mrf.mxu3  ;;  %v1348_v49 = vpop.f32.mrf.mxu0 }
 0x2ea   : > { %v12418_v56 = vadd.f32 %v1904_v14, %v1487_v31  ;;  %v12423_v15 = vadd.f32 %v1348_v49, %v14400_v50  ;;  %v3313_v54 = vpop.f32.mrf.mxu2  ;;  %v2245_v31 = vshll.u32 %v12401_v36, 16 }
 0x2ec   : > { %14399 = vst [vmem:[#allocation9_spill] sm:$0xff] %v12418_v56  ;;  %2514 = vmatmul.bf16.gmra.mxu0 %v2240_v7  ;;  %v3772_v7 = vshrl.u32 %v10927_v16, 16  ;;  %v2247_v50 = vrot.slane %v2245_v31, 1  ;;  %v10896_v56 = vld [vmem:[%s11542_s22 + $0x68] sm:$0xff] }
 0x2ee   : > { %4045 = vmatmul.bf16.gmra.mxu3 %v3771_v27  ;;  %v2836_v27 = vpop.f32.mrf.mxu1  ;;  %v3774_v32 = vor.u32 %v3772_v7, %v3770_v51  ;;  %v2248_v29 = vsel %vm483_vm0, %v2243_v40, %v2247_v50  ;;  %v10929_v51 = vld [vmem:[%s11542_s22 + $0x60] sm:$0xff] }
 0x2ef   : > { %v14405_v7 = vld [vmem:[#allocation23_spill] sm:$0xff] }
 0x2f0   : > { %v1060_v40 = vadd.f32 %v14406_v13, %v14405_v7 }
 0x2f1   : > { %v1907_v61 = vpop.f32.mrf.mxu3  ;;  %v1350_v57 = vpop.f32.mrf.mxu0 }
 0x2f2   : > { %v12435_v49 = vadd.f32 %v1907_v61, %v12101_v20  ;;  %v12439_v14 = vadd.f32 %v1350_v57, %v1055_v55  ;;  %v3315_v54 = vpop.f32.mrf.mxu2  ;;  %v10895_v61 = vld [vmem:[%s11542_s22 + $0x60] sm:$0xff]  ;;  %v3779_v55 = vsel %vm483_vm0, %v3774_v32, %v3778_v9  ;;  %v2249_v32 = vshrl.u32 %v12401_v36, 16 }
 0x2f3   : > { %v12448_v57 = vld [vmem:[%s11542_s22 + $0x5c] sm:$0xff]  ;;  %3357 = vmatmul.bf16.gmra.mxu2 %v10895_v61  ;;  %v3784_v61 = vshll.u32 %v10929_v51, 16 }
 0x2f4   : > { %14403 = vst [vmem:[#allocation10_spill] sm:$0xff] %v12435_v49  ;;  %v2714_v16 = vrot.slane %v12448_v57, 1 }
 0x2f6   : > { %v2839_v35 = vpop.f32.mrf.mxu1  ;;  %v2715_v25 = vsel %vm1163_vm1, %v2712_v26, %v2714_v16 }
 0x2f8   : > { %2878 = vmatmul.bf16.gmra.mxu1 %v2715_v25 }
 0x2f9   : > { %v1909_v20 = vpop.f32.mrf.mxu3  ;;  %v1353_v18 = vpop.f32.mrf.mxu0 }
 0x2fa   : > { %v12444_v49 = vadd.f32 %v1353_v18, %v14404_v30  ;;  %v3318_v31 = vpop.f32.mrf.mxu2  ;;  %v2253_v20 = vshll.u32 %v12427_v44, 16  ;;  %v2251_v30 = vor.u32 %v2249_v32, %v2247_v50 }
 0x2fb   : > { %v3786_v31 = vrot.slane %v3784_v61, 1  ;;  %v2261_v61 = vshll.u32 %v12448_v57, 16 }
 0x2fc   : > { %2519 = vmatmul.bf16.gmra.mxu0 %v2248_v29  ;;  %v3780_v29 = vshrl.u32 %v10928_v22, 16  ;;  %v2716_v22 = vrot.slane %v12463_v3, 1 }
 0x2fe   : > { %4050 = vmatmul.bf16.gmra.mxu3 %v3779_v55  ;;  %v2255_v55 = vrot.slane %v2253_v20, 1  ;;  %v2841_v26 = vpop.f32.mrf.mxu1  ;;  %v3782_v35 = vor.u32 %v3780_v29, %v3778_v9  ;;  %v2717_v9 = vsel %vm1163_vm1, %v2714_v16, %v2716_v22  ;;  %v2263_v16 = vrot.slane %v2261_v61, 1 }
 0x300   : > { %v3787_v36 = vsel %vm483_vm0, %v3782_v35, %v3786_v31 }
 0x301   : > { %v1912_v27 = vpop.f32.mrf.mxu3  ;;  %v1355_v54 = vpop.f32.mrf.mxu0 }
 0x302   : > { %v12457_v18 = vadd.f32 %v1355_v54, %v1060_v40  ;;  %v3320_v7 = vpop.f32.mrf.mxu2  ;;  %v2256_v27 = vsel %vm483_vm0, %v2251_v30, %v2255_v55  ;;  %v10930_v40 = vld [vmem:[%s11542_s22 + $0x68] sm:$0xff]  ;;  %v10959_v54 = vld [vmem:[%s14307_s1 + $0x220] sm:$0xff]  ;;  %v3788_v30 = vshrl.u32 %v10929_v51, 16  ;;  %v10897_v51 = vld [vmem:[%s11542_s22 + $0x70] sm:$0xff] }
 0x303   : > { %3362 = vmatmul.bf16.gmra.mxu2 %v10896_v56  ;;  %4359 = vmatpush.bf16.msrb.mxu0 %v10959_v54  ;;  %v2257_v56 = vshrl.u32 %v12427_v44, 16  ;;  %v3792_v35 = vshll.u32 %v10930_v40, 16 }
 0x306   : > { %v12466_v50 = vpop.f32.mrf.mxu1 }
 0x308   : > { %2883 = vmatmul.bf16.gmra.mxu1 %v2717_v9  ;;  %v10993_v9 = vld [vmem:[%s14309_s3 + $0x38] sm:$0xff] }
 0x309   : > { %v1914_v13 = vpop.f32.mrf.mxu3  ;;  %v2485_v25 = vpop.f32.mrf.mxu0  ;;  %5750 = vmatpush.bf16.msra.mxu2 %v10993_v9 }
 0x30a   : > { %v12473_v32 = vpop.f32.mrf.mxu2  ;;  %v2259_v13 = vor.u32 %v2257_v56, %v2255_v55  ;;  %v12488_v56 = vld [vmem:[%s11542_s22 + $0x6c] sm:$0xff] }
 0x30b   : > { %v2718_v61 = vrot.slane %v12488_v56, 1 }
 0x30c   : > { %2524 = vmatmul.bf16.gmra.mxu0 %v2256_v27  ;;  %v3790_v27 = vor.u32 %v3788_v30, %v3786_v31  ;;  %v11001_v31 = vld [vmem:[%s14309_s3 + $0x78] sm:$0xff] }
 0x30d   : > { %5565 = vmatpush.bf16.msra.mxu1 %v11001_v31 }
 0x30e   : > { %4055 = vmatmul.bf16.gmra.mxu3 %v3787_v36  ;;  %v12477_v25 = vpop.f32.mrf.mxu1  ;;  %v3794_v36 = vrot.slane %v3792_v35, 1  ;;  %v10931_v35 = vld [vmem:[%s11542_s22 + $0x70] sm:$0xff] }
 0x30f   : > { %v3800_v46 = vshll.u32 %v10931_v35, 16 }
 0x310   : > { %v3795_v55 = vsel %vm483_vm0, %v3790_v27, %v3794_v36 }
 0x311   : > { %v4016_v20 = vpop.f32.mrf.mxu3  ;;  %v2487_v29 = vpop.f32.mrf.mxu0  ;;  %v3802_v1 = vrot.slane %v3800_v46, 1 }
 0x312   : > { %v12482_v54 = vpop.f32.mrf.mxu2  ;;  %v2264_v29 = vsel %vm483_vm0, %v2259_v13, %v2263_v16  ;;  %v2719_v13 = vsel %vm1163_vm1, %v2716_v22, %v2718_v61  ;;  %v2271_v22 = vrot.slane %v2269_v19, 1 }
 0x313   : > { %3367 = vmatmul.bf16.gmra.mxu2 %v10897_v51  ;;  %v2265_v51 = vshrl.u32 %v12448_v57, 16  ;;  %v14408_v57 = vld [vmem:[#allocation26_spill] sm:$0xff] }
 0x315   : > { %v2267_v31 = vor.u32 %v2265_v51, %v2263_v16 }
 0x316   : > { %v12494_v30 = vpop.f32.mrf.mxu1 }
 0x318   : > { %2888 = vmatmul.bf16.gmra.mxu1 %v2719_v13 }
 0x319   : > { %v4018_v20 = vpop.f32.mrf.mxu3  ;;  %v2490_v44 = vpop.f32.mrf.mxu0 }
 0x31a   : > { %v12498_v9 = vpop.f32.mrf.mxu2  ;;  %v14407_v20 = vld [vmem:[#allocation25_spill] sm:$0xff] }
 0x31b   : > { %v1920_v44 = vadd.f32 %v14407_v20, %v12223_v24  ;;  %v1921_v20 = vadd.f32 %v14408_v57, %v12236_v10  ;;  %v2273_v57 = vshrl.u32 %v12463_v3, 16 }
 0x31c   : > { %2529 = vmatmul.bf16.gmra.mxu0 %v2264_v29 }
 0x31e   : > { %4060 = vmatmul.bf16.gmra.mxu3 %v3795_v55  ;;  %v3796_v55 = vshrl.u32 %v10930_v40, 16  ;;  %v12504_v5 = vpop.f32.mrf.mxu1 }
 0x320   : > { %v3798_v17 = vor.u32 %v3796_v55, %v3794_v36  ;;  %v10932_v36 = vld [vmem:[%s11542_s22 + $0x78] sm:$0xff] }
 0x321   : > { %v4021_v27 = vpop.f32.mrf.mxu3  ;;  %v2492_v29 = vpop.f32.mrf.mxu0 }
 0x322   : > { %v2623_v39 = vadd.f32 %v2492_v29, %v1920_v44  ;;  %v12506_v24 = vpop.f32.mrf.mxu2  ;;  %v3803_v19 = vsel %vm483_vm0, %v3798_v17, %v3802_v1  ;;  %v12516_v29 = vld [vmem:[%s11542_s22 + $0x74] sm:$0xff]  ;;  %v14409_v17 = vld [vmem:[#allocation27_spill] sm:$0xff] }
 0x323   : > { %v2720_v46 = vrot.slane %v12516_v29, 1 }
 0x324   : > { %v2972_v2 = vadd.f32 %v2841_v26, %v2623_v39  ;;  %v2272_v39 = vsel %vm483_vm0, %v2267_v31, %v2271_v22  ;;  %v10898_v26 = vld [vmem:[%s11542_s22 + $0x78] sm:$0xff] }
 0x325   : > { %3372 = vmatmul.bf16.gmra.mxu2 %v10898_v26  ;;  %v2721_v51 = vsel %vm1163_vm1, %v2718_v61, %v2720_v46  ;;  %v2275_v26 = vor.u32 %v2273_v57, %v2271_v22  ;;  %v10899_v22 = vld [vmem:[%s11542_s22 + $0x80] sm:$0xff] }
 0x326   : > { %v3451_v27 = vadd.f32 %v3320_v7, %v2972_v2  ;;  %v12520_v7 = vpop.f32.mrf.mxu1 }
 0x328   : > { %2893 = vmatmul.bf16.gmra.mxu1 %v2721_v51 }
 0x329   : > { %v4023_v13 = vpop.f32.mrf.mxu3  ;;  %v2495_v40 = vpop.f32.mrf.mxu0 }
 0x32a   : > { %v12510_v44 = vadd.f32 %v4023_v13, %v3451_v27  ;;  %v2624_v16 = vadd.f32 %v2495_v40, %v1921_v20  ;;  %v12525_v55 = vpop.f32.mrf.mxu2  ;;  %v1922_v27 = vadd.f32 %v14409_v17, %v12252_v53  ;;  %v2277_v20 = vshll.u32 %v12488_v56, 16 }
 0x32c   : > { %v2973_v2 = vadd.f32 %v12466_v50, %v2624_v16  ;;  %2534 = vmatmul.bf16.gmra.mxu0 %v2272_v39  ;;  %v3808_v39 = vshll.u32 %v10932_v36, 16  ;;  %v2279_v16 = vrot.slane %v2277_v20, 1  ;;  %v12547_v20 = vld [vmem:[%s11542_s22 + $0x7c] sm:$0xff] }
 0x32e   : > { %4065 = vmatmul.bf16.gmra.mxu3 %v3803_v19  ;;  %v3452_v10 = vadd.f32 %v12473_v32, %v2973_v2  ;;  %v3804_v32 = vshrl.u32 %v10931_v35, 16  ;;  %v12534_v19 = vpop.f32.mrf.mxu1 }
 0x330   : > { %v3806_v2 = vor.u32 %v3804_v32, %v3802_v1  ;;  %v10933_v32 = vld [vmem:[%s11542_s22 + $0x80] sm:$0xff] }
 0x331   : > { %v4026_v31 = vpop.f32.mrf.mxu3  ;;  %v2497_v13 = vpop.f32.mrf.mxu0 }
 0x332   : > { %v12529_v50 = vadd.f32 %v4026_v31, %v3452_v10  ;;  %v2625_v40 = vadd.f32 %v2497_v13, %v1922_v27  ;;  %v3810_v10 = vrot.slane %v3808_v39, 1  ;;  %v12537_v51 = vpop.f32.mrf.mxu2  ;;  %v14410_v31 = vld [vmem:[#allocation28_spill] sm:$0xff] }
 0x333   : > { %v1923_v17 = vadd.f32 %v14410_v31, %v12262_v59  ;;  %v2281_v31 = vshrl.u32 %v12488_v56, 16 }
 0x334   : > { %v2974_v61 = vadd.f32 %v12477_v25, %v2625_v40  ;;  %v2280_v25 = vsel %vm483_vm0, %v2275_v26, %v2279_v16  ;;  %v3811_v57 = vsel %vm483_vm0, %v3806_v2, %v3810_v10 }
 0x335   : > { %3377 = vmatmul.bf16.gmra.mxu2 %v10899_v22  ;;  %v10958_v22 = vld [vmem:[%s14307_s1 + $0x218] sm:$0xff] }
 0x336   : > { %v3453_v53 = vadd.f32 %v12482_v54, %v2974_v61  ;;  %v2722_v54 = vrot.slane %v12547_v20, 1  ;;  %v12551_v40 = vpop.f32.mrf.mxu1  ;;  %4360 = vmatpush.bf16.msrb.mxu0 %v10958_v22 }
 0x338   : > { %v2723_v39 = vsel %vm1163_vm1, %v2720_v46, %v2722_v54 }
 0x339   : > { %v4028_v3 = vpop.f32.mrf.mxu3  ;;  %v2500_v27 = vpop.f32.mrf.mxu0  ;;  %2898 = vmatmul.bf16.gmra.mxu1 %v2723_v39 }
 0x33a   : > { %v12541_v35 = vadd.f32 %v4028_v3, %v3453_v53  ;;  %v2626_v13 = vadd.f32 %v2500_v27, %v1923_v17  ;;  %v12556_v61 = vpop.f32.mrf.mxu2  ;;  %v14411_v53 = vld [vmem:[#allocation29_spill] sm:$0xff]  ;;  %v2285_v17 = vshll.u32 %v12516_v29, 16 }
 0x33b   : > { %v1924_v2 = vadd.f32 %v14411_v53, %v12277_v38 }
 0x33c   : > { %v2975_v1 = vadd.f32 %v12494_v30, %v2626_v13  ;;  %2539 = vmatmul.bf16.gmra.mxu0 %v2280_v25  ;;  %v3812_v25 = vshrl.u32 %v10932_v36, 16  ;;  %v2283_v13 = vor.u32 %v2281_v31, %v2279_v16  ;;  %v2287_v38 = vrot.slane %v2285_v17, 1 }
 0x33e   : > { %4070 = vmatmul.bf16.gmra.mxu3 %v3811_v57  ;;  %v3454_v59 = vadd.f32 %v12498_v9, %v2975_v1  ;;  %v3816_v9 = vshll.u32 %v10933_v32, 16  ;;  %v12568_v57 = vpop.f32.mrf.mxu1  ;;  %v3814_v56 = vor.u32 %v3812_v25, %v3810_v10  ;;  %v2288_v16 = vsel %vm483_vm0, %v2283_v13, %v2287_v38  ;;  %v10992_v25 = vld [vmem:[%s14309_s3 + $0x30] sm:$0xff] }
 0x33f   : > { %5751 = vmatpush.bf16.msra.mxu2 %v10992_v25 }
 0x341   : > { %v4031_v26 = vpop.f32.mrf.mxu3  ;;  %v2502_v3 = vpop.f32.mrf.mxu0 }
 0x342   : > { %v12560_v30 = vadd.f32 %v4031_v26, %v3454_v59  ;;  %v2627_v27 = vadd.f32 %v2502_v3, %v1924_v2  ;;  %v3818_v59 = vrot.slane %v3816_v9, 1  ;;  %v12571_v39 = vpop.f32.mrf.mxu2  ;;  %v14412_v26 = vld [vmem:[#allocation30_spill] sm:$0xff]  ;;  %v10900_v3 = vld [vmem:[%s11542_s22 + $0x88] sm:$0xff] }
 0x344   : > { %v2976_v46 = vadd.f32 %v12504_v5, %v2627_v27  ;;  %v1925_v5 = vadd.f32 %v14412_v26, %v12287_v21  ;;  %v3819_v17 = vsel %vm483_vm0, %v3814_v56, %v3818_v59 }
 0x345   : > { %3382 = vmatmul.bf16.gmra.mxu2 %v10900_v3 }
 0x346   : > { %v3455_v1 = vadd.f32 %v12506_v24, %v2976_v46  ;;  %v12581_v24 = vld [vmem:[%s11542_s22 + $0x84] sm:$0xff]  ;;  %v12585_v21 = vpop.f32.mrf.mxu1 }
 0x347   : > { %v2724_v27 = vrot.slane %v12581_v24, 1  ;;  %v10934_v46 = vld [vmem:[%s11542_s22 + $0x88] sm:$0xff] }
 0x348   : > { %v3824_v3 = vshll.u32 %v10934_v46, 16 }
 0x349   : > { %v4033_v36 = vpop.f32.mrf.mxu3  ;;  %v2505_v2 = vpop.f32.mrf.mxu0  ;;  %v2725_v22 = vsel %vm1163_vm1, %v2722_v54, %v2724_v27  ;;  %v11000_v54 = vld [vmem:[%s14309_s3 + $0x70] sm:$0xff] }
 0x34a   : > { %v12575_v53 = vadd.f32 %v4033_v36, %v3455_v1  ;;  %v2628_v31 = vadd.f32 %v2505_v2, %v1925_v5  ;;  %v12593_v13 = vpop.f32.mrf.mxu2  ;;  %v14413_v1 = vld [vmem:[#allocation31_spill] sm:$0xff]  ;;  %2903 = vmatmul.bf16.gmra.mxu1 %v2725_v22  ;;  %v2289_v5 = vshrl.u32 %v12516_v29, 16  ;;  %v2293_v2 = vshll.u32 %v12547_v20, 16 }
 0x34b   : > { %v1926_v56 = vadd.f32 %v14413_v1, %v12303_v41  ;;  %5566 = vmatpush.bf16.msra.mxu1 %v11000_v54 }
 0x34c   : > { %v2977_v10 = vadd.f32 %v12520_v7, %v2628_v31  ;;  %2544 = vmatmul.bf16.gmra.mxu0 %v2288_v16  ;;  %v2291_v41 = vor.u32 %v2289_v5, %v2287_v38  ;;  %v10901_v38 = vld [vmem:[%s11542_s22 + $0x90] sm:$0xff] }
 0x34e   : > { %4075 = vmatmul.bf16.gmra.mxu3 %v3819_v17  ;;  %v3456_v9 = vadd.f32 %v12525_v55, %v2977_v10  ;;  %v3820_v55 = vshrl.u32 %v10933_v32, 16  ;;  %v2295_v17 = vrot.slane %v2293_v2, 1  ;;  %v12605_v10 = vpop.f32.mrf.mxu1 }
 0x350   : > { %v3822_v25 = vor.u32 %v3820_v55, %v3818_v59 }
 0x351   : > { %v4036_v7 = vpop.f32.mrf.mxu3  ;;  %v2507_v26 = vpop.f32.mrf.mxu0 }
 0x352   : > { %v12597_v36 = vadd.f32 %v4036_v7, %v3456_v9  ;;  %v2629_v16 = vadd.f32 %v2507_v26, %v1926_v56  ;;  %v3826_v9 = vrot.slane %v3824_v3, 1  ;;  %v12608_v22 = vpop.f32.mrf.mxu2  ;;  %v14414_v7 = vld [vmem:[#allocation32_spill] sm:$0xff]  ;;  %v2296_v26 = vsel %vm483_vm0, %v2291_v41, %v2295_v17 }
 0x353   : > { %v1927_v1 = vadd.f32 %v14414_v7, %v12316_v11  ;;  %v10935_v3 = vld [vmem:[%s11542_s22 + $0x90] sm:$0xff]  ;;  %v2297_v7 = vshrl.u32 %v12547_v20, 16 }
 0x354   : > { %v2978_v31 = vadd.f32 %v12534_v19, %v2629_v16  ;;  %v3827_v2 = vsel %vm483_vm0, %v3822_v25, %v3826_v9  ;;  %v12618_v16 = vld [vmem:[%s11542_s22 + $0x8c] sm:$0xff] }
 0x355   : > { %3387 = vmatmul.bf16.gmra.mxu2 %v10901_v38  ;;  %v2726_v59 = vrot.slane %v12618_v16, 1  ;;  %v2299_v38 = vor.u32 %v2297_v7, %v2295_v17  ;;  %v10902_v17 = vld [vmem:[%s11542_s22 + $0x98] sm:$0xff] }
 0x356   : > { %v3457_v29 = vadd.f32 %v12537_v51, %v2978_v31  ;;  %v12622_v55 = vpop.f32.mrf.mxu1 }
 0x357   : > { %v2727_v54 = vsel %vm1163_vm1, %v2724_v27, %v2726_v59 }
 0x359   : > { %v4038_v32 = vpop.f32.mrf.mxu3  ;;  %v2510_v19 = vpop.f32.mrf.mxu0 }
 0x35a   : > { %v12612_v56 = vadd.f32 %v4038_v32, %v3457_v29  ;;  %v2630_v5 = vadd.f32 %v2510_v19, %v1927_v1  ;;  %v12627_v31 = vpop.f32.mrf.mxu2  ;;  %v14415_v29 = vld [vmem:[#allocation33_spill] sm:$0xff]  ;;  %2908 = vmatmul.bf16.gmra.mxu1 %v2727_v54  ;;  %v2301_v1 = vshll.u32 %v12581_v24, 16 }
 0x35b   : > { %v1928_v25 = vadd.f32 %v14415_v29, %v12332_v8 }
 0x35c   : > { %v2979_v51 = vadd.f32 %v12551_v40, %v2630_v5  ;;  %2549 = vmatmul.bf16.gmra.mxu0 %v2296_v26  ;;  %v3832_v26 = vshll.u32 %v10935_v3, 16  ;;  %v2303_v5 = vrot.slane %v2301_v1, 1  ;;  %v12649_v1 = vld [vmem:[%s11542_s22 + $0x94] sm:$0xff] }
 0x35e   : > { %4080 = vmatmul.bf16.gmra.mxu3 %v3827_v2  ;;  %v3458_v11 = vadd.f32 %v12556_v61, %v2979_v51  ;;  %v3828_v61 = vshrl.u32 %v10934_v46, 16  ;;  %v12636_v2 = vpop.f32.mrf.mxu1 }
 0x360   : > { %v3830_v51 = vor.u32 %v3828_v61, %v3826_v9  ;;  %v2728_v9 = vrot.slane %v12649_v1, 1  ;;  %v10936_v61 = vld [vmem:[%s11542_s22 + $0x98] sm:$0xff] }
 0x361   : > { %v4041_v41 = vpop.f32.mrf.mxu3  ;;  %v2512_v32 = vpop.f32.mrf.mxu0 }
 0x362   : > { %v12631_v40 = vadd.f32 %v4041_v41, %v3458_v11  ;;  %v2631_v19 = vadd.f32 %v2512_v32, %v1928_v25  ;;  %v3834_v11 = vrot.slane %v3832_v26, 1  ;;  %v12639_v54 = vpop.f32.mrf.mxu2  ;;  %v14416_v41 = vld [vmem:[#allocation34_spill] sm:$0xff]  ;;  %v2729_v26 = vsel %vm1163_vm1, %v2726_v59, %v2728_v9 }
 0x363   : > { %v1929_v29 = vadd.f32 %v14416_v41, %v12342_v48  ;;  %v2305_v41 = vshrl.u32 %v12581_v24, 16 }
 0x364   : > { %v2980_v27 = vadd.f32 %v12568_v57, %v2631_v19  ;;  %v2304_v57 = vsel %vm483_vm0, %v2299_v38, %v2303_v5  ;;  %v3835_v7 = vsel %vm483_vm0, %v3830_v51, %v3834_v11 }
 0x365   : > { %3392 = vmatmul.bf16.gmra.mxu2 %v10902_v17  ;;  %v2307_v17 = vor.u32 %v2305_v41, %v2303_v5  ;;  %v10903_v5 = vld [vmem:[%s11542_s22 + $0xa0] sm:$0xff] }
 0x366   : > { %v3459_v8 = vadd.f32 %v12571_v39, %v2980_v27  ;;  %v12653_v19 = vpop.f32.mrf.mxu1 }
 0x369   : > { %v4043_v20 = vpop.f32.mrf.mxu3  ;;  %v2515_v25 = vpop.f32.mrf.mxu0 }
 0x36a   : > { %v12643_v46 = vadd.f32 %v4043_v20, %v3459_v8  ;;  %v2632_v32 = vadd.f32 %v2515_v25, %v1929_v29  ;;  %v12658_v27 = vpop.f32.mrf.mxu2  ;;  %v14417_v8 = vld [vmem:[#allocation35_spill] sm:$0xff]  ;;  %2913 = vmatmul.bf16.gmra.mxu1 %v2729_v26  ;;  %v2309_v29 = vshll.u32 %v12618_v16, 16 }
 0x36b   : > { %v1930_v51 = vadd.f32 %v14417_v8, %v12358_v23 }
 0x36c   : > { %v2981_v39 = vadd.f32 %v12585_v21, %v2632_v32  ;;  %2554 = vmatmul.bf16.gmra.mxu0 %v2304_v57  ;;  %v3840_v57 = vshll.u32 %v10936_v61, 16  ;;  %v2311_v32 = vrot.slane %v2309_v29, 1 }
 0x36e   : > { %4085 = vmatmul.bf16.gmra.mxu3 %v3835_v7  ;;  %v3460_v48 = vadd.f32 %v12593_v13, %v2981_v39  ;;  %v3836_v13 = vshrl.u32 %v10935_v3, 16  ;;  %v12667_v7 = vpop.f32.mrf.mxu1 }
 0x370   : > { %v3838_v39 = vor.u32 %v3836_v13, %v3834_v11  ;;  %v12683_v11 = vld [vmem:[%s11542_s22 + $0x9c] sm:$0xff] }
 0x371   : > { %v4046_v38 = vpop.f32.mrf.mxu3  ;;  %v2517_v20 = vpop.f32.mrf.mxu0 }
 0x372   : > { %v12662_v21 = vadd.f32 %v4046_v38, %v3460_v48  ;;  %v2633_v25 = vadd.f32 %v2517_v20, %v1930_v51  ;;  %v3842_v48 = vrot.slane %v3840_v57, 1  ;;  %v12670_v26 = vpop.f32.mrf.mxu2  ;;  %v14418_v38 = vld [vmem:[#allocation36_spill] sm:$0xff]  ;;  %v10937_v57 = vld [vmem:[%s11542_s22 + $0xa0] sm:$0xff] }
 0x373   : > { %v1931_v8 = vadd.f32 %v14418_v38, %v12368_v43  ;;  %v2730_v43 = vrot.slane %v12683_v11, 1 }
 0x374   : > { %v2982_v59 = vadd.f32 %v12605_v10, %v2633_v25  ;;  %v2312_v10 = vsel %vm483_vm0, %v2307_v17, %v2311_v32  ;;  %v3843_v41 = vsel %vm483_vm0, %v3838_v39, %v3842_v48  ;;  %v14419_v39 = vld [vmem:[#allocation38_spill] sm:$0xff] }
 0x375   : > { %3397 = vmatmul.bf16.gmra.mxu2 %v10903_v5  ;;  %v3844_v5 = vshrl.u32 %v10936_v61, 16 }
 0x376   : > { %v3461_v23 = vadd.f32 %v12608_v22, %v2982_v59  ;;  %v10957_v22 = vld [vmem:[%s14307_s1 + $0x210] sm:$0xff]  ;;  %v12687_v25 = vpop.f32.mrf.mxu1  ;;  %v2731_v59 = vsel %vm1163_vm1, %v2728_v9, %v2730_v43  ;;  %v10991_v9 = vld [vmem:[%s14309_s3 + $0x28] sm:$0xff] }
 0x377   : > { %4361 = vmatpush.bf16.msrb.mxu0 %v10957_v22  ;;  %5752 = vmatpush.bf16.msra.mxu2 %v10991_v9  ;;  %v10938_v9 = vld [vmem:[%s11542_s22 + $0xa8] sm:$0xff] }
 0x379   : > { %v4048_v24 = vpop.f32.mrf.mxu3  ;;  %v2520_v3 = vpop.f32.mrf.mxu0 }
 0x37a   : > { %v12674_v51 = vadd.f32 %v4048_v24, %v3461_v23  ;;  %v2634_v20 = vadd.f32 %v2520_v3, %v1931_v8  ;;  %v12692_v17 = vpop.f32.mrf.mxu2  ;;  %v1932_v24 = vadd.f32 %v14419_v39, %v12384_v6  ;;  %2918 = vmatmul.bf16.gmra.mxu1 %v2731_v59  ;;  %v2313_v8 = vshrl.u32 %v12618_v16, 16 }
 0x37b   : > { %v2317_v3 = vshll.u32 %v12649_v1, 16 }
 0x37c   : > { %v2983_v29 = vadd.f32 %v12622_v55, %v2634_v20  ;;  %2559 = vmatmul.bf16.gmra.mxu0 %v2312_v10  ;;  %v2315_v6 = vor.u32 %v2313_v8, %v2311_v32  ;;  %v10904_v8 = vld [vmem:[%s11542_s22 + $0xa8] sm:$0xff] }
 0x37e   : > { %4090 = vmatmul.bf16.gmra.mxu3 %v3843_v41  ;;  %v3462_v13 = vadd.f32 %v12627_v31, %v2983_v29  ;;  %v3848_v31 = vshll.u32 %v10937_v57, 16  ;;  %v2319_v41 = vrot.slane %v2317_v3, 1  ;;  %v12704_v22 = vpop.f32.mrf.mxu1  ;;  %v3846_v29 = vor.u32 %v3844_v5, %v3842_v48  ;;  %v12720_v3 = vld [vmem:[%s11542_s22 + $0xa4] sm:$0xff] }
 0x380   : > { %v2320_v32 = vsel %vm483_vm0, %v2315_v6, %v2319_v41 }
 0x381   : > { %v4051_v23 = vpop.f32.mrf.mxu3  ;;  %v2522_v38 = vpop.f32.mrf.mxu0 }
 0x382   : > { %v12696_v55 = vadd.f32 %v4051_v23, %v3462_v13  ;;  %v2635_v10 = vadd.f32 %v2522_v38, %v1932_v24  ;;  %v3850_v13 = vrot.slane %v3848_v31, 1  ;;  %v12707_v59 = vpop.f32.mrf.mxu2  ;;  %v14420_v23 = vld [vmem:[#allocation39_spill] sm:$0xff] }
 0x383   : > { %v1933_v39 = vadd.f32 %v14420_v23, %v12397_v0  ;;  %v10999_v38 = vld [vmem:[%s14309_s3 + $0x68] sm:$0xff]  ;;  %v2732_v0 = vrot.slane %v12720_v3, 1 }
 0x384   : > { %v2984_v20 = vadd.f32 %v12636_v2, %v2635_v10  ;;  %v3851_v48 = vsel %vm483_vm0, %v3846_v29, %v3850_v13  ;;  %5567 = vmatpush.bf16.msra.mxu1 %v10999_v38  ;;  %v14421_v29 = vld [vmem:[#allocation41_spill] sm:$0xff]  ;;  %v3856_v38 = vshll.u32 %v10938_v9, 16 }
 0x385   : > { %3402 = vmatmul.bf16.gmra.mxu2 %v10904_v8 }
 0x386   : > { %v3463_v16 = vadd.f32 %v12639_v54, %v2984_v20  ;;  %v12724_v5 = vpop.f32.mrf.mxu1  ;;  %v2733_v20 = vsel %vm1163_vm1, %v2730_v43, %v2732_v0 }
 0x389   : > { %v4053_v61 = vpop.f32.mrf.mxu3  ;;  %v2525_v2 = vpop.f32.mrf.mxu0 }
 0x38a   : > { %v12711_v24 = vadd.f32 %v4053_v61, %v3463_v16  ;;  %v2636_v54 = vadd.f32 %v2525_v2, %v1933_v39  ;;  %v12729_v6 = vpop.f32.mrf.mxu2  ;;  %v1934_v61 = vadd.f32 %v14421_v29, %v12413_v63  ;;  %2923 = vmatmul.bf16.gmra.mxu1 %v2733_v20  ;;  %v2321_v39 = vshrl.u32 %v12649_v1, 16 }
 0x38b   : > { %v2325_v2 = vshll.u32 %v12683_v11, 16 }
 0x38c   : > { %v2985_v10 = vadd.f32 %v12653_v19, %v2636_v54  ;;  %2564 = vmatmul.bf16.gmra.mxu0 %v2320_v32  ;;  %v2323_v8 = vor.u32 %v2321_v39, %v2319_v41  ;;  %v10905_v41 = vld [vmem:[%s11542_s22 + $0xb0] sm:$0xff] }
 0x38d   : > { %v2327_v54 = vrot.slane %v2325_v2, 1  ;;  %v12751_v2 = vld [vmem:[%s11542_s22 + $0xac] sm:$0xff] }
 0x38e   : > { %4095 = vmatmul.bf16.gmra.mxu3 %v3851_v48  ;;  %v3464_v31 = vadd.f32 %v12658_v27, %v2985_v10  ;;  %v3852_v27 = vshrl.u32 %v10937_v57, 16  ;;  %v12738_v48 = vpop.f32.mrf.mxu1 }
 0x390   : > { %v3854_v10 = vor.u32 %v3852_v27, %v3850_v13  ;;  %v2734_v13 = vrot.slane %v12751_v2, 1  ;;  %v10939_v27 = vld [vmem:[%s11542_s22 + $0xb0] sm:$0xff] }
 0x391   : > { %v4056_v16 = vpop.f32.mrf.mxu3  ;;  %v2527_v23 = vpop.f32.mrf.mxu0 }
 0x392   : > { %v12733_v19 = vadd.f32 %v4056_v16, %v3464_v31  ;;  %v2637_v32 = vadd.f32 %v2527_v23, %v1934_v61  ;;  %v3858_v31 = vrot.slane %v3856_v38, 1  ;;  %v12741_v20 = vpop.f32.mrf.mxu2  ;;  %v14422_v16 = vld [vmem:[#allocation42_spill] sm:$0xff]  ;;  %v2735_v38 = vsel %vm1163_vm1, %v2732_v0, %v2734_v13 }
 0x393   : > { %v1935_v29 = vadd.f32 %v14422_v16, %v12423_v15  ;;  %v2329_v16 = vshrl.u32 %v12683_v11, 16 }
 0x394   : > { %v2986_v43 = vadd.f32 %v12667_v7, %v2637_v32  ;;  %v2328_v7 = vsel %vm483_vm0, %v2323_v8, %v2327_v54  ;;  %v3859_v39 = vsel %vm483_vm0, %v3854_v10, %v3858_v31 }
 0x395   : > { %3407 = vmatmul.bf16.gmra.mxu2 %v10905_v41  ;;  %v2331_v41 = vor.u32 %v2329_v16, %v2327_v54  ;;  %v10906_v54 = vld [vmem:[%s11542_s22 + $0xb8] sm:$0xff] }
 0x396   : > { %v3465_v63 = vadd.f32 %v12670_v26, %v2986_v43  ;;  %v12755_v32 = vpop.f32.mrf.mxu1 }
 0x399   : > { %v4058_v1 = vpop.f32.mrf.mxu3  ;;  %v2530_v61 = vpop.f32.mrf.mxu0 }
 0x39a   : > { %v12745_v57 = vadd.f32 %v4058_v1, %v3465_v63  ;;  %v2638_v23 = vadd.f32 %v2530_v61, %v1935_v29  ;;  %v12760_v43 = vpop.f32.mrf.mxu2  ;;  %v14423_v63 = vld [vmem:[#allocation44_spill] sm:$0xff]  ;;  %2928 = vmatmul.bf16.gmra.mxu1 %v2735_v38  ;;  %v2333_v29 = vshll.u32 %v12720_v3, 16 }
 0x39b   : > { %v1936_v10 = vadd.f32 %v14423_v63, %v12439_v14 }
 0x39c   : > { %v2987_v26 = vadd.f32 %v12687_v25, %v2638_v23  ;;  %2569 = vmatmul.bf16.gmra.mxu0 %v2328_v7  ;;  %v3864_v7 = vshll.u32 %v10939_v27, 16  ;;  %v2335_v23 = vrot.slane %v2333_v29, 1  ;;  %v12782_v29 = vld [vmem:[%s11542_s22 + $0xb4] sm:$0xff] }
 0x39e   : > { %4100 = vmatmul.bf16.gmra.mxu3 %v3859_v39  ;;  %v3466_v15 = vadd.f32 %v12692_v17, %v2987_v26  ;;  %v3860_v17 = vshrl.u32 %v10938_v9, 16  ;;  %v12769_v39 = vpop.f32.mrf.mxu1 }
 0x3a0   : > { %v3862_v26 = vor.u32 %v3860_v17, %v3858_v31  ;;  %v2736_v31 = vrot.slane %v12782_v29, 1  ;;  %v10940_v17 = vld [vmem:[%s11542_s22 + $0xb8] sm:$0xff] }
 0x3a1   : > { %v4061_v8 = vpop.f32.mrf.mxu3  ;;  %v2532_v1 = vpop.f32.mrf.mxu0 }
 0x3a2   : > { %v12764_v25 = vadd.f32 %v4061_v8, %v3466_v15  ;;  %v2639_v61 = vadd.f32 %v2532_v1, %v1936_v10  ;;  %v3866_v15 = vrot.slane %v3864_v7, 1  ;;  %v12772_v38 = vpop.f32.mrf.mxu2  ;;  %v14424_v8 = vld [vmem:[#allocation45_spill] sm:$0xff]  ;;  %v2737_v7 = vsel %vm1163_vm1, %v2734_v13, %v2736_v31 }
 0x3a3   : > { %v1937_v63 = vadd.f32 %v14424_v8, %v12444_v49  ;;  %v2337_v8 = vshrl.u32 %v12720_v3, 16  ;;  %v3868_v13 = vshrl.u32 %v10939_v27, 16 }
 0x3a4   : > { %v2988_v0 = vadd.f32 %v12704_v22, %v2639_v61  ;;  %v2336_v22 = vsel %vm483_vm0, %v2331_v41, %v2335_v23  ;;  %v3867_v16 = vsel %vm483_vm0, %v3862_v26, %v3866_v15 }
 0x3a5   : > { %3412 = vmatmul.bf16.gmra.mxu2 %v10906_v54 }
 0x3a6   : > { %v3467_v14 = vadd.f32 %v12707_v59, %v2988_v0  ;;  %v12786_v61 = vpop.f32.mrf.mxu1 }
 0x3a9   : > { %v4063_v11 = vpop.f32.mrf.mxu3  ;;  %v2535_v10 = vpop.f32.mrf.mxu0 }
 0x3aa   : > { %v12776_v9 = vadd.f32 %v4063_v11, %v3467_v14  ;;  %v2640_v1 = vadd.f32 %v2535_v10, %v1937_v63  ;;  %v12791_v0 = vpop.f32.mrf.mxu2  ;;  %v14425_v14 = vld [vmem:[#allocation47_spill] sm:$0xff]  ;;  %2933 = vmatmul.bf16.gmra.mxu1 %v2737_v7  ;;  %v2341_v63 = vshll.u32 %v12751_v2, 16 }
 0x3ab   : > { %v1938_v26 = vadd.f32 %v14425_v14, %v12457_v18  ;;  %v2339_v18 = vor.u32 %v2337_v8, %v2335_v23  ;;  %v10907_v23 = vld [vmem:[%s11542_s22 + $0xc0] sm:$0xff] }
 0x3ac   : > { %v2989_v59 = vadd.f32 %v12724_v5, %v2640_v1  ;;  %2574 = vmatmul.bf16.gmra.mxu0 %v2336_v22  ;;  %v3872_v22 = vshll.u32 %v10940_v17, 16  ;;  %v2343_v1 = vrot.slane %v2341_v63, 1 }
 0x3ae   : > { %4105 = vmatmul.bf16.gmra.mxu3 %v3867_v16  ;;  %v3468_v49 = vadd.f32 %v12729_v6, %v2989_v59  ;;  %v10956_v6 = vld [vmem:[%s14307_s1 + $0x208] sm:$0xff]  ;;  %v12803_v16 = vpop.f32.mrf.mxu1  ;;  %v3870_v59 = vor.u32 %v3868_v13, %v3866_v15  ;;  %v12818_v15 = vld [vmem:[%s11542_s22 + $0xbc] sm:$0xff] }
 0x3af   : > { %4362 = vmatpush.bf16.msrb.mxu0 %v10956_v6  ;;  %v2738_v6 = vrot.slane %v12818_v15, 1 }
 0x3b1   : > { %v4066_v41 = vpop.f32.mrf.mxu3  ;;  %v2537_v11 = vpop.f32.mrf.mxu0 }
 0x3b2   : > { %v12795_v5 = vadd.f32 %v4066_v41, %v3468_v49  ;;  %v2641_v10 = vadd.f32 %v2537_v11, %v1938_v26  ;;  %v3874_v49 = vrot.slane %v3872_v22, 1  ;;  %v12806_v7 = vpop.f32.mrf.mxu2  ;;  %v2344_v26 = vsel %vm483_vm0, %v2339_v18, %v2343_v1  ;;  %v14426_v11 = vld [vmem:[#allocation48_spill] sm:$0xff]  ;;  %v10941_v22 = vld [vmem:[%s11542_s22 + $0xc0] sm:$0xff] }
 0x3b3   : > { %v2739_v18 = vsel %vm1163_vm1, %v2736_v31, %v2738_v6 }
 0x3b4   : > { %v2990_v54 = vadd.f32 %v12738_v48, %v2641_v10  ;;  %v10990_v48 = vld [vmem:[%s14309_s3 + $0x20] sm:$0xff] }
 0x3b5   : > { %5753 = vmatpush.bf16.msra.mxu2 %v10990_v48 }
 0x3b6   : > { %v3469_v3 = vadd.f32 %v12741_v20, %v2990_v54  ;;  %v3875_v20 = vsel %vm483_vm0, %v3870_v59, %v3874_v49  ;;  %3417 = vmatmul.bf16.gmra.mxu2 %v10907_v23  ;;  %v12822_v10 = vpop.f32.mrf.mxu1  ;;  %v10998_v54 = vld [vmem:[%s14309_s3 + $0x60] sm:$0xff]  ;;  %v3876_v23 = vshrl.u32 %v10940_v17, 16 }
 0x3b7   : > { %5568 = vmatpush.bf16.msra.mxu1 %v10998_v54 }
 0x3b8   : > { %v3878_v54 = vor.u32 %v3876_v23, %v3874_v49  ;;  %v10942_v23 = vld [vmem:[%s11542_s22 + $0xc8] sm:$0xff] }
 0x3b9   : > { %v4068_v41 = vpop.f32.mrf.mxu3  ;;  %v2540_v27 = vpop.f32.mrf.mxu0 }
 0x3ba   : > { %v12808_v14 = vadd.f32 %v4068_v41, %v3469_v3  ;;  %v2642_v8 = vadd.f32 %v2540_v27, %v14426_v11  ;;  %v12830_v3 = vpop.f32.mrf.mxu2  ;;  %v2345_v27 = vshrl.u32 %v12751_v2, 16  ;;  %2938 = vmatmul.bf16.gmra.mxu1 %v2739_v18  ;;  %v3880_v11 = vshll.u32 %v10941_v22, 16 }
 0x3bc   : > { %v2991_v63 = vadd.f32 %v12755_v32, %v2642_v8  ;;  %2579 = vmatmul.bf16.gmra.mxu0 %v2344_v26  ;;  %v2349_v26 = vshll.u32 %v12782_v29, 16  ;;  %v2347_v8 = vor.u32 %v2345_v27, %v2343_v1  ;;  %v12850_v27 = vld [vmem:[%s11542_s22 + $0xc4] sm:$0xff] }
 0x3bd   : > { %v2740_v49 = vrot.slane %v12850_v27, 1 }
 0x3be   : > { %4110 = vmatmul.bf16.gmra.mxu3 %v3875_v20  ;;  %v3470_v13 = vadd.f32 %v12760_v43, %v2991_v63  ;;  %v14428_v43 = vld [vmem:[#allocation50_spill] sm:$0xff]  ;;  %v2351_v20 = vrot.slane %v2349_v26, 1  ;;  %v12838_v63 = vpop.f32.mrf.mxu1 }
 0x3c0   : > { %v2352_v17 = vsel %vm483_vm0, %v2347_v8, %v2351_v20 }
 0x3c1   : > { %v4071_v59 = vpop.f32.mrf.mxu3  ;;  %v2542_v41 = vpop.f32.mrf.mxu0 }
 0x3c2   : > { %v12832_v32 = vadd.f32 %v4071_v59, %v3470_v13  ;;  %v2643_v48 = vadd.f32 %v2542_v41, %v14428_v43  ;;  %v3882_v59 = vrot.slane %v3880_v11, 1  ;;  %v12841_v2 = vpop.f32.mrf.mxu2  ;;  %v10908_v43 = vld [vmem:[%s11542_s22 + $0xc8] sm:$0xff]  ;;  %v2741_v11 = vsel %vm1163_vm1, %v2738_v6, %v2740_v49 }
 0x3c4   : > { %14427 = vst [vmem:[#allocation43_spill] sm:$0xff] %v12832_v32  ;;  %v2992_v31 = vadd.f32 %v12769_v39, %v2643_v48  ;;  %v3883_v1 = vsel %vm483_vm0, %v3878_v54, %v3882_v59  ;;  %v2357_v54 = vshll.u32 %v12818_v15, 16 }
 0x3c6   : > { %v3471_v13 = vadd.f32 %v12772_v38, %v2992_v31  ;;  %3422 = vmatmul.bf16.gmra.mxu2 %v10908_v43  ;;  %v2359_v43 = vrot.slane %v2357_v54, 1 }
 0x3c7   : > { %v12854_v26 = vpop.f32.mrf.mxu1 }
 0x3c9   : > { %v4073_v18 = vpop.f32.mrf.mxu3  ;;  %v2545_v41 = vpop.f32.mrf.mxu0 }
 0x3ca   : > { %v12843_v32 = vadd.f32 %v4073_v18, %v3471_v13  ;;  %v2644_v39 = vadd.f32 %v2545_v41, %v12067_v42  ;;  %v12859_v31 = vpop.f32.mrf.mxu2  ;;  %2943 = vmatmul.bf16.gmra.mxu1 %v2741_v11  ;;  %v3884_v41 = vshrl.u32 %v10941_v22, 16 }
 0x3cc   : > { %v2993_v38 = vadd.f32 %v12786_v61, %v2644_v39  ;;  %2584 = vmatmul.bf16.gmra.mxu0 %v2352_v17  ;;  %v2353_v61 = vshrl.u32 %v12782_v29, 16  ;;  %v3888_v17 = vshll.u32 %v10942_v23, 16 }
 0x3ce   : > { %4115 = vmatmul.bf16.gmra.mxu3 %v3883_v1  ;;  %v3472_v48 = vadd.f32 %v12791_v0, %v2993_v38  ;;  %v2355_v6 = vor.u32 %v2353_v61, %v2351_v20  ;;  %v3886_v38 = vor.u32 %v3884_v41, %v3882_v59  ;;  %v12879_v61 = vld [vmem:[%s11542_s22 + $0xcc] sm:$0xff] }
 0x3cf   : > { %v12867_v39 = vpop.f32.mrf.mxu1  ;;  %v2742_v59 = vrot.slane %v12879_v61, 1  ;;  %v10943_v41 = vld [vmem:[%s11542_s22 + $0xd0] sm:$0xff] }
 0x3d0   : > { %v2360_v22 = vsel %vm483_vm0, %v2355_v6, %v2359_v43 }
 0x3d1   : > { %v4076_v42 = vpop.f32.mrf.mxu3  ;;  %v2547_v13 = vpop.f32.mrf.mxu0 }
 0x3d2   : > { %v12861_v8 = vadd.f32 %v4076_v42, %v3472_v48  ;;  %v2645_v18 = vadd.f32 %v2547_v13, %v12073_v28  ;;  %v3890_v48 = vrot.slane %v3888_v17, 1  ;;  %v12870_v29 = vpop.f32.mrf.mxu2  ;;  %v10909_v13 = vld [vmem:[%s11542_s22 + $0xd0] sm:$0xff]  ;;  %v2743_v17 = vsel %vm1163_vm1, %v2740_v49, %v2742_v59 }
 0x3d4   : > { %v2994_v0 = vadd.f32 %v12803_v16, %v2645_v18  ;;  %v3891_v20 = vsel %vm483_vm0, %v3886_v38, %v3890_v48  ;;  %v2365_v38 = vshll.u32 %v12850_v27, 16 }
 0x3d6   : > { %v3473_v1 = vadd.f32 %v12806_v7, %v2994_v0  ;;  %3427 = vmatmul.bf16.gmra.mxu2 %v10909_v13  ;;  %v2367_v49 = vrot.slane %v2365_v38, 1 }
 0x3d7   : > { %v12883_v54 = vpop.f32.mrf.mxu1 }
 0x3d9   : > { %v4078_v11 = vpop.f32.mrf.mxu3  ;;  %v2550_v28 = vpop.f32.mrf.mxu0 }
 0x3da   : > { %v12872_v42 = vadd.f32 %v4078_v11, %v3473_v1  ;;  %v2646_v16 = vadd.f32 %v2550_v28, %v12084_v12  ;;  %v12888_v0 = vpop.f32.mrf.mxu2  ;;  %2948 = vmatmul.bf16.gmra.mxu1 %v2743_v17  ;;  %v3892_v28 = vshrl.u32 %v10942_v23, 16 }
 0x3dc   : > { %v2995_v7 = vadd.f32 %v12822_v10, %v2646_v16  ;;  %2589 = vmatmul.bf16.gmra.mxu0 %v2360_v22  ;;  %v2361_v10 = vshrl.u32 %v12818_v15, 16  ;;  %v3896_v22 = vshll.u32 %v10943_v41, 16  ;;  %v10955_v15 = vld [vmem:[%s14307_s1 + $0x200] sm:$0xff] }
 0x3dd   : > { %4363 = vmatpush.bf16.msrb.mxu0 %v10955_v15  ;;  %v2369_v15 = vshrl.u32 %v12850_v27, 16 }
 0x3de   : > { %4120 = vmatmul.bf16.gmra.mxu3 %v3891_v20  ;;  %v3474_v18 = vadd.f32 %v12830_v3, %v2995_v7  ;;  %v2363_v13 = vor.u32 %v2361_v10, %v2359_v43  ;;  %v3894_v7 = vor.u32 %v3892_v28, %v3890_v48  ;;  %v12911_v48 = vld [vmem:[%s11542_s22 + $0xd4] sm:$0xff] }
 0x3df   : > { %v12896_v16 = vpop.f32.mrf.mxu1  ;;  %v2744_v38 = vrot.slane %v12911_v48, 1 }
 0x3e0   : > { %v2368_v43 = vsel %vm483_vm0, %v2363_v13, %v2367_v49 }
 0x3e1   : > { %v4081_v12 = vpop.f32.mrf.mxu3  ;;  %v2552_v1 = vpop.f32.mrf.mxu0 }
 0x3e2   : > { %v12890_v6 = vadd.f32 %v4081_v12, %v3474_v18  ;;  %v2647_v11 = vadd.f32 %v2552_v1, %v12093_v34  ;;  %v3898_v18 = vrot.slane %v3896_v22, 1  ;;  %v12902_v17 = vpop.f32.mrf.mxu2  ;;  %v10910_v12 = vld [vmem:[%s11542_s22 + $0xd8] sm:$0xff] }
 0x3e3   : > { %v10944_v22 = vld [vmem:[%s11542_s22 + $0xd8] sm:$0xff] }
 0x3e4   : > { %v2996_v3 = vadd.f32 %v12838_v63, %v2647_v11 }
 0x3e6   : > { %v3475_v20 = vadd.f32 %v12841_v2, %v2996_v3  ;;  %v3899_v2 = vsel %vm483_vm0, %v3894_v7, %v3898_v18  ;;  %3432 = vmatmul.bf16.gmra.mxu2 %v10910_v12  ;;  %v2745_v3 = vsel %vm1163_vm1, %v2742_v59, %v2744_v38  ;;  %v3900_v59 = vshrl.u32 %v10943_v41, 16 }
 0x3e7   : > { %v2914_v11 = vpop.f32.mrf.mxu1  ;;  %v2371_v12 = vor.u32 %v2369_v15, %v2367_v49  ;;  %v12942_v49 = vld [vmem:[%s11542_s22 + $0xdc] sm:$0xff] }
 0x3e9   : > { %v4083_v34 = vpop.f32.mrf.mxu3  ;;  %v2555_v63 = vpop.f32.mrf.mxu0 }
 0x3ea   : > { %v12904_v23 = vadd.f32 %v4083_v34, %v3475_v20  ;;  %v2648_v1 = vadd.f32 %v2555_v63, %v12104_v47  ;;  %v10989_v47 = vld [vmem:[%s14309_s3 + $0x18] sm:$0xff]  ;;  %v3393_v13 = vpop.f32.mrf.mxu2  ;;  %v2373_v34 = vshll.u32 %v12879_v61, 16  ;;  %2953 = vmatmul.bf16.gmra.mxu1 %v2745_v3  ;;  %v3904_v63 = vshll.u32 %v10944_v22, 16 }
 0x3eb   : > { %5754 = vmatpush.bf16.msra.mxu2 %v10989_v47  ;;  %v10911_v47 = vld [vmem:[%s11542_s22 + $0xe0] sm:$0xff] }
 0x3ec   : > { %v2997_v10 = vadd.f32 %v12854_v26, %v2648_v1  ;;  %2594 = vmatmul.bf16.gmra.mxu0 %v2368_v43  ;;  %v10997_v43 = vld [vmem:[%s14309_s3 + $0x58] sm:$0xff]  ;;  %v2375_v1 = vrot.slane %v2373_v34, 1  ;;  %v3906_v27 = vrot.slane %v3904_v63, 1  ;;  %v10945_v63 = vld [vmem:[%s11542_s22 + $0xe0] sm:$0xff] }
 0x3ed   : > { %5569 = vmatpush.bf16.msra.mxu1 %v10997_v43 }
 0x3ee   : > { %4125 = vmatmul.bf16.gmra.mxu3 %v3899_v2  ;;  %v3476_v28 = vadd.f32 %v12859_v31, %v2997_v10  ;;  %v3902_v10 = vor.u32 %v3900_v59, %v3898_v18  ;;  %v2376_v41 = vsel %vm483_vm0, %v2371_v12, %v2375_v1  ;;  %v14314_v18 = vrot.slane %v12942_v49, 1 }
 0x3ef   : > { %v12931_v2 = vpop.f32.mrf.mxu1 }
 0x3f0   : > { %14429 = vst [vmem:[#allocation11_spill] sm:$0xff] %v12931_v2  ;;  %v2747_v43 = vsel %vm1163_vm1, %v2744_v38, %v14314_v18 }
 0x3f1   : > { %v4086_v20 = vpop.f32.mrf.mxu3  ;;  %v2557_v26 = vpop.f32.mrf.mxu0 }
 0x3f2   : > { %v12921_v7 = vadd.f32 %v4086_v20, %v3476_v28  ;;  %v12926_v31 = vadd.f32 %v2557_v26, %v12113_v4  ;;  %v12933_v28 = vpop.f32.mrf.mxu2  ;;  %v3907_v26 = vsel %vm483_vm0, %v3902_v10, %v3906_v27 }
 0x3f3   : > { %14430 = vst [vmem:[#allocation12_spill] sm:$0xff] %v12933_v28 }
 0x3f6   : > { %3437 = vmatmul.bf16.gmra.mxu2 %v10911_v47 }
 0x3f7   : > { %v2919_v34 = vpop.f32.mrf.mxu1 }
 0x3f9   : > { %v12935_v3 = vpop.f32.mrf.mxu3  ;;  %v2560_v4 = vpop.f32.mrf.mxu0 }
 0x3fa   : > { %v2650_v20 = vadd.f32 %v2560_v4, %v12124_v62  ;;  %v3398_v62 = vpop.f32.mrf.mxu2  ;;  %2958 = vmatmul.bf16.gmra.mxu1 %v2747_v43 }
 0x3fc   : > { %v2999_v15 = vadd.f32 %v12883_v54, %v2650_v20  ;;  %2599 = vmatmul.bf16.gmra.mxu0 %v2376_v41  ;;  %v2377_v54 = vshrl.u32 %v12879_v61, 16  ;;  %v2381_v41 = vshll.u32 %v12911_v48, 16  ;;  %v3908_v20 = vshrl.u32 %v10944_v22, 16 }
 0x3fe   : > { %4130 = vmatmul.bf16.gmra.mxu3 %v3907_v26  ;;  %v3478_v59 = vadd.f32 %v12888_v0, %v2999_v15  ;;  %v3912_v0 = vshll.u32 %v10945_v63, 16  ;;  %v2379_v26 = vor.u32 %v2377_v54, %v2375_v1  ;;  %v2383_v15 = vrot.slane %v2381_v41, 1  ;;  %v12968_v54 = vld [vmem:[%s11542_s22 + $0xe8] sm:$0xff] }
 0x3ff   : > { %v12958_v28 = vpop.f32.mrf.mxu1  ;;  %v3910_v38 = vor.u32 %v3908_v20, %v3906_v27 }
 0x400   : > { %14431 = vst [vmem:[#allocation13_spill] sm:$0xff] %v12958_v28  ;;  %v3914_v18 = vrot.slane %v3912_v0, 1  ;;  %v2384_v2 = vsel %vm483_vm0, %v2379_v26, %v2383_v15  ;;  %v2389_v26 = vshll.u32 %v12942_v49, 16 }
 0x401   : > { %v4091_v12 = vpop.f32.mrf.mxu3  ;;  %v2562_v4 = vpop.f32.mrf.mxu0 }
 0x402   : > { %v12951_v10 = vadd.f32 %v4091_v12, %v3478_v59  ;;  %v12956_v47 = vadd.f32 %v2562_v4, %v12148_v52  ;;  %v12960_v59 = vpop.f32.mrf.mxu2  ;;  %v3915_v52 = vsel %vm483_vm0, %v3910_v38, %v3914_v18 }
 0x403   : > { %14432 = vst [vmem:[#allocation14_spill] sm:$0xff] %v12960_v59  ;;  %v2385_v59 = vshrl.u32 %v12911_v48, 16 }
 0x405   : > { %v2387_v38 = vor.u32 %v2385_v59, %v2383_v15 }
 0x407   : > { %v2924_v1 = vpop.f32.mrf.mxu1 }
 0x409   : > { %v12962_v12 = vpop.f32.mrf.mxu3  ;;  %v2565_v61 = vpop.f32.mrf.mxu0 }
 0x40a   : > { %v2652_v43 = vadd.f32 %v2565_v61, %v12174_v60  ;;  %v3403_v27 = vpop.f32.mrf.mxu2 }
 0x40c   : > { %v3001_v22 = vadd.f32 %v2914_v11, %v2652_v43  ;;  %2604 = vmatmul.bf16.gmra.mxu0 %v2384_v2  ;;  %v3916_v11 = vshrl.u32 %v10945_v63, 16  ;;  %v3920_v2 = vshll.u32 %v12968_v54, 16 }
 0x40e   : > { %4135 = vmatmul.bf16.gmra.mxu3 %v3915_v52  ;;  %v3480_v4 = vadd.f32 %v3393_v13, %v3001_v22  ;;  %v2391_v13 = vrot.slane %v2389_v26, 1  ;;  %v3918_v43 = vor.u32 %v3916_v11, %v3914_v18  ;;  %v12980_v52 = vrot.slane %v3920_v2, 1  ;;  %v2025_v22 = vld [vmem:[%s11542_s22 + $0xe4] sm:$0x1] }
 0x40f   : > { %v12978_v61 = vpop.f32.mrf.mxu1 }
 0x410   : > { %14433 = vst [vmem:[#allocation46_spill] sm:$0xff] %v12978_v61  ;;  %v2392_v28 = vsel %vm483_vm0, %v2387_v38, %v2391_v13  ;;  %v3923_v15 = vsel %vm483_vm0, %v3918_v43, %v12980_v52  ;;  %v2393_v38 = vshrl.u32 %v12942_v49, 16 }
 0x411   : > { %v4096_v41 = vpop.f32.mrf.mxu3  ;;  %v2567_v0 = vpop.f32.mrf.mxu0 }
 0x412   : > { %v12970_v20 = vadd.f32 %v4096_v41, %v3480_v4  ;;  %v12975_v60 = vadd.f32 %v2567_v0, %v12203_v45  ;;  %v12983_v4 = vpop.f32.mrf.mxu2  ;;  %v2152_v45 = vunpack.c.l.b16 %v2025_v22 }
 0x413   : > { %14434 = vst [vmem:[#allocation15_spill] sm:$0xff] %v12983_v4 }
 0x414   : > { %v12991_v18 = vpack.c.b16 %v2152_v45, %v2152_v45 }
 0x416   : > { %v2397_v22 = vshll.u32 %v12991_v18, 16 }
 0x417   : > { %v2929_v0 = vpop.f32.mrf.mxu1 }
 0x419   : > { %v12985_v41 = vpop.f32.mrf.mxu3  ;;  %v2570_v48 = vpop.f32.mrf.mxu0 }
 0x41a   : > { %v2654_v63 = vadd.f32 %v2570_v48, %v12220_v37  ;;  %v3408_v11 = vpop.f32.mrf.mxu2 }
 0x41c   : > { %v3003_v59 = vadd.f32 %v2919_v34, %v2654_v63  ;;  %2609 = vmatmul.bf16.gmra.mxu0 %v2392_v28  ;;  %v10988_v28 = vld [vmem:[%s14309_s3 + $0x10] sm:$0xff]  ;;  %v2395_v34 = vor.u32 %v2393_v38, %v2391_v13  ;;  %v11308_v38 = vld [vmem:[%s11542_s22 + $0x18] sm:$0xe] }
 0x41d   : > { %5755 = vmatpush.bf16.msra.mxu2 %v10988_v28 }
 0x41e   : > { %4140 = vmatmul.bf16.gmra.mxu3 %v3923_v15  ;;  %v3482_v26 = vadd.f32 %v3398_v62, %v3003_v59  ;;  %v2399_v62 = vrot.slane %v2397_v22, 1 }
 0x41f   : > { %v13003_v43 = vpop.f32.mrf.mxu1 }
 0x420   : > { %14437 = vst [vmem:[#allocation18_spill] sm:$0xff] %v13003_v43  ;;  %v2400_v15 = vsel %vm483_vm0, %v2395_v34, %v2399_v62  ;;  %v14441_v62 = vld [vmem:[#allocation51_spill] sm:$0xff] }
 0x421   : > { %v4101_v2 = vpop.f32.mrf.mxu3  ;;  %v2572_v61 = vpop.f32.mrf.mxu0 }
 0x422   : > { %v12993_v4 = vadd.f32 %v4101_v2, %v3482_v26  ;;  %v12998_v37 = vadd.f32 %v2572_v61, %v12228_v58  ;;  %v13005_v48 = vpop.f32.mrf.mxu2  ;;  %v10996_v61 = vld [vmem:[%s14309_s3 + $0x50] sm:$0xff]  ;;  %v11307_v2 = vld [vmem:[%s11542_s22 + $0x18] sm:$0xf0] }
 0x423   : > { %14438 = vst [vmem:[#allocation49_spill] sm:$0xff] %v13005_v48  ;;  %5570 = vmatpush.bf16.msra.mxu1 %v10996_v61  ;;  %v11309_v34 = vor.u32 %v11308_v38, %v11307_v2 }
 0x424   : > { %14435 = vst [vmem:[#allocation16_spill] sm:$0xff] %v12993_v4 }
 0x425   : > { %14436 = vst [vmem:[#allocation17_spill] sm:$0xff] %v12998_v37 }
 0x427   : > { %v2934_v59 = vpop.f32.mrf.mxu1 }
 0x429   : > { %v13007_v45 = vpop.f32.mrf.mxu3  ;;  %v2575_v63 = vpop.f32.mrf.mxu0 }
 0x42a   : > { %14439 = vst [vmem:[#allocation19_spill] sm:$0xff] %v13007_v45  ;;  %v2656_v58 = vadd.f32 %v2575_v63, %v12247_v33  ;;  %v3413_v22 = vpop.f32.mrf.mxu2  ;;  %v4226_v63 = vrot.slane %v11309_v34, 1  ;;  %v11403_v45 = vld [vmem:[%s11542_s22 + $0x20] sm:$0xff] }
 0x42b   : > { %v4227_v4 = vrot.slane %v11403_v45, 1 }
 0x42c   : > { %v3005_v13 = vadd.f32 %v2924_v1, %v2656_v58  ;;  %2614 = vmatmul.bf16.gmra.mxu0 %v2400_v15 }
 0x42d   : > { %v4228_v61 = vsel %vm1163_vm1, %v4226_v63, %v4227_v4 }
 0x42e   : > { %v3484_v26 = vadd.f32 %v3403_v27, %v3005_v13  ;;  %v14446_v13 = vld [vmem:[#allocation52_spill] sm:$0xff] }
 0x42f   : > { %v13022_v1 = vpop.f32.mrf.mxu1 }
 0x430   : > { %14443 = vst [vmem:[#allocation22_spill] sm:$0xff] %v13022_v1 }
 0x431   : > { %v4106_v28 = vpop.f32.mrf.mxu3  ;;  %v2577_v43 = vpop.f32.mrf.mxu0 }
 0x432   : > { %v13016_v48 = vadd.f32 %v4106_v28, %v3484_v26  ;;  %v13019_v33 = vadd.f32 %v2577_v43, %v14441_v62  ;;  %v13024_v15 = vpop.f32.mrf.mxu2 }
 0x433   : > { %14444 = vst [vmem:[#allocation23_spill] sm:$0xff] %v13024_v15  ;;  %v11404_v15 = vld [vmem:[%s11542_s22 + $0x28] sm:$0xff] }
 0x434   : > { %14440 = vst [vmem:[#allocation20_spill] sm:$0xff] %v13016_v48  ;;  %v14448_v48 = vld [vmem:[#allocation53_spill] sm:$0xff] }
 0x435   : > { %14442 = vst [vmem:[#allocation21_spill] sm:$0xff] %v13019_v33  ;;  %v4229_v33 = vrot.slane %v11404_v15, 1 }
 0x437   : > { %v2939_v43 = vpop.f32.mrf.mxu1 }
 0x439   : > { %v13026_v27 = vpop.f32.mrf.mxu3  ;;  %v2580_v58 = vpop.f32.mrf.mxu0 }
 0x43a   : > { %14445 = vst [vmem:[#allocation24_spill] sm:$0xff] %v13026_v27  ;;  %v2658_v26 = vadd.f32 %v2580_v58, %v14446_v13  ;;  %v3418_v38 = vpop.f32.mrf.mxu2 }
 0x43c   : > { %v3007_v28 = vadd.f32 %v2929_v0, %v2658_v26  ;;  %4364 = vmatmul.bf16.vlgmr.msrb.gmra.mxu0 %v4228_v61  ;;  %v14453_v61 = vld [vmem:[#allocation54_spill] sm:$0xff] }
 0x43e   : > { %v3486_v2 = vadd.f32 %v3408_v11, %v3007_v28  ;;  %v4230_v11 = vsel %vm1163_vm1, %v4227_v4, %v4229_v33 }
 0x43f   : > { %v13036_v27 = vpop.f32.mrf.mxu1 }
 0x440   : > { %14450 = vst [vmem:[#allocation27_spill] sm:$0xff] %v13036_v27 }
 0x441   : > { %v4111_v34 = vpop.f32.mrf.mxu3  ;;  %v2582_v45 = vpop.f32.mrf.mxu0 }
 0x442   : > { %v13030_v62 = vadd.f32 %v4111_v34, %v3486_v2  ;;  %v13033_v1 = vadd.f32 %v2582_v45, %v14448_v48  ;;  %v13038_v63 = vpop.f32.mrf.mxu2 }
 0x443   : > { %14451 = vst [vmem:[#allocation28_spill] sm:$0xff] %v13038_v63  ;;  %v11405_v63 = vld [vmem:[%s11542_s22 + $0x30] sm:$0xff] }
 0x444   : > { %14447 = vst [vmem:[#allocation25_spill] sm:$0xff] %v13030_v62  ;;  %v14455_v62 = vld [vmem:[#allocation37_spill] sm:$0xff] }
 0x445   : > { %14449 = vst [vmem:[#allocation26_spill] sm:$0xff] %v13033_v1  ;;  %v4231_v1 = vrot.slane %v11405_v63, 1 }
 0x447   : > { %v2944_v2 = vpop.f32.mrf.mxu1 }
 0x449   : > { %v13040_v58 = vpop.f32.mrf.mxu3  ;;  %v2585_v0 = vpop.f32.mrf.mxu0 }
 0x44a   : > { %14452 = vst [vmem:[#allocation29_spill] sm:$0xff] %v13040_v58  ;;  %v2660_v13 = vadd.f32 %v2585_v0, %v14453_v61  ;;  %v3423_v48 = vpop.f32.mrf.mxu2  ;;  %v14460_v0 = vld [vmem:[#allocation3_spill] sm:$0xff] }
 0x44b   : > { %v10987_v61 = vld [vmem:[%s14309_s3 + $0x8] sm:$0xff] }
 0x44c   : > { %v3009_v26 = vadd.f32 %v2934_v59, %v2660_v13  ;;  %4369 = vmatmul.bf16.gmra.mxu0 %v4230_v11  ;;  %5756 = vmatpush.bf16.msra.mxu2 %v10987_v61 }
 0x44e   : > { %v3488_v28 = vadd.f32 %v3413_v22, %v3009_v26  ;;  %v4232_v22 = vsel %vm1163_vm1, %v4229_v33, %v4231_v1  ;;  %v10995_v33 = vld [vmem:[%s14309_s3 + $0x48] sm:$0xff] }
 0x44f   : > { %v13050_v58 = vpop.f32.mrf.mxu1  ;;  %5571 = vmatpush.bf16.msra.mxu1 %v10995_v33 }
 0x450   : > { %14457 = vst [vmem:[#allocation32_spill] sm:$0xff] %v13050_v58 }
 0x451   : > { %v4116_v34 = vpop.f32.mrf.mxu3  ;;  %v2587_v15 = vpop.f32.mrf.mxu0 }
 0x452   : > { %v13044_v45 = vadd.f32 %v4116_v34, %v3488_v28  ;;  %v13047_v27 = vadd.f32 %v2587_v15, %v14455_v62  ;;  %v13052_v37 = vpop.f32.mrf.mxu2 }
 0x453   : > { %14458 = vst [vmem:[#allocation33_spill] sm:$0xff] %v13052_v37  ;;  %v14462_v37 = vld [vmem:[#allocation4_spill] sm:$0xff] }
 0x454   : > { %14454 = vst [vmem:[#allocation30_spill] sm:$0xff] %v13044_v45 }
 0x455   : > { %14456 = vst [vmem:[#allocation31_spill] sm:$0xff] %v13047_v27 }
 0x457   : > { %v2949_v13 = vpop.f32.mrf.mxu1 }
 0x459   : > { %v13054_v4 = vpop.f32.mrf.mxu3  ;;  %v2590_v59 = vpop.f32.mrf.mxu0 }
 0x45a   : > { %14459 = vst [vmem:[#allocation34_spill] sm:$0xff] %v13054_v4  ;;  %v2662_v11 = vadd.f32 %v2590_v59, %v14460_v0  ;;  %v3428_v26 = vpop.f32.mrf.mxu2  ;;  %v11406_v0 = vld [vmem:[%s11542_s22 + $0x38] sm:$0xff] }
 0x45b   : > { %v4233_v58 = vrot.slane %v11406_v0, 1  ;;  %v14468_v4 = vld [vmem:[#allocation6_spill] sm:$0xff] }
 0x45c   : > { %v3011_v62 = vadd.f32 %v2939_v43, %v2662_v11  ;;  %4374 = vmatmul.bf16.gmra.mxu0 %v4232_v22 }
 0x45d   : > { %v4234_v61 = vsel %vm1163_vm1, %v4231_v1, %v4233_v58 }
 0x45e   : > { %v3490_v63 = vadd.f32 %v3418_v38, %v3011_v62  ;;  %v14467_v62 = vld [vmem:[#allocation5_spill] sm:$0xff] }
 0x45f   : > { %v13070_v43 = vpop.f32.mrf.mxu1 }
 0x460   : > { %14464 = vst [vmem:[#allocation38_spill] sm:$0xff] %v13070_v43 }
 0x461   : > { %v4121_v28 = vpop.f32.mrf.mxu3  ;;  %v2592_v15 = vpop.f32.mrf.mxu0 }
 0x462   : > { %v13061_v34 = vadd.f32 %v4121_v28, %v3490_v63  ;;  %v13067_v59 = vadd.f32 %v2592_v15, %v14462_v37  ;;  %v13072_v38 = vpop.f32.mrf.mxu2 }
 0x463   : > { %14465 = vst [vmem:[#allocation39_spill] sm:$0xff] %v13072_v38  ;;  %v11407_v38 = vld [vmem:[%s11542_s22 + $0x40] sm:$0xff] }
 0x464   : > { %14461 = vst [vmem:[#allocation35_spill] sm:$0xff] %v13061_v34  ;;  %v4235_v45 = vrot.slane %v11407_v38, 1 }
 0x465   : > { %14463 = vst [vmem:[#allocation36_spill] sm:$0xff] %v13067_v59 }
 0x467   : > { %v2954_v37 = vpop.f32.mrf.mxu1 }
 0x469   : > { %v13074_v22 = vpop.f32.mrf.mxu3  ;;  %v2595_v11 = vpop.f32.mrf.mxu0 }
 0x46a   : > { %14466 = vst [vmem:[#allocation41_spill] sm:$0xff] %v13074_v22  ;;  %v2664_v63 = vadd.f32 %v2595_v11, %v14467_v62  ;;  %v3433_v15 = vpop.f32.mrf.mxu2  ;;  %v14472_v11 = vld [vmem:[#allocation40_spill] sm:$0xff] }
 0x46c   : > { %v3013_v28 = vadd.f32 %v2944_v2, %v2664_v63  ;;  %4379 = vmatmul.bf16.gmra.mxu0 %v4234_v61 }
 0x46e   : > { %v3492_v34 = vadd.f32 %v3423_v48, %v3013_v28  ;;  %v4236_v48 = vsel %vm1163_vm1, %v4233_v58, %v4235_v45  ;;  %v11408_v58 = vld [vmem:[%s11542_s22 + $0x48] sm:$0xff] }
 0x46f   : > { %v13084_v22 = vpop.f32.mrf.mxu1 }
 0x470   : > { %14469 = vst [vmem:[#allocation42_spill] sm:$0xff] %v13084_v22 }
 0x471   : > { %v4126_v33 = vpop.f32.mrf.mxu3  ;;  %v2597_v0 = vpop.f32.mrf.mxu0 }
 0x472   : > { %v13078_v59 = vadd.f32 %v4126_v33, %v3492_v34  ;;  %v13081_v43 = vadd.f32 %v2597_v0, %v14468_v4  ;;  %v13086_v27 = vpop.f32.mrf.mxu2  ;;  %v11009_v0 = vld [vmem:[%s14309_s3 + $0xb8] sm:$0xff] }
 0x473   : > { %14470 = vst [vmem:[#allocation44_spill] sm:$0xff] %v13086_v27  ;;  %v14473_v27 = vld [vmem:[#allocation7_spill] sm:$0xff]  ;;  %6005 = vmatpush.bf16.msrb.mxu3 %v11009_v0 }
 0x477   : > { %v2959_v63 = vpop.f32.mrf.mxu1 }
 0x479   : > { %v13088_v1 = vpop.f32.mrf.mxu3  ;;  %v2600_v2 = vpop.f32.mrf.mxu0 }
 0x47a   : > { %14471 = vst [vmem:[#allocation45_spill] sm:$0xff] %v13088_v1  ;;  %v2666_v61 = vadd.f32 %v2600_v2, %v14472_v11  ;;  %v3438_v4 = vpop.f32.mrf.mxu2  ;;  %v4237_v1 = vrot.slane %v11408_v58, 1 }
 0x47c   : > { %v3015_v34 = vadd.f32 %v2949_v13, %v2666_v61  ;;  %4384 = vmatmul.bf16.gmra.mxu0 %v4236_v48  ;;  %v4238_v11 = vsel %vm1163_vm1, %v4235_v45, %v4237_v1  ;;  %v14475_v61 = vld [vmem:[#allocation8_spill] sm:$0xff]  ;;  %v14477_v45 = vld [vmem:[#allocation9_spill] sm:$0xff] }
 0x47e   : > { %v3494_v62 = vadd.f32 %v3428_v26, %v3015_v34 }
 0x47f   : > { %v2961_v2 = vpop.f32.mrf.mxu1 }
 0x480   : > { %v10994_v2 = vld [vmem:[%s14309_s3 + $0x40] sm:$0xff] }
 0x481   : > { %v4131_v28 = vpop.f32.mrf.mxu3  ;;  %v2602_v38 = vpop.f32.mrf.mxu0  ;;  %5572 = vmatpush.bf16.msra.mxu1 %v10994_v2  ;;  %v11410_v2 = vld [vmem:[%s11542_s22 + $0x58] sm:$0xff] }
 0x482   : > { %v13092_v33 = vadd.f32 %v4131_v28, %v3494_v62  ;;  %v13098_v22 = vadd.f32 %v2602_v38, %v14473_v27  ;;  %v3440_v13 = vpop.f32.mrf.mxu2  ;;  %v10986_v27 = vld [vmem:[%s14309_s3] sm:$0xff] }
 0x483   : > { %5757 = vmatpush.bf16.msra.mxu2 %v10986_v27 }
 0x489   : > { %v13101_v26 = vpop.f32.mrf.mxu3  ;;  %v2605_v48 = vpop.f32.mrf.mxu0 }
 0x48a   : > { %14474 = vst [vmem:[#allocation47_spill] sm:$0xff] %v13101_v26  ;;  %v2668_v34 = vadd.f32 %v2605_v48, %v14475_v61 }
 0x48c   : > { %v3017_v62 = vadd.f32 %v2954_v37, %v2668_v34  ;;  %4389 = vmatmul.bf16.gmra.mxu0 %v4238_v11  ;;  %v11409_v37 = vld [vmem:[%s11542_s22 + $0x50] sm:$0xff]  ;;  %v14480_v34 = vld [vmem:[#allocation10_spill] sm:$0xff] }
 0x48d   : > { %v4239_v48 = vrot.slane %v11409_v37, 1 }
 0x48e   : > { %v3496_v28 = vadd.f32 %v3433_v15, %v3017_v62 }
 0x48f   : > { %v4240_v61 = vsel %vm1163_vm1, %v4237_v1, %v4239_v48  ;;  %v11008_v1 = vld [vmem:[%s14309_s3 + $0xb0] sm:$0xff] }
 0x490   : > { %6006 = vmatpush.bf16.msrb.mxu3 %v11008_v1 }
 0x491   : > { %v4136_v38 = vpop.f32.mrf.mxu3  ;;  %v2607_v58 = vpop.f32.mrf.mxu0 }
 0x492   : > { %v13108_v0 = vadd.f32 %v4136_v38, %v3496_v28  ;;  %v13114_v13 = vadd.f32 %v2607_v58, %v14477_v45  ;;  %v10912_v45 = vld [vmem:[%s11542_s22 + $0xe8] sm:$0xff] }
 0x493   : > { %3442 = vmatmul.bf16.gmra.mxu2 %v10912_v45 }
 0x494   : > { %14476 = vst [vmem:[#allocation48_spill] sm:$0xff] %v13108_v0 }
 0x495   : > { %14478 = vst [vmem:[#allocation50_spill] sm:$0xff] %v13114_v13  ;;  %v4241_v13 = vrot.slane %v11410_v2, 1 }
 0x499   : > { %v13117_v11 = vpop.f32.mrf.mxu3  ;;  %v2610_v15 = vpop.f32.mrf.mxu0 }
 0x49a   : > { %14479 = vst [vmem:[#allocation51_spill] sm:$0xff] %v13117_v11  ;;  %v2670_v62 = vadd.f32 %v2610_v15, %v14480_v34  ;;  %v4242_v11 = vsel %vm1163_vm1, %v4239_v48, %v4241_v13  ;;  %v11460_v34 = vmov 0.0|0.0  }
 0x49c   : > { %v3019_v27 = vadd.f32 %v2959_v63, %v2670_v62  ;;  %4394 = vmatmul.bf16.gmra.mxu0 %v4240_v61  ;;  %v3556_v63 = vld [vmem:[%s11542_s22 + $0xf0] sm:$0x1]  ;;  %v13133_v62 = vunpack.c.l.bf16 %v11460_v34  ;;  %v11002_v34 = vld [vmem:[%s14309_s3 + $0x80] sm:$0xff] }
 0x49d   : > { %v3683_v15 = vunpack.c.l.b16 %v3556_v63 }
 0x49e   : > { %v3498_v28 = vadd.f32 %v3438_v4, %v3019_v27  ;;  %v11007_v4 = vld [vmem:[%s14309_s3 + $0xa8] sm:$0xff]  ;;  %14481 = vst [vmem:[#allocation52_spill] sm:$0xff] %v13133_v62  ;;  %v14482_v27 = vrot.slane %v12942_v49, 1 }
 0x49f   : > { %6007 = vmatpush.bf16.msrb.mxu3 %v11007_v4  ;;  %v13136_v48 = vpack.c.b16 %v3683_v15, %v3683_v15  ;;  %v11004_v15 = vld [vmem:[%s14309_s3 + $0x90] sm:$0xff] }
 0x4a1   : > { %v4141_v38 = vpop.f32.mrf.mxu3  ;;  %v2612_v58 = vpop.f32.mrf.mxu0  ;;  %v3928_v45 = vshll.u32 %v13136_v48, 16 }
 0x4a2   : > { %v13121_v0 = vadd.f32 %v4141_v38, %v3498_v28  ;;  %v11006_v38 = vld [vmem:[%s14309_s3 + $0xa0] sm:$0xff]  ;;  %v3924_v58 = vshrl.u32 %v12968_v54, 16  ;;  %v11005_v54 = vld [vmem:[%s14309_s3 + $0x98] sm:$0xff] }
 0x4a3   : > { %6008 = vmatpush.bf16.msrb.mxu3 %v11006_v38  ;;  %v11072_v38 = vld [vmem:[%s14309_s3 + $0x138] sm:$0xff] }
 0x4a4   : > { %v3926_v49 = vor.u32 %v3924_v58, %v12980_v52  ;;  %v11003_v52 = vld [vmem:[%s14309_s3 + $0x88] sm:$0xff]  ;;  %v4666_v58 = vlaneseq  ;;  %7009 = vmatpush.bf16.msrb.mxu2 %v11072_v38 }
 0x4a7   : > { %6009 = vmatpush.bf16.msrb.mxu3 %v11005_v54  ;;  %v11413_v54 = vld [vmem:[%s11542_s22 + $0x70] sm:$0xff] }
 0x4a9   : > { %v4143_v37 = vpop.f32.mrf.mxu3  ;;  %v2615_v26 = vpop.f32.mrf.mxu0 }
 0x4aa   : > { %v2748_v26 = vrot.slane %v12991_v18, 1  ;;  %v11411_v18 = vld [vmem:[%s11542_s22 + $0x60] sm:$0xff]  ;;  %v3930_v37 = vrot.slane %v3928_v45, 1 }
 0x4ab   : > { %v4243_v2 = vrot.slane %v11411_v18, 1  ;;  %6010 = vmatpush.bf16.msrb.mxu3 %v11004_v15  ;;  %v13177_v45 = vld [vmem:[%s14308_s2] ss:$0 sm:$0xff]  ;;  %v11041_v18 = vld [vmem:[%s14309_s3 + $0xf8] sm:$0xff] }
 0x4ac   : > { %4399 = vmatmul.bf16.gmra.mxu0 %v4242_v11  ;;  %v13140_v11 = vpack.c.bf16 %v13133_v62, %v13133_v62  ;;  %v2749_v28 = vsel %vm1163_vm1, %v14482_v27, %v2748_v26  ;;  %v3931_v1 = vsel %vm483_vm0, %v3926_v49, %v3930_v37  ;;  %v11412_v26 = vld [vmem:[%s11542_s22 + $0x68] sm:$0xff]  ;;  %v13182_v37 = vshrl.u32 %v4666_v58, 7  ;;  %6407 = vmatpush.bf16.msrb.mxu1 %v11041_v18 }
 0x4ad   : > { %2963 = vmatmul.bf16.gmra.mxu1 %v2749_v28  ;;  %4145 = vmatmul.bf16.gmra.mxu3 %v3931_v1  ;;  %v4244_v4 = vsel %vm1163_vm1, %v4241_v13, %v4243_v2  ;;  %v4245_v27 = vrot.slane %v11412_v26, 1 }
 0x4ae   : > { %11164 = vst [vmem:[#allocation2] sm:$0xff] %v13140_v11   ;;  %5758 = vmatmul.bf16.vlgmr.msra.gmra.mxu2 %v13140_v11  ;;  %vm4759_vm2 = vcmp.ge.s32.totalorder %v13182_v37, 1  ;;  %v5298_v58 = vshrl.u32 %v13140_v11, 16 }
 0x4af   : > { %11335 = vst [vmem:[#allocation2 + $0xd0] sm:$0xff] %v13140_v11   ;;  %6011 = vmatpush.bf16.msrb.mxu3 %v11003_v52  ;;  %v4246_v28 = vsel %vm1163_vm1, %v4243_v2, %v4245_v27 }
 0x4b1   : > { %v2617_v61 = vpop.f32.mrf.mxu0 }
 0x4b3   : > { %6012 = vmatpush.bf16.msrb.mxu3 %v11002_v34 }
 0x4b5   : > { %v11336_v26 = vld [vmem:[#allocation2] sm:$0xf0] }
 0x4b9   : > { %v4365_v63 = vpop.f32.mrf.mxu0 }
 0x4ba   : > { %v4247_v63 = vrot.slane %v11413_v54, 1 }
 0x4bc   : > { %4404 = vmatmul.bf16.gmra.mxu0 %v4244_v4  ;;  %v4248_v34 = vsel %vm1163_vm1, %v4245_v27, %v4247_v63 }
 0x4c1   : > { %v4367_v61 = vpop.f32.mrf.mxu0 }
 0x4c9   : > { %v4370_v13 = vpop.f32.mrf.mxu0 }
 0x4ca   : > { %v11337_v13 = vld [vmem:[#allocation2] sm:$0xe] }
 0x4cc   : > { %4409 = vmatmul.bf16.gmra.mxu0 %v4246_v28  ;;  %v11338_v28 = vor.u32 %v11337_v13, %v11336_v26 }
 0x4ce   : > { %v5884_v54 = vrot.slane %v11338_v28, 1 }
 0x4d1   : > { %v4372_v49 = vpop.f32.mrf.mxu0 }
 0x4d2   : > { %v4503_v2 = vadd.f32 %v4372_v49, %v12510_v44  ;;  %v5300_v44 = vshll.u32 %v13140_v11, 16 }
 0x4d4   : > { %v4561_v1 = vadd.f32 %v13177_v45, %v4503_v2  ;;  %v5302_v18 = vrot.slane %v5300_v44, 1  ;;  %v13196_v2 = vadd.s32 16, %v13182_v37 }
 0x4d6   : > { %v4615_v4 = vmax.f32 %v4561_v1, 0.0  ;;  %vm4764_vm3 = vcmp.le.s32.totalorder %v13196_v2, 16 }
 0x4d8   : > { %v4933_v15 = vsel %vm4759_vm2, %v4615_v4, 0.0 }
 0x4d9   : > { %v11168_v52 = vpack.c.bf16 %v4933_v15, %v13133_v62  ;;  %v4375_v61 = vpop.f32.mrf.mxu0  ;;  %v5303_v15 = vor.u32 %v5302_v18, %v5298_v58 }
 0x4da   : > { %v4504_v38 = vadd.f32 %v4375_v61, %v12529_v50  ;;  %v11414_v50 = vld [vmem:[%s11542_s22 + $0x78] sm:$0xff] }
 0x4db   : > { %11310 = vst [vmem:[#allocation2 + $0x8] sm:$0xff] %v11168_v52   ;;  %v4249_v11 = vrot.slane %v11414_v50, 1 }
 0x4dc   : > { %4414 = vmatmul.bf16.gmra.mxu0 %v4248_v34  ;;  %v4562_v4 = vadd.f32 %v13177_v45, %v4504_v38 }
 0x4dd   : > { %v4250_v18 = vsel %vm1163_vm1, %v4247_v63, %v4249_v11 }
 0x4de   : > { %v4616_v62 = vmax.f32 %v4562_v4, 0.0 }
 0x4e1   : > { %v4377_v49 = vpop.f32.mrf.mxu0 }
 0x4e2   : > { %v4505_v1 = vadd.f32 %v4377_v49, %v12541_v35  ;;  %v10963_v27 = vld [vmem:[#allocation2 + $0x8] sm:$0xff] }
 0x4e3   : > { %5763 = vmatmul.bf16.gmra.mxu2 %v10963_v27  ;;  %v5885_v34 = vrot.slane %v10963_v27, 1  ;;  %v5305_v26 = vshll.u32 %v10963_v27, 16 }
 0x4e4   : > { %v4563_v52 = vadd.f32 %v13177_v45, %v4505_v1 }
 0x4e5   : > { %v5886_v13 = vsel %vm1163_vm1, %v5884_v54, %v5885_v34  ;;  %v5307_v44 = vrot.slane %v5305_v26, 1 }
 0x4e6   : > { %v4617_v61 = vmax.f32 %v4563_v52, 0.0  ;;  %6013 = vmatmul.bf16.vlgmr.msrb.gmra.mxu3 %v5886_v13  ;;  %v11415_v13 = vld [vmem:[%s11542_s22 + $0x80] sm:$0xff] }
 0x4e7   : > { %v5308_v28 = vsel %vm483_vm0, %v5303_v15, %v5307_v44  ;;  %v5309_v15 = vshrl.u32 %v10963_v27, 16  ;;  %v11071_v27 = vld [vmem:[%s14309_s3 + $0x130] sm:$0xff] }
 0x4e8   : > { %v4935_v35 = vsel %vm4764_vm3, %v4617_v61, 0.0  ;;  %5573 = vmatmul.bf16.vlgmr.msra.gmra.mxu1 %v5308_v28  ;;  %7010 = vmatpush.bf16.msrb.mxu2 %v11071_v27 }
 0x4e9   : > { %v11173_v38 = vpack.c.bf16 %v4935_v35, %v4616_v62  ;;  %v4380_v58 = vpop.f32.mrf.mxu0  ;;  %v4251_v35 = vrot.slane %v11415_v13, 1 }
 0x4ea   : > { %v4506_v49 = vadd.f32 %v4380_v58, %v12560_v30  ;;  %v5311_v30 = vor.u32 %v5309_v15, %v5307_v44 }
 0x4eb   : > { %11311 = vst [vmem:[#allocation2 + $0x10] sm:$0xff] %v11173_v38  }
 0x4ec   : > { %4419 = vmatmul.bf16.gmra.mxu0 %v4250_v18  ;;  %v4564_v1 = vadd.f32 %v13177_v45, %v4506_v49 }
 0x4ee   : > { %v4618_v26 = vmax.f32 %v4564_v1, 0.0  ;;  %v4252_v1 = vsel %vm1163_vm1, %v4249_v11, %v4251_v35 }
 0x4f0   : > { %v4936_v58 = vsel %vm4759_vm2, %v4618_v26, 0.0 }
 0x4f1   : > { %v4382_v54 = vpop.f32.mrf.mxu0 }
 0x4f2   : > { %v4507_v4 = vadd.f32 %v4382_v54, %v12575_v53  ;;  %v10964_v52 = vld [vmem:[#allocation2 + $0x10] sm:$0xff] }
 0x4f3   : > { %5767 = vmatmul.bf16.gmra.mxu2 %v10964_v52  ;;  %v5887_v62 = vrot.slane %v10964_v52, 1  ;;  %v5313_v61 = vshll.u32 %v10964_v52, 16  ;;  %v11040_v54 = vld [vmem:[%s14309_s3 + $0xf0] sm:$0xff]  ;;  %v5317_v15 = vshrl.u32 %v10964_v52, 16 }
 0x4f4   : > { %v4565_v50 = vadd.f32 %v13177_v45, %v4507_v4  ;;  %6408 = vmatpush.bf16.msrb.mxu1 %v11040_v54 }
 0x4f5   : > { %v5888_v28 = vsel %vm1163_vm1, %v5885_v34, %v5887_v62  ;;  %v5315_v38 = vrot.slane %v5313_v61, 1 }
 0x4f6   : > { %v4619_v63 = vmax.f32 %v4565_v50, 0.0  ;;  %6018 = vmatmul.bf16.gmra.mxu3 %v5888_v28 }
 0x4f7   : > { %v5316_v18 = vsel %vm483_vm0, %v5311_v30, %v5315_v38  ;;  %v5319_v28 = vor.u32 %v5317_v15, %v5315_v38 }
 0x4f8   : > { %v11178_v53 = vpack.c.bf16 %v4619_v63, %v4936_v58  ;;  %5578 = vmatmul.bf16.gmra.mxu1 %v5316_v18  ;;  %v11416_v58 = vld [vmem:[%s11542_s22 + $0x88] sm:$0xff] }
 0x4f9   : > { %v4385_v49 = vpop.f32.mrf.mxu0 }
 0x4fa   : > { %11312 = vst [vmem:[#allocation2 + $0x18] sm:$0xff] %v11178_v53   ;;  %v4508_v34 = vadd.f32 %v4385_v49, %v12597_v36  ;;  %v4253_v53 = vrot.slane %v11416_v58, 1 }
 0x4fc   : > { %4424 = vmatmul.bf16.gmra.mxu0 %v4252_v1  ;;  %v4566_v44 = vadd.f32 %v13177_v45, %v4508_v34 }
 0x4fe   : > { %v4620_v13 = vmax.f32 %v4566_v44, 0.0 }
 0x501   : > { %v4387_v4 = vpop.f32.mrf.mxu0  ;;  %v10965_v26 = vld [vmem:[#allocation2 + $0x18] sm:$0xff] }
 0x502   : > { %v4509_v11 = vadd.f32 %v4387_v4, %v12612_v56  ;;  %v5889_v50 = vrot.slane %v10965_v26, 1  ;;  %v5321_v61 = vshll.u32 %v10965_v26, 16  ;;  %v4938_v56 = vsel %vm4764_vm3, %v4620_v13, 0.0 }
 0x503   : > { %5771 = vmatmul.bf16.gmra.mxu2 %v10965_v26 }
 0x504   : > { %v4567_v36 = vadd.f32 %v13177_v45, %v4509_v11  ;;  %v5890_v63 = vsel %vm1163_vm1, %v5887_v62, %v5889_v50  ;;  %v5323_v30 = vrot.slane %v5321_v61, 1  ;;  %v4254_v62 = vsel %vm1163_vm1, %v4251_v35, %v4253_v53 }
 0x505   : > { %v5325_v61 = vshrl.u32 %v10965_v26, 16 }
 0x506   : > { %v4621_v18 = vmax.f32 %v4567_v36, 0.0  ;;  %6022 = vmatmul.bf16.gmra.mxu3 %v5890_v63  ;;  %v5324_v49 = vsel %vm483_vm0, %v5319_v28, %v5323_v30  ;;  %v11417_v36 = vld [vmem:[%s11542_s22 + $0x90] sm:$0xff] }
 0x507   : > { %v4255_v63 = vrot.slane %v11417_v36, 1  ;;  %v5327_v58 = vor.u32 %v5325_v61, %v5323_v30  ;;  %v11418_v61 = vld [vmem:[%s11542_s22 + $0x98] sm:$0xff] }
 0x508   : > { %v4939_v52 = vsel %vm4759_vm2, %v4621_v18, 0.0  ;;  %5582 = vmatmul.bf16.gmra.mxu1 %v5324_v49 }
 0x509   : > { %v11183_v1 = vpack.c.bf16 %v4939_v52, %v4938_v56  ;;  %v4390_v27 = vpop.f32.mrf.mxu0  ;;  %v4256_v26 = vsel %vm1163_vm1, %v4253_v53, %v4255_v63 }
 0x50a   : > { %v4510_v38 = vadd.f32 %v4390_v27, %v12631_v40 }
 0x50b   : > { %11313 = vst [vmem:[#allocation2 + $0x20] sm:$0xff] %v11183_v1  }
 0x50c   : > { %4429 = vmatmul.bf16.gmra.mxu0 %v4254_v62  ;;  %v4568_v4 = vadd.f32 %v13177_v45, %v4510_v38 }
 0x50e   : > { %v4622_v40 = vmax.f32 %v4568_v4, 0.0 }
 0x511   : > { %v4392_v34 = vpop.f32.mrf.mxu0 }
 0x512   : > { %v4511_v44 = vadd.f32 %v4392_v34, %v12643_v46  ;;  %v10966_v54 = vld [vmem:[#allocation2 + $0x20] sm:$0xff] }
 0x513   : > { %5776 = vmatmul.bf16.gmra.mxu2 %v10966_v54  ;;  %v5891_v15 = vrot.slane %v10966_v54, 1  ;;  %v5329_v13 = vshll.u32 %v10966_v54, 16  ;;  %v5333_v4 = vshrl.u32 %v10966_v54, 16 }
 0x514   : > { %v4569_v11 = vadd.f32 %v13177_v45, %v4511_v44 }
 0x515   : > { %v5892_v35 = vsel %vm1163_vm1, %v5889_v50, %v5891_v15  ;;  %v5331_v18 = vrot.slane %v5329_v13, 1  ;;  %v4257_v13 = vrot.slane %v11418_v61, 1 }
 0x516   : > { %v4623_v28 = vmax.f32 %v4569_v11, 0.0  ;;  %6026 = vmatmul.bf16.gmra.mxu3 %v5892_v35  ;;  %v3443_v35 = vpop.f32.mrf.mxu2 }
 0x517   : > { %v5332_v49 = vsel %vm483_vm0, %v5327_v58, %v5331_v18  ;;  %v4258_v54 = vsel %vm1163_vm1, %v4255_v63, %v4257_v13 }
 0x518   : > { %v4941_v46 = vsel %vm4764_vm3, %v4623_v28, 0.0  ;;  %5586 = vmatmul.bf16.gmra.mxu1 %v5332_v49  ;;  %v11070_v49 = vld [vmem:[%s14309_s3 + $0x128] sm:$0xff] }
 0x519   : > { %v11188_v56 = vpack.c.bf16 %v4941_v46, %v4622_v40  ;;  %v4395_v52 = vpop.f32.mrf.mxu0  ;;  %7011 = vmatpush.bf16.msrb.mxu2 %v11070_v49 }
 0x51a   : > { %v4512_v1 = vadd.f32 %v4395_v52, %v12662_v21  ;;  %v5335_v21 = vor.u32 %v5333_v4, %v5331_v18  ;;  %v11039_v52 = vld [vmem:[%s14309_s3 + $0xe8] sm:$0xff] }
 0x51b   : > { %11314 = vst [vmem:[#allocation2 + $0x28] sm:$0xff] %v11188_v56   ;;  %6409 = vmatpush.bf16.msrb.mxu1 %v11039_v52 }
 0x51c   : > { %4434 = vmatmul.bf16.gmra.mxu0 %v4256_v26  ;;  %v4570_v50 = vadd.f32 %v13177_v45, %v4512_v1 }
 0x51e   : > { %v4624_v38 = vmax.f32 %v4570_v50, 0.0  ;;  %v3445_v18 = vpop.f32.mrf.mxu2 }
 0x520   : > { %v4942_v58 = vsel %vm4759_vm2, %v4624_v38, 0.0 }
 0x521   : > { %v4397_v30 = vpop.f32.mrf.mxu0 }
 0x522   : > { %v4513_v27 = vadd.f32 %v4397_v30, %v12674_v51  ;;  %v10967_v62 = vld [vmem:[#allocation2 + $0x28] sm:$0xff] }
 0x523   : > { %5780 = vmatmul.bf16.gmra.mxu2 %v10967_v62  ;;  %v5893_v44 = vrot.slane %v10967_v62, 1  ;;  %v5337_v11 = vshll.u32 %v10967_v62, 16 }
 0x524   : > { %v4571_v34 = vadd.f32 %v13177_v45, %v4513_v27  ;;  %v5341_v27 = vshrl.u32 %v10967_v62, 16 }
 0x525   : > { %v5894_v36 = vsel %vm1163_vm1, %v5891_v15, %v5893_v44  ;;  %v5339_v28 = vrot.slane %v5337_v11, 1 }
 0x526   : > { %v4625_v53 = vmax.f32 %v4571_v34, 0.0  ;;  %6031 = vmatmul.bf16.gmra.mxu3 %v5894_v36 }
 0x527   : > { %v5340_v40 = vsel %vm483_vm0, %v5335_v21, %v5339_v28  ;;  %v5343_v11 = vor.u32 %v5341_v27, %v5339_v28 }
 0x528   : > { %v11193_v51 = vpack.c.bf16 %v4625_v53, %v4942_v58  ;;  %5591 = vmatmul.bf16.gmra.mxu1 %v5340_v40  ;;  %v11419_v53 = vld [vmem:[%s11542_s22 + $0xa0] sm:$0xff] }
 0x529   : > { %v4400_v46 = vpop.f32.mrf.mxu0  ;;  %v4259_v36 = vrot.slane %v11419_v53, 1 }
 0x52a   : > { %11315 = vst [vmem:[#allocation2 + $0x30] sm:$0xff] %v11193_v51   ;;  %v4514_v15 = vadd.f32 %v4400_v46, %v12696_v55  ;;  %v2964_v63 = vpop.f32.mrf.mxu1 }
 0x52b   : > { %v4260_v40 = vsel %vm1163_vm1, %v4257_v13, %v4259_v36 }
 0x52c   : > { %4439 = vmatmul.bf16.gmra.mxu0 %v4258_v54  ;;  %v4572_v56 = vadd.f32 %v13177_v45, %v4514_v15 }
 0x52e   : > { %v4626_v55 = vmax.f32 %v4572_v56, 0.0 }
 0x530   : > { %v4146_v28 = vpop.f32.mrf.mxu3 }
 0x531   : > { %v4402_v26 = vpop.f32.mrf.mxu0  ;;  %v10968_v1 = vld [vmem:[#allocation2 + $0x30] sm:$0xff] }
 0x532   : > { %v4515_v50 = vadd.f32 %v4402_v26, %v12711_v24  ;;  %v5895_v30 = vrot.slane %v10968_v1, 1  ;;  %v5345_v38 = vshll.u32 %v10968_v1, 16  ;;  %v4944_v24 = vsel %vm4764_vm3, %v4626_v55, 0.0 }
 0x533   : > { %5784 = vmatmul.bf16.gmra.mxu2 %v10968_v1  ;;  %v5349_v63 = vshrl.u32 %v10968_v1, 16 }
 0x534   : > { %v4573_v34 = vadd.f32 %v13177_v45, %v4515_v50  ;;  %v5896_v4 = vsel %vm1163_vm1, %v5893_v44, %v5895_v30  ;;  %v5347_v61 = vrot.slane %v5345_v38, 1  ;;  %v2966_v44 = vpop.f32.mrf.mxu1  ;;  %v11420_v50 = vld [vmem:[%s11542_s22 + $0xa8] sm:$0xff] }
 0x535   : > { %v4261_v27 = vrot.slane %v11420_v50, 1 }
 0x536   : > { %v4627_v21 = vmax.f32 %v4573_v34, 0.0  ;;  %6035 = vmatmul.bf16.gmra.mxu3 %v5896_v4  ;;  %v5348_v35 = vsel %vm483_vm0, %v5343_v11, %v5347_v61  ;;  %v5351_v34 = vor.u32 %v5349_v63, %v5347_v61 }
 0x537   : > { %v4262_v1 = vsel %vm1163_vm1, %v4259_v36, %v4261_v27 }
 0x538   : > { %v4945_v62 = vsel %vm4759_vm2, %v4627_v21, 0.0  ;;  %5595 = vmatmul.bf16.gmra.mxu1 %v5348_v35  ;;  %v4148_v56 = vpop.f32.mrf.mxu3 }
 0x539   : > { %v11198_v58 = vpack.c.bf16 %v4945_v62, %v4944_v24  ;;  %v4405_v51 = vpop.f32.mrf.mxu0 }
 0x53a   : > { %v4516_v46 = vadd.f32 %v4405_v51, %v12733_v19  ;;  %v5759_v51 = vpop.f32.mrf.mxu2 }
 0x53b   : > { %11316 = vst [vmem:[#allocation2 + $0x38] sm:$0xff] %v11198_v58  }
 0x53c   : > { %4444 = vmatmul.bf16.gmra.mxu0 %v4260_v40  ;;  %v4574_v18 = vadd.f32 %v13177_v45, %v4516_v46 }
 0x53e   : > { %v4628_v4 = vmax.f32 %v4574_v18, 0.0 }
 0x541   : > { %v4407_v54 = vpop.f32.mrf.mxu0 }
 0x542   : > { %v4517_v49 = vadd.f32 %v4407_v54, %v12745_v57  ;;  %v10969_v15 = vld [vmem:[#allocation2 + $0x38] sm:$0xff]  ;;  %v11421_v54 = vld [vmem:[%s11542_s22 + $0xb0] sm:$0xff] }
 0x543   : > { %5789 = vmatmul.bf16.gmra.mxu2 %v10969_v15  ;;  %v5897_v26 = vrot.slane %v10969_v15, 1  ;;  %v5353_v13 = vshll.u32 %v10969_v15, 16  ;;  %v5357_v28 = vshrl.u32 %v10969_v15, 16  ;;  %v4263_v36 = vrot.slane %v11421_v54, 1  ;;  %v11069_v15 = vld [vmem:[%s14309_s3 + $0x120] sm:$0xff] }
 0x544   : > { %v4575_v52 = vadd.f32 %v13177_v45, %v4517_v49  ;;  %7012 = vmatpush.bf16.msrb.mxu2 %v11069_v15 }
 0x545   : > { %v5898_v55 = vsel %vm1163_vm1, %v5895_v30, %v5897_v26  ;;  %v5355_v19 = vrot.slane %v5353_v13, 1  ;;  %v4264_v50 = vsel %vm1163_vm1, %v4261_v27, %v4263_v36 }
 0x546   : > { %v4629_v38 = vmax.f32 %v4575_v52, 0.0  ;;  %6039 = vmatmul.bf16.gmra.mxu3 %v5898_v55 }
 0x547   : > { %v5356_v11 = vsel %vm483_vm0, %v5351_v34, %v5355_v19  ;;  %v5359_v18 = vor.u32 %v5357_v28, %v5355_v19  ;;  %v11038_v34 = vld [vmem:[%s14309_s3 + $0xe0] sm:$0xff] }
 0x548   : > { %v4947_v57 = vsel %vm4764_vm3, %v4629_v38, 0.0  ;;  %5599 = vmatmul.bf16.gmra.mxu1 %v5356_v11  ;;  %v5761_v38 = vpop.f32.mrf.mxu2 }
 0x549   : > { %v11203_v53 = vpack.c.bf16 %v4947_v57, %v4628_v4  ;;  %v4410_v21 = vpop.f32.mrf.mxu0  ;;  %6410 = vmatpush.bf16.msrb.mxu1 %v11038_v34 }
 0x54a   : > { %v4518_v35 = vadd.f32 %v4410_v21, %v12764_v25 }
 0x54b   : > { %11317 = vst [vmem:[#allocation2 + $0x40] sm:$0xff] %v11203_v53  }
 0x54c   : > { %4449 = vmatmul.bf16.gmra.mxu0 %v4262_v1  ;;  %v4576_v30 = vadd.f32 %v13177_v45, %v4518_v35 }
 0x54e   : > { %v4630_v58 = vmax.f32 %v4576_v30, 0.0 }
 0x550   : > { %v4948_v52 = vsel %vm4759_vm2, %v4630_v58, 0.0 }
 0x551   : > { %v4412_v61 = vpop.f32.mrf.mxu0 }
 0x552   : > { %v4519_v24 = vadd.f32 %v4412_v61, %v12776_v9  ;;  %v10970_v62 = vld [vmem:[#allocation2 + $0x40] sm:$0xff]  ;;  %v11422_v61 = vld [vmem:[%s11542_s22 + $0xb8] sm:$0xff] }
 0x553   : > { %5793 = vmatmul.bf16.gmra.mxu2 %v10970_v62  ;;  %v5899_v44 = vrot.slane %v10970_v62, 1  ;;  %v5361_v46 = vshll.u32 %v10970_v62, 16  ;;  %v5365_v11 = vshrl.u32 %v10970_v62, 16 }
 0x554   : > { %v4577_v40 = vadd.f32 %v13177_v45, %v4519_v24  ;;  %v4265_v24 = vrot.slane %v11422_v61, 1 }
 0x555   : > { %v5900_v25 = vsel %vm1163_vm1, %v5897_v26, %v5899_v44  ;;  %v5363_v56 = vrot.slane %v5361_v46, 1 }
 0x556   : > { %v4631_v49 = vmax.f32 %v4577_v40, 0.0  ;;  %6044 = vmatmul.bf16.gmra.mxu3 %v5900_v25 }
 0x557   : > { %v5364_v63 = vsel %vm483_vm0, %v5359_v18, %v5363_v56  ;;  %v5367_v35 = vor.u32 %v5365_v11, %v5363_v56 }
 0x558   : > { %v11208_v9 = vpack.c.bf16 %v4631_v49, %v4948_v52  ;;  %5604 = vmatmul.bf16.gmra.mxu1 %v5364_v63  ;;  %v14483_v52 = vld [vmem:[#allocation43_spill] sm:$0xff] }
 0x559   : > { %v4415_v13 = vpop.f32.mrf.mxu0 }
 0x55a   : > { %11318 = vst [vmem:[#allocation2 + $0x48] sm:$0xff] %v11208_v9   ;;  %v4520_v26 = vadd.f32 %v4415_v13, %v12795_v5 }
 0x55c   : > { %4454 = vmatmul.bf16.gmra.mxu0 %v4264_v50  ;;  %v4578_v55 = vadd.f32 %v13177_v45, %v4520_v26 }
 0x55e   : > { %v4632_v21 = vmax.f32 %v4578_v55, 0.0 }
 0x560   : > { %v4950_v62 = vsel %vm4764_vm3, %v4632_v21, 0.0  ;;  %v11423_v21 = vld [vmem:[%s11542_s22 + $0xc0] sm:$0xff] }
 0x561   : > { %v4417_v19 = vpop.f32.mrf.mxu0  ;;  %v10971_v4 = vld [vmem:[#allocation2 + $0x48] sm:$0xff] }
 0x562   : > { %v4521_v27 = vadd.f32 %v4417_v19, %v12808_v14  ;;  %v5901_v57 = vrot.slane %v10971_v4, 1  ;;  %v5369_v53 = vshll.u32 %v10971_v4, 16  ;;  %v5373_v11 = vshrl.u32 %v10971_v4, 16  ;;  %v11087_v37 = vld [vmem:[#allocation2 + $0x48] sm:$0xff] }
 0x563   : > { %5797 = vmatmul.bf16.gmra.mxu2 %v10971_v4 }
 0x564   : > { %v4579_v5 = vadd.f32 %v13177_v45, %v4521_v27  ;;  %v5902_v1 = vsel %vm1163_vm1, %v5899_v44, %v5901_v57  ;;  %v5371_v30 = vrot.slane %v5369_v53, 1  ;;  %v4266_v44 = vsel %vm1163_vm1, %v4263_v36, %v4265_v24 }
 0x565   : > { %v5574_v40 = vpop.f32.mrf.mxu1 }
 0x566   : > { %v4633_v58 = vmax.f32 %v4579_v5, 0.0  ;;  %v5760_v28 = vadd.f32 %v5759_v51, %v5574_v40  ;;  %v5764_v46 = vpop.f32.mrf.mxu2  ;;  %6048 = vmatmul.bf16.gmra.mxu3 %v5902_v1  ;;  %v5372_v14 = vsel %vm483_vm0, %v5367_v35, %v5371_v30  ;;  %v4267_v5 = vrot.slane %v11423_v21, 1 }
 0x567   : > { %v5375_v61 = vor.u32 %v5373_v11, %v5371_v30 }
 0x568   : > { %v4951_v54 = vsel %vm4759_vm2, %v4633_v58, 0.0  ;;  %5608 = vmatmul.bf16.gmra.mxu1 %v5372_v14  ;;  %v4268_v4 = vsel %vm1163_vm1, %v4265_v24, %v4267_v5 }
 0x569   : > { %v11213_v49 = vpack.c.bf16 %v4951_v54, %v4950_v62  ;;  %v4420_v25 = vpop.f32.mrf.mxu0  ;;  %v6014_v18 = vpop.f32.mrf.mxu3 }
 0x56a   : > { %v13312_v56 = vadd.f32 %v6014_v18, %v5760_v28  ;;  %v4522_v9 = vadd.f32 %v4420_v25, %v14483_v52 }
 0x56b   : > { %11319 = vst [vmem:[#allocation2 + $0x50] sm:$0xff] %v11213_v49  }
 0x56c   : > { %4459 = vmatmul.bf16.gmra.mxu0 %v4266_v44  ;;  %v4580_v34 = vadd.f32 %v13177_v45, %v4522_v9 }
 0x56d   : > { %v5576_v51 = vpop.f32.mrf.mxu1 }
 0x56e   : > { %v5762_v63 = vadd.f32 %v5761_v38, %v5576_v51  ;;  %v5765_v13 = vpop.f32.mrf.mxu2  ;;  %v4634_v58 = vmax.f32 %v4580_v34, 0.0  ;;  %v11424_v34 = vld [vmem:[%s11542_s22 + $0xc8] sm:$0xff] }
 0x571   : > { %v4422_v50 = vpop.f32.mrf.mxu0  ;;  %v6016_v26 = vpop.f32.mrf.mxu3 }
 0x572   : > { %v4523_v15 = vadd.f32 %v4422_v50, %v12843_v32  ;;  %v10972_v55 = vld [vmem:[#allocation2 + $0x50] sm:$0xff]  ;;  %v13317_v19 = vadd.f32 %v6016_v26, %v5762_v63 }
 0x573   : > { %5802 = vmatmul.bf16.gmra.mxu2 %v10972_v55  ;;  %v5903_v27 = vrot.slane %v10972_v55, 1  ;;  %v5377_v53 = vshll.u32 %v10972_v55, 16 }
 0x574   : > { %v4581_v36 = vadd.f32 %v13177_v45, %v4523_v15 }
 0x575   : > { %v5579_v38 = vpop.f32.mrf.mxu1  ;;  %v5904_v35 = vsel %vm1163_vm1, %v5901_v57, %v5903_v27  ;;  %v5379_v32 = vrot.slane %v5377_v53, 1 }
 0x576   : > { %v4635_v1 = vmax.f32 %v4581_v36, 0.0  ;;  %v5768_v40 = vpop.f32.mrf.mxu2  ;;  %6052 = vmatmul.bf16.gmra.mxu3 %v5904_v35  ;;  %v4269_v36 = vrot.slane %v11424_v34, 1 }
 0x577   : > { %v5380_v46 = vsel %vm483_vm0, %v5375_v61, %v5379_v32 }
 0x578   : > { %v4953_v28 = vsel %vm4764_vm3, %v4635_v1, 0.0  ;;  %5612 = vmatmul.bf16.gmra.mxu1 %v5380_v46 }
 0x579   : > { %v11218_v14 = vpack.c.bf16 %v4953_v28, %v4634_v58  ;;  %v4425_v62 = vpop.f32.mrf.mxu0  ;;  %v6019_v54 = vpop.f32.mrf.mxu3 }
 0x57a   : > { %v4524_v49 = vadd.f32 %v4425_v62, %v12861_v8  ;;  %v5381_v8 = vshrl.u32 %v10972_v55, 16  ;;  %v4270_v55 = vsel %vm1163_vm1, %v4267_v5, %v4269_v36  ;;  %v11037_v5 = vld [vmem:[%s14309_s3 + $0xd8] sm:$0xff] }
 0x57b   : > { %11320 = vst [vmem:[#allocation2 + $0x58] sm:$0xff] %v11218_v14   ;;  %6411 = vmatpush.bf16.msrb.mxu1 %v11037_v5 }
 0x57c   : > { %4464 = vmatmul.bf16.gmra.mxu0 %v4268_v4  ;;  %v4582_v30 = vadd.f32 %v13177_v45, %v4524_v49  ;;  %v5383_v21 = vor.u32 %v5381_v8, %v5379_v32  ;;  %v11425_v8 = vld [vmem:[%s11542_s22 + $0xd0] sm:$0xff] }
 0x57d   : > { %v5580_v57 = vpop.f32.mrf.mxu1 }
 0x57e   : > { %v5766_v25 = vadd.f32 %v5765_v13, %v5580_v57  ;;  %v5770_v44 = vpop.f32.mrf.mxu2  ;;  %v4636_v63 = vmax.f32 %v4582_v30, 0.0 }
 0x581   : > { %v4427_v18 = vpop.f32.mrf.mxu0  ;;  %v6020_v52 = vpop.f32.mrf.mxu3 }
 0x582   : > { %v4525_v51 = vadd.f32 %v4427_v18, %v12872_v42  ;;  %v10973_v9 = vld [vmem:[#allocation2 + $0x58] sm:$0xff]  ;;  %v13329_v50 = vadd.f32 %v6020_v52, %v5766_v25  ;;  %v4954_v42 = vsel %vm4759_vm2, %v4636_v63, 0.0 }
 0x583   : > { %5806 = vmatmul.bf16.gmra.mxu2 %v10973_v9  ;;  %v5905_v15 = vrot.slane %v10973_v9, 1  ;;  %v5385_v26 = vshll.u32 %v10973_v9, 16  ;;  %v5389_v44 = vshrl.u32 %v10973_v9, 16  ;;  %v2998_v9 = vadd.f32 %v12867_v39, %v12926_v31 }
 0x584   : > { %v4583_v24 = vadd.f32 %v13177_v45, %v4525_v51 }
 0x585   : > { %v5583_v53 = vpop.f32.mrf.mxu1  ;;  %v5906_v13 = vsel %vm1163_vm1, %v5903_v27, %v5905_v15  ;;  %v5387_v1 = vrot.slane %v5385_v26, 1  ;;  %v11068_v27 = vld [vmem:[%s14309_s3 + $0x118] sm:$0xff]  ;;  %v4271_v26 = vrot.slane %v11425_v8, 1  ;;  %v3000_v8 = vadd.f32 %v12896_v16, %v12956_v47 }
 0x586   : > { %v4637_v11 = vmax.f32 %v4583_v24, 0.0  ;;  %v5769_v38 = vadd.f32 %v5768_v40, %v5583_v53  ;;  %v5772_v35 = vpop.f32.mrf.mxu2  ;;  %6057 = vmatmul.bf16.gmra.mxu3 %v5906_v13  ;;  %7013 = vmatpush.bf16.msrb.mxu2 %v11068_v27  ;;  %v13385_v16 = vld [vmem:[%s14309_s3 + $0x1b8] sm:$0xff] }
 0x587   : > { %v5388_v58 = vsel %vm483_vm0, %v5383_v21, %v5387_v1  ;;  %v5391_v63 = vor.u32 %v5389_v44, %v5387_v1  ;;  %v13370_v44 = vld [vmem:[%s11542_s22 + $0xd8] sm:$0xff]  ;;  %7698 = vmatpush.bf16.msra.mxu0 %v13385_v16 }
 0x588   : > { %v11223_v61 = vpack.c.bf16 %v4637_v11, %v4954_v42  ;;  %5617 = vmatmul.bf16.gmra.mxu1 %v5388_v58  ;;  %v3477_v58 = vadd.f32 %v12870_v29, %v2998_v9 }
 0x589   : > { %v4430_v28 = vpop.f32.mrf.mxu0  ;;  %v6023_v46 = vpop.f32.mrf.mxu3 }
 0x58a   : > { %11321 = vst [vmem:[#allocation2 + $0x60] sm:$0xff] %v11223_v61   ;;  %v13338_v14 = vadd.f32 %v6023_v46, %v5769_v38  ;;  %v4526_v32 = vadd.f32 %v4430_v28, %v12890_v6  ;;  %v4272_v38 = vsel %vm1163_vm1, %v4269_v36, %v4271_v26  ;;  %v4180_v46 = vadd.f32 %v12935_v3, %v3477_v58 }
 0x58c   : > { %4469 = vmatmul.bf16.gmra.mxu0 %v4270_v55  ;;  %v4584_v4 = vadd.f32 %v13177_v45, %v4526_v32 }
 0x58d   : > { %v5585_v40 = vpop.f32.mrf.mxu1 }
 0x58e   : > { %v5774_v62 = vpop.f32.mrf.mxu2  ;;  %v4638_v18 = vmax.f32 %v4584_v4, 0.0 }
 0x590   : > { %v4956_v21 = vsel %vm4764_vm3, %v4638_v18, 0.0 }
 0x591   : > { %v4432_v54 = vpop.f32.mrf.mxu0  ;;  %v10974_v49 = vld [vmem:[#allocation2 + $0x60] sm:$0xff]  ;;  %v6025_v30 = vpop.f32.mrf.mxu3 }
 0x592   : > { %v4527_v57 = vadd.f32 %v4432_v54, %v12904_v23  ;;  %v5907_v25 = vrot.slane %v10974_v49, 1  ;;  %v5393_v6 = vshll.u32 %v10974_v49, 16 }
 0x593   : > { %5810 = vmatmul.bf16.gmra.mxu2 %v10974_v49 }
 0x594   : > { %v4585_v51 = vadd.f32 %v13177_v45, %v4527_v57  ;;  %v5908_v52 = vsel %vm1163_vm1, %v5905_v15, %v5907_v25  ;;  %v5395_v24 = vrot.slane %v5393_v6, 1  ;;  %v5397_v57 = vshrl.u32 %v10974_v49, 16 }
 0x595   : > { %v5587_v11 = vpop.f32.mrf.mxu1 }
 0x596   : > { %v4639_v34 = vmax.f32 %v4585_v51, 0.0  ;;  %v5773_v53 = vadd.f32 %v5772_v35, %v5587_v11  ;;  %v5777_v13 = vpop.f32.mrf.mxu2  ;;  %6061 = vmatmul.bf16.gmra.mxu3 %v5908_v52  ;;  %v5396_v23 = vsel %vm483_vm0, %v5391_v63, %v5395_v24  ;;  %v5399_v18 = vor.u32 %v5397_v57, %v5395_v24 }
 0x597   : > { %v3479_v24 = vadd.f32 %v12902_v17, %v3000_v8  ;;  %v13393_v17 = vld [vmem:[%s14309_s3 + $0x1b0] sm:$0xff] }
 0x598   : > { %v4957_v15 = vsel %vm4759_vm2, %v4639_v34, 0.0  ;;  %5621 = vmatmul.bf16.gmra.mxu1 %v5396_v23  ;;  %7699 = vmatpush.bf16.msra.mxu0 %v13393_v17 }
 0x599   : > { %v11228_v1 = vpack.c.bf16 %v4957_v15, %v4956_v21  ;;  %v4435_v42 = vpop.f32.mrf.mxu0  ;;  %v6027_v61 = vpop.f32.mrf.mxu3 }
 0x59a   : > { %v13360_v35 = vadd.f32 %v6027_v61, %v5773_v53  ;;  %v4528_v39 = vadd.f32 %v4435_v42, %v12921_v7  ;;  %v4273_v7 = vrot.slane %v13370_v44, 1 }
 0x59b   : > { %11322 = vst [vmem:[#allocation2 + $0x68] sm:$0xff] %v11228_v1  }
 0x59c   : > { %4474 = vmatmul.bf16.gmra.mxu0 %v4272_v38  ;;  %v4586_v36 = vadd.f32 %v13177_v45, %v4528_v39  ;;  %v4274_v13 = vsel %vm1163_vm1, %v4271_v26, %v4273_v7  ;;  %v4182_v26 = vadd.f32 %v12962_v12, %v3479_v24  ;;  %v11036_v24 = vld [vmem:[%s14309_s3 + $0xd0] sm:$0xff] }
 0x59d   : > { %v5589_v28 = vpop.f32.mrf.mxu1  ;;  %6412 = vmatpush.bf16.msrb.mxu1 %v11036_v24  ;;  %v14490_v24 = vld [vmem:[#allocation19_spill] sm:$0xff] }
 0x59e   : > { %v5775_v31 = vadd.f32 %v5774_v62, %v5589_v28  ;;  %v5778_v55 = vpop.f32.mrf.mxu2  ;;  %v4640_v52 = vmax.f32 %v4586_v36, 0.0 }
 0x5a1   : > { %v4437_v27 = vpop.f32.mrf.mxu0  ;;  %v6029_v40 = vpop.f32.mrf.mxu3 }
 0x5a2   : > { %v4529_v32 = vadd.f32 %v4437_v27, %v4180_v46  ;;  %v10975_v4 = vld [vmem:[#allocation2 + $0x68] sm:$0xff]  ;;  %v13366_v5 = vadd.f32 %v6029_v40, %v5775_v31  ;;  %v13405_v46 = vld [vmem:[%s11542_s22 + $0xe0] sm:$0xff] }
 0x5a3   : > { %5815 = vmatmul.bf16.gmra.mxu2 %v10975_v4  ;;  %v5909_v29 = vrot.slane %v10975_v4, 1  ;;  %v5401_v30 = vshll.u32 %v10975_v4, 16  ;;  %v5405_v31 = vshrl.u32 %v10975_v4, 16  ;;  %v4275_v27 = vrot.slane %v13405_v46, 1 }
 0x5a4   : > { %v4587_v54 = vadd.f32 %v13177_v45, %v4529_v32 }
 0x5a5   : > { %v5592_v3 = vpop.f32.mrf.mxu1  ;;  %v5910_v6 = vsel %vm1163_vm1, %v5907_v25, %v5909_v29  ;;  %v5403_v51 = vrot.slane %v5401_v30, 1 }
 0x5a6   : > { %v4641_v62 = vmax.f32 %v4587_v54, 0.0  ;;  %v5781_v63 = vpop.f32.mrf.mxu2  ;;  %6065 = vmatmul.bf16.gmra.mxu3 %v5910_v6 }
 0x5a7   : > { %v5404_v34 = vsel %vm483_vm0, %v5399_v18, %v5403_v51  ;;  %v5407_v54 = vor.u32 %v5405_v31, %v5403_v51 }
 0x5a8   : > { %v4959_v49 = vsel %vm4764_vm3, %v4641_v62, 0.0  ;;  %5625 = vmatmul.bf16.gmra.mxu1 %v5404_v34  ;;  %v14484_v62 = vld [vmem:[#allocation11_spill] sm:$0xff] }
 0x5a9   : > { %v11233_v11 = vpack.c.bf16 %v4959_v49, %v4640_v52  ;;  %v4440_v53 = vpop.f32.mrf.mxu0  ;;  %v6032_v23 = vpop.f32.mrf.mxu3  ;;  %v3002_v3 = vadd.f32 %v14484_v62, %v12975_v60  ;;  %v4276_v52 = vsel %vm1163_vm1, %v4273_v7, %v4275_v27  ;;  %v11067_v60 = vld [vmem:[%s14309_s3 + $0x110] sm:$0xff] }
 0x5aa   : > { %v4530_v25 = vadd.f32 %v4440_v53, %v12951_v10  ;;  %v14485_v49 = vld [vmem:[#allocation12_spill] sm:$0xff]  ;;  %v13434_v53 = vld [vmem:[%s14309_s3 + $0x198] sm:$0xff]  ;;  %7014 = vmatpush.bf16.msrb.mxu2 %v11067_v60 }
 0x5ab   : > { %11323 = vst [vmem:[#allocation2 + $0x70] sm:$0xff] %v11233_v11   ;;  %v3481_v34 = vadd.f32 %v14485_v49, %v3002_v3  ;;  %v14487_v62 = vld [vmem:[#allocation13_spill] sm:$0xff]  ;;  %v14488_v60 = vld [vmem:[#allocation14_spill] sm:$0xff] }
 0x5ac   : > { %4479 = vmatmul.bf16.gmra.mxu0 %v4274_v13  ;;  %v4588_v9 = vadd.f32 %v13177_v45, %v4530_v25 }
 0x5ad   : > { %v5593_v47 = vpop.f32.mrf.mxu1  ;;  %v4184_v23 = vadd.f32 %v12985_v41, %v3481_v34 }
 0x5ae   : > { %v5779_v21 = vadd.f32 %v5778_v55, %v5593_v47  ;;  %v5783_v15 = vpop.f32.mrf.mxu2  ;;  %v4642_v61 = vmax.f32 %v4588_v9, 0.0  ;;  %v13402_v55 = vld [vmem:[%s14309_s3 + $0x1a8] sm:$0xff] }
 0x5af   : > { %7700 = vmatpush.bf16.msra.mxu0 %v13402_v55 }
 0x5b0   : > { %v4960_v4 = vsel %vm4759_vm2, %v4642_v61, 0.0  ;;  %v13452_v61 = vld [vmem:[%s14309_s3 + $0x188] sm:$0xff] }
 0x5b1   : > { %v4442_v10 = vpop.f32.mrf.mxu0  ;;  %v6033_v42 = vpop.f32.mrf.mxu3 }
 0x5b2   : > { %v4531_v1 = vadd.f32 %v4442_v10, %v4182_v26  ;;  %v10976_v38 = vld [vmem:[#allocation2 + $0x70] sm:$0xff]  ;;  %v13396_v58 = vadd.f32 %v6033_v42, %v5779_v21 }
 0x5b3   : > { %5819 = vmatmul.bf16.gmra.mxu2 %v10976_v38  ;;  %v5911_v39 = vrot.slane %v10976_v38, 1  ;;  %v5409_v12 = vshll.u32 %v10976_v38, 16  ;;  %v5413_v26 = vshrl.u32 %v10976_v38, 16 }
 0x5b4   : > { %v4589_v28 = vadd.f32 %v13177_v45, %v4531_v1 }
 0x5b5   : > { %v5596_v40 = vpop.f32.mrf.mxu1  ;;  %v5912_v36 = vsel %vm1163_vm1, %v5909_v29, %v5911_v39  ;;  %v5411_v57 = vrot.slane %v5409_v12, 1  ;;  %v13418_v29 = vld [vmem:[%s14309_s3 + $0x1a0] sm:$0xff] }
 0x5b6   : > { %v4643_v32 = vmax.f32 %v4589_v28, 0.0  ;;  %v5782_v30 = vadd.f32 %v5781_v63, %v5596_v40  ;;  %v5785_v44 = vpop.f32.mrf.mxu2  ;;  %6070 = vmatmul.bf16.gmra.mxu3 %v5912_v36  ;;  %7701 = vmatpush.bf16.msra.mxu0 %v13418_v29 }
 0x5b7   : > { %v5412_v18 = vsel %vm483_vm0, %v5407_v54, %v5411_v57  ;;  %v5415_v31 = vor.u32 %v5413_v26, %v5411_v57  ;;  %v13467_v57 = vld [vmem:[%s14309_s3 + $0x180] sm:$0xff] }
 0x5b8   : > { %v11238_v6 = vpack.c.bf16 %v4643_v32, %v4960_v4  ;;  %5630 = vmatmul.bf16.gmra.mxu1 %v5412_v18  ;;  %v11428_v32 = vld [vmem:[%s11542_s22 + $0xe8] sm:$0xff]  ;;  %v13481_v26 = vld [vmem:[%s14308_s2] ss:$0 sm:$0xff] }
 0x5b9   : > { %v4445_v51 = vpop.f32.mrf.mxu0  ;;  %v6036_v63 = vpop.f32.mrf.mxu3  ;;  %v4277_v40 = vrot.slane %v11428_v32, 1  ;;  %v4279_v32 = vrot.slane %v13136_v48, 1 }
 0x5ba   : > { %11324 = vst [vmem:[#allocation2 + $0x78] sm:$0xff] %v11238_v6   ;;  %v13424_v8 = vadd.f32 %v6036_v63, %v5782_v30  ;;  %v4532_v11 = vadd.f32 %v4445_v51, %v12970_v20  ;;  %7702 = vmatpush.bf16.msra.mxu0 %v13434_v53  ;;  %v13445_v20 = vld [vmem:[%s14309_s3 + $0x190] sm:$0xff] }
 0x5bb   : > { %v14486_v30 = vld [vmem:[#allocation17_spill] sm:$0xff]  ;;  %v4278_v51 = vsel %vm1163_vm1, %v4275_v27, %v4277_v40  ;;  %v4280_v48 = vsel %vm1163_vm1, %v4277_v40, %v4279_v32 }
 0x5bc   : > { %4484 = vmatmul.bf16.gmra.mxu0 %v4276_v52  ;;  %v4590_v25 = vadd.f32 %v13177_v45, %v4532_v11  ;;  %v3004_v3 = vadd.f32 %v14487_v62, %v14486_v30  ;;  %v14489_v11 = vld [vmem:[#allocation16_spill] sm:$0xff] }
 0x5bd   : > { %v5598_v7 = vpop.f32.mrf.mxu1 }
 0x5be   : > { %v5787_v13 = vpop.f32.mrf.mxu2  ;;  %7703 = vmatpush.bf16.msra.mxu0 %v13445_v20  ;;  %v4644_v1 = vmax.f32 %v4590_v25, 0.0  ;;  %v3483_v49 = vadd.f32 %v14488_v60, %v3004_v3  ;;  %v14491_v3 = vld [vmem:[#allocation21_spill] sm:$0xff]  ;;  %v14494_v60 = vld [vmem:[#allocation15_spill] sm:$0xff] }
 0x5c0   : > { %v4962_v6 = vsel %vm4764_vm3, %v4644_v1, 0.0 }
 0x5c1   : > { %v4447_v47 = vpop.f32.mrf.mxu0  ;;  %v10977_v9 = vld [vmem:[#allocation2 + $0x78] sm:$0xff]  ;;  %v6038_v15 = vpop.f32.mrf.mxu3 }
 0x5c2   : > { %v4533_v21 = vadd.f32 %v4447_v47, %v4184_v23  ;;  %v5913_v41 = vrot.slane %v10977_v9, 1  ;;  %v5417_v10 = vshll.u32 %v10977_v9, 16  ;;  %7704 = vmatpush.bf16.msra.mxu0 %v13452_v61  ;;  %v4186_v47 = vadd.f32 %v14490_v24, %v3483_v49  ;;  %v14495_v24 = vld [vmem:[#allocation24_spill] sm:$0xff] }
 0x5c3   : > { %5823 = vmatmul.bf16.gmra.mxu2 %v10977_v9 }
 0x5c4   : > { %v4591_v42 = vadd.f32 %v13177_v45, %v4533_v21  ;;  %v5914_v28 = vsel %vm1163_vm1, %v5911_v39, %v5913_v41  ;;  %v5419_v12 = vrot.slane %v5417_v10, 1 }
 0x5c5   : > { %v5600_v54 = vpop.f32.mrf.mxu1 }
 0x5c6   : > { %v4645_v36 = vmax.f32 %v4591_v42, 0.0  ;;  %v5786_v38 = vadd.f32 %v5785_v44, %v5600_v54  ;;  %v5790_v4 = vpop.f32.mrf.mxu2  ;;  %6074 = vmatmul.bf16.gmra.mxu3 %v5914_v28  ;;  %v5420_v45 = vsel %vm483_vm0, %v5415_v31, %v5419_v12  ;;  %7705 = vmatpush.bf16.msra.mxu0 %v13467_v57  ;;  %v5421_v28 = vshrl.u32 %v10977_v9, 16 }
 0x5c8   : > { %v4963_v39 = vsel %vm4759_vm2, %v4645_v36, 0.0  ;;  %5634 = vmatmul.bf16.gmra.mxu1 %v5420_v45  ;;  %v5423_v4 = vor.u32 %v5421_v28, %v5419_v12 }
 0x5c9   : > { %v11243_v18 = vpack.c.bf16 %v4963_v39, %v4962_v6  ;;  %v4450_v44 = vpop.f32.mrf.mxu0  ;;  %v6040_v52 = vpop.f32.mrf.mxu3  ;;  %v14492_v6 = vld [vmem:[#allocation46_spill] sm:$0xff] }
 0x5ca   : > { %v13473_v63 = vadd.f32 %v6040_v52, %v5786_v38  ;;  %v4534_v7 = vadd.f32 %v4450_v44, %v14489_v11  ;;  %v3006_v39 = vadd.f32 %v14492_v6, %v14491_v3 }
 0x5cb   : > { %11325 = vst [vmem:[#allocation2 + $0x80] sm:$0xff] %v11243_v18  }
 0x5cc   : > { %4489 = vmatmul.bf16.gmra.mxu0 %v4278_v51  ;;  %v4592_v10 = vadd.f32 %v13481_v26, %v4534_v7  ;;  %v3485_v49 = vadd.f32 %v14494_v60, %v3006_v39  ;;  %v14499_v60 = vld [vmem:[#allocation25_spill] sm:$0xff] }
 0x5cd   : > { %v5602_v34 = vpop.f32.mrf.mxu1 }
 0x5ce   : > { %v5788_v23 = vadd.f32 %v5787_v13, %v5602_v34  ;;  %v5791_v25 = vpop.f32.mrf.mxu2  ;;  %v4646_v30 = vmax.f32 %v4592_v10, 0.0 }
 0x5d1   : > { %v4452_v21 = vpop.f32.mrf.mxu0  ;;  %v6042_v15 = vpop.f32.mrf.mxu3 }
 0x5d2   : > { %v4535_v46 = vadd.f32 %v4452_v21, %v4186_v47  ;;  %v10978_v27 = vld [vmem:[#allocation2 + $0x80] sm:$0xff]  ;;  %v13484_v1 = vadd.f32 %v6042_v15, %v5788_v23  ;;  %v4188_v47 = vadd.f32 %v14495_v24, %v3485_v49 }
 0x5d3   : > { %5828 = vmatmul.bf16.gmra.mxu2 %v10978_v27  ;;  %v5915_v13 = vrot.slane %v10978_v27, 1  ;;  %v5425_v31 = vshll.u32 %v10978_v27, 16  ;;  %v5429_v32 = vshrl.u32 %v10978_v27, 16 }
 0x5d4   : > { %v4593_v42 = vadd.f32 %v13481_v26, %v4535_v46 }
 0x5d5   : > { %v5605_v54 = vpop.f32.mrf.mxu1  ;;  %v5916_v38 = vsel %vm1163_vm1, %v5913_v41, %v5915_v13  ;;  %v5427_v45 = vrot.slane %v5425_v31, 1  ;;  %v14493_v41 = vld [vmem:[#allocation20_spill] sm:$0xff] }
 0x5d6   : > { %v4647_v36 = vmax.f32 %v4593_v42, 0.0  ;;  %v5794_v62 = vpop.f32.mrf.mxu2  ;;  %6078 = vmatmul.bf16.gmra.mxu3 %v5916_v38 }
 0x5d7   : > { %v5428_v9 = vsel %vm483_vm0, %v5423_v4, %v5427_v45  ;;  %v5431_v4 = vor.u32 %v5429_v32, %v5427_v45  ;;  %v11066_v45 = vld [vmem:[%s14309_s3 + $0x108] sm:$0xff] }
 0x5d8   : > { %v4965_v18 = vsel %vm4764_vm3, %v4647_v36, 0.0  ;;  %5638 = vmatmul.bf16.gmra.mxu1 %v5428_v9  ;;  %v14497_v9 = vld [vmem:[#allocation18_spill] sm:$0xff]  ;;  %7015 = vmatpush.bf16.msrb.mxu2 %v11066_v45 }
 0x5d9   : > { %v11248_v44 = vpack.c.bf16 %v4965_v18, %v4646_v30  ;;  %v4455_v51 = vpop.f32.mrf.mxu0  ;;  %v6045_v52 = vpop.f32.mrf.mxu3  ;;  %v14496_v18 = vld [vmem:[#allocation26_spill] sm:$0xff] }
 0x5da   : > { %v4536_v12 = vadd.f32 %v4455_v51, %v14493_v41  ;;  %v11081_v41 = vld [vmem:[#allocation2 + $0x18] sm:$0xff] }
 0x5db   : > { %11326 = vst [vmem:[#allocation2 + $0x88] sm:$0xff] %v11248_v44   ;;  %v3008_v44 = vadd.f32 %v14497_v9, %v14496_v18 }
 0x5dc   : > { %4494 = vmatmul.bf16.gmra.mxu0 %v4280_v48  ;;  %v4594_v11 = vadd.f32 %v13481_v26, %v4536_v12 }
 0x5dd   : > { %v5606_v34 = vpop.f32.mrf.mxu1 }
 0x5de   : > { %v5792_v7 = vadd.f32 %v5791_v25, %v5606_v34  ;;  %v5796_v23 = vpop.f32.mrf.mxu2  ;;  %v4648_v42 = vmax.f32 %v4594_v11, 0.0 }
 0x5e0   : > { %v4966_v3 = vsel %vm4759_vm2, %v4648_v42, 0.0 }
 0x5e1   : > { %v4457_v21 = vpop.f32.mrf.mxu0  ;;  %v6046_v15 = vpop.f32.mrf.mxu3 }
 0x5e2   : > { %v4537_v46 = vadd.f32 %v4457_v21, %v4188_v47  ;;  %v10979_v10 = vld [vmem:[#allocation2 + $0x88] sm:$0xff]  ;;  %v13499_v40 = vadd.f32 %v6046_v15, %v5792_v7  ;;  %v14500_v7 = vld [vmem:[#allocation29_spill] sm:$0xff] }
 0x5e3   : > { %5832 = vmatmul.bf16.gmra.mxu2 %v10979_v10  ;;  %v5917_v31 = vrot.slane %v10979_v10, 1  ;;  %v5433_v36 = vshll.u32 %v10979_v10, 16  ;;  %v11035_v47 = vld [vmem:[%s14309_s3 + $0xc8] sm:$0xff]  ;;  %v5437_v32 = vshrl.u32 %v10979_v10, 16 }
 0x5e4   : > { %v4595_v28 = vadd.f32 %v13481_v26, %v4537_v46  ;;  %6413 = vmatpush.bf16.msrb.mxu1 %v11035_v47  ;;  %v14505_v47 = vld [vmem:[#allocation34_spill] sm:$0xff] }
 0x5e5   : > { %v5609_v38 = vpop.f32.mrf.mxu1  ;;  %v5918_v25 = vsel %vm1163_vm1, %v5915_v13, %v5917_v31  ;;  %v5435_v30 = vrot.slane %v5433_v36, 1 }
 0x5e6   : > { %v4649_v54 = vmax.f32 %v4595_v28, 0.0  ;;  %v5795_v6 = vadd.f32 %v5794_v62, %v5609_v38  ;;  %v5798_v39 = vpop.f32.mrf.mxu2  ;;  %6083 = vmatmul.bf16.gmra.mxu3 %v5918_v25  ;;  %v14498_v62 = vld [vmem:[#allocation49_spill] sm:$0xff] }
 0x5e7   : > { %v5436_v48 = vsel %vm483_vm0, %v5431_v4, %v5435_v30  ;;  %v3487_v12 = vadd.f32 %v14498_v62, %v3008_v44  ;;  %v5439_v4 = vor.u32 %v5437_v32, %v5435_v30  ;;  %v11082_v62 = vld [vmem:[#allocation2 + $0x20] sm:$0xff] }
 0x5e8   : > { %v11253_v51 = vpack.c.bf16 %v4649_v54, %v4966_v3  ;;  %5643 = vmatmul.bf16.gmra.mxu1 %v5436_v48  ;;  %v14501_v48 = vld [vmem:[#allocation31_spill] sm:$0xff] }
 0x5e9   : > { %v4460_v27 = vpop.f32.mrf.mxu0  ;;  %v6049_v52 = vpop.f32.mrf.mxu3  ;;  %v4190_v23 = vadd.f32 %v14500_v7, %v3487_v12  ;;  %v14503_v12 = vld [vmem:[#allocation23_spill] sm:$0xff] }
 0x5ea   : > { %11327 = vst [vmem:[#allocation2 + $0x90] sm:$0xff] %v11253_v51   ;;  %v13508_v13 = vadd.f32 %v6049_v52, %v5795_v6  ;;  %v4538_v49 = vadd.f32 %v4460_v27, %v14499_v60  ;;  %v14502_v27 = vld [vmem:[#allocation22_spill] sm:$0xff] }
 0x5eb   : > { %v3010_v52 = vadd.f32 %v14502_v27, %v14501_v48 }
 0x5ec   : > { %7706 = vmatmul.bf16.vlgmr.msra.gmra.mxu0 %v11081_v41  ;;  %v4596_v24 = vadd.f32 %v13481_v26, %v4538_v49 }
 0x5ed   : > { %v5611_v34 = vpop.f32.mrf.mxu1  ;;  %v3489_v60 = vadd.f32 %v14503_v12, %v3010_v52 }
 0x5ee   : > { %v5800_v11 = vpop.f32.mrf.mxu2  ;;  %v4650_v54 = vmax.f32 %v4596_v24, 0.0  ;;  %v14504_v34 = vld [vmem:[#allocation30_spill] sm:$0xff] }
 0x5f0   : > { %v4968_v10 = vsel %vm4764_vm3, %v4650_v54, 0.0 }
 0x5f1   : > { %v4462_v21 = vpop.f32.mrf.mxu0  ;;  %v10980_v46 = vld [vmem:[#allocation2 + $0x90] sm:$0xff]  ;;  %v6051_v42 = vpop.f32.mrf.mxu3 }
 0x5f2   : > { %v4539_v15 = vadd.f32 %v4462_v21, %v4190_v23  ;;  %v5919_v28 = vrot.slane %v10980_v46, 1  ;;  %v5441_v36 = vshll.u32 %v10980_v46, 16  ;;  %v4192_v21 = vadd.f32 %v14505_v47, %v3489_v60  ;;  %v11083_v60 = vld [vmem:[#allocation2 + $0x28] sm:$0xff] }
 0x5f3   : > { %5836 = vmatmul.bf16.gmra.mxu2 %v10980_v46 }
 0x5f4   : > { %v4597_v38 = vadd.f32 %v13481_v26, %v4539_v15  ;;  %v5920_v25 = vsel %vm1163_vm1, %v5917_v31, %v5919_v28  ;;  %v5443_v3 = vrot.slane %v5441_v36, 1 }
 0x5f5   : > { %v5613_v18 = vpop.f32.mrf.mxu1 }
 0x5f6   : > { %v4651_v6 = vmax.f32 %v4597_v38, 0.0  ;;  %v5799_v9 = vadd.f32 %v5798_v39, %v5613_v18  ;;  %v5803_v44 = vpop.f32.mrf.mxu2  ;;  %6087 = vmatmul.bf16.gmra.mxu3 %v5920_v25  ;;  %v5444_v51 = vsel %vm483_vm0, %v5439_v4, %v5443_v3 }
 0x5f8   : > { %v4969_v41 = vsel %vm4759_vm2, %v4651_v6, 0.0  ;;  %5647 = vmatmul.bf16.gmra.mxu1 %v5444_v51  ;;  %v5445_v6 = vshrl.u32 %v10980_v46, 16 }
 0x5f9   : > { %v11258_v45 = vpack.c.bf16 %v4969_v41, %v4968_v10  ;;  %v4465_v31 = vpop.f32.mrf.mxu0  ;;  %v6053_v30 = vpop.f32.mrf.mxu3  ;;  %v14506_v10 = vld [vmem:[#allocation36_spill] sm:$0xff]  ;;  %v14507_v41 = vld [vmem:[#allocation27_spill] sm:$0xff] }
 0x5fa   : > { %v13529_v39 = vadd.f32 %v6053_v30, %v5799_v9  ;;  %v4540_v7 = vadd.f32 %v4465_v31, %v14504_v34  ;;  %v5447_v51 = vor.u32 %v5445_v6, %v5443_v3 }
 0x5fb   : > { %11328 = vst [vmem:[#allocation2 + $0x98] sm:$0xff] %v11258_v45   ;;  %v3012_v45 = vadd.f32 %v14507_v41, %v14506_v10 }
 0x5fc   : > { %7711 = vmatmul.bf16.gmra.mxu0 %v11082_v62  ;;  %v4598_v54 = vadd.f32 %v13481_v26, %v4540_v7 }
 0x5fd   : > { %v5615_v49 = vpop.f32.mrf.mxu1 }
 0x5fe   : > { %v5801_v23 = vadd.f32 %v5800_v11, %v5615_v49  ;;  %v5804_v24 = vpop.f32.mrf.mxu2  ;;  %v4652_v27 = vmax.f32 %v4598_v54, 0.0  ;;  %v14509_v49 = vld [vmem:[#allocation28_spill] sm:$0xff] }
 0x5ff   : > { %v3491_v34 = vadd.f32 %v14509_v49, %v3012_v45 }
 0x601   : > { %v4467_v15 = vpop.f32.mrf.mxu0  ;;  %v6055_v32 = vpop.f32.mrf.mxu3 }
 0x602   : > { %v4541_v42 = vadd.f32 %v4467_v15, %v4192_v21  ;;  %v10981_v36 = vld [vmem:[#allocation2 + $0x98] sm:$0xff]  ;;  %v13535_v38 = vadd.f32 %v6055_v32, %v5801_v23 }
 0x603   : > { %5841 = vmatmul.bf16.gmra.mxu2 %v10981_v36  ;;  %v5921_v4 = vrot.slane %v10981_v36, 1  ;;  %v5449_v18 = vshll.u32 %v10981_v36, 16  ;;  %v14510_v15 = vld [vmem:[#allocation41_spill] sm:$0xff] }
 0x604   : > { %v4599_v25 = vadd.f32 %v13481_v26, %v4541_v42  ;;  %v4194_v42 = vadd.f32 %v14510_v15, %v3491_v34  ;;  %v11084_v34 = vld [vmem:[#allocation2 + $0x30] sm:$0xff] }
 0x605   : > { %v5618_v44 = vpop.f32.mrf.mxu1  ;;  %v5922_v11 = vsel %vm1163_vm1, %v5919_v28, %v5921_v4  ;;  %v5451_v48 = vrot.slane %v5449_v18, 1  ;;  %v14508_v28 = vld [vmem:[#allocation35_spill] sm:$0xff] }
 0x606   : > { %v4653_v9 = vmax.f32 %v4599_v25, 0.0  ;;  %v5807_v52 = vpop.f32.mrf.mxu2  ;;  %6091 = vmatmul.bf16.gmra.mxu3 %v5922_v11 }
 0x607   : > { %v5452_v30 = vsel %vm483_vm0, %v5447_v51, %v5451_v48  ;;  %v5453_v51 = vshrl.u32 %v10981_v36, 16 }
 0x608   : > { %v4971_v31 = vsel %vm4764_vm3, %v4653_v9, 0.0  ;;  %5651 = vmatmul.bf16.gmra.mxu1 %v5452_v30 }
 0x609   : > { %v11263_v62 = vpack.c.bf16 %v4971_v31, %v4652_v27  ;;  %v4470_v46 = vpop.f32.mrf.mxu0  ;;  %v6058_v12 = vpop.f32.mrf.mxu3  ;;  %v5455_v45 = vor.u32 %v5453_v51, %v5451_v48  ;;  %v11065_v48 = vld [vmem:[%s14309_s3 + $0x100] sm:$0xff] }
 0x60a   : > { %v4542_v3 = vadd.f32 %v4470_v46, %v14508_v28  ;;  %v14511_v12 = vld [vmem:[#allocation32_spill] sm:$0xff]  ;;  %7016 = vmatpush.bf16.msrb.mxu2 %v11065_v48 }
 0x60b   : > { %11329 = vst [vmem:[#allocation2 + $0xa0] sm:$0xff] %v11263_v62  }
 0x60c   : > { %7715 = vmatmul.bf16.gmra.mxu0 %v11083_v60  ;;  %v4600_v23 = vadd.f32 %v13481_v26, %v4542_v3  ;;  %v3014_v60 = vadd.f32 %v14511_v12, %v13081_v43 }
 0x60d   : > { %v5619_v7 = vpop.f32.mrf.mxu1 }
 0x60e   : > { %v5805_v47 = vadd.f32 %v5804_v24, %v5619_v7  ;;  %v5809_v21 = vpop.f32.mrf.mxu2  ;;  %v4654_v18 = vmax.f32 %v4600_v23, 0.0 }
 0x60f   : > { %v14513_v21 = vld [vmem:[#allocation45_spill] sm:$0xff] }
 0x610   : > { %v4972_v30 = vsel %vm4759_vm2, %v4654_v18, 0.0 }
 0x611   : > { %v4472_v32 = vpop.f32.mrf.mxu0  ;;  %v6059_v25 = vpop.f32.mrf.mxu3 }
 0x612   : > { %v4543_v54 = vadd.f32 %v4472_v32, %v4194_v42  ;;  %v10982_v6 = vld [vmem:[#allocation2 + $0xa0] sm:$0xff]  ;;  %v13548_v9 = vadd.f32 %v6059_v25, %v5805_v47 }
 0x613   : > { %5845 = vmatmul.bf16.gmra.mxu2 %v10982_v6  ;;  %v5923_v11 = vrot.slane %v10982_v6, 1  ;;  %v5457_v27 = vshll.u32 %v10982_v6, 16  ;;  %v11034_v32 = vld [vmem:[%s14309_s3 + $0xc0] sm:$0xff] }
 0x614   : > { %v4601_v44 = vadd.f32 %v13481_v26, %v4543_v54  ;;  %6414 = vmatpush.bf16.msrb.mxu1 %v11034_v32 }
 0x615   : > { %v5622_v41 = vpop.f32.mrf.mxu1  ;;  %v5924_v24 = vsel %vm1163_vm1, %v5921_v4, %v5923_v11  ;;  %v5459_v31 = vrot.slane %v5457_v27, 1  ;;  %v5461_v27 = vshrl.u32 %v10982_v6, 16 }
 0x616   : > { %v4655_v10 = vmax.f32 %v4601_v44, 0.0  ;;  %v5808_v62 = vadd.f32 %v5807_v52, %v5622_v41  ;;  %v5811_v46 = vpop.f32.mrf.mxu2  ;;  %6096 = vmatmul.bf16.gmra.mxu3 %v5924_v24  ;;  %v14512_v52 = vld [vmem:[#allocation33_spill] sm:$0xff] }
 0x617   : > { %v5460_v3 = vsel %vm483_vm0, %v5455_v45, %v5459_v31  ;;  %v3493_v7 = vadd.f32 %v14512_v52, %v3014_v60  ;;  %v5463_v45 = vor.u32 %v5461_v27, %v5459_v31  ;;  %v11080_v31 = vld [vmem:[%s14309_s3 + $0x178] sm:$0xff]  ;;  %v11078_v27 = vld [vmem:[%s14309_s3 + $0x168] sm:$0xff] }
 0x618   : > { %v11268_v28 = vpack.c.bf16 %v4655_v10, %v4972_v30  ;;  %5656 = vmatmul.bf16.gmra.mxu1 %v5460_v3  ;;  %v11085_v52 = vld [vmem:[#allocation2 + $0x38] sm:$0xff]  ;;  %7296 = vmatpush.bf16.msra.mxu3 %v11080_v31 }
 0x619   : > { %v4475_v36 = vpop.f32.mrf.mxu0  ;;  %v6062_v49 = vpop.f32.mrf.mxu3  ;;  %v4196_v15 = vadd.f32 %v14513_v21, %v3493_v7  ;;  %v14518_v31 = vld [vmem:[#allocation42_spill] sm:$0xff] }
 0x61a   : > { %11330 = vst [vmem:[#allocation2 + $0xa8] sm:$0xff] %v11268_v28   ;;  %v13557_v4 = vadd.f32 %v6062_v49, %v5808_v62  ;;  %v4544_v23 = vadd.f32 %v4475_v36, %v13078_v59  ;;  %v14514_v36 = vld [vmem:[#allocation38_spill] sm:$0xff] }
 0x61b   : > { %v3016_v49 = vadd.f32 %v14514_v36, %v13098_v22  ;;  %v14515_v22 = vld [vmem:[#allocation39_spill] sm:$0xff] }
 0x61c   : > { %7719 = vmatmul.bf16.gmra.mxu0 %v11084_v34  ;;  %v4602_v42 = vadd.f32 %v13481_v26, %v4544_v23 }
 0x61d   : > { %v5624_v43 = vpop.f32.mrf.mxu1  ;;  %v3495_v23 = vadd.f32 %v14515_v22, %v3016_v49 }
 0x61e   : > { %v5813_v47 = vpop.f32.mrf.mxu2  ;;  %v4656_v10 = vmax.f32 %v4602_v42, 0.0  ;;  %v11079_v43 = vld [vmem:[%s14309_s3 + $0x170] sm:$0xff] }
 0x61f   : > { %7297 = vmatpush.bf16.msra.mxu3 %v11079_v43  ;;  %v11086_v43 = vld [vmem:[#allocation2 + $0x40] sm:$0xff] }
 0x620   : > { %v4974_v6 = vsel %vm4764_vm3, %v4656_v10, 0.0 }
 0x621   : > { %v4477_v54 = vpop.f32.mrf.mxu0  ;;  %v10983_v25 = vld [vmem:[#allocation2 + $0xa8] sm:$0xff]  ;;  %v6064_v44 = vpop.f32.mrf.mxu3 }
 0x622   : > { %v4545_v18 = vadd.f32 %v4477_v54, %v4196_v15  ;;  %v5925_v51 = vrot.slane %v10983_v25, 1  ;;  %v5465_v59 = vshll.u32 %v10983_v25, 16  ;;  %v14516_v54 = vld [vmem:[#allocation47_spill] sm:$0xff] }
 0x623   : > { %5849 = vmatmul.bf16.gmra.mxu2 %v10983_v25  ;;  %7298 = vmatpush.bf16.msra.mxu3 %v11078_v27  ;;  %v6552_v27 = vld [vmem:[#allocation2 + $0xc] sm:$0xff]  }
 0x624   : > { %v4603_v41 = vadd.f32 %v13481_v26, %v4545_v18  ;;  %v5926_v24 = vsel %vm1163_vm1, %v5923_v11, %v5925_v51  ;;  %v5467_v30 = vrot.slane %v5465_v59, 1  ;;  %v4198_v18 = vadd.f32 %v14516_v54, %v3495_v23 }
 0x625   : > { %v5626_v12 = vpop.f32.mrf.mxu1 }
 0x626   : > { %v4657_v62 = vmax.f32 %v4603_v41, 0.0  ;;  %v5812_v60 = vadd.f32 %v5811_v46, %v5626_v12  ;;  %v5816_v28 = vpop.f32.mrf.mxu2  ;;  %6100 = vmatmul.bf16.gmra.mxu3 %v5926_v24  ;;  %v5468_v3 = vsel %vm483_vm0, %v5463_v45, %v5467_v30 }
 0x628   : > { %v4975_v34 = vsel %vm4759_vm2, %v4657_v62, 0.0  ;;  %5660 = vmatmul.bf16.gmra.mxu1 %v5468_v3  ;;  %v5469_v62 = vshrl.u32 %v10983_v25, 16 }
 0x629   : > { %v11273_v48 = vpack.c.bf16 %v4975_v34, %v4974_v6  ;;  %v4480_v11 = vpop.f32.mrf.mxu0  ;;  %v6066_v46 = vpop.f32.mrf.mxu3 }
 0x62a   : > { %v13581_v7 = vadd.f32 %v6066_v46, %v5812_v60  ;;  %v4546_v15 = vadd.f32 %v4480_v11, %v13092_v33  ;;  %v11077_v60 = vld [vmem:[%s14309_s3 + $0x160] sm:$0xff]  ;;  %v5471_v49 = vor.u32 %v5469_v62, %v5467_v30 }
 0x62b   : > { %11331 = vst [vmem:[#allocation2 + $0xb0] sm:$0xff] %v11273_v48   ;;  %v14517_v11 = vld [vmem:[#allocation50_spill] sm:$0xff]  ;;  %7299 = vmatpush.bf16.msra.mxu3 %v11077_v60  ;;  %v14521_v62 = vld [vmem:[#allocation51_spill] sm:$0xff] }
 0x62c   : > { %7724 = vmatmul.bf16.gmra.mxu0 %v11085_v52  ;;  %v4604_v24 = vadd.f32 %v13481_v26, %v4546_v15  ;;  %v3018_v46 = vadd.f32 %v14518_v31, %v14517_v11 }
 0x62d   : > { %v5628_v21 = vpop.f32.mrf.mxu1 }
 0x62e   : > { %v5814_v42 = vadd.f32 %v5813_v47, %v5628_v21  ;;  %v5817_v32 = vpop.f32.mrf.mxu2  ;;  %v4658_v34 = vmax.f32 %v4604_v24, 0.0  ;;  %v14519_v21 = vld [vmem:[#allocation48_spill] sm:$0xff] }
 0x631   : > { %v4482_v44 = vpop.f32.mrf.mxu0  ;;  %v6068_v10 = vpop.f32.mrf.mxu3 }
 0x632   : > { %v4547_v59 = vadd.f32 %v4482_v44, %v4198_v18  ;;  %v10984_v41 = vld [vmem:[#allocation2 + $0xb0] sm:$0xff]  ;;  %v13593_v45 = vadd.f32 %v6068_v10, %v5814_v42 }
 0x633   : > { %5854 = vmatmul.bf16.gmra.mxu2 %v10984_v41  ;;  %v5927_v47 = vrot.slane %v10984_v41, 1  ;;  %v5473_v12 = vshll.u32 %v10984_v41, 16  ;;  %v14520_v42 = vld [vmem:[#allocation44_spill] sm:$0xff] }
 0x634   : > { %v4605_v33 = vadd.f32 %v13481_v26, %v4547_v59  ;;  %v3497_v54 = vadd.f32 %v14520_v42, %v3018_v46  ;;  %v11075_v18 = vld [vmem:[%s14309_s3 + $0x150] sm:$0xff]  ;;  %v5477_v46 = vshrl.u32 %v10984_v41, 16 }
 0x635   : > { %v5631_v3 = vpop.f32.mrf.mxu1  ;;  %v5928_v36 = vsel %vm1163_vm1, %v5925_v51, %v5927_v47  ;;  %v5475_v6 = vrot.slane %v5473_v12, 1  ;;  %v11076_v51 = vld [vmem:[%s14309_s3 + $0x158] sm:$0xff]  ;;  %v13613_v59 = vld [vmem:[#allocation2 + $0xc] sm:$0xf0] }
 0x636   : > { %v4659_v28 = vmax.f32 %v4605_v33, 0.0  ;;  %v5820_v48 = vpop.f32.mrf.mxu2  ;;  %6104 = vmatmul.bf16.gmra.mxu3 %v5928_v36  ;;  %v4200_v12 = vadd.f32 %v14521_v62, %v3497_v54  ;;  %v13637_v54 = vld [vmem:[#allocation2 + $0x14] sm:$0xff] }
 0x637   : > { %v5476_v52 = vsel %vm483_vm0, %v5471_v49, %v5475_v6  ;;  %7300 = vmatpush.bf16.msra.mxu3 %v11076_v51  ;;  %v11143_v62 = vld [vmem:[%s14309_s3 + $0x1f8] sm:$0xff] }
 0x638   : > { %v4977_v25 = vsel %vm4764_vm3, %v4659_v28, 0.0  ;;  %5664 = vmatmul.bf16.gmra.mxu1 %v5476_v52  ;;  %v11074_v28 = vld [vmem:[%s14309_s3 + $0x148] sm:$0xff]  ;;  %v11073_v52 = vld [vmem:[%s14309_s3 + $0x140] sm:$0xff] }
 0x639   : > { %v11278_v22 = vpack.c.bf16 %v4977_v25, %v4658_v34  ;;  %v4485_v23 = vpop.f32.mrf.mxu0  ;;  %v6071_v30 = vpop.f32.mrf.mxu3  ;;  %8300 = vmatpush.bf16.msra.mxu1 %v11143_v62  ;;  %v6753_v62 = vshrl.u32 %v13637_v54, 16 }
 0x63a   : > { %v4548_v15 = vadd.f32 %v4485_v23, %v14519_v21 }
 0x63b   : > { %11332 = vst [vmem:[#allocation2 + $0xb8] sm:$0xff] %v11278_v22   ;;  %7301 = vmatpush.bf16.msra.mxu3 %v11075_v18  ;;  %v11151_v22 = vld [vmem:[%s14309_s3 + $0x238] sm:$0xff] }
 0x63c   : > { %7728 = vmatmul.bf16.gmra.mxu0 %v11086_v43  ;;  %v4606_v10 = vadd.f32 %v13481_v26, %v4548_v15  ;;  %v5479_v43 = vor.u32 %v5477_v46, %v5475_v6  ;;  %8587 = vmatpush.bf16.msra.mxu2 %v11151_v22 }
 0x63d   : > { %v5632_v44 = vpop.f32.mrf.mxu1 }
 0x63e   : > { %v5818_v24 = vadd.f32 %v5817_v32, %v5632_v44  ;;  %v5822_v33 = vpop.f32.mrf.mxu2  ;;  %v4660_v34 = vmax.f32 %v4606_v10, 0.0 }
 0x63f   : > { %7302 = vmatpush.bf16.msra.mxu3 %v11074_v28 }
 0x640   : > { %v4978_v41 = vsel %vm4759_vm2, %v4660_v34, 0.0 }
 0x641   : > { %v4487_v60 = vpop.f32.mrf.mxu0  ;;  %v6072_v36 = vpop.f32.mrf.mxu3 }
 0x642   : > { %v4549_v3 = vadd.f32 %v4487_v60, %v4200_v12  ;;  %v13620_v49 = vld [vmem:[#allocation2 + $0xb8] sm:$0xff]  ;;  %v13622_v11 = vadd.f32 %v6072_v36, %v5818_v24  ;;  %v6744_v24 = vshll.u32 %v6552_v27, 16 }
 0x643   : > { %5858 = vmatmul.bf16.gmra.mxu2 %v13620_v49  ;;  %v5929_v32 = vrot.slane %v13620_v49, 1  ;;  %v5481_v25 = vshll.u32 %v13620_v49, 16  ;;  %7303 = vmatpush.bf16.msra.mxu3 %v11073_v52  ;;  %v5485_v2 = vshrl.u32 %v13620_v49, 16 }
 0x644   : > { %v4607_v31 = vadd.f32 %v13481_v26, %v4549_v3  ;;  %v6746_v60 = vrot.slane %v6744_v24, 1  ;;  %v6742_v3 = vshrl.u32 %v6552_v27, 16 }
 0x645   : > { %v5635_v51 = vpop.f32.mrf.mxu1  ;;  %v5930_v30 = vsel %vm1163_vm1, %v5927_v47, %v5929_v32  ;;  %v5483_v21 = vrot.slane %v5481_v25, 1 }
 0x646   : > { %v4661_v23 = vmax.f32 %v4607_v31, 0.0  ;;  %v5821_v15 = vadd.f32 %v5820_v48, %v5635_v51  ;;  %v5824_v42 = vpop.f32.mrf.mxu2  ;;  %6109 = vmatmul.bf16.gmra.mxu3 %v5930_v30  ;;  %v6749_v48 = vshll.u32 %v13637_v54, 16  ;;  %v14522_v31 = vld [vmem:[#allocation52_spill] sm:$0xff]  ;;  %v6747_v52 = vor.u32 %v6746_v60, %v6742_v3 }
 0x647   : > { %v5484_v44 = vsel %vm483_vm0, %v5479_v43, %v5483_v21  ;;  %11359 = vmatpush.bf16.msrb.mxu3 %v13385_v16 }
 0x648   : > { %v11283_v18 = vpack.c.bf16 %v4661_v23, %v4978_v41  ;;  %5669 = vmatmul.bf16.gmra.mxu1 %v5484_v44  ;;  %v6751_v36 = vrot.slane %v6749_v48, 1  ;;  %v5487_v44 = vor.u32 %v5485_v2, %v5483_v21 }
 0x649   : > { %v4490_v10 = vpop.f32.mrf.mxu0  ;;  %v6075_v6 = vpop.f32.mrf.mxu3 }
 0x64a   : > { %11333 = vst [vmem:[#allocation2 + $0xc0] sm:$0xff] %v11283_v18   ;;  %v4550_v47 = vadd.f32 %v4490_v10, %v13121_v0  ;;  %v13642_v33 = vadd.f32 %v6075_v6, %v5821_v15  ;;  %v13657_v18 = vld [vmem:[#allocation2 + $0x1c] sm:$0xff] }
 0x64b   : > { %11360 = vmatpush.bf16.msrb.mxu3 %v13393_v17  ;;  %v6752_v17 = vsel %vm483_vm0, %v6747_v52, %v6751_v36  ;;  %v6757_v49 = vshll.u32 %v13657_v18, 16 }
 0x64c   : > { %v4608_v12 = vadd.f32 %v13481_v26, %v4550_v47  ;;  %7732 = vmatmul.bf16.gmra.mxu0 %v11087_v37  ;;  %v11088_v37 = vld [vmem:[#allocation2 + $0x50] sm:$0xff] }
 0x64d   : > { %v5637_v28 = vpop.f32.mrf.mxu1 }
 0x64e   : > { %v4662_v16 = vmax.f32 %v4608_v12, 0.0  ;;  %v5826_v0 = vpop.f32.mrf.mxu2  ;;  %v6759_v12 = vrot.slane %v6757_v49, 1  ;;  %v11011_v49 = vld [vmem:[#allocation2 + $0x14] sm:$0xff] }
 0x64f   : > { %11361 = vmatpush.bf16.msrb.mxu3 %v13402_v55 }
 0x650   : > { %v4980_v34 = vsel %vm4764_vm3, %v4662_v16, 0.0  ;;  %v6755_v16 = vor.u32 %v6753_v62, %v6751_v36 }
 0x651   : > { %v11288_v46 = vpack.c.bf16 %v14522_v31, %v4980_v34  ;;  %v4492_v25 = vpop.f32.mrf.mxu0  ;;  %v5156_v22 = vld [vmem:[#allocation2 + $0xc0] sm:$0x1]  ;;  %v6077_v26 = vpop.f32.mrf.mxu3  ;;  %v7176_v31 = vrot.slane %v13637_v54, 1 }
 0x652   : > { %v5271_v23 = vunpack.c.l.b16 %v5156_v22  ;;  %v6760_v34 = vsel %vm483_vm0, %v6755_v16, %v6759_v12  ;;  %v13674_v25 = vld [vmem:[#allocation2 + $0x24] sm:$0xff]  ;;  %v11089_v22 = vld [vmem:[#allocation2 + $0x58] sm:$0xff] }
 0x653   : > { %11334 = vst [vmem:[#allocation2 + $0xc8] sm:$0xff] %v11288_v46   ;;  %7017 = vmatmul.bf16.vlgmr.msrb.gmra.mxu2 %v6752_v17  ;;  %11362 = vmatpush.bf16.msrb.mxu3 %v13418_v29  ;;  %v6765_v26 = vshll.u32 %v13674_v25, 16 }
 0x654   : > { %v5296_v51 = vpack.c.b16 %v5271_v23, %v5271_v23 }
 0x655   : > { %v5639_v27 = vpop.f32.mrf.mxu1 }
 0x656   : > { %v5931_v30 = vrot.slane %v5296_v51, 1  ;;  %v5489_v43 = vshll.u32 %v5296_v51, 16  ;;  %v5825_v41 = vadd.f32 %v5824_v42, %v5639_v27  ;;  %v5829_v15 = vpop.f32.mrf.mxu2  ;;  %v11431_v42 = vld [vmem:[#allocation2 + $0xc] sm:$0xe]  ;;  %v6767_v51 = vrot.slane %v6765_v26, 1  ;;  %v11012_v26 = vld [vmem:[#allocation2 + $0x1c] sm:$0xff] }
 0x657   : > { %11363 = vmatpush.bf16.msrb.mxu3 %v13434_v53  ;;  %v11432_v53 = vor.u32 %v11431_v42, %v13613_v59  ;;  %v7178_v15 = vrot.slane %v13657_v18, 1 }
 0x658   : > { %v5932_v55 = vsel %vm1163_vm1, %v5929_v32, %v5931_v30  ;;  %v5491_v10 = vrot.slane %v5489_v43, 1 }
 0x659   : > { %v4495_v24 = vpop.f32.mrf.mxu0  ;;  %6113 = vmatmul.bf16.gmra.mxu3 %v5932_v55  ;;  %v6079_v6 = vpop.f32.mrf.mxu3  ;;  %v11150_v55 = vld [vmem:[%s14309_s3 + $0x230] sm:$0xff] }
 0x65a   : > { %v5492_v47 = vsel %vm483_vm0, %v5487_v44, %v5491_v10  ;;  %v13662_v29 = vadd.f32 %v6079_v6, %v5825_v41  ;;  %8588 = vmatpush.bf16.msra.mxu2 %v11150_v55  ;;  %v7179_v6 = vsel %vm1163_vm1, %v7176_v31, %v7178_v15 }
 0x65b   : > { %5673 = vmatmul.bf16.gmra.mxu1 %v5492_v47  ;;  %11364 = vmatpush.bf16.msrb.mxu3 %v13445_v20  ;;  %v13690_v47 = vld [vmem:[#allocation2 + $0x2c] sm:$0xff] }
 0x65c   : > { %7737 = vmatmul.bf16.gmra.mxu0 %v11088_v37 }
 0x65d   : > { %v5641_v48 = vpop.f32.mrf.mxu1 }
 0x65e   : > { %v5827_v32 = vadd.f32 %v5826_v0, %v5641_v48  ;;  %v5830_v21 = vpop.f32.mrf.mxu2  ;;  %v7175_v0 = vrot.slane %v11432_v53, 1  ;;  %v11090_v48 = vld [vmem:[#allocation2 + $0x60] sm:$0xff] }
 0x65f   : > { %11365 = vmatpush.bf16.msrb.mxu3 %v13452_v61  ;;  %v11010_v61 = vld [vmem:[#allocation2 + $0xc] sm:$0xff] }
 0x660   : > { %v7177_v36 = vsel %vm1163_vm1, %v7175_v0, %v7176_v31 }
 0x661   : > { %v4497_v60 = vpop.f32.mrf.mxu0  ;;  %v6081_v28 = vpop.f32.mrf.mxu3 }
 0x662   : > { %v13669_v3 = vadd.f32 %v6081_v28, %v5827_v32  ;;  %v6769_v60 = vshrl.u32 %v13674_v25, 16 }
 0x663   : > { %7022 = vmatmul.bf16.gmra.mxu2 %v6760_v34  ;;  %11366 = vmatpush.bf16.msrb.mxu3 %v13467_v57  ;;  %v6761_v57 = vshrl.u32 %v13657_v18, 16  ;;  %v6773_v18 = vshll.u32 %v13690_v47, 16 }
 0x664   : > { %v6771_v53 = vor.u32 %v6769_v60, %v6767_v51 }
 0x665   : > { %v5644_v20 = vpop.f32.mrf.mxu1  ;;  %v6763_v30 = vor.u32 %v6761_v57, %v6759_v12  ;;  %v6775_v16 = vrot.slane %v6773_v18, 1 }
 0x666   : > { %v5833_v46 = vpop.f32.mrf.mxu2  ;;  %v7180_v20 = vrot.slane %v13674_v25, 1 }
 0x667   : > { %v6768_v41 = vsel %vm483_vm0, %v6763_v30, %v6767_v51  ;;  %v6776_v31 = vsel %vm483_vm0, %v6771_v53, %v6775_v16 }
 0x669   : > { %7304 = vmatmul.bf16.vlgmr.msra.gmra.mxu3 %v7177_v36  ;;  %v13677_v59 = vpop.f32.mrf.mxu0  ;;  %v6084_v52 = vpop.f32.mrf.mxu3 }
 0x66a   : > { %v7181_v52 = vsel %vm1163_vm1, %v7178_v15, %v7180_v20 }
 0x66b   : > { %6415 = vmatmul.bf16.vlgmr.msrb.gmra.mxu1 %v11010_v61  ;;  %v13704_v61 = vld [vmem:[#allocation2 + $0x34] sm:$0xff] }
 0x66c   : > { %7741 = vmatmul.bf16.gmra.mxu0 %v11089_v22  ;;  %v6781_v57 = vshll.u32 %v13704_v61, 16 }
 0x66d   : > { %v5645_v54 = vpop.f32.mrf.mxu1 }
 0x66e   : > { %v5831_v23 = vadd.f32 %v5830_v21, %v5645_v54  ;;  %v5835_v17 = vpop.f32.mrf.mxu2  ;;  %v11142_v21 = vld [vmem:[%s14309_s3 + $0x1f0] sm:$0xff] }
 0x66f   : > { %8301 = vmatpush.bf16.msra.mxu1 %v11142_v21  ;;  %v11013_v21 = vld [vmem:[#allocation2 + $0x24] sm:$0xff] }
 0x671   : > { %v13681_v27 = vpop.f32.mrf.mxu0  ;;  %v6085_v2 = vpop.f32.mrf.mxu3 }
 0x672   : > { %v13683_v43 = vadd.f32 %v6085_v2, %v5831_v23  ;;  %v11091_v23 = vld [vmem:[#allocation2 + $0x68] sm:$0xff]  ;;  %v6777_v2 = vshrl.u32 %v13690_v47, 16 }
 0x673   : > { %7026 = vmatmul.bf16.gmra.mxu2 %v6768_v41  ;;  %v6783_v41 = vrot.slane %v6781_v57, 1 }
 0x674   : > { %v6779_v15 = vor.u32 %v6777_v2, %v6775_v16 }
 0x675   : > { %v5648_v44 = vpop.f32.mrf.mxu1 }
 0x676   : > { %v5834_v10 = vadd.f32 %v5833_v46, %v5648_v44  ;;  %v5837_v24 = vpop.f32.mrf.mxu2 }
 0x679   : > { %7309 = vmatmul.bf16.gmra.mxu3 %v7179_v6  ;;  %v7712_v37 = vpop.f32.mrf.mxu0  ;;  %v6088_v42 = vpop.f32.mrf.mxu3  ;;  %v7182_v6 = vrot.slane %v13690_v47, 1  ;;  %v6785_v47 = vshrl.u32 %v13704_v61, 16 }
 0x67a   : > { %v13693_v32 = vadd.f32 %v6088_v42, %v5834_v10  ;;  %v13717_v42 = vld [vmem:[#allocation2 + $0x3c] sm:$0xff] }
 0x67b   : > { %6420 = vmatmul.bf16.gmra.mxu1 %v11011_v49  ;;  %v6789_v60 = vshll.u32 %v13717_v42, 16 }
 0x67c   : > { %7745 = vmatmul.bf16.gmra.mxu0 %v11090_v48  ;;  %v7183_v48 = vsel %vm1163_vm1, %v7180_v20, %v7182_v6 }
 0x67d   : > { %v5650_v62 = vpop.f32.mrf.mxu1 }
 0x67e   : > { %v5839_v12 = vpop.f32.mrf.mxu2 }
 0x681   : > { %v13700_v28 = vpop.f32.mrf.mxu0  ;;  %v6090_v34 = vpop.f32.mrf.mxu3 }
 0x683   : > { %7030 = vmatmul.bf16.gmra.mxu2 %v6776_v31  ;;  %v6791_v31 = vrot.slane %v6789_v60, 1 }
 0x685   : > { %v5652_v0 = vpop.f32.mrf.mxu1 }
 0x686   : > { %v5838_v46 = vadd.f32 %v5837_v24, %v5652_v0  ;;  %v5842_v36 = vpop.f32.mrf.mxu2  ;;  %v6784_v24 = vsel %vm483_vm0, %v6779_v15, %v6783_v41  ;;  %v11093_v15 = vld [vmem:[#allocation2 + $0x78] sm:$0xff] }
 0x689   : > { %7313 = vmatmul.bf16.gmra.mxu3 %v7181_v52  ;;  %v13707_v22 = vpop.f32.mrf.mxu0  ;;  %v6092_v54 = vpop.f32.mrf.mxu3 }
 0x68a   : > { %v13709_v17 = vadd.f32 %v6092_v54, %v5838_v46  ;;  %v6787_v46 = vor.u32 %v6785_v47, %v6783_v41  ;;  %v11149_v54 = vld [vmem:[%s14309_s3 + $0x228] sm:$0xff] }
 0x68b   : > { %6424 = vmatmul.bf16.gmra.mxu1 %v11012_v26  ;;  %v7184_v26 = vrot.slane %v13704_v61, 1  ;;  %8589 = vmatpush.bf16.msra.mxu2 %v11149_v54  ;;  %v11014_v41 = vld [vmem:[#allocation2 + $0x2c] sm:$0xff]  ;;  %v11015_v54 = vld [vmem:[#allocation2 + $0x34] sm:$0xff] }
 0x68c   : > { %7750 = vmatmul.bf16.gmra.mxu0 %v11091_v23  ;;  %v6792_v52 = vsel %vm483_vm0, %v6787_v46, %v6791_v31  ;;  %v13747_v46 = vld [vmem:[#allocation2 + $0x4c] sm:$0xff] }
 0x68d   : > { %v5654_v25 = vpop.f32.mrf.mxu1 }
 0x68e   : > { %v5840_v51 = vadd.f32 %v5839_v12, %v5654_v25  ;;  %v5843_v30 = vpop.f32.mrf.mxu2  ;;  %v11092_v12 = vld [vmem:[#allocation2 + $0x70] sm:$0xff] }
 0x691   : > { %v7718_v55 = vpop.f32.mrf.mxu0  ;;  %v6094_v44 = vpop.f32.mrf.mxu3 }
 0x692   : > { %v13713_v10 = vadd.f32 %v6094_v44, %v5840_v51  ;;  %v13733_v51 = vld [vmem:[#allocation2 + $0x44] sm:$0xff] }
 0x693   : > { %7035 = vmatmul.bf16.gmra.mxu2 %v6784_v24  ;;  %v6797_v61 = vshll.u32 %v13733_v51, 16  ;;  %v11141_v24 = vld [vmem:[%s14309_s3 + $0x1e8] sm:$0xff] }
 0x694   : > { %8302 = vmatpush.bf16.msra.mxu1 %v11141_v24 }
 0x695   : > { %v5657_v37 = vpop.f32.mrf.mxu1 }
 0x696   : > { %v5846_v49 = vpop.f32.mrf.mxu2 }
 0x699   : > { %7317 = vmatmul.bf16.gmra.mxu3 %v7183_v48  ;;  %v13720_v18 = vpop.f32.mrf.mxu0  ;;  %v6097_v62 = vpop.f32.mrf.mxu3  ;;  %v6799_v48 = vrot.slane %v6797_v61, 1 }
 0x69b   : > { %6428 = vmatmul.bf16.gmra.mxu1 %v11013_v21 }
 0x69c   : > { %7754 = vmatmul.bf16.gmra.mxu0 %v11092_v12 }
 0x69d   : > { %v5658_v16 = vpop.f32.mrf.mxu1 }
 0x69e   : > { %v5844_v53 = vadd.f32 %v5843_v30, %v5658_v16  ;;  %v5848_v34 = vpop.f32.mrf.mxu2  ;;  %v7185_v30 = vsel %vm1163_vm1, %v7182_v6, %v7184_v26  ;;  %v6793_v6 = vshrl.u32 %v13717_v42, 16  ;;  %v7186_v16 = vrot.slane %v13717_v42, 1 }
 0x6a0   : > { %v6795_v62 = vor.u32 %v6793_v6, %v6791_v31  ;;  %v7188_v6 = vrot.slane %v13733_v51, 1 }
 0x6a1   : > { %v13724_v0 = vpop.f32.mrf.mxu0  ;;  %v6098_v20 = vpop.f32.mrf.mxu3 }
 0x6a2   : > { %v13726_v36 = vadd.f32 %v6098_v20, %v5844_v53  ;;  %v6800_v60 = vsel %vm483_vm0, %v6795_v62, %v6799_v48  ;;  %v7187_v20 = vsel %vm1163_vm1, %v7184_v26, %v7186_v16 }
 0x6a3   : > { %7039 = vmatmul.bf16.gmra.mxu2 %v6792_v52 }
 0x6a5   : > { %v5661_v23 = vpop.f32.mrf.mxu1 }
 0x6a6   : > { %v5847_v57 = vadd.f32 %v5846_v49, %v5661_v23  ;;  %v5850_v25 = vpop.f32.mrf.mxu2 }
 0x6a9   : > { %7322 = vmatmul.bf16.gmra.mxu3 %v7185_v30  ;;  %v7725_v2 = vpop.f32.mrf.mxu0  ;;  %v6101_v55 = vpop.f32.mrf.mxu3  ;;  %v6805_v30 = vshll.u32 %v13747_v46, 16 }
 0x6aa   : > { %v13736_v44 = vadd.f32 %v6101_v55, %v5847_v57  ;;  %v11094_v57 = vld [vmem:[#allocation2 + $0x80] sm:$0xff] }
 0x6ab   : > { %6433 = vmatmul.bf16.gmra.mxu1 %v11014_v41  ;;  %v6801_v41 = vshrl.u32 %v13733_v51, 16  ;;  %v6807_v55 = vrot.slane %v6805_v30, 1  ;;  %v6809_v51 = vshrl.u32 %v13747_v46, 16 }
 0x6ac   : > { %7758 = vmatmul.bf16.gmra.mxu0 %v11093_v15 }
 0x6ad   : > { %v5663_v37 = vpop.f32.mrf.mxu1  ;;  %v6803_v26 = vor.u32 %v6801_v41, %v6799_v48  ;;  %v11095_v48 = vld [vmem:[#allocation2 + $0x88] sm:$0xff] }
 0x6ae   : > { %v5852_v49 = vpop.f32.mrf.mxu2 }
 0x6af   : > { %v6808_v37 = vsel %vm483_vm0, %v6803_v26, %v6807_v55  ;;  %v7190_v26 = vrot.slane %v13747_v46, 1  ;;  %v11140_v46 = vld [vmem:[%s14309_s3 + $0x1e0] sm:$0xff] }
 0x6b0   : > { %8303 = vmatpush.bf16.msra.mxu1 %v11140_v46  ;;  %v11018_v46 = vld [vmem:[#allocation2 + $0x4c] sm:$0xff] }
 0x6b1   : > { %v13743_v21 = vpop.f32.mrf.mxu0  ;;  %v6103_v12 = vpop.f32.mrf.mxu3 }
 0x6b3   : > { %7043 = vmatmul.bf16.gmra.mxu2 %v6800_v60  ;;  %v13760_v60 = vld [vmem:[#allocation2 + $0x54] sm:$0xff] }
 0x6b5   : > { %v5665_v53 = vpop.f32.mrf.mxu1 }
 0x6b6   : > { %v5851_v34 = vadd.f32 %v5850_v25, %v5665_v53  ;;  %v5855_v47 = vpop.f32.mrf.mxu2 }
 0x6b9   : > { %7326 = vmatmul.bf16.gmra.mxu3 %v7187_v20  ;;  %v13750_v52 = vpop.f32.mrf.mxu0  ;;  %v6105_v23 = vpop.f32.mrf.mxu3  ;;  %v6813_v20 = vshll.u32 %v13760_v60, 16 }
 0x6ba   : > { %v13752_v31 = vadd.f32 %v6105_v23, %v5851_v34  ;;  %v11016_v34 = vld [vmem:[#allocation2 + $0x3c] sm:$0xff] }
 0x6bb   : > { %6437 = vmatmul.bf16.gmra.mxu1 %v11015_v54  ;;  %v6815_v30 = vrot.slane %v6813_v20, 1 }
 0x6bc   : > { %7763 = vmatmul.bf16.gmra.mxu0 %v11094_v57 }
 0x6bd   : > { %v5667_v42 = vpop.f32.mrf.mxu1 }
 0x6be   : > { %v5853_v2 = vadd.f32 %v5852_v49, %v5667_v42  ;;  %v5856_v25 = vpop.f32.mrf.mxu2  ;;  %v7189_v49 = vsel %vm1163_vm1, %v7186_v16, %v7188_v6 }
 0x6c1   : > { %v7731_v15 = vpop.f32.mrf.mxu0  ;;  %v6107_v61 = vpop.f32.mrf.mxu3 }
 0x6c2   : > { %v13756_v24 = vadd.f32 %v6107_v61, %v5853_v2  ;;  %v6811_v2 = vor.u32 %v6809_v51, %v6807_v55  ;;  %v11148_v61 = vld [vmem:[%s14309_s3 + $0x220] sm:$0xff] }
 0x6c3   : > { %7048 = vmatmul.bf16.gmra.mxu2 %v6808_v37  ;;  %v13776_v37 = vld [vmem:[#allocation2 + $0x5c] sm:$0xff] }
 0x6c4   : > { %v6816_v15 = vsel %vm483_vm0, %v6811_v2, %v6815_v30  ;;  %8590 = vmatpush.bf16.msra.mxu2 %v11148_v61  ;;  %v6821_v20 = vshll.u32 %v13776_v37, 16 }
 0x6c5   : > { %v5670_v62 = vpop.f32.mrf.mxu1 }
 0x6c6   : > { %v5859_v12 = vpop.f32.mrf.mxu2 }
 0x6c9   : > { %7330 = vmatmul.bf16.gmra.mxu3 %v7189_v49  ;;  %v13763_v53 = vpop.f32.mrf.mxu0  ;;  %v6110_v47 = vpop.f32.mrf.mxu3  ;;  %v7191_v49 = vsel %vm1163_vm1, %v7188_v6, %v7190_v26  ;;  %v6817_v6 = vshrl.u32 %v13760_v60, 16 }
 0x6ca   : > { %v11017_v47 = vld [vmem:[#allocation2 + $0x44] sm:$0xff] }
 0x6cb   : > { %6441 = vmatmul.bf16.gmra.mxu1 %v11016_v34 }
 0x6cc   : > { %7767 = vmatmul.bf16.gmra.mxu0 %v11095_v48  ;;  %v11096_v48 = vld [vmem:[#allocation2 + $0x90] sm:$0xff] }
 0x6cd   : > { %v5671_v54 = vpop.f32.mrf.mxu1 }
 0x6ce   : > { %v5857_v23 = vadd.f32 %v5856_v25, %v5671_v54  ;;  %v5861_v57 = vpop.f32.mrf.mxu2 }
 0x6d1   : > { %v13767_v42 = vpop.f32.mrf.mxu0  ;;  %v6111_v16 = vpop.f32.mrf.mxu3 }
 0x6d2   : > { %v13769_v41 = vadd.f32 %v6111_v16, %v5857_v23  ;;  %v6819_v16 = vor.u32 %v6817_v6, %v6815_v30 }
 0x6d3   : > { %7052 = vmatmul.bf16.gmra.mxu2 %v6816_v15 }
 0x6d6   : > { %v7018_v25 = vpop.f32.mrf.mxu2 }
 0x6d8   : > { %v5674_v62 = vpop.f32.mrf.mxu1 }
 0x6d9   : > { %v5860_v55 = vadd.f32 %v5859_v12, %v5674_v62  ;;  %7335 = vmatmul.bf16.gmra.mxu3 %v7191_v49  ;;  %v7738_v34 = vpop.f32.mrf.mxu0  ;;  %v6823_v12 = vrot.slane %v6821_v20, 1  ;;  %v7192_v62 = vrot.slane %v13760_v60, 1 }
 0x6da   : > { %v13790_v34 = vld [vmem:[#allocation2 + $0x64] sm:$0xff] }
 0x6db   : > { %6446 = vmatmul.bf16.gmra.mxu1 %v11017_v47  ;;  %v6824_v15 = vsel %vm483_vm0, %v6819_v16, %v6823_v12  ;;  %v7193_v47 = vsel %vm1163_vm1, %v7190_v26, %v7192_v62  ;;  %v6829_v6 = vshll.u32 %v13790_v34, 16 }
 0x6dc   : > { %v6114_v54 = vpop.f32.mrf.mxu3  ;;  %7771 = vmatmul.bf16.gmra.mxu0 %v11096_v48 }
 0x6dd   : > { %v13783_v23 = vadd.f32 %v6114_v54, %v5860_v55  ;;  %v11097_v54 = vld [vmem:[#allocation2 + $0x98] sm:$0xff] }
 0x6de   : > { %v7020_v57 = vpop.f32.mrf.mxu2 }
 0x6e0   : > { %v5676_v51 = vpop.f32.mrf.mxu1 }
 0x6e1   : > { %v13786_v2 = vpop.f32.mrf.mxu0 }
 0x6e2   : > { %14523 = vst [vmem:[#allocation53_spill] sm:$0xff] %v13786_v2 }
 0x6e3   : > { %7056 = vmatmul.bf16.gmra.mxu2 %v6824_v15  ;;  %v6825_v15 = vshrl.u32 %v13776_v37, 16 }
 0x6e4   : > { %v6116_v61 = vpop.f32.mrf.mxu3 }
 0x6e5   : > { %v6831_v61 = vrot.slane %v6829_v6, 1 }
 0x6e6   : > { %v7023_v49 = vpop.f32.mrf.mxu2 }
 0x6e8   : > { %v6416_v55 = vpop.f32.mrf.mxu1 }
 0x6e9   : > { %v6520_v48 = vadd.f32 %v6416_v55, %v13312_v56  ;;  %7339 = vmatmul.bf16.gmra.mxu3 %v7193_v47  ;;  %v13794_v20 = vpop.f32.mrf.mxu0  ;;  %v6827_v55 = vor.u32 %v6825_v15, %v6823_v12  ;;  %v11098_v12 = vld [vmem:[#allocation2 + $0xa0] sm:$0xff] }
 0x6ea   : > { %14524 = vst [vmem:[#allocation54_spill] sm:$0xff] %v13794_v20 }
 0x6eb   : > { %6450 = vmatmul.bf16.gmra.mxu1 %v11018_v46  ;;  %v7122_v30 = vadd.f32 %v7018_v25, %v6520_v48  ;;  %v6832_v20 = vsel %vm483_vm0, %v6827_v55, %v6831_v61  ;;  %v7194_v25 = vrot.slane %v13776_v37, 1  ;;  %v6833_v37 = vshrl.u32 %v13790_v34, 16 }
 0x6ec   : > { %v7305_v51 = vpop.f32.mrf.mxu3  ;;  %7776 = vmatmul.bf16.gmra.mxu0 %v11097_v54 }
 0x6ed   : > { %v13797_v60 = vadd.f32 %v7305_v51, %v7122_v30  ;;  %v13805_v30 = vld [vmem:[#allocation2 + $0x6c] sm:$0xff]  ;;  %v7195_v6 = vsel %vm1163_vm1, %v7192_v62, %v7194_v25  ;;  %v6835_v62 = vor.u32 %v6833_v37, %v6831_v61  ;;  %v11020_v37 = vld [vmem:[#allocation2 + $0x5c] sm:$0xff] }
 0x6ee   : > { %v7024_v16 = vpop.f32.mrf.mxu2 }
 0x6f0   : > { %v6418_v26 = vpop.f32.mrf.mxu1 }
 0x6f1   : > { %v6521_v56 = vadd.f32 %v6418_v26, %v13317_v19  ;;  %v7744_v49 = vpop.f32.mrf.mxu0  ;;  %v11019_v19 = vld [vmem:[#allocation2 + $0x54] sm:$0xff] }
 0x6f3   : > { %v7123_v47 = vadd.f32 %v7020_v57, %v6521_v56  ;;  %7061 = vmatmul.bf16.gmra.mxu2 %v6832_v20  ;;  %v6837_v57 = vshll.u32 %v13805_v30, 16 }
 0x6f4   : > { %v7307_v46 = vpop.f32.mrf.mxu3 }
 0x6f5   : > { %v13803_v48 = vadd.f32 %v7307_v46, %v7123_v47  ;;  %v6839_v26 = vrot.slane %v6837_v57, 1 }
 0x6f6   : > { %v7027_v54 = vpop.f32.mrf.mxu2 }
 0x6f7   : > { %v6840_v46 = vsel %vm483_vm0, %v6835_v62, %v6839_v26  ;;  %v11139_v62 = vld [vmem:[%s14309_s3 + $0x1d8] sm:$0xff] }
 0x6f8   : > { %v6421_v51 = vpop.f32.mrf.mxu1  ;;  %8304 = vmatpush.bf16.msra.mxu1 %v11139_v62 }
 0x6f9   : > { %7343 = vmatmul.bf16.gmra.mxu3 %v7195_v6  ;;  %v13808_v2 = vpop.f32.mrf.mxu0  ;;  %v7196_v6 = vrot.slane %v13790_v34, 1 }
 0x6fa   : > { %14525 = vst [vmem:[#allocation37_spill] sm:$0xff] %v13808_v2 }
 0x6fb   : > { %6454 = vmatmul.bf16.gmra.mxu1 %v11019_v19  ;;  %v7197_v61 = vsel %vm1163_vm1, %v7194_v25, %v7196_v6 }
 0x6fc   : > { %v7310_v15 = vpop.f32.mrf.mxu3  ;;  %7780 = vmatmul.bf16.gmra.mxu0 %v11098_v12  ;;  %v11147_v12 = vld [vmem:[%s14309_s3 + $0x218] sm:$0xff] }
 0x6fd   : > { %v13822_v15 = vld [vmem:[#allocation2 + $0x74] sm:$0xff]  ;;  %8591 = vmatpush.bf16.msra.mxu2 %v11147_v12 }
 0x6fe   : > { %v7029_v20 = vpop.f32.mrf.mxu2 }
 0x700   : > { %v6422_v56 = vpop.f32.mrf.mxu1 }
 0x701   : > { %v6522_v49 = vadd.f32 %v6422_v56, %v13329_v50  ;;  %v13813_v55 = vpop.f32.mrf.mxu0  ;;  %v11099_v56 = vld [vmem:[#allocation2 + $0xa8] sm:$0xff] }
 0x702   : > { %14526 = vst [vmem:[#allocation3_spill] sm:$0xff] %v13813_v55  ;;  %v13837_v55 = vld [vmem:[#allocation2 + $0x7c] sm:$0xff] }
 0x703   : > { %v7124_v47 = vadd.f32 %v7024_v16, %v6522_v49  ;;  %7065 = vmatmul.bf16.gmra.mxu2 %v6840_v46  ;;  %v6845_v49 = vshll.u32 %v13822_v15, 16 }
 0x704   : > { %v7311_v51 = vpop.f32.mrf.mxu3 }
 0x705   : > { %v13817_v19 = vadd.f32 %v7311_v51, %v7124_v47  ;;  %v6847_v51 = vrot.slane %v6845_v49, 1 }
 0x706   : > { %v7031_v57 = vpop.f32.mrf.mxu2 }
 0x708   : > { %v6425_v50 = vpop.f32.mrf.mxu1 }
 0x709   : > { %v6523_v16 = vadd.f32 %v6425_v50, %v13338_v14  ;;  %7348 = vmatmul.bf16.gmra.mxu3 %v7197_v61  ;;  %v7751_v20 = vpop.f32.mrf.mxu0  ;;  %v6841_v14 = vshrl.u32 %v13805_v30, 16 }
 0x70a   : > { %v7198_v20 = vrot.slane %v13805_v30, 1 }
 0x70b   : > { %6459 = vmatmul.bf16.gmra.mxu1 %v11020_v37  ;;  %v7125_v34 = vadd.f32 %v7027_v54, %v6523_v16  ;;  %v6843_v61 = vor.u32 %v6841_v14, %v6839_v26  ;;  %v6853_v14 = vshll.u32 %v13837_v55, 16 }
 0x70c   : > { %v7314_v47 = vpop.f32.mrf.mxu3  ;;  %7784 = vmatmul.bf16.gmra.mxu0 %v11099_v56 }
 0x70d   : > { %v13830_v46 = vadd.f32 %v7314_v47, %v7125_v34  ;;  %v6848_v54 = vsel %vm483_vm0, %v6843_v61, %v6847_v51  ;;  %v7199_v34 = vsel %vm1163_vm1, %v7196_v6, %v7198_v20  ;;  %v11021_v47 = vld [vmem:[#allocation2 + $0x64] sm:$0xff] }
 0x70e   : > { %v7033_v25 = vpop.f32.mrf.mxu2 }
 0x710   : > { %v6427_v12 = vpop.f32.mrf.mxu1 }
 0x711   : > { %v13833_v50 = vpop.f32.mrf.mxu0  ;;  %v11100_v12 = vld [vmem:[#allocation2 + $0xb0] sm:$0xff] }
 0x712   : > { %14527 = vst [vmem:[#allocation4_spill] sm:$0xff] %v13833_v50 }
 0x713   : > { %7069 = vmatmul.bf16.gmra.mxu2 %v6848_v54 }
 0x714   : > { %v7316_v16 = vpop.f32.mrf.mxu3 }
 0x715   : > { %v6849_v16 = vshrl.u32 %v13822_v15, 16 }
 0x716   : > { %v7036_v37 = vpop.f32.mrf.mxu2 }
 0x717   : > { %v6855_v37 = vrot.slane %v6853_v14, 1 }
 0x718   : > { %v6429_v56 = vpop.f32.mrf.mxu1 }
 0x719   : > { %v6524_v62 = vadd.f32 %v6429_v56, %v13360_v35  ;;  %7352 = vmatmul.bf16.gmra.mxu3 %v7199_v34  ;;  %v13841_v49 = vpop.f32.mrf.mxu0  ;;  %v6851_v34 = vor.u32 %v6849_v16, %v6847_v51  ;;  %v11101_v51 = vld [vmem:[#allocation2 + $0xb8] sm:$0xff] }
 0x71a   : > { %14528 = vst [vmem:[#allocation5_spill] sm:$0xff] %v13841_v49 }
 0x71b   : > { %6463 = vmatmul.bf16.gmra.mxu1 %v11021_v47  ;;  %v7126_v26 = vadd.f32 %v7031_v57, %v6524_v62  ;;  %v6856_v50 = vsel %vm483_vm0, %v6851_v34, %v6855_v37  ;;  %v7200_v57 = vrot.slane %v13822_v15, 1  ;;  %v6857_v15 = vshrl.u32 %v13837_v55, 16 }
 0x71c   : > { %v7318_v61 = vpop.f32.mrf.mxu3  ;;  %7789 = vmatmul.bf16.gmra.mxu0 %v11100_v12 }
 0x71d   : > { %v13844_v30 = vadd.f32 %v7318_v61, %v7126_v26  ;;  %v13852_v26 = vld [vmem:[#allocation2 + $0x84] sm:$0xff]  ;;  %v7201_v14 = vsel %vm1163_vm1, %v7198_v20, %v7200_v57  ;;  %v6859_v20 = vor.u32 %v6857_v15, %v6855_v37  ;;  %v11023_v15 = vld [vmem:[#allocation2 + $0x74] sm:$0xff] }
 0x71e   : > { %v7037_v54 = vpop.f32.mrf.mxu2 }
 0x720   : > { %v6431_v6 = vpop.f32.mrf.mxu1 }
 0x721   : > { %v6525_v35 = vadd.f32 %v6431_v6, %v13366_v5  ;;  %v7757_v56 = vpop.f32.mrf.mxu0  ;;  %v11022_v5 = vld [vmem:[#allocation2 + $0x6c] sm:$0xff] }
 0x723   : > { %v7127_v49 = vadd.f32 %v7033_v25, %v6525_v35  ;;  %7074 = vmatmul.bf16.gmra.mxu2 %v6856_v50  ;;  %v6861_v25 = vshll.u32 %v13852_v26, 16 }
 0x724   : > { %v7320_v47 = vpop.f32.mrf.mxu3 }
 0x725   : > { %v13850_v62 = vadd.f32 %v7320_v47, %v7127_v49  ;;  %v6863_v49 = vrot.slane %v6861_v25, 1 }
 0x726   : > { %v7040_v12 = vpop.f32.mrf.mxu2 }
 0x727   : > { %v6864_v47 = vsel %vm483_vm0, %v6859_v20, %v6863_v49  ;;  %v11138_v20 = vld [vmem:[%s14309_s3 + $0x1d0] sm:$0xff] }
 0x728   : > { %v6434_v61 = vpop.f32.mrf.mxu1  ;;  %8305 = vmatpush.bf16.msra.mxu1 %v11138_v20 }
 0x729   : > { %7356 = vmatmul.bf16.gmra.mxu3 %v7201_v14  ;;  %v13855_v2 = vpop.f32.mrf.mxu0  ;;  %v7202_v14 = vrot.slane %v13837_v55, 1 }
 0x72a   : > { %14529 = vst [vmem:[#allocation6_spill] sm:$0xff] %v13855_v2 }
 0x72b   : > { %6467 = vmatmul.bf16.gmra.mxu1 %v11022_v5  ;;  %v7203_v37 = vsel %vm1163_vm1, %v7200_v57, %v7202_v14 }
 0x72c   : > { %v7323_v16 = vpop.f32.mrf.mxu3  ;;  %7793 = vmatmul.bf16.gmra.mxu0 %v11101_v51  ;;  %v11146_v51 = vld [vmem:[%s14309_s3 + $0x210] sm:$0xff] }
 0x72d   : > { %v13869_v16 = vld [vmem:[#allocation2 + $0x8c] sm:$0xff]  ;;  %8592 = vmatpush.bf16.msra.mxu2 %v11146_v51 }
 0x72e   : > { %v7042_v50 = vpop.f32.mrf.mxu2 }
 0x730   : > { %v6435_v6 = vpop.f32.mrf.mxu1 }
 0x731   : > { %v6526_v35 = vadd.f32 %v6435_v6, %v13396_v58  ;;  %v13860_v56 = vpop.f32.mrf.mxu0  ;;  %v11102_v6 = vld [vmem:[#allocation2 + $0xc0] sm:$0xff] }
 0x732   : > { %14530 = vst [vmem:[#allocation40_spill] sm:$0xff] %v13860_v56  ;;  %v13884_v56 = vld [vmem:[#allocation2 + $0x94] sm:$0xff] }
 0x733   : > { %v7128_v34 = vadd.f32 %v7037_v54, %v6526_v35  ;;  %7078 = vmatmul.bf16.gmra.mxu2 %v6864_v47  ;;  %v6869_v35 = vshll.u32 %v13869_v16, 16 }
 0x734   : > { %v7324_v61 = vpop.f32.mrf.mxu3 }
 0x735   : > { %v13864_v5 = vadd.f32 %v7324_v61, %v7128_v34  ;;  %v6871_v61 = vrot.slane %v6869_v35, 1 }
 0x736   : > { %v7044_v25 = vpop.f32.mrf.mxu2 }
 0x738   : > { %v6438_v58 = vpop.f32.mrf.mxu1 }
 0x739   : > { %v6527_v54 = vadd.f32 %v6438_v58, %v13424_v8  ;;  %7361 = vmatmul.bf16.gmra.mxu3 %v7203_v37  ;;  %v7764_v50 = vpop.f32.mrf.mxu0  ;;  %v6865_v8 = vshrl.u32 %v13852_v26, 16 }
 0x73a   : > { %v7204_v50 = vrot.slane %v13852_v26, 1 }
 0x73b   : > { %6472 = vmatmul.bf16.gmra.mxu1 %v11023_v15  ;;  %v7129_v55 = vadd.f32 %v7040_v12, %v6527_v54  ;;  %v6867_v37 = vor.u32 %v6865_v8, %v6863_v49  ;;  %v6877_v8 = vshll.u32 %v13884_v56, 16 }
 0x73c   : > { %v7327_v34 = vpop.f32.mrf.mxu3  ;;  %7797 = vmatmul.bf16.gmra.mxu0 %v11102_v6 }
 0x73d   : > { %v13877_v47 = vadd.f32 %v7327_v34, %v7129_v55  ;;  %v6872_v12 = vsel %vm483_vm0, %v6867_v37, %v6871_v61  ;;  %v7205_v55 = vsel %vm1163_vm1, %v7202_v14, %v7204_v50  ;;  %v11024_v34 = vld [vmem:[#allocation2 + $0x7c] sm:$0xff] }
 0x73e   : > { %v7046_v57 = vpop.f32.mrf.mxu2 }
 0x740   : > { %v6440_v51 = vpop.f32.mrf.mxu1 }
 0x741   : > { %v13880_v58 = vpop.f32.mrf.mxu0  ;;  %v11103_v51 = vld [vmem:[#allocation2 + $0xc8] sm:$0xff] }
 0x742   : > { %14531 = vst [vmem:[#allocation7_spill] sm:$0xff] %v13880_v58 }
 0x743   : > { %7082 = vmatmul.bf16.gmra.mxu2 %v6872_v12 }
 0x744   : > { %v7329_v54 = vpop.f32.mrf.mxu3 }
 0x745   : > { %v6873_v54 = vshrl.u32 %v13869_v16, 16 }
 0x746   : > { %v7049_v15 = vpop.f32.mrf.mxu2 }
 0x747   : > { %v6879_v15 = vrot.slane %v6877_v8, 1 }
 0x748   : > { %v6442_v6 = vpop.f32.mrf.mxu1 }
 0x749   : > { %v6528_v20 = vadd.f32 %v6442_v6, %v13473_v63  ;;  %7365 = vmatmul.bf16.gmra.mxu3 %v7205_v55  ;;  %v13888_v35 = vpop.f32.mrf.mxu0  ;;  %v6875_v55 = vor.u32 %v6873_v54, %v6871_v61 }
 0x74a   : > { %14532 = vst [vmem:[#allocation8_spill] sm:$0xff] %v13888_v35 }
 0x74b   : > { %6476 = vmatmul.bf16.gmra.mxu1 %v11024_v34  ;;  %v7130_v49 = vadd.f32 %v7044_v25, %v6528_v20  ;;  %v6880_v58 = vsel %vm483_vm0, %v6875_v55, %v6879_v15  ;;  %v7206_v25 = vrot.slane %v13869_v16, 1 }
 0x74c   : > { %v7331_v37 = vpop.f32.mrf.mxu3  ;;  %7802 = vmatmul.bf16.gmra.mxu0 %v11103_v51 }
 0x74d   : > { %v13891_v26 = vadd.f32 %v7331_v37, %v7130_v49  ;;  %v13899_v49 = vld [vmem:[#allocation2 + $0x9c] sm:$0xff]  ;;  %v7207_v8 = vsel %vm1163_vm1, %v7204_v50, %v7206_v25 }
 0x74e   : > { %v7050_v12 = vpop.f32.mrf.mxu2 }
 0x750   : > { %v6444_v14 = vpop.f32.mrf.mxu1 }
 0x751   : > { %v6529_v63 = vadd.f32 %v6444_v14, %v13484_v1  ;;  %v7770_v6 = vpop.f32.mrf.mxu0  ;;  %v11025_v1 = vld [vmem:[#allocation2 + $0x84] sm:$0xff] }
 0x753   : > { %v7131_v35 = vadd.f32 %v7046_v57, %v6529_v63  ;;  %7087 = vmatmul.bf16.gmra.mxu2 %v6880_v58  ;;  %v6885_v57 = vshll.u32 %v13899_v49, 16  ;;  %v6881_v58 = vshrl.u32 %v13884_v56, 16 }
 0x754   : > { %v7333_v34 = vpop.f32.mrf.mxu3 }
 0x755   : > { %v13897_v20 = vadd.f32 %v7333_v34, %v7131_v35  ;;  %v6887_v16 = vrot.slane %v6885_v57, 1  ;;  %v6883_v6 = vor.u32 %v6881_v58, %v6879_v15  ;;  %v11026_v58 = vld [vmem:[#allocation2 + $0x8c] sm:$0xff] }
 0x756   : > { %v7053_v51 = vpop.f32.mrf.mxu2 }
 0x757   : > { %v6888_v50 = vsel %vm483_vm0, %v6883_v6, %v6887_v16 }
 0x758   : > { %v6447_v37 = vpop.f32.mrf.mxu1 }
 0x759   : > { %7369 = vmatmul.bf16.gmra.mxu3 %v7207_v8  ;;  %v13902_v2 = vpop.f32.mrf.mxu0  ;;  %v7208_v37 = vrot.slane %v13884_v56, 1 }
 0x75a   : > { %14533 = vst [vmem:[#allocation9_spill] sm:$0xff] %v13902_v2 }
 0x75b   : > { %6480 = vmatmul.bf16.gmra.mxu1 %v11025_v1  ;;  %v11145_v1 = vld [vmem:[%s14309_s3 + $0x208] sm:$0xff]  ;;  %v7209_v15 = vsel %vm1163_vm1, %v7206_v25, %v7208_v37  ;;  %v6889_v25 = vshrl.u32 %v13899_v49, 16 }
 0x75c   : > { %v7336_v61 = vpop.f32.mrf.mxu3  ;;  %8593 = vmatpush.bf16.msra.mxu2 %v11145_v1 }
 0x75d   : > { %v13916_v61 = vld [vmem:[#allocation2 + $0xa4] sm:$0xff] }
 0x75e   : > { %v7055_v54 = vpop.f32.mrf.mxu2 }
 0x760   : > { %v6448_v35 = vpop.f32.mrf.mxu1 }
 0x761   : > { %v6530_v14 = vadd.f32 %v6448_v35, %v13499_v40  ;;  %v13907_v63 = vpop.f32.mrf.mxu0  ;;  %v6893_v35 = vshll.u32 %v13916_v61, 16 }
 0x762   : > { %14534 = vst [vmem:[#allocation10_spill] sm:$0xff] %v13907_v63 }
 0x763   : > { %v7132_v55 = vadd.f32 %v7050_v12, %v6530_v14  ;;  %7091 = vmatmul.bf16.gmra.mxu2 %v6888_v50  ;;  %v11137_v14 = vld [vmem:[%s14309_s3 + $0x1c8] sm:$0xff] }
 0x764   : > { %v7337_v34 = vpop.f32.mrf.mxu3  ;;  %8306 = vmatpush.bf16.msra.mxu1 %v11137_v14 }
 0x765   : > { %v13911_v8 = vadd.f32 %v7337_v34, %v7132_v55  ;;  %v6895_v34 = vrot.slane %v6893_v35, 1 }
 0x766   : > { %v7057_v57 = vpop.f32.mrf.mxu2 }
 0x768   : > { %v6451_v40 = vpop.f32.mrf.mxu1 }
 0x769   : > { %v6531_v12 = vadd.f32 %v6451_v40, %v13508_v13  ;;  %7374 = vmatmul.bf16.gmra.mxu3 %v7209_v15  ;;  %v7777_v54 = vpop.f32.mrf.mxu0  ;;  %v6891_v40 = vor.u32 %v6889_v25, %v6887_v16 }
 0x76b   : > { %6485 = vmatmul.bf16.gmra.mxu1 %v11026_v58  ;;  %v7133_v56 = vadd.f32 %v7053_v51, %v6531_v12  ;;  %v6896_v51 = vsel %vm483_vm0, %v6891_v40, %v6895_v34  ;;  %v7210_v12 = vrot.slane %v13899_v49, 1  ;;  %v13931_v58 = vld [vmem:[#allocation2 + $0xac] sm:$0xff] }
 0x76c   : > { %v7340_v6 = vpop.f32.mrf.mxu3  ;;  %v6901_v25 = vshll.u32 %v13931_v58, 16 }
 0x76d   : > { %v13924_v55 = vadd.f32 %v7340_v6, %v7133_v56  ;;  %v7211_v14 = vsel %vm1163_vm1, %v7208_v37, %v7210_v12 }
 0x76e   : > { %v7059_v50 = vpop.f32.mrf.mxu2 }
 0x770   : > { %v6453_v13 = vpop.f32.mrf.mxu1 }
 0x771   : > { %v13927_v1 = vpop.f32.mrf.mxu0  ;;  %v11027_v13 = vld [vmem:[#allocation2 + $0x94] sm:$0xff] }
 0x772   : > { %14535 = vst [vmem:[#allocation43_spill] sm:$0xff] %v13927_v1 }
 0x773   : > { %7095 = vmatmul.bf16.gmra.mxu2 %v6896_v51 }
 0x774   : > { %v7342_v15 = vpop.f32.mrf.mxu3 }
 0x775   : > { %v6897_v15 = vshrl.u32 %v13916_v61, 16 }
 0x776   : > { %v7062_v54 = vpop.f32.mrf.mxu2 }
 0x777   : > { %v6903_v54 = vrot.slane %v6901_v25, 1 }
 0x778   : > { %v6455_v56 = vpop.f32.mrf.mxu1 }
 0x779   : > { %v6532_v6 = vadd.f32 %v6455_v56, %v13529_v39  ;;  %7378 = vmatmul.bf16.gmra.mxu3 %v7211_v14  ;;  %v13935_v35 = vpop.f32.mrf.mxu0  ;;  %v6899_v39 = vor.u32 %v6897_v15, %v6895_v34 }
 0x77a   : > { %14536 = vst [vmem:[#allocation11_spill] sm:$0xff] %v13935_v35 }
 0x77b   : > { %6489 = vmatmul.bf16.gmra.mxu1 %v11027_v13  ;;  %v7134_v16 = vadd.f32 %v7057_v57, %v6532_v6  ;;  %v6904_v14 = vsel %vm483_vm0, %v6899_v39, %v6903_v54  ;;  %v7212_v57 = vrot.slane %v13916_v61, 1 }
 0x77c   : > { %v7344_v40 = vpop.f32.mrf.mxu3 }
 0x77d   : > { %v13938_v51 = vadd.f32 %v7344_v40, %v7134_v16  ;;  %v13946_v16 = vld [vmem:[#allocation2 + $0xb4] sm:$0xff]  ;;  %v7213_v25 = vsel %vm1163_vm1, %v7210_v12, %v7212_v57 }
 0x77e   : > { %v7063_v49 = vpop.f32.mrf.mxu2 }
 0x780   : > { %v6457_v1 = vpop.f32.mrf.mxu1 }
 0x781   : > { %v6533_v37 = vadd.f32 %v6457_v1, %v13535_v38  ;;  %v7783_v63 = vpop.f32.mrf.mxu0  ;;  %v11028_v38 = vld [vmem:[#allocation2 + $0x9c] sm:$0xff]  ;;  %v6905_v1 = vshrl.u32 %v13931_v58, 16 }
 0x782   : > { %v6909_v63 = vshll.u32 %v13946_v16, 16 }
 0x783   : > { %v7135_v56 = vadd.f32 %v7059_v50, %v6533_v37  ;;  %7100 = vmatmul.bf16.gmra.mxu2 %v6904_v14  ;;  %v6907_v39 = vor.u32 %v6905_v1, %v6903_v54  ;;  %v11029_v1 = vld [vmem:[#allocation2 + $0xa4] sm:$0xff] }
 0x784   : > { %v7346_v35 = vpop.f32.mrf.mxu3  ;;  %v6911_v61 = vrot.slane %v6909_v63, 1 }
 0x785   : > { %v13944_v6 = vadd.f32 %v7346_v35, %v7135_v56 }
 0x786   : > { %v7066_v13 = vpop.f32.mrf.mxu2  ;;  %v6912_v12 = vsel %vm483_vm0, %v6907_v39, %v6911_v61 }
 0x788   : > { %v6460_v40 = vpop.f32.mrf.mxu1 }
 0x789   : > { %7382 = vmatmul.bf16.gmra.mxu3 %v7213_v25  ;;  %v13949_v2 = vpop.f32.mrf.mxu0  ;;  %v7214_v40 = vrot.slane %v13931_v58, 1 }
 0x78a   : > { %14537 = vst [vmem:[#allocation12_spill] sm:$0xff] %v13949_v2 }
 0x78b   : > { %6493 = vmatmul.bf16.gmra.mxu1 %v11028_v38  ;;  %v11144_v38 = vld [vmem:[%s14309_s3 + $0x200] sm:$0xff]  ;;  %v7215_v54 = vsel %vm1163_vm1, %v7212_v57, %v7214_v40  ;;  %v6913_v57 = vshrl.u32 %v13946_v16, 16 }
 0x78c   : > { %v7349_v50 = vpop.f32.mrf.mxu3  ;;  %8594 = vmatpush.bf16.msra.mxu2 %v11144_v38 }
 0x78d   : > { %v13963_v50 = vld [vmem:[#allocation2 + $0xbc] sm:$0xff] }
 0x78e   : > { %v7068_v34 = vpop.f32.mrf.mxu2 }
 0x790   : > { %v6461_v35 = vpop.f32.mrf.mxu1 }
 0x791   : > { %v6534_v15 = vadd.f32 %v6461_v35, %v13548_v9  ;;  %v13954_v37 = vpop.f32.mrf.mxu0  ;;  %v6917_v35 = vshll.u32 %v13963_v50, 16 }
 0x792   : > { %14538 = vst [vmem:[#allocation17_spill] sm:$0xff] %v13954_v37  ;;  %v6600_v37 = vld [vmem:[#allocation2 + $0xcc] sm:$0x1] }
 0x793   : > { %v7136_v56 = vadd.f32 %v7063_v49, %v6534_v15  ;;  %7104 = vmatmul.bf16.gmra.mxu2 %v6912_v12  ;;  %v11136_v15 = vld [vmem:[%s14309_s3 + $0x1c0] sm:$0xff] }
 0x794   : > { %v7350_v14 = vpop.f32.mrf.mxu3  ;;  %8307 = vmatpush.bf16.msra.mxu1 %v11136_v15 }
 0x795   : > { %v13958_v25 = vadd.f32 %v7350_v14, %v7136_v56  ;;  %v6919_v14 = vrot.slane %v6917_v35, 1 }
 0x796   : > { %v7070_v63 = vpop.f32.mrf.mxu2 }
 0x798   : > { %v6464_v9 = vpop.f32.mrf.mxu1 }
 0x799   : > { %v6535_v49 = vadd.f32 %v6464_v9, %v13557_v4  ;;  %7387 = vmatmul.bf16.gmra.mxu3 %v7215_v54  ;;  %v7790_v34 = vpop.f32.mrf.mxu0  ;;  %v6915_v9 = vor.u32 %v6913_v57, %v6911_v61 }
 0x79b   : > { %6498 = vmatmul.bf16.gmra.mxu1 %v11029_v1  ;;  %v7137_v58 = vadd.f32 %v7066_v13, %v6535_v49  ;;  %v6920_v13 = vsel %vm483_vm0, %v6915_v9, %v6919_v14  ;;  %v7216_v49 = vrot.slane %v13946_v16, 1  ;;  %v13978_v1 = vld [vmem:[#allocation2 + $0xc4] sm:$0xff] }
 0x79c   : > { %v7353_v39 = vpop.f32.mrf.mxu3  ;;  %v6925_v57 = vshll.u32 %v13978_v1, 16 }
 0x79d   : > { %v13971_v56 = vadd.f32 %v7353_v39, %v7137_v58  ;;  %v7217_v15 = vsel %vm1163_vm1, %v7214_v40, %v7216_v49 }
 0x79e   : > { %v7072_v12 = vpop.f32.mrf.mxu2 }
 0x79f   : > { %14539 = vst [vmem:[#allocation13_spill] sm:$0xff] %v13971_v56 }
 0x7a0   : > { %v6466_v4 = vpop.f32.mrf.mxu1 }
 0x7a1   : > { %v13974_v38 = vpop.f32.mrf.mxu0  ;;  %v11030_v4 = vld [vmem:[#allocation2 + $0xac] sm:$0xff] }
 0x7a2   : > { %14540 = vst [vmem:[#allocation14_spill] sm:$0xff] %v13974_v38 }
 0x7a3   : > { %7108 = vmatmul.bf16.gmra.mxu2 %v6920_v13 }
 0x7a4   : > { %v7355_v54 = vpop.f32.mrf.mxu3 }
 0x7a5   : > { %v6921_v54 = vshrl.u32 %v13963_v50, 16 }
 0x7a6   : > { %v7075_v34 = vpop.f32.mrf.mxu2 }
 0x7a7   : > { %v6927_v34 = vrot.slane %v6925_v57, 1 }
 0x7a8   : > { %v6468_v58 = vpop.f32.mrf.mxu1 }
 0x7a9   : > { %v6536_v39 = vadd.f32 %v6468_v58, %v13581_v7  ;;  %7391 = vmatmul.bf16.gmra.mxu3 %v7217_v15  ;;  %v13982_v35 = vpop.f32.mrf.mxu0  ;;  %v6923_v58 = vor.u32 %v6921_v54, %v6919_v14 }
 0x7aa   : > { %14541 = vst [vmem:[#allocation16_spill] sm:$0xff] %v13982_v35 }
 0x7ab   : > { %6502 = vmatmul.bf16.gmra.mxu1 %v11030_v4  ;;  %v7138_v61 = vadd.f32 %v7070_v63, %v6536_v39  ;;  %v6928_v35 = vsel %vm483_vm0, %v6923_v58, %v6927_v34  ;;  %v6715_v4 = vunpack.c.l.b16 %v6600_v37  ;;  %v7218_v39 = vrot.slane %v13963_v50, 1 }
 0x7ac   : > { %v7357_v9 = vpop.f32.mrf.mxu3  ;;  %v6929_v37 = vshrl.u32 %v13978_v1, 16 }
 0x7ad   : > { %v13985_v13 = vadd.f32 %v7357_v9, %v7138_v61  ;;  %v6740_v2 = vpack.c.b16 %v6715_v4, %v6715_v4  ;;  %v7219_v57 = vsel %vm1163_vm1, %v7216_v49, %v7218_v39 }
 0x7ae   : > { %v7076_v16 = vpop.f32.mrf.mxu2 }
 0x7af   : > { %14542 = vst [vmem:[#allocation19_spill] sm:$0xff] %v13985_v13 }
 0x7b0   : > { %v6470_v38 = vpop.f32.mrf.mxu1 }
 0x7b1   : > { %v6537_v40 = vadd.f32 %v6470_v38, %v13593_v45  ;;  %v7796_v7 = vpop.f32.mrf.mxu0  ;;  %v11031_v45 = vld [vmem:[#allocation2 + $0xb4] sm:$0xff] }
 0x7b3   : > { %v7139_v15 = vadd.f32 %v7072_v12, %v6537_v40  ;;  %7113 = vmatmul.bf16.gmra.mxu2 %v6928_v35  ;;  %v6933_v12 = vshll.u32 %v6740_v2, 16  ;;  %v6931_v35 = vor.u32 %v6929_v37, %v6927_v34  ;;  %v11341_v37 = vld [vmem:[#allocation2 + $0x18] sm:$0xe] }
 0x7b4   : > { %v7359_v63 = vpop.f32.mrf.mxu3 }
 0x7b5   : > { %v13991_v61 = vadd.f32 %v7359_v63, %v7139_v15  ;;  %v6935_v54 = vrot.slane %v6933_v12, 1  ;;  %v7220_v15 = vrot.slane %v13978_v1, 1 }
 0x7b6   : > { %v7079_v9 = vpop.f32.mrf.mxu2 }
 0x7b7   : > { %v6936_v49 = vsel %vm483_vm0, %v6931_v35, %v6935_v54 }
 0x7b8   : > { %v6473_v13 = vpop.f32.mrf.mxu1 }
 0x7b9   : > { %7395 = vmatmul.bf16.gmra.mxu3 %v7219_v57  ;;  %v13994_v56 = vpop.f32.mrf.mxu0 }
 0x7ba   : > { %14543 = vst [vmem:[#allocation21_spill] sm:$0xff] %v13994_v56 }
 0x7bb   : > { %6506 = vmatmul.bf16.gmra.mxu1 %v11031_v45  ;;  %v7221_v45 = vsel %vm1163_vm1, %v7218_v39, %v7220_v15 }
 0x7bc   : > { %v7362_v14 = vpop.f32.mrf.mxu3 }
 0x7bd   : > { %v11340_v14 = vld [vmem:[#allocation2 + $0x18] sm:$0xf0] }
 0x7be   : > { %v7081_v38 = vpop.f32.mrf.mxu2  ;;  %v11342_v1 = vor.u32 %v11341_v37, %v11340_v14  ;;  %v11114_v14 = vld [vmem:[#allocation2 + $0x28] sm:$0xff] }
 0x7bf   : > { %v11113_v38 = vld [vmem:[#allocation2 + $0x20] sm:$0xff] }
 0x7c0   : > { %v6474_v50 = vpop.f32.mrf.mxu1 }
 0x7c1   : > { %v6538_v40 = vadd.f32 %v6474_v50, %v13622_v11  ;;  %v13998_v7 = vpop.f32.mrf.mxu0  ;;  %v11032_v11 = vld [vmem:[#allocation2 + $0xbc] sm:$0xff] }
 0x7c2   : > { %14544 = vst [vmem:[#allocation46_spill] sm:$0xff] %v13998_v7 }
 0x7c3   : > { %v7140_v13 = vadd.f32 %v7076_v16, %v6538_v40  ;;  %7117 = vmatmul.bf16.gmra.mxu2 %v6936_v49  ;;  %v8467_v40 = vrot.slane %v11113_v38, 1  ;;  %v8466_v49 = vrot.slane %v11342_v1, 1 }
 0x7c4   : > { %v7363_v58 = vpop.f32.mrf.mxu3 }
 0x7c5   : > { %v14002_v4 = vadd.f32 %v7363_v58, %v7140_v13  ;;  %v8468_v39 = vsel %vm1163_vm1, %v8466_v49, %v8467_v40 }
 0x7c6   : > { %v7083_v63 = vpop.f32.mrf.mxu2 }
 0x7c8   : > { %v6477_v57 = vpop.f32.mrf.mxu1 }
 0x7c9   : > { %v6539_v34 = vadd.f32 %v6477_v57, %v13642_v33  ;;  %7400 = vmatmul.bf16.gmra.mxu3 %v7221_v45  ;;  %v7803_v12 = vpop.f32.mrf.mxu0  ;;  %v7222_v33 = vrot.slane %v6740_v2, 1 }
 0x7cb   : > { %6511 = vmatmul.bf16.gmra.mxu1 %v11032_v11  ;;  %v7141_v16 = vadd.f32 %v7079_v9, %v6539_v34  ;;  %v7223_v12 = vsel %vm1163_vm1, %v7220_v15, %v7222_v33  ;;  %v11033_v34 = vld [vmem:[#allocation2 + $0xc4] sm:$0xff] }
 0x7cc   : > { %v7366_v35 = vpop.f32.mrf.mxu3 }
 0x7cd   : > { %v14006_v54 = vadd.f32 %v7366_v35, %v7141_v16  ;;  %v11339_v35 = vld [vmem:[#allocation2 + $0x18] sm:$0xff]  }
 0x7ce   : > { %v7085_v50 = vpop.f32.mrf.mxu2 }
 0x7d0   : > { %v6479_v13 = vpop.f32.mrf.mxu1 }
 0x7d1   : > { %v8469_v13 = vrot.slane %v11114_v14, 1 }
 0x7d3   : > { %8595 = vmatmul.bf16.vlgmr.msra.gmra.mxu2 %v8468_v39  ;;  %v8035_v39 = vshll.u32 %v11339_v35, 16  ;;  %v8470_v15 = vsel %vm1163_vm1, %v8467_v40, %v8469_v13 }
 0x7d4   : > { %v7368_v58 = vpop.f32.mrf.mxu3 }
 0x7d5   : > { %v8040_v58 = vshll.u32 %v11113_v38, 16  ;;  %v8037_v33 = vrot.slane %v8035_v39, 1  ;;  %v8048_v39 = vshll.u32 %v11114_v14, 16 }
 0x7d6   : > { %v7088_v57 = vpop.f32.mrf.mxu2 }
 0x7d8   : > { %v6481_v45 = vpop.f32.mrf.mxu1 }
 0x7d9   : > { %v6540_v9 = vadd.f32 %v6481_v45, %v13662_v29  ;;  %7404 = vmatmul.bf16.gmra.mxu3 %v7223_v12  ;;  %v8033_v12 = vshrl.u32 %v11339_v35, 16 }
 0x7db   : > { %6515 = vmatmul.bf16.gmra.mxu1 %v11033_v34  ;;  %v7142_v11 = vadd.f32 %v7083_v63, %v6540_v9  ;;  %v11104_v63 = vld [vmem:[#allocation2 + $0xd0] sm:$0xff]  ;;  %v8042_v9 = vrot.slane %v8040_v58, 1 }
 0x7dc   : > { %v7370_v37 = vpop.f32.mrf.mxu3 }
 0x7dd   : > { %v14011_v16 = vadd.f32 %v7370_v37, %v7142_v11  ;;  %v8038_v37 = vor.u32 %v8037_v33, %v8033_v12  ;;  %v8044_v33 = vshrl.u32 %v11113_v38, 16 }
 0x7de   : > { %v7089_v1 = vpop.f32.mrf.mxu2 }
 0x7df   : > { %v8043_v7 = vsel %vm483_vm0, %v8038_v37, %v8042_v9 }
 0x7e0   : > { %v6483_v49 = vpop.f32.mrf.mxu1 }
 0x7e1   : > { %v6541_v2 = vadd.f32 %v6483_v49, %v13669_v3  ;;  %v11115_v3 = vld [vmem:[#allocation2 + $0x30] sm:$0xff] }
 0x7e3   : > { %v7143_v57 = vadd.f32 %v7085_v50, %v6541_v2  ;;  %8600 = vmatmul.bf16.gmra.mxu2 %v8470_v15  ;;  %v8471_v2 = vrot.slane %v11115_v3, 1 }
 0x7e4   : > { %v7372_v29 = vpop.f32.mrf.mxu3 }
 0x7e5   : > { %v14015_v45 = vadd.f32 %v7372_v29, %v7143_v57  ;;  %v8472_v29 = vsel %vm1163_vm1, %v8469_v13, %v8471_v2 }
 0x7e6   : > { %v7092_v34 = vpop.f32.mrf.mxu2 }
 0x7e8   : > { %v6486_v11 = vpop.f32.mrf.mxu1 }
 0x7e9   : > { %7806 = vmatmul.bf16.vlgmr.msrb.gmra.mxu3 %v11104_v63  ;;  %v8050_v63 = vrot.slane %v8048_v39, 1 }
 0x7eb   : > { %8308 = vmatmul.bf16.vlgmr.msra.gmra.mxu1 %v8043_v7  ;;  %v8046_v7 = vor.u32 %v8044_v33, %v8042_v9 }
 0x7ec   : > { %v7375_v49 = vpop.f32.mrf.mxu3 }
 0x7ed   : > { %v8051_v49 = vsel %vm483_vm0, %v8046_v7, %v8050_v63 }
 0x7ee   : > { %v7094_v50 = vpop.f32.mrf.mxu2 }
 0x7f0   : > { %v6487_v40 = vpop.f32.mrf.mxu1 }
 0x7f1   : > { %v6542_v15 = vadd.f32 %v6487_v40, %v13683_v43  ;;  %v11116_v43 = vld [vmem:[#allocation2 + $0x38] sm:$0xff] }
 0x7f3   : > { %v7144_v57 = vadd.f32 %v7089_v1, %v6542_v15  ;;  %8604 = vmatmul.bf16.gmra.mxu2 %v8472_v29  ;;  %v8473_v15 = vrot.slane %v11116_v43, 1 }
 0x7f4   : > { %v7376_v35 = vpop.f32.mrf.mxu3 }
 0x7f5   : > { %v14020_v58 = vadd.f32 %v7376_v35, %v7144_v57  ;;  %v8056_v57 = vshll.u32 %v11115_v3, 16  ;;  %v8474_v38 = vsel %vm1163_vm1, %v8471_v2, %v8473_v15  ;;  %v8052_v35 = vshrl.u32 %v11114_v14, 16 }
 0x7f6   : > { %v7096_v12 = vpop.f32.mrf.mxu2  ;;  %v8064_v14 = vshll.u32 %v11116_v43, 16 }
 0x7f7   : > { %v8058_v9 = vrot.slane %v8056_v57, 1 }
 0x7f8   : > { %v6490_v11 = vpop.f32.mrf.mxu1 }
 0x7f9   : > { %v6543_v37 = vadd.f32 %v6490_v11, %v13693_v32  ;;  %v8054_v11 = vor.u32 %v8052_v35, %v8050_v63  ;;  %v8060_v35 = vshrl.u32 %v11115_v3, 16 }
 0x7fb   : > { %8313 = vmatmul.bf16.gmra.mxu1 %v8051_v49  ;;  %v7145_v50 = vadd.f32 %v7092_v34, %v6543_v37  ;;  %v8059_v34 = vsel %vm483_vm0, %v8054_v11, %v8058_v9  ;;  %v11117_v49 = vld [vmem:[#allocation2 + $0x40] sm:$0xff]  ;;  %v8062_v11 = vor.u32 %v8060_v35, %v8058_v9 }
 0x7fc   : > { %v7379_v40 = vpop.f32.mrf.mxu3  ;;  %v8475_v56 = vrot.slane %v11117_v49, 1 }
 0x7fd   : > { %v14024_v1 = vadd.f32 %v7379_v40, %v7145_v50 }
 0x7fe   : > { %v7098_v13 = vpop.f32.mrf.mxu2 }
 0x800   : > { %v6492_v29 = vpop.f32.mrf.mxu1 }
 0x803   : > { %8608 = vmatmul.bf16.gmra.mxu2 %v8474_v38 }
 0x804   : > { %v7381_v39 = vpop.f32.mrf.mxu3 }
 0x805   : > { %v8476_v39 = vsel %vm1163_vm1, %v8473_v15, %v8475_v56  ;;  %v8072_v15 = vshll.u32 %v11117_v49, 16 }
 0x806   : > { %v7101_v33 = vpop.f32.mrf.mxu2 }
 0x807   : > { %v8066_v33 = vrot.slane %v8064_v14, 1  ;;  %v8068_v14 = vshrl.u32 %v11116_v43, 16  ;;  %v8074_v9 = vrot.slane %v8072_v15, 1 }
 0x808   : > { %v6494_v32 = vpop.f32.mrf.mxu1 }
 0x809   : > { %v6544_v7 = vadd.f32 %v6494_v32, %v13709_v17 }
 0x80b   : > { %8317 = vmatmul.bf16.gmra.mxu1 %v8059_v34  ;;  %v7146_v37 = vadd.f32 %v7096_v12, %v6544_v7  ;;  %v8067_v7 = vsel %vm483_vm0, %v8062_v11, %v8066_v33  ;;  %v11118_v34 = vld [vmem:[#allocation2 + $0x48] sm:$0xff] }
 0x80c   : > { %v7383_v50 = vpop.f32.mrf.mxu3 }
 0x80d   : > { %v14029_v40 = vadd.f32 %v7383_v50, %v7146_v37 }
 0x80e   : > { %v7102_v29 = vpop.f32.mrf.mxu2 }
 0x810   : > { %v6496_v2 = vpop.f32.mrf.mxu1 }
 0x811   : > { %v6545_v38 = vadd.f32 %v6496_v2, %v13713_v10  ;;  %v8477_v10 = vrot.slane %v11118_v34, 1 }
 0x813   : > { %v7147_v57 = vadd.f32 %v7098_v13, %v6545_v38  ;;  %8613 = vmatmul.bf16.gmra.mxu2 %v8476_v39 }
 0x814   : > { %v7385_v63 = vpop.f32.mrf.mxu3 }
 0x815   : > { %v14033_v17 = vadd.f32 %v7385_v63, %v7147_v57  ;;  %v8478_v57 = vsel %vm1163_vm1, %v8475_v56, %v8477_v10 }
 0x816   : > { %v7105_v12 = vpop.f32.mrf.mxu2 }
 0x818   : > { %v6499_v32 = vpop.f32.mrf.mxu1 }
 0x819   : > { %v8070_v32 = vor.u32 %v8068_v14, %v8066_v33 }
 0x81b   : > { %8321 = vmatmul.bf16.gmra.mxu1 %v8067_v7  ;;  %v8075_v7 = vsel %vm483_vm0, %v8070_v32, %v8074_v9 }
 0x81c   : > { %v7388_v37 = vpop.f32.mrf.mxu3 }
 0x81e   : > { %v7107_v50 = vpop.f32.mrf.mxu2 }
 0x820   : > { %v6500_v2 = vpop.f32.mrf.mxu1 }
 0x821   : > { %v6546_v13 = vadd.f32 %v6500_v2, %v13726_v36  ;;  %v11119_v36 = vld [vmem:[#allocation2 + $0x50] sm:$0xff] }
 0x822   : > { %v8479_v2 = vrot.slane %v11119_v36, 1 }
 0x823   : > { %v7148_v38 = vadd.f32 %v7102_v29, %v6546_v13  ;;  %8617 = vmatmul.bf16.gmra.mxu2 %v8478_v57  ;;  %v8076_v57 = vshrl.u32 %v11117_v49, 16  ;;  %v8088_v49 = vshll.u32 %v11119_v36, 16 }
 0x824   : > { %v7389_v39 = vpop.f32.mrf.mxu3  ;;  %v8480_v43 = vsel %vm1163_vm1, %v8477_v10, %v8479_v2 }
 0x825   : > { %v14038_v3 = vadd.f32 %v7389_v39, %v7148_v38  ;;  %v8080_v38 = vshll.u32 %v11118_v34, 16  ;;  %v8078_v14 = vor.u32 %v8076_v57, %v8074_v9  ;;  %v8084_v57 = vshrl.u32 %v11118_v34, 16 }
 0x826   : > { %v7109_v63 = vpop.f32.mrf.mxu2 }
 0x827   : > { %v8082_v33 = vrot.slane %v8080_v38, 1 }
 0x828   : > { %v6503_v35 = vpop.f32.mrf.mxu1 }
 0x829   : > { %v6547_v11 = vadd.f32 %v6503_v35, %v13736_v44 }
 0x82b   : > { %8326 = vmatmul.bf16.gmra.mxu1 %v8075_v7  ;;  %v7149_v37 = vadd.f32 %v7105_v12, %v6547_v11  ;;  %v8083_v12 = vsel %vm483_vm0, %v8078_v14, %v8082_v33  ;;  %v11120_v11 = vld [vmem:[#allocation2 + $0x58] sm:$0xff]  ;;  %v8086_v14 = vor.u32 %v8084_v57, %v8082_v33  ;;  %v8092_v33 = vshrl.u32 %v11119_v36, 16 }
 0x82c   : > { %v7392_v50 = vpop.f32.mrf.mxu3 }
 0x82d   : > { %v14042_v29 = vadd.f32 %v7392_v50, %v7149_v37 }
 0x82e   : > { %v7111_v56 = vpop.f32.mrf.mxu2 }
 0x830   : > { %v6505_v13 = vpop.f32.mrf.mxu1 }
 0x831   : > { %v8481_v13 = vrot.slane %v11120_v11, 1 }
 0x833   : > { %8621 = vmatmul.bf16.gmra.mxu2 %v8480_v43 }
 0x834   : > { %v7394_v15 = vpop.f32.mrf.mxu3 }
 0x835   : > { %v8482_v15 = vsel %vm1163_vm1, %v8479_v2, %v8481_v13 }
 0x836   : > { %v7114_v39 = vpop.f32.mrf.mxu2 }
 0x837   : > { %v8090_v39 = vrot.slane %v8088_v49, 1 }
 0x838   : > { %v6507_v44 = vpop.f32.mrf.mxu1 }
 0x839   : > { %v6548_v35 = vadd.f32 %v6507_v44, %v13752_v31 }
 0x83b   : > { %8330 = vmatmul.bf16.gmra.mxu1 %v8083_v12  ;;  %v7150_v32 = vadd.f32 %v7109_v63, %v6548_v35  ;;  %v8091_v35 = vsel %vm483_vm0, %v8086_v14, %v8090_v39  ;;  %v14054_v12 = vld [vmem:[#allocation2 + $0x60] sm:$0xff] }
 0x83c   : > { %v7396_v7 = vpop.f32.mrf.mxu3  ;;  %v8104_v36 = vshll.u32 %v14054_v12, 16 }
 0x83d   : > { %v14047_v37 = vadd.f32 %v7396_v7, %v7150_v32 }
 0x83e   : > { %v7115_v50 = vpop.f32.mrf.mxu2 }
 0x840   : > { %v6509_v10 = vpop.f32.mrf.mxu1 }
 0x841   : > { %v6549_v43 = vadd.f32 %v6509_v10, %v13756_v24  ;;  %v8096_v10 = vshll.u32 %v11120_v11, 16 }
 0x843   : > { %v7151_v38 = vadd.f32 %v7111_v56, %v6549_v43  ;;  %8626 = vmatmul.bf16.gmra.mxu2 %v8482_v15  ;;  %v8483_v56 = vrot.slane %v14054_v12, 1  ;;  %v8098_v15 = vrot.slane %v8096_v10, 1 }
 0x844   : > { %v7398_v9 = vpop.f32.mrf.mxu3 }
 0x845   : > { %v14051_v31 = vadd.f32 %v7398_v9, %v7151_v38  ;;  %v8484_v34 = vsel %vm1163_vm1, %v8481_v13, %v8483_v56 }
 0x846   : > { %v7118_v63 = vpop.f32.mrf.mxu2 }
 0x848   : > { %v6512_v44 = vpop.f32.mrf.mxu1 }
 0x849   : > { %v8094_v44 = vor.u32 %v8092_v33, %v8090_v39 }
 0x84b   : > { %8334 = vmatmul.bf16.gmra.mxu1 %v8091_v35  ;;  %v8099_v35 = vsel %vm483_vm0, %v8094_v44, %v8098_v15  ;;  %v14073_v44 = vld [vmem:[%s14310_s4] ss:$0 sm:$0xff] }
 0x84c   : > { %v7401_v32 = vpop.f32.mrf.mxu3 }
 0x84e   : > { %v7120_v24 = vpop.f32.mrf.mxu2 }
 0x850   : > { %v6513_v7 = vpop.f32.mrf.mxu1 }
 0x851   : > { %v6550_v2 = vadd.f32 %v6513_v7, %v13769_v41  ;;  %v14063_v41 = vld [vmem:[#allocation2 + $0x68] sm:$0xff] }
 0x852   : > { %v8485_v7 = vrot.slane %v14063_v41, 1 }
 0x853   : > { %v7152_v43 = vadd.f32 %v7115_v50, %v6550_v2  ;;  %8630 = vmatmul.bf16.gmra.mxu2 %v8484_v34 }
 0x854   : > { %v7402_v49 = vpop.f32.mrf.mxu3  ;;  %v8486_v10 = vsel %vm1163_vm1, %v8483_v56, %v8485_v7 }
 0x855   : > { %v14059_v38 = vadd.f32 %v7402_v49, %v7152_v43  ;;  %v8106_v43 = vrot.slane %v8104_v36, 1  ;;  %v8112_v36 = vshll.u32 %v14063_v41, 16 }
 0x856   : > { %v8596_v9 = vpop.f32.mrf.mxu2 }
 0x858   : > { %v6516_v57 = vpop.f32.mrf.mxu1 }
 0x859   : > { %v6551_v14 = vadd.f32 %v6516_v57, %v13783_v23  ;;  %v8100_v23 = vshrl.u32 %v11120_v11, 16 }
 0x85b   : > { %8339 = vmatmul.bf16.gmra.mxu1 %v8099_v35  ;;  %v7153_v32 = vadd.f32 %v7118_v63, %v6551_v14  ;;  %v7811_v63 = vadd.f32 %v13677_v59, %v13797_v60  ;;  %v8102_v33 = vor.u32 %v8100_v23, %v8098_v15  ;;  %v14077_v35 = vld [vmem:[#allocation2 + $0x70] sm:$0xff]  ;;  %v7812_v15 = vadd.f32 %v13681_v27, %v13803_v48 }
 0x85c   : > { %v7405_v50 = vpop.f32.mrf.mxu3  ;;  %v8114_v27 = vrot.slane %v8112_v36, 1 }
 0x85d   : > { %v7440_v24 = vadd.f32 %v7405_v50, %v7153_v32  ;;  %v8107_v14 = vsel %vm483_vm0, %v8102_v33, %v8106_v43  ;;  %v8487_v50 = vrot.slane %v14077_v35, 1 }
 0x85e   : > { %v8598_v13 = vpop.f32.mrf.mxu2 }
 0x860   : > { %v6518_v2 = vpop.f32.mrf.mxu1 }
 0x863   : > { %8634 = vmatmul.bf16.gmra.mxu2 %v8486_v10 }
 0x864   : > { %v7407_v39 = vpop.f32.mrf.mxu3 }
 0x865   : > { %v8488_v39 = vsel %vm1163_vm1, %v8485_v7, %v8487_v50 }
 0x866   : > { %v8601_v34 = vpop.f32.mrf.mxu2 }
 0x867   : > { %v8108_v34 = vshrl.u32 %v14054_v12, 16 }
 0x868   : > { %v8309_v49 = vpop.f32.mrf.mxu1 }
 0x869   : > { %v8413_v57 = vadd.f32 %v8309_v49, %v7811_v63 }
 0x86b   : > { %v8700_v56 = vadd.f32 %v8596_v9, %v8413_v57  ;;  %8343 = vmatmul.bf16.gmra.mxu1 %v8107_v14  ;;  %v8110_v57 = vor.u32 %v8108_v34, %v8106_v43  ;;  %v11125_v34 = vld [vmem:[#allocation2 + $0x80] sm:$0xff] }
 0x86c   : > { %v7807_v11 = vpop.f32.mrf.mxu3 }
 0x86d   : > { %v8736_v32 = vadd.f32 %v14073_v44, %v8700_v56  ;;  %v14080_v59 = vadd.f32 %v7807_v11, %v7440_v24  ;;  %v8115_v14 = vsel %vm483_vm0, %v8110_v57, %v8114_v27  ;;  %v14099_v56 = vld [vmem:[#allocation2 + $0x78] sm:$0xff]  ;;  %v8491_v57 = vrot.slane %v11125_v34, 1 }
 0x86e   : > { %v8602_v9 = vpop.f32.mrf.mxu2  ;;  %v8489_v11 = vrot.slane %v14099_v56, 1 }
 0x86f   : > { %v8768_v60 = vmax.f32 %v8736_v32, 0.0 }
 0x870   : > { %v8311_v2 = vpop.f32.mrf.mxu1  ;;  %v8490_v43 = vsel %vm1163_vm1, %v8487_v50, %v8489_v11 }
 0x871   : > { %8801 = vst.msk [vmem:[%s14085_s13] sm:$0xff] %vm8800_vm4, %v8768_v60  ;;  %v8414_v24 = vadd.f32 %v8311_v2, %v7812_v15  ;;  %v8120_v60 = vshll.u32 %v14077_v35, 16 }
 0x873   : > { %v8701_v10 = vadd.f32 %v8598_v13, %v8414_v24  ;;  %8639 = vmatmul.bf16.gmra.mxu2 %v8488_v39  ;;  %v7813_v13 = vadd.f32 %v13700_v28, %v13817_v19  ;;  %v8116_v24 = vshrl.u32 %v14063_v41, 16  ;;  %v8122_v36 = vrot.slane %v8120_v60, 1 }
 0x874   : > { %v7809_v23 = vpop.f32.mrf.mxu3  ;;  %v7814_v28 = vadd.f32 %v13707_v22, %v13830_v46  ;;  %v8128_v22 = vshll.u32 %v14099_v56, 16  ;;  %v8492_v46 = vsel %vm1163_vm1, %v8489_v11, %v8491_v57 }
 0x875   : > { %v8737_v63 = vadd.f32 %v14073_v44, %v8701_v10  ;;  %v8118_v23 = vor.u32 %v8116_v24, %v8114_v27  ;;  %v8124_v27 = vshrl.u32 %v14077_v35, 16  ;;  %v7816_v35 = vadd.f32 %v13724_v0, %v13850_v62 }
 0x876   : > { %v8605_v49 = vpop.f32.mrf.mxu2 }
 0x877   : > { %v8769_v48 = vmax.f32 %v8737_v63, 0.0 }
 0x878   : > { %v8314_v33 = vpop.f32.mrf.mxu1 }
 0x879   : > { %8802 = vst.msk [vmem:[%s14085_s13 + $0x8] sm:$0xff] %vm8800_vm4, %v8769_v48 }
 0x87b   : > { %8347 = vmatmul.bf16.gmra.mxu1 %v8115_v14 }
 0x87e   : > { %v8607_v7 = vpop.f32.mrf.mxu2 }
 0x880   : > { %v8315_v12 = vpop.f32.mrf.mxu1 }
 0x881   : > { %v8415_v32 = vadd.f32 %v8315_v12, %v7813_v13  ;;  %v8130_v13 = vrot.slane %v8128_v22, 1 }
 0x883   : > { %v8702_v15 = vadd.f32 %v8602_v9, %v8415_v32  ;;  %8643 = vmatmul.bf16.gmra.mxu2 %v8490_v43  ;;  %v8123_v9 = vsel %vm483_vm0, %v8118_v23, %v8122_v36  ;;  %v8126_v32 = vor.u32 %v8124_v27, %v8122_v36 }
 0x885   : > { %v8738_v2 = vadd.f32 %v14073_v44, %v8702_v15  ;;  %v8131_v15 = vsel %vm483_vm0, %v8126_v32, %v8130_v13 }
 0x886   : > { %v8609_v19 = vpop.f32.mrf.mxu2 }
 0x887   : > { %v8770_v10 = vmax.f32 %v8738_v2, 0.0  ;;  %v11126_v2 = vld [vmem:[#allocation2 + $0x88] sm:$0xff] }
 0x888   : > { %v8318_v39 = vpop.f32.mrf.mxu1  ;;  %v8144_v27 = vshll.u32 %v11126_v2, 16 }
 0x889   : > { %8803 = vst.msk [vmem:[%s14085_s13 + $0x10] sm:$0xff] %vm8800_vm4, %v8770_v10  ;;  %v8416_v63 = vadd.f32 %v8318_v39, %v7814_v28  ;;  %v8493_v28 = vrot.slane %v11126_v2, 1 }
 0x88a   : > { %v8146_v32 = vrot.slane %v8144_v27, 1 }
 0x88b   : > { %v8703_v50 = vadd.f32 %v8605_v49, %v8416_v63  ;;  %8352 = vmatmul.bf16.gmra.mxu1 %v8123_v9  ;;  %v7815_v49 = vadd.f32 %v13720_v18, %v13844_v30  ;;  %v8136_v30 = vshll.u32 %v11125_v34, 16  ;;  %v8494_v23 = vsel %vm1163_vm1, %v8491_v57, %v8493_v28 }
 0x88c   : > { %v8132_v63 = vshrl.u32 %v14099_v56, 16 }
 0x88d   : > { %v8739_v48 = vadd.f32 %v14073_v44, %v8703_v50  ;;  %v8138_v9 = vrot.slane %v8136_v30, 1 }
 0x88e   : > { %v8611_v33 = vpop.f32.mrf.mxu2  ;;  %v8134_v62 = vor.u32 %v8132_v63, %v8130_v13 }
 0x88f   : > { %v8771_v41 = vmax.f32 %v8739_v48, 0.0 }
 0x890   : > { %v8320_v14 = vpop.f32.mrf.mxu1 }
 0x891   : > { %8804 = vst.msk [vmem:[%s14085_s13 + $0x18] sm:$0xff] %vm8800_vm4, %v8771_v41  ;;  %v8139_v41 = vsel %vm483_vm0, %v8134_v62, %v8138_v9  ;;  %v14133_v14 = vld [vmem:[#allocation2 + $0x90] sm:$0xff] }
 0x892   : > { %v8495_v22 = vrot.slane %v14133_v14, 1 }
 0x893   : > { %8647 = vmatmul.bf16.gmra.mxu2 %v8492_v46 }
 0x894   : > { %v8496_v13 = vsel %vm1163_vm1, %v8493_v28, %v8495_v22 }
 0x896   : > { %v8614_v7 = vpop.f32.mrf.mxu2 }
 0x898   : > { %v8322_v12 = vpop.f32.mrf.mxu1 }
 0x899   : > { %v8417_v60 = vadd.f32 %v8322_v12, %v7815_v49  ;;  %v8140_v12 = vshrl.u32 %v11125_v34, 16 }
 0x89b   : > { %v8704_v43 = vadd.f32 %v8609_v19, %v8417_v60  ;;  %8356 = vmatmul.bf16.gmra.mxu1 %v8131_v15 }
 0x89d   : > { %v8740_v24 = vadd.f32 %v14073_v44, %v8704_v43  ;;  %v8142_v43 = vor.u32 %v8140_v12, %v8138_v9 }
 0x89e   : > { %v8615_v10 = vpop.f32.mrf.mxu2 }
 0x89f   : > { %v8772_v11 = vmax.f32 %v8740_v24, 0.0 }
 0x8a0   : > { %v8324_v39 = vpop.f32.mrf.mxu1 }
 0x8a1   : > { %8805 = vst.msk [vmem:[%s14085_s13 + $0x20] sm:$0xff] %vm8800_vm4, %v8772_v11  ;;  %v8418_v18 = vadd.f32 %v8324_v39, %v7816_v35  ;;  %v8147_v11 = vsel %vm483_vm0, %v8142_v43, %v8146_v32 }
 0x8a3   : > { %v8705_v36 = vadd.f32 %v8611_v33, %v8418_v18  ;;  %8652 = vmatmul.bf16.gmra.mxu2 %v8494_v23  ;;  %v7817_v33 = vadd.f32 %v13743_v21, %v13864_v5  ;;  %v7818_v21 = vadd.f32 %v13750_v52, %v13877_v47  ;;  %v8152_v52 = vshll.u32 %v14133_v14, 16 }
 0x8a5   : > { %v8741_v19 = vadd.f32 %v14073_v44, %v8705_v36  ;;  %v8148_v36 = vshrl.u32 %v11126_v2, 16  ;;  %v8154_v23 = vrot.slane %v8152_v52, 1  ;;  %v7820_v2 = vadd.f32 %v13767_v42, %v13897_v20 }
 0x8a6   : > { %v8618_v48 = vpop.f32.mrf.mxu2 }
 0x8a7   : > { %v8773_v50 = vmax.f32 %v8741_v19, 0.0  ;;  %v7819_v19 = vadd.f32 %v13763_v53, %v13891_v26 }
 0x8a8   : > { %v8327_v0 = vpop.f32.mrf.mxu1 }
 0x8a9   : > { %8806 = vst.msk [vmem:[%s14085_s13 + $0x28] sm:$0xff] %vm8800_vm4, %v8773_v50  ;;  %v8150_v50 = vor.u32 %v8148_v36, %v8146_v32  ;;  %v14546_v36 = vld [vmem:[#allocation54_spill] sm:$0xff] }
 0x8ab   : > { %8360 = vmatmul.bf16.gmra.mxu1 %v8139_v41  ;;  %v8155_v0 = vsel %vm483_vm0, %v8150_v50, %v8154_v23  ;;  %v11129_v41 = vld [vmem:[#allocation2 + $0xa0] sm:$0xff] }
 0x8ae   : > { %v8620_v57 = vpop.f32.mrf.mxu2 }
 0x8b0   : > { %v8328_v56 = vpop.f32.mrf.mxu1 }
 0x8b1   : > { %v8419_v46 = vadd.f32 %v8328_v56, %v7817_v33  ;;  %v8499_v56 = vrot.slane %v11129_v41, 1 }
 0x8b3   : > { %v8706_v49 = vadd.f32 %v8615_v10, %v8419_v46  ;;  %8656 = vmatmul.bf16.gmra.mxu2 %v8496_v13  ;;  %v11128_v10 = vld [vmem:[#allocation2 + $0x98] sm:$0xff] }
 0x8b4   : > { %v8497_v18 = vrot.slane %v11128_v10, 1  ;;  %v8160_v26 = vshll.u32 %v11128_v10, 16 }
 0x8b5   : > { %v8742_v7 = vadd.f32 %v14073_v44, %v8706_v49 }
 0x8b6   : > { %v8622_v5 = vpop.f32.mrf.mxu2  ;;  %v8498_v47 = vsel %vm1163_vm1, %v8495_v22, %v8497_v18  ;;  %v8500_v49 = vsel %vm1163_vm1, %v8497_v18, %v8499_v56  ;;  %v8162_v12 = vrot.slane %v8160_v26, 1 }
 0x8b7   : > { %v8774_v60 = vmax.f32 %v8742_v7, 0.0  ;;  %v8156_v7 = vshrl.u32 %v14133_v14, 16 }
 0x8b8   : > { %v8331_v15 = vpop.f32.mrf.mxu1 }
 0x8b9   : > { %8807 = vst.msk [vmem:[%s14085_s13 + $0x30] sm:$0xff] %vm8800_vm4, %v8774_v60  ;;  %v8420_v24 = vadd.f32 %v8331_v15, %v7818_v21  ;;  %v8158_v20 = vor.u32 %v8156_v7, %v8154_v23  ;;  %v14545_v15 = vld [vmem:[#allocation53_spill] sm:$0xff] }
 0x8ba   : > { %v7821_v43 = vadd.f32 %v14545_v15, %v13911_v8  ;;  %v7822_v8 = vadd.f32 %v14546_v36, %v13924_v55  ;;  %v14195_v36 = vld [vmem:[#allocation2 + $0xc0] sm:$0xff] }
 0x8bb   : > { %v8707_v35 = vadd.f32 %v8618_v48, %v8420_v24  ;;  %8365 = vmatmul.bf16.gmra.mxu1 %v8147_v11  ;;  %v8163_v21 = vsel %vm483_vm0, %v8158_v20, %v8162_v12 }
 0x8bd   : > { %v8743_v28 = vadd.f32 %v14073_v44, %v8707_v35 }
 0x8be   : > { %v8624_v39 = vpop.f32.mrf.mxu2 }
 0x8bf   : > { %v8775_v34 = vmax.f32 %v8743_v28, 0.0  ;;  %v8168_v28 = vshll.u32 %v11129_v41, 16 }
 0x8c0   : > { %v8333_v30 = vpop.f32.mrf.mxu1 }
 0x8c1   : > { %8808 = vst.msk [vmem:[%s14085_s13 + $0x38] sm:$0xff] %vm8800_vm4, %v8775_v34  ;;  %v8164_v30 = vshrl.u32 %v11128_v10, 16  ;;  %v8170_v52 = vrot.slane %v8168_v28, 1 }
 0x8c3   : > { %8660 = vmatmul.bf16.gmra.mxu2 %v8498_v47 }
 0x8c6   : > { %v8627_v63 = vpop.f32.mrf.mxu2 }
 0x8c7   : > { %v8166_v63 = vor.u32 %v8164_v30, %v8162_v12 }
 0x8c8   : > { %v8335_v9 = vpop.f32.mrf.mxu1 }
 0x8c9   : > { %v8421_v48 = vadd.f32 %v8335_v9, %v7819_v19  ;;  %v8171_v50 = vsel %vm483_vm0, %v8166_v63, %v8170_v52  ;;  %v8507_v63 = vrot.slane %v14195_v36, 1 }
 0x8cb   : > { %v8708_v62 = vadd.f32 %v8622_v5, %v8421_v48  ;;  %8369 = vmatmul.bf16.gmra.mxu1 %v8155_v0  ;;  %v14164_v5 = vld [vmem:[#allocation2 + $0xa8] sm:$0xff]  ;;  %v11131_v0 = vld [vmem:[#allocation2 + $0xb0] sm:$0xff] }
 0x8cc   : > { %v8501_v11 = vrot.slane %v14164_v5, 1  ;;  %v8176_v55 = vshll.u32 %v14164_v5, 16 }
 0x8cd   : > { %v8744_v33 = vadd.f32 %v14073_v44, %v8708_v62 }
 0x8ce   : > { %v8628_v22 = vpop.f32.mrf.mxu2 }
 0x8cf   : > { %v8776_v57 = vmax.f32 %v8744_v33, 0.0 }
 0x8d0   : > { %v8337_v46 = vpop.f32.mrf.mxu1 }
 0x8d1   : > { %8809 = vst.msk [vmem:[%s14085_s13 + $0x40] sm:$0xff] %vm8800_vm4, %v8776_v57  ;;  %v8422_v53 = vadd.f32 %v8337_v46, %v7820_v2  ;;  %v8503_v57 = vrot.slane %v11131_v0, 1  ;;  %v8178_v46 = vrot.slane %v8176_v55, 1  ;;  %v14550_v55 = vld [vmem:[#allocation13_spill] sm:$0xff] }
 0x8d3   : > { %v8709_v27 = vadd.f32 %v8624_v39, %v8422_v53  ;;  %8665 = vmatmul.bf16.gmra.mxu2 %v8500_v49  ;;  %v8502_v39 = vsel %vm1163_vm1, %v8499_v56, %v8501_v11  ;;  %v8172_v56 = vshrl.u32 %v11129_v41, 16  ;;  %v14547_v53 = vld [vmem:[#allocation37_spill] sm:$0xff] }
 0x8d4   : > { %v7823_v26 = vadd.f32 %v14547_v53, %v13938_v51 }
 0x8d5   : > { %v8745_v13 = vadd.f32 %v14073_v44, %v8709_v27 }
 0x8d6   : > { %v8631_v60 = vpop.f32.mrf.mxu2 }
 0x8d7   : > { %v8777_v32 = vmax.f32 %v8745_v13, 0.0  ;;  %v8174_v13 = vor.u32 %v8172_v56, %v8170_v52 }
 0x8d8   : > { %v8340_v42 = vpop.f32.mrf.mxu1 }
 0x8d9   : > { %8810 = vst.msk [vmem:[%s14085_s13 + $0x48] sm:$0xff] %vm8800_vm4, %v8777_v32  ;;  %v8179_v12 = vsel %vm483_vm0, %v8174_v13, %v8178_v46  ;;  %v11134_v13 = vld [vmem:[#allocation2 + $0xc8] sm:$0xff] }
 0x8db   : > { %8373 = vmatmul.bf16.gmra.mxu1 %v8163_v21  ;;  %v14548_v21 = vld [vmem:[#allocation3_spill] sm:$0xff] }
 0x8dc   : > { %v7824_v41 = vadd.f32 %v14548_v21, %v13944_v6 }
 0x8de   : > { %v8633_v24 = vpop.f32.mrf.mxu2 }
 0x8e0   : > { %v8341_v14 = vpop.f32.mrf.mxu1 }
 0x8e1   : > { %v8423_v35 = vadd.f32 %v8341_v14, %v7821_v43 }
 0x8e3   : > { %v8710_v34 = vadd.f32 %v8628_v22, %v8423_v35  ;;  %8669 = vmatmul.bf16.gmra.mxu2 %v8502_v39  ;;  %v8504_v22 = vsel %vm1163_vm1, %v8501_v11, %v8503_v57  ;;  %v8184_v11 = vshll.u32 %v11131_v0, 16 }
 0x8e5   : > { %v8746_v18 = vadd.f32 %v14073_v44, %v8710_v34  ;;  %v8180_v34 = vshrl.u32 %v14164_v5, 16  ;;  %v8186_v39 = vrot.slane %v8184_v11, 1 }
 0x8e6   : > { %v8635_v23 = vpop.f32.mrf.mxu2 }
 0x8e7   : > { %v8778_v47 = vmax.f32 %v8746_v18, 0.0  ;;  %v8182_v52 = vor.u32 %v8180_v34, %v8178_v46 }
 0x8e8   : > { %v8344_v19 = vpop.f32.mrf.mxu1 }
 0x8e9   : > { %8811 = vst.msk [vmem:[%s14085_s13 + $0x50] sm:$0xff] %vm8800_vm4, %v8778_v47  ;;  %v8424_v9 = vadd.f32 %v8344_v19, %v7822_v8  ;;  %v8187_v47 = vsel %vm483_vm0, %v8182_v52, %v8186_v39  ;;  %v14549_v8 = vld [vmem:[#allocation4_spill] sm:$0xff] }
 0x8ea   : > { %v14554_v52 = vld [vmem:[#allocation40_spill] sm:$0xff] }
 0x8eb   : > { %v8711_v48 = vadd.f32 %v8631_v60, %v8424_v9  ;;  %8378 = vmatmul.bf16.gmra.mxu1 %v8171_v50  ;;  %v11132_v60 = vld [vmem:[#allocation2 + $0xb8] sm:$0xff] }
 0x8ec   : > { %v8505_v43 = vrot.slane %v11132_v60, 1  ;;  %v8192_v50 = vshll.u32 %v11132_v60, 16 }
 0x8ed   : > { %v8747_v62 = vadd.f32 %v14073_v44, %v8711_v48 }
 0x8ee   : > { %v8637_v33 = vpop.f32.mrf.mxu2  ;;  %v8506_v35 = vsel %vm1163_vm1, %v8503_v57, %v8505_v43  ;;  %v8194_v57 = vrot.slane %v8192_v50, 1 }
 0x8ef   : > { %v8779_v10 = vmax.f32 %v8747_v62, 0.0  ;;  %v8508_v62 = vsel %vm1163_vm1, %v8505_v43, %v8507_v63  ;;  %v14552_v43 = vld [vmem:[#allocation19_spill] sm:$0xff] }
 0x8f0   : > { %v8346_v2 = vpop.f32.mrf.mxu1 }
 0x8f1   : > { %8812 = vst.msk [vmem:[%s14085_s13 + $0x58] sm:$0xff] %vm8800_vm4, %v8779_v10 }
 0x8f3   : > { %8673 = vmatmul.bf16.gmra.mxu2 %v8504_v22  ;;  %v14551_v22 = vld [vmem:[#allocation5_spill] sm:$0xff] }
 0x8f6   : > { %v8640_v27 = vpop.f32.mrf.mxu2 }
 0x8f8   : > { %v8348_v49 = vpop.f32.mrf.mxu1 }
 0x8f9   : > { %v8425_v7 = vadd.f32 %v8348_v49, %v7823_v26 }
 0x8fb   : > { %v8712_v32 = vadd.f32 %v8635_v23, %v8425_v7  ;;  %8382 = vmatmul.bf16.gmra.mxu1 %v8179_v12  ;;  %v7825_v23 = vadd.f32 %v14549_v8, %v13958_v25  ;;  %v7826_v25 = vadd.f32 %v14551_v22, %v14550_v55 }
 0x8fd   : > { %v8748_v42 = vadd.f32 %v14073_v44, %v8712_v32  ;;  %v8509_v32 = vrot.slane %v11134_v13, 1 }
 0x8fe   : > { %v8641_v15 = vpop.f32.mrf.mxu2 }
 0x8ff   : > { %v8780_v20 = vmax.f32 %v8748_v42, 0.0  ;;  %v8510_v21 = vsel %vm1163_vm1, %v8507_v63, %v8509_v32  ;;  %v8208_v63 = vshll.u32 %v11134_v13, 16 }
 0x900   : > { %v8350_v24 = vpop.f32.mrf.mxu1 }
 0x901   : > { %8813 = vst.msk [vmem:[%s14085_s13 + $0x60] sm:$0xff] %vm8800_vm4, %v8780_v20  ;;  %v8426_v51 = vadd.f32 %v8350_v24, %v7824_v41  ;;  %v8200_v20 = vshll.u32 %v14195_v36, 16  ;;  %v8196_v41 = vshrl.u32 %v11132_v60, 16  ;;  %v14553_v24 = vld [vmem:[#allocation6_spill] sm:$0xff]  ;;  %v7828_v60 = vadd.f32 %v14554_v52, %v13991_v61 }
 0x903   : > { %v8713_v14 = vadd.f32 %v8637_v33, %v8426_v51  ;;  %8678 = vmatmul.bf16.gmra.mxu2 %v8506_v35  ;;  %v8188_v33 = vshrl.u32 %v11131_v0, 16  ;;  %v7827_v51 = vadd.f32 %v14553_v24, %v14552_v43  ;;  %v8198_v35 = vor.u32 %v8196_v41, %v8194_v57  ;;  %v14556_v41 = vld [vmem:[#allocation8_spill] sm:$0xff] }
 0x905   : > { %v8749_v28 = vadd.f32 %v14073_v44, %v8713_v14  ;;  %v8190_v53 = vor.u32 %v8188_v33, %v8186_v39  ;;  %v8210_v33 = vrot.slane %v8208_v63, 1 }
 0x906   : > { %v8644_v30 = vpop.f32.mrf.mxu2 }
 0x907   : > { %v8781_v18 = vmax.f32 %v8749_v28, 0.0  ;;  %v8195_v27 = vsel %vm483_vm0, %v8190_v53, %v8194_v57 }
 0x908   : > { %v8353_v6 = vpop.f32.mrf.mxu1 }
 0x909   : > { %8814 = vst.msk [vmem:[%s14085_s13 + $0x68] sm:$0xff] %vm8800_vm4, %v8781_v18  ;;  %v11135_v18 = vld [vmem:[#allocation2 + $0xd0] sm:$0xff] }
 0x90a   : > { %v8511_v8 = vrot.slane %v11135_v18, 1 }
 0x90b   : > { %8386 = vmatmul.bf16.gmra.mxu1 %v8187_v47 }
 0x90c   : > { %v8512_v50 = vsel %vm1163_vm1, %v8509_v32, %v8511_v8 }
 0x90e   : > { %v8646_v19 = vpop.f32.mrf.mxu2 }
 0x910   : > { %v8354_v5 = vpop.f32.mrf.mxu1 }
 0x911   : > { %v8427_v9 = vadd.f32 %v8354_v5, %v7825_v23  ;;  %v7891_v5 = vld [vmem:[#allocation2 + $0xd8] sm:$0x1] }
 0x913   : > { %v8714_v48 = vadd.f32 %v8641_v15, %v8427_v9  ;;  %8682 = vmatmul.bf16.gmra.mxu2 %v8508_v62  ;;  %v8202_v15 = vrot.slane %v8200_v20, 1  ;;  %v8006_v62 = vunpack.c.l.b16 %v7891_v5  ;;  %v14558_v5 = vld [vmem:[#allocation10_spill] sm:$0xff] }
 0x915   : > { %v8750_v10 = vadd.f32 %v14073_v44, %v8714_v48  ;;  %v8203_v34 = vsel %vm483_vm0, %v8198_v35, %v8202_v15  ;;  %v8031_v22 = vpack.c.b16 %v8006_v62, %v8006_v62 }
 0x916   : > { %v8648_v56 = vpop.f32.mrf.mxu2 }
 0x917   : > { %v8782_v2 = vmax.f32 %v8750_v10, 0.0  ;;  %v8204_v10 = vshrl.u32 %v14195_v36, 16 }
 0x918   : > { %v8357_v46 = vpop.f32.mrf.mxu1 }
 0x919   : > { %8815 = vst.msk [vmem:[%s14085_s13 + $0x70] sm:$0xff] %vm8800_vm4, %v8782_v2  ;;  %v8428_v26 = vadd.f32 %v8357_v46, %v7826_v25  ;;  %v8206_v55 = vor.u32 %v8204_v10, %v8202_v15  ;;  %v14555_v46 = vld [vmem:[#allocation7_spill] sm:$0xff]  ;;  %v7830_v15 = vadd.f32 %v14556_v41, %v14006_v54 }
 0x91a   : > { %v7829_v53 = vadd.f32 %v14555_v46, %v14002_v4 }
 0x91b   : > { %v8715_v49 = vadd.f32 %v8644_v30, %v8428_v26  ;;  %8391 = vmatmul.bf16.gmra.mxu1 %v8195_v27  ;;  %v8211_v25 = vsel %vm483_vm0, %v8206_v55, %v8210_v33 }
 0x91d   : > { %v8751_v7 = vadd.f32 %v14073_v44, %v8715_v49 }
 0x91e   : > { %v8650_v12 = vpop.f32.mrf.mxu2 }
 0x91f   : > { %v8783_v0 = vmax.f32 %v8751_v7, 0.0  ;;  %v8216_v7 = vshll.u32 %v11135_v18, 16 }
 0x920   : > { %v8359_v42 = vpop.f32.mrf.mxu1 }
 0x921   : > { %8816 = vst.msk [vmem:[%s14085_s13 + $0x78] sm:$0xff] %vm8800_vm4, %v8783_v0  ;;  %v8218_v20 = vrot.slane %v8216_v7, 1 }
 0x923   : > { %8686 = vmatmul.bf16.gmra.mxu2 %v8510_v21 }
 0x926   : > { %v8653_v11 = vpop.f32.mrf.mxu2 }
 0x928   : > { %v8361_v14 = vpop.f32.mrf.mxu1 }
 0x929   : > { %v8429_v28 = vadd.f32 %v8361_v14, %v7827_v51 }
 0x92b   : > { %v8716_v39 = vadd.f32 %v8648_v56, %v8429_v28  ;;  %8395 = vmatmul.bf16.gmra.mxu1 %v8203_v34  ;;  %v8513_v56 = vrot.slane %v8031_v22, 1  ;;  %v8220_v34 = vshrl.u32 %v11135_v18, 16 }
 0x92d   : > { %v8752_v30 = vadd.f32 %v14073_v44, %v8716_v39  ;;  %v8514_v36 = vsel %vm1163_vm1, %v8511_v8, %v8513_v56  ;;  %v8224_v39 = vshll.u32 %v8031_v22, 16  ;;  %v8222_v54 = vor.u32 %v8220_v34, %v8218_v20 }
 0x92e   : > { %v8654_v47 = vpop.f32.mrf.mxu2 }
 0x92f   : > { %v8784_v6 = vmax.f32 %v8752_v30, 0.0  ;;  %v8226_v30 = vrot.slane %v8224_v39, 1 }
 0x930   : > { %v8363_v23 = vpop.f32.mrf.mxu1 }
 0x931   : > { %8817 = vst.msk [vmem:[%s14085_s13 + $0x80] sm:$0xff] %vm8800_vm4, %v8784_v6  ;;  %v8430_v19 = vadd.f32 %v8363_v23, %v7828_v60  ;;  %v14557_v6 = vld [vmem:[#allocation9_spill] sm:$0xff]  ;;  %v8227_v8 = vsel %vm483_vm0, %v8222_v54, %v8226_v30  ;;  %v14563_v30 = vld [vmem:[#allocation14_spill] sm:$0xff] }
 0x932   : > { %v7831_v52 = vadd.f32 %v14557_v6, %v14011_v16  ;;  %v7837_v6 = vadd.f32 %v14563_v30, %v14038_v3 }
 0x933   : > { %v8717_v9 = vadd.f32 %v8650_v12, %v8430_v19  ;;  %8691 = vmatmul.bf16.gmra.mxu2 %v8512_v50  ;;  %v8212_v12 = vshrl.u32 %v11134_v13, 16 }
 0x935   : > { %v8753_v48 = vadd.f32 %v14073_v44, %v8717_v9  ;;  %v8214_v42 = vor.u32 %v8212_v12, %v8210_v33  ;;  %v7832_v9 = vadd.f32 %v14558_v5, %v14015_v45 }
 0x936   : > { %v8657_v57 = vpop.f32.mrf.mxu2 }
 0x937   : > { %v8785_v61 = vmax.f32 %v8753_v48, 0.0  ;;  %v8219_v51 = vsel %vm483_vm0, %v8214_v42, %v8218_v20  ;;  %v14561_v20 = vld [vmem:[#allocation12_spill] sm:$0xff] }
 0x938   : > { %v8366_v2 = vpop.f32.mrf.mxu1 }
 0x939   : > { %8818 = vst.msk [vmem:[%s14085_s13 + $0x88] sm:$0xff] %vm8800_vm4, %v8785_v61  ;;  %v14559_v2 = vld [vmem:[#allocation43_spill] sm:$0xff] }
 0x93a   : > { %v7833_v55 = vadd.f32 %v14559_v2, %v14020_v58 }
 0x93b   : > { %8399 = vmatmul.bf16.gmra.mxu1 %v8211_v25 }
 0x93e   : > { %v8659_v26 = vpop.f32.mrf.mxu2 }
 0x93f   : > { %v14560_v26 = vld [vmem:[#allocation11_spill] sm:$0xff] }
 0x940   : > { %v8367_v27 = vpop.f32.mrf.mxu1 }
 0x941   : > { %v8431_v49 = vadd.f32 %v8367_v27, %v7829_v53  ;;  %v7834_v27 = vadd.f32 %v14560_v26, %v14024_v1 }
 0x943   : > { %v8718_v0 = vadd.f32 %v8654_v47, %v8431_v49  ;;  %8695 = vmatmul.bf16.gmra.mxu2 %v8514_v36 }
 0x945   : > { %v8754_v32 = vadd.f32 %v14073_v44, %v8718_v0 }
 0x946   : > { %v8661_v4 = vpop.f32.mrf.mxu2 }
 0x947   : > { %v8786_v21 = vmax.f32 %v8754_v32, 0.0 }
 0x948   : > { %v8370_v43 = vpop.f32.mrf.mxu1 }
 0x949   : > { %8819 = vst.msk [vmem:[%s14085_s13 + $0x90] sm:$0xff] %vm8800_vm4, %v8786_v21  ;;  %v8432_v24 = vadd.f32 %v8370_v43, %v7830_v15  ;;  %v7835_v21 = vadd.f32 %v14561_v20, %v14029_v40 }
 0x94b   : > { %v8719_v11 = vadd.f32 %v8657_v57, %v8432_v24  ;;  %8404 = vmatmul.bf16.gmra.mxu1 %v8219_v51  ;;  %v14562_v51 = vld [vmem:[#allocation17_spill] sm:$0xff] }
 0x94d   : > { %v8755_v13 = vadd.f32 %v14073_v44, %v8719_v11  ;;  %v7836_v11 = vadd.f32 %v14562_v51, %v14033_v17 }
 0x94e   : > { %v8663_v35 = vpop.f32.mrf.mxu2 }
 0x94f   : > { %v8787_v14 = vmax.f32 %v8755_v13, 0.0 }
 0x950   : > { %v8372_v28 = vpop.f32.mrf.mxu1 }
 0x951   : > { %8820 = vst.msk [vmem:[%s14085_s13 + $0x98] sm:$0xff] %vm8800_vm4, %v8787_v14 }
 0x956   : > { %v8666_v60 = vpop.f32.mrf.mxu2 }
 0x958   : > { %v8374_v47 = vpop.f32.mrf.mxu1 }
 0x959   : > { %v8433_v23 = vadd.f32 %v8374_v47, %v7831_v52 }
 0x95b   : > { %v8720_v19 = vadd.f32 %v8661_v4, %v8433_v23  ;;  %8408 = vmatmul.bf16.gmra.mxu1 %v8227_v8 }
 0x95d   : > { %v8756_v63 = vadd.f32 %v14073_v44, %v8720_v19  ;;  %v14564_v19 = vld [vmem:[#allocation16_spill] sm:$0xff] }
 0x95e   : > { %v8667_v50 = vpop.f32.mrf.mxu2 }
 0x95f   : > { %v8788_v18 = vmax.f32 %v8756_v63, 0.0  ;;  %v7838_v63 = vadd.f32 %v14564_v19, %v14042_v29 }
 0x960   : > { %v8376_v48 = vpop.f32.mrf.mxu1 }
 0x961   : > { %8821 = vst.msk [vmem:[%s14085_s13 + $0xa0] sm:$0xff] %vm8800_vm4, %v8788_v18  ;;  %v8434_v62 = vadd.f32 %v8376_v48, %v7832_v9 }
 0x963   : > { %v8721_v16 = vadd.f32 %v8663_v35, %v8434_v62 }
 0x965   : > { %v8757_v10 = vadd.f32 %v14073_v44, %v8721_v16 }
 0x966   : > { %v8670_v61 = vpop.f32.mrf.mxu2 }
 0x967   : > { %v8789_v33 = vmax.f32 %v8757_v10, 0.0  ;;  %v14565_v10 = vld [vmem:[#allocation21_spill] sm:$0xff] }
 0x968   : > { %v8379_v57 = vpop.f32.mrf.mxu1 }
 0x969   : > { %8822 = vst.msk [vmem:[%s14085_s13 + $0xa8] sm:$0xff] %vm8800_vm4, %v8789_v33  ;;  %v7839_v33 = vadd.f32 %v14565_v10, %v14047_v37 }
 0x96e   : > { %v8672_v22 = vpop.f32.mrf.mxu2 }
 0x970   : > { %v8380_v45 = vpop.f32.mrf.mxu1 }
 0x971   : > { %v8435_v25 = vadd.f32 %v8380_v45, %v7833_v55  ;;  %v14566_v45 = vld [vmem:[#allocation46_spill] sm:$0xff] }
 0x973   : > { %v8722_v56 = vadd.f32 %v8667_v50, %v8435_v25  ;;  %v7840_v25 = vadd.f32 %v14566_v45, %v14051_v31 }
 0x975   : > { %v8758_v46 = vadd.f32 %v14073_v44, %v8722_v56 }
 0x976   : > { %v8674_v49 = vpop.f32.mrf.mxu2 }
 0x977   : > { %v8790_v53 = vmax.f32 %v8758_v46, 0.0 }
 0x978   : > { %v8383_v36 = vpop.f32.mrf.mxu1 }
 0x979   : > { %8823 = vst.msk [vmem:[%s14085_s13 + $0xb0] sm:$0xff] %vm8800_vm4, %v8790_v53  ;;  %v8436_v7 = vadd.f32 %v8383_v36, %v7834_v27 }
 0x97b   : > { %v8723_v0 = vadd.f32 %v8670_v61, %v8436_v7  ;;  %v7804_v7 = vpop.f32.mrf.mxu0 }
 0x97d   : > { %v8759_v58 = vadd.f32 %v14073_v44, %v8723_v0  ;;  %v7841_v0 = vadd.f32 %v7804_v7, %v14059_v38 }
 0x97e   : > { %v8676_v32 = vpop.f32.mrf.mxu2 }
 0x97f   : > { %v8791_v12 = vmax.f32 %v8759_v58, 0.0 }
 0x980   : > { %v8385_v42 = vpop.f32.mrf.mxu1 }
 0x981   : > { %8824 = vst.msk [vmem:[%s14085_s13 + $0xb8] sm:$0xff] %vm8800_vm4, %v8791_v12 }
 0x986   : > { %v8679_v41 = vpop.f32.mrf.mxu2 }
 0x988   : > { %v8387_v1 = vpop.f32.mrf.mxu1 }
 0x989   : > { %v8437_v15 = vadd.f32 %v8387_v1, %v7835_v21 }
 0x98b   : > { %v8724_v4 = vadd.f32 %v8674_v49, %v8437_v15 }
 0x98d   : > { %v8760_v43 = vadd.f32 %v14073_v44, %v8724_v4 }
 0x98e   : > { %v8680_v13 = vpop.f32.mrf.mxu2 }
 0x98f   : > { %v8792_v24 = vmax.f32 %v8760_v43, 0.0 }
 0x990   : > { %v8389_v14 = vpop.f32.mrf.mxu1 }
 0x991   : > { %8825 = vst.msk [vmem:[%s14085_s13 + $0xc0] sm:$0xff] %vm8800_vm4, %v8792_v24  ;;  %v8438_v35 = vadd.f32 %v8389_v14, %v7836_v11 }
 0x993   : > { %v8725_v28 = vadd.f32 %v8676_v32, %v8438_v35 }
 0x995   : > { %v8761_v40 = vadd.f32 %v14073_v44, %v8725_v28 }
 0x996   : > { %v8683_v39 = vpop.f32.mrf.mxu2 }
 0x997   : > { %v8793_v34 = vmax.f32 %v8761_v40, 0.0 }
 0x998   : > { %v8392_v54 = vpop.f32.mrf.mxu1 }
 0x999   : > { %8826 = vst.msk [vmem:[%s14085_s13 + $0xc8] sm:$0xff] %vm8800_vm4, %v8793_v34 }
 0x99e   : > { %v8685_v52 = vpop.f32.mrf.mxu2 }
 0x9a0   : > { %v8393_v17 = vpop.f32.mrf.mxu1 }
 0x9a1   : > { %v8439_v60 = vadd.f32 %v8393_v17, %v7837_v6 }
 0x9a3   : > { %v8726_v47 = vadd.f32 %v8680_v13, %v8439_v60 }
 0x9a5   : > { %v8762_v8 = vadd.f32 %v14073_v44, %v8726_v47 }
 0x9a6   : > { %v8687_v18 = vpop.f32.mrf.mxu2 }
 0x9a7   : > { %v8794_v23 = vmax.f32 %v8762_v8, 0.0 }
 0x9a8   : > { %v8396_v5 = vpop.f32.mrf.mxu1 }
 0x9a9   : > { %8827 = vst.msk [vmem:[%s14085_s13 + $0xd0] sm:$0xff] %vm8800_vm4, %v8794_v23  ;;  %v8440_v9 = vadd.f32 %v8396_v5, %v7838_v63 }
 0x9ab   : > { %v8727_v50 = vadd.f32 %v8683_v39, %v8440_v9 }
 0x9ad   : > { %v8763_v3 = vadd.f32 %v14073_v44, %v8727_v50 }
 0x9ae   : > { %v8689_v62 = vpop.f32.mrf.mxu2 }
 0x9af   : > { %v8795_v48 = vmax.f32 %v8763_v3, 0.0 }
 0x9b0   : > { %v8398_v16 = vpop.f32.mrf.mxu1 }
 0x9b1   : > { %8828 = vst.msk [vmem:[%s14085_s13 + $0xd8] sm:$0xff] %vm8800_vm4, %v8795_v48 }
 0x9b6   : > { %v8692_v61 = vpop.f32.mrf.mxu2 }
 0x9b8   : > { %v8400_v29 = vpop.f32.mrf.mxu1 }
 0x9b9   : > { %v8441_v57 = vadd.f32 %v8400_v29, %v7839_v33 }
 0x9bb   : > { %v8728_v2 = vadd.f32 %v8687_v18, %v8441_v57 }
 0x9bd   : > { %v8764_v55 = vadd.f32 %v14073_v44, %v8728_v2 }
 0x9be   : > { %v8693_v56 = vpop.f32.mrf.mxu2 }
 0x9bf   : > { %v8796_v22 = vmax.f32 %v8764_v55, 0.0 }
 0x9c0   : > { %v8402_v46 = vpop.f32.mrf.mxu1 }
 0x9c1   : > { %8829 = vst.msk [vmem:[%s14085_s13 + $0xe0] sm:$0xff] %vm8800_vm4, %v8796_v22  ;;  %v8442_v53 = vadd.f32 %v8402_v46, %v7840_v25 }
 0x9c3   : > { %v8729_v26 = vadd.f32 %v8689_v62, %v8442_v53 }
 0x9c5   : > { %v8765_v37 = vadd.f32 %v14073_v44, %v8729_v26 }
 0x9c6   : > { %v8696_v49 = vpop.f32.mrf.mxu2 }
 0x9c7   : > { %v8797_v27 = vmax.f32 %v8765_v37, 0.0 }
 0x9c8   : > { %v8405_v36 = vpop.f32.mrf.mxu1 }
 0x9c9   : > { %8830 = vst.msk [vmem:[%s14085_s13 + $0xe8] sm:$0xff] %vm8800_vm4, %v8797_v27 }
 0x9ce   : > { %v8698_v58 = vpop.f32.mrf.mxu2 }
 0x9d0   : > { %v8406_v31 = vpop.f32.mrf.mxu1 }
 0x9d1   : > { %v8443_v12 = vadd.f32 %v8406_v31, %v7841_v0 }
 0x9d3   : > { %v8730_v32 = vadd.f32 %v8693_v56, %v8443_v12 }
 0x9d5   : > { %v8766_v42 = vadd.f32 %v14073_v44, %v8730_v32 }
 0x9d7   : > { %v8798_v20 = vmax.f32 %v8766_v42, 0.0 }
 0x9d8   : > { %v8409_v21 = vpop.f32.mrf.mxu1 }
 0x9d9   : > { %8831 = vst.msk [vmem:[%s14085_s13 + $0xf0] sm:$0xff] %vm8800_vm4, %v8798_v20  ;;  %v8444_v41 = vadd.f32 %v8409_v21, %v14080_v59 }
 0x9db   : > { %v8731_v1 = vadd.f32 %v8696_v49, %v8444_v41 }
 0x9dd   : > { %v8767_v15 = vadd.f32 %v14073_v44, %v8731_v1 }
 0x9df   : > { %v8799_v4 = vmax.f32 %v8767_v15, 0.0 }
 0x9e0   : > { %v8411_v43 = vpop.f32.mrf.mxu1 }
 0x9e1   : > { %8832 = vst.msk [vmem:[%s14085_s13 + $0xf8] sm:$0xff] %vm8800_vm4, %v8799_v4 }
 0x9e2 PF: > { %s15_s20 = sadd.s32 1, %s11458_s20   ;;  %s14567_s18 = smov %s11454_s19 }
 0x9e3   : > { %p12_p5 = scmp.ge.s32.totalorder %s15_s20, 4   ;;  %s14568_s19 = smov %s14570_s21 }
 0x9e5   :  { %14 = sbr.rel (!%p12_p5) target bundleno = 2 (0x2), region = 86 }

</bundles_post_ra>
